<compile_context>
chip_gen: v7x
topology: tpu7x:2x2x1
jax: 0.10.0
libtpu: 0.0.40
codegen_flags: <defaults>
</compile_context>

<pallas_src>
import functools
import math

import jax
import jax.numpy as jnp
from jax.experimental import pallas as pl
from jax.experimental.pallas import tpu as pltpu


# ----------------------------------------------------------------------------
# helpers
# ----------------------------------------------------------------------------
def _round_up(x, m):
    return (x + m - 1) // m * m


def _pad_num_nodes(n):
    # >=128 lanes for the adjacency tile's last dim; 256-multiples beyond that.
    if n <= 128:
        return 128
    return _round_up(n, 256)


def _vmem_limit_bytes():
    """~75% of physical VMEM: 48 MiB on v7x (64 MiB), 96 MiB on v5e/v6e (128 MiB)."""
    cap = 64 * 1024 * 1024
    try:
        info = pltpu.get_tpu_info()
        cap = int(getattr(info, "vmem_capacity_bytes", cap) or cap)
    except Exception:
        pass
    return (cap * 3) // 4


def _choose_tiles(n_pad, dp, vmem_limit):
    """Tiles for the (fallback) streamed per-layer kernel.

    tm: large, with an even row-tile count where possible (v7x has 2 TensorCores
        sharing the 'parallel' row axis).
    tk: the largest divisor of n_pad whose double-buffered working set fits the
        per-generation VMEM budget (often tk == n_pad -> 1 reduction step).
    """
    divs = [t for t in range(128, n_pad + 1, 128) if n_pad % t == 0]
    even = [t for t in divs if t <= 2048 and (n_pad // t) % 2 == 0]
    tm = max(even) if even else max(t for t in divs if t <= 2048)

    def step_bytes(tk):
        adj = 2 * tm * tk * 2          # bf16 adjacency tile, double buffered
        xk = 2 * tk * dp * 2           # bf16 rhs tile
        hw = 2 * tm * dp * 2           # bf16 hw tile
        out = 2 * tm * dp * 4          # output tile (worst case f32)
        gw = 2 * dp * dp * 2           # resident bf16 gate weight
        acc = tm * dp * 4              # f32 accumulator scratch
        return adj + xk + hw + out + gw + acc + (1 << 20)

    tk = divs[0]
    for t in sorted(divs, reverse=True):
        if step_bytes(t) <= vmem_limit:
            tk = t
            break
    return tm, tk


# ----------------------------------------------------------------------------
# Fused multi-layer kernel: grid = (num_layers,), adjacency + features resident
# in VMEM for the whole forward pass; only the final features hit HBM.
# ----------------------------------------------------------------------------
def _fused_gcn_highway_kernel(adj_ref, x0_ref, w_ref, b_ref, gw_ref, gb_ref,
                              o_ref, *, num_layers):
    l = pl.program_id(0)

    # o_ref has a constant block index across the layer axis -> it stays
    # resident in VMEM and doubles as the inter-layer feature buffer.
    @pl.when(l == 0)
    def _():
        o_ref[...] = x0_ref[...]

    hw = o_ref[...]                                    # f32 (Np, Dp)
    hw_bf = hw.astype(jnp.bfloat16)

    # A_norm @ x on the MXU (bf16 operands, f32 accumulation). Per-column scale
    # applied AFTER aggregation: A @ (x*diag(w)) == (A@x)*diag(w).
    agg = jnp.dot(adj_ref[...], hw_bf, preferred_element_type=jnp.float32)
    out = agg * w_ref[0] + b_ref[0]

    # relu on all but the last layer
    not_last = l != (num_layers - 1)
    out = jnp.where(not_last & (out < 0.0), 0.0, out)

    # highway gate: sigmoid(hw @ Wg + bg)  (bf16 operands, f32 accumulation)
    gate = jnp.dot(hw_bf, gw_ref[0], preferred_element_type=jnp.float32) + gb_ref[0]
    gate = jax.nn.sigmoid(gate)

    o_ref[...] = out * gate + hw * (1.0 - gate)


def fused_gcn_highway(adj_bf16, x_f32, w_stack, b_stack, gw_stack, gb_stack, *,
                      num_layers, vmem_limit):
    n_pad = adj_bf16.shape[0]
    dp = x_f32.shape[1]
    kernel = functools.partial(_fused_gcn_highway_kernel, num_layers=num_layers)
    return pl.pallas_call(
        kernel,
        out_shape=jax.ShapeDtypeStruct((n_pad, dp), jnp.float32),
        grid_spec=pltpu.PrefetchScalarGridSpec(
            num_scalar_prefetch=0,
            grid=(num_layers,),
            in_specs=[
                pl.BlockSpec((n_pad, n_pad), lambda l: (0, 0)),   # adjacency (bf16, resident)
                pl.BlockSpec((n_pad, dp), lambda l: (0, 0)),      # x0 (f32, resident)
                pl.BlockSpec((1, 1, dp), lambda l: (l, 0, 0)),    # layer weight
                pl.BlockSpec((1, 1, dp), lambda l: (l, 0, 0)),    # layer bias
                pl.BlockSpec((1, dp, dp), lambda l: (l, 0, 0)),   # gate weight (bf16)
                pl.BlockSpec((1, 1, dp), lambda l: (l, 0, 0)),    # gate bias
            ],
            out_specs=pl.BlockSpec((n_pad, dp), lambda l: (0, 0)),
        ),
        compiler_params=pltpu.CompilerParams(
            dimension_semantics=("arbitrary",),
            vmem_limit_bytes=int(vmem_limit),
        ),
    )(adj_bf16, x_f32, w_stack, b_stack, gw_stack, gb_stack)


# ----------------------------------------------------------------------------
# Fallback: per-layer tiled kernel (adjacency streamed from HBM)
#   grid = (N_pad // tm, N_pad // tk);  rows parallel, K arbitrary (reduction)
# ----------------------------------------------------------------------------
def _gcn_highway_layer_kernel(adj_ref, xk_ref, hw_ref, w_ref, b_ref, gw_ref,
                              gb_ref, o_ref, acc_ref, *, apply_relu):
    k = pl.program_id(1)

    @pl.when(k == 0)
    def _():
        acc_ref[...] = jnp.zeros_like(acc_ref)

    # bf16 (tm, tk) @ bf16 (tk, Dp) -> f32 accumulate on the MXU
    acc_ref[...] += jnp.dot(adj_ref[...], xk_ref[...],
                            preferred_element_type=jnp.float32)

    @pl.when(k == pl.num_programs(1) - 1)
    def _():
        out = acc_ref[...] * w_ref[...] + b_ref[...]
        if apply_relu:
            out = jnp.maximum(out, 0.0)
        hw_bf = hw_ref[...]                       # bf16 (same array as xk, row-tiled)
        hw = hw_bf.astype(jnp.float32)
        gate = jnp.dot(hw_bf, gw_ref[...],
                       preferred_element_type=jnp.float32) + gb_ref[...]
        gate = jax.nn.sigmoid(gate)
        o_ref[...] = (out * gate + hw * (1.0 - gate)).astype(o_ref.dtype)


def gcn_highway_layer_tiled(adj_bf16, x_bf16, w, b, gw_bf16, gb, *,
                            apply_relu, out_dtype, tm, tk, vmem_limit):
    n_pad = adj_bf16.shape[0]
    dp = x_bf16.shape[1]
    grid = (n_pad // tm, n_pad // tk)
    kernel = functools.partial(_gcn_highway_layer_kernel, apply_relu=apply_relu)
    return pl.pallas_call(
        kernel,
        out_shape=jax.ShapeDtypeStruct((n_pad, dp), out_dtype),
        grid_spec=pltpu.PrefetchScalarGridSpec(
            num_scalar_prefetch=0,
            grid=grid,
            in_specs=[
                pl.BlockSpec((tm, tk), lambda i, k: (i, k)),   # adjacency (bf16)
                pl.BlockSpec((tk, dp), lambda i, k: (k, 0)),   # x (bf16, MXU rhs)
                pl.BlockSpec((tm, dp), lambda i, k: (i, 0)),   # hw (same bf16 array)
                pl.BlockSpec((1, dp), lambda i, k: (0, 0)),    # layer weight
                pl.BlockSpec((1, dp), lambda i, k: (0, 0)),    # layer bias
                pl.BlockSpec((dp, dp), lambda i, k: (0, 0)),   # gate weight (bf16, resident)
                pl.BlockSpec((1, dp), lambda i, k: (0, 0)),    # gate bias
            ],
            out_specs=pl.BlockSpec((tm, dp), lambda i, k: (i, 0)),
            scratch_shapes=[pltpu.VMEM((tm, dp), jnp.float32)],
        ),
        compiler_params=pltpu.CompilerParams(
            dimension_semantics=("parallel", "arbitrary"),
            vmem_limit_bytes=int(vmem_limit),
        ),
    )(adj_bf16, x_bf16, x_bf16, w, b, gw_bf16, gb)


# ----------------------------------------------------------------------------
# Glue: normalized adjacency (GCNAlign_GCNConv.norm, add_remaining_self_loops)
# ----------------------------------------------------------------------------
def build_norm_adjacency(edge_index, num_nodes):
    """edge_index: (2, E) int32.  Adds remaining self loops (fill=1), computes
    sym norm deg^-1/2 A deg^-1/2, returns dense (N, N) f32 so that out = M @ x."""
    row, col = edge_index[0], edge_index[1]
    # add_remaining_self_loops: append (i, i) only for nodes without a self loop.
    has_self = jnp.zeros((num_nodes,), jnp.bool_).at[row].max(row == col)
    loop_w = jnp.where(has_self, 0.0, 1.0)             # weight 0 => no effect
    loop_idx = jnp.arange(num_nodes, dtype=edge_index.dtype)
    row = jnp.concatenate([row, loop_idx])
    col = jnp.concatenate([col, loop_idx])
    ew = jnp.concatenate([jnp.ones_like(edge_index[0], jnp.float32), loop_w])

    deg = jnp.zeros((num_nodes,), jnp.float32).at[row].add(ew)
    deg_inv_sqrt = jnp.where(deg > 0, 1.0 / jnp.sqrt(deg), 0.0)
    norm = deg_inv_sqrt[row] * ew * deg_inv_sqrt[col]

    # PyG source_to_target: message from src=row aggregated at dst=col.
    adj = jnp.zeros((num_nodes, num_nodes), jnp.float32).at[col, row].add(norm)
    return adj
    # TODO(synk): for realistic graph sizes replace the dense (N,N) matrix with a
    # block-sparse / CSR formulation using PrefetchScalarGridSpec row offsets, and
    # narrow the adjacency stream to int8 (v5e/v6e) / fp8 (v7x) with a per-row scale.


# ----------------------------------------------------------------------------
# Encoder forward (gcn-align + highway)
# ----------------------------------------------------------------------------
class EncoderGCNAlignHighway:
    def __init__(self, hiddens, ent_num, key):
        self.hiddens = hiddens
        self.num_layers = len(hiddens) - 1
        self.ent_num = ent_num
        d = hiddens[0]
        self.d = d
        self.dp = _round_up(d, 128)                      # lane-dense hidden dim
        dp = self.dp

        # unpadded params (for the pure-JAX reference)
        self.layer_w, self.layer_b, self.gate_w, self.gate_b = [], [], [], []
        # zero-padded params (for the Pallas kernels)
        self.layer_w_p, self.layer_b_p, self.gate_w_bf_p, self.gate_b_p = [], [], [], []
        for l in range(self.num_layers):
            h_in, h_out = hiddens[l], hiddens[l + 1]
            w = jnp.ones((1, h_out), jnp.float32)        # nn.init.ones_
            b = jnp.zeros((1, h_out), jnp.float32)       # nn.init.zeros_
            key, sub = jax.random.split(key)
            bound = math.sqrt(6.0 / (h_in + h_in))       # xavier_uniform_
            gw = jax.random.uniform(sub, (h_in, h_in), jnp.float32, -bound, bound)
            gb = jnp.zeros((1, h_in), jnp.float32)
            self.layer_w.append(w); self.layer_b.append(b)
            self.gate_w.append(gw); self.gate_b.append(gb)
            self.layer_w_p.append(jnp.zeros((1, dp), jnp.float32).at[:, :h_out].set(w))
            self.layer_b_p.append(jnp.zeros((1, dp), jnp.float32).at[:, :h_out].set(b))
            self.gate_w_bf_p.append(
                jnp.zeros((dp, dp), jnp.float32).at[:h_in, :h_in].set(gw)
                .astype(jnp.bfloat16))
            self.gate_b_p.append(jnp.zeros((1, dp), jnp.float32).at[:, :h_in].set(gb))

        # layer-stacked padded params for the fused single-pallas_call path
        self.w_stack = jnp.stack(self.layer_w_p)          # (L, 1, dp) f32
        self.b_stack = jnp.stack(self.layer_b_p)          # (L, 1, dp) f32
        self.gw_stack = jnp.stack(self.gate_w_bf_p)       # (L, dp, dp) bf16
        self.gb_stack = jnp.stack(self.gate_b_p)          # (L, 1, dp) f32

    def __call__(self, edges, x):
        # edges: (E, 2) as in the PyTorch call site; forward transposes it.
        edge_index = edges.T
        n, d, dp = self.ent_num, self.d, self.dp
        adj = build_norm_adjacency(edge_index, n)        # (N, N) f32

        n_pad = _pad_num_nodes(n)

        # zero-pad node axis and hidden axis to 128 lanes; padding is inert
        # (zero adjacency columns for padded nodes, final [:n, :d] slice).
        adj_p = jnp.zeros((n_pad, n_pad), jnp.bfloat16).at[:n, :n].set(
            adj.astype(jnp.bfloat16))
        x_p = jnp.zeros((n_pad, dp), jnp.float32).at[:n, :d].set(x)

        vmem_limit = _vmem_limit_bytes()    # per-generation budget (v7x vs v5e/v6e)

        # Fused path: adjacency read from HBM once and resident in VMEM across
        # both layers, intermediate features never leave VMEM, one grid step per
        # layer.  Gate it on the per-generation VMEM budget (double-buffered adj
        # + resident feature blocks + epilogue temporaries).
        adj_bytes = n_pad * n_pad * 2
        feat_bytes = n_pad * dp * 4
        fused_est = 2 * adj_bytes + 8 * feat_bytes + 4 * dp * dp * 2 + (2 << 20)

        if fused_est <= int(vmem_limit * 0.9):
            out_p = fused_gcn_highway(
                adj_p, x_p, self.w_stack, self.b_stack, self.gw_stack,
                self.gb_stack, num_layers=self.num_layers, vmem_limit=vmem_limit)
        else:
            # Fallback: per-layer tiled kernel; feature matrix shipped once in
            # bf16, intermediate layer outputs emitted in bf16 (feat_drop = 0.0
            # so dropout is identity).
            tm, tk = _choose_tiles(n_pad, dp, vmem_limit)
            xb = x_p.astype(jnp.bfloat16)
            for l in range(self.num_layers):
                last = (l == self.num_layers - 1)
                xb = gcn_highway_layer_tiled(
                    adj_p, xb, self.layer_w_p[l], self.layer_b_p[l],
                    self.gate_w_bf_p[l], self.gate_b_p[l],
                    apply_relu=not last,
                    out_dtype=jnp.float32 if last else jnp.bfloat16,
                    tm=tm, tk=tk, vmem_limit=vmem_limit)
            out_p = xb

        return out_p[:n, :d]

    # pure-JAX f32 reference of the same math (no Pallas), for verification
    def reference(self, edges, x):
        edge_index = edges.T
        adj = build_norm_adjacency(edge_index, self.ent_num)
        for l in range(self.num_layers):
            hw = x
            x = adj @ (x * self.layer_w[l]) + self.layer_b[l]
            if l != self.num_layers - 1:
                x = jnp.maximum(x, 0.0)
            gate = jax.nn.sigmoid(hw @ self.gate_w[l] + self.gate_b[l])
            x = x * gate + hw * (1.0 - gate)
        return x


# ----------------------------------------------------------------------------
if __name__ == "__main__":
    key = jax.random.PRNGKey(0)
    ENT_NUM = 600          # number of graph nodes (pads to 768)
    HIDDEN = 32            # hidden dim (GCN-Align requires in == out)
    HIDDENS = [HIDDEN, HIDDEN, HIDDEN]   # 2 GNN layers
    NUM_EDGES = 1800

    key, k_x, k_e1, k_e2, k_p = jax.random.split(key, 5)
    x = jax.random.normal(k_x, (ENT_NUM, HIDDEN), jnp.float32)
    # random directed edge list (E, 2), no self loops (they get added by norm)
    src = jax.random.randint(k_e1, (NUM_EDGES,), 0, ENT_NUM)
    dst = (src + 1 + jax.random.randint(k_e2, (NUM_EDGES,), 0, ENT_NUM - 1)) % ENT_NUM
    edges = jnp.stack([src, dst], axis=1).astype(jnp.int32)   # (E, 2)

    enc = EncoderGCNAlignHighway(HIDDENS, ENT_NUM, k_p)

    out = enc(edges, x)
    out = jax.block_until_ready(out)

    ref = enc.reference(edges, x)
    assert out.shape == (ENT_NUM, HIDDEN)
    # adjacency / features / gate weights hit the MXU in bf16 (f32 accumulation),
    # so compare against the f32 reference with a correspondingly looser tolerance.
    assert jnp.allclose(out, ref, atol=5e-2, rtol=5e-2), "mismatch vs reference"

    # TODO(synk): other Encoder variants (compgcn / kecg / dual-amn) use sparse
    # scatter / circular-correlation message functions not implemented here.
    print("KERNEL_OK")
</pallas_src>

<mosaic_0001>
module attributes {stable_mosaic.version = 11 : i64} {
  func.func @_fused_gcn_highway_kernel(%arg0: i32, %arg1: memref<768x768xbf16, #tpu.memory_space<vmem>>, %arg2: memref<768x128xf32, #tpu.memory_space<vmem>>, %arg3: memref<1x1x128xf32, #tpu.memory_space<vmem>>, %arg4: memref<1x1x128xf32, #tpu.memory_space<vmem>>, %arg5: memref<1x128x128xbf16, #tpu.memory_space<vmem>>, %arg6: memref<1x1x128xf32, #tpu.memory_space<vmem>>, %arg7: memref<768x128xf32, #tpu.memory_space<vmem>>) attributes {dimension_semantics = [#tpu.dimension_semantics<arbitrary>], iteration_bounds = array<i64: 2>, scalar_prefetch = 0 : i64, scratch_operands = 0 : i64, tpu.core_type = #tpu.core_type<tc>, window_params = [{pipeline_mode = #tpu.pipeline_mode<synchronous>, transform_indices = @transform_0, window_bounds = array<i64: 768, 768>}, {pipeline_mode = #tpu.pipeline_mode<synchronous>, transform_indices = @transform_1, window_bounds = array<i64: 768, 128>}, {transform_indices = @transform_2, window_bounds = array<i64: 1, 1, 128>}, {transform_indices = @transform_3, window_bounds = array<i64: 1, 1, 128>}, {transform_indices = @transform_4, window_bounds = array<i64: 1, 128, 128>}, {transform_indices = @transform_5, window_bounds = array<i64: 1, 1, 128>}, {pipeline_mode = #tpu.pipeline_mode<synchronous>, transform_indices = @transform_6, window_bounds = array<i64: 768, 128>}]} {
    %c0_i32 = arith.constant 0 : i32
    %0 = arith.cmpi eq, %arg0, %c0_i32 : i32
    %1 = arith.extui %0 : i1 to i32
    %c0_i32_0 = arith.constant 0 : i32
    %2 = arith.cmpi ne, %1, %c0_i32_0 : i32
    scf.if %2 {
      %c0_23 = arith.constant 0 : index
      %c0_24 = arith.constant 0 : index
      %40 = vector.load %arg2[%c0_23, %c0_24] : memref<768x128xf32, #tpu.memory_space<vmem>>, vector<768x128xf32>
      %c0_25 = arith.constant 0 : index
      %c0_26 = arith.constant 0 : index
      %41 = vector.load %arg7[%c0_25, %c0_26] : memref<768x128xf32, #tpu.memory_space<vmem>>, vector<768x128xf32>
      tpu.vector_store %arg7[%c0_25, %c0_26], %40 {strides = array<i32>} : memref<768x128xf32, #tpu.memory_space<vmem>>, vector<768x128xf32>,
    } else {
    }
    %c0 = arith.constant 0 : index
    %c0_1 = arith.constant 0 : index
    %3 = vector.load %arg7[%c0, %c0_1] : memref<768x128xf32, #tpu.memory_space<vmem>>, vector<768x128xf32>
    %4 = arith.truncf %3 : vector<768x128xf32> to vector<768x128xbf16>
    %c0_2 = arith.constant 0 : index
    %c0_3 = arith.constant 0 : index
    %5 = vector.load %arg1[%c0_2, %c0_3] : memref<768x768xbf16, #tpu.memory_space<vmem>>, vector<768x768xbf16>
    %cst = arith.constant dense<0.000000e+00> : vector<768x128xf32>
    %6 = tpu.matmul %5, %4, %cst {dimension_numbers = #tpu.dot_dimension_numbers<[1], [0], [0], [1], [0, 0, 1, 1], [], []>} : vector<768x768xbf16>, vector<768x128xbf16>, vector<768x128xf32> -> vector<768x128xf32>
    %c0_4 = arith.constant 0 : index
    %c0_5 = arith.constant 0 : index
    %c0_6 = arith.constant 0 : index
    %7 = vector.load %arg3[%c0_4, %c0_5, %c0_6] : memref<1x1x128xf32, #tpu.memory_space<vmem>>, vector<1x1x128xf32>
    %8 = vector.shape_cast %7 : vector<1x1x128xf32> to vector<1x128xf32>
    %9 = vector.broadcast %8 : vector<1x128xf32> to vector<768x128xf32>
    %10 = arith.mulf %6, %9 : vector<768x128xf32>
    %c0_7 = arith.constant 0 : index
    %c0_8 = arith.constant 0 : index
    %c0_9 = arith.constant 0 : index
    %11 = vector.load %arg4[%c0_7, %c0_8, %c0_9] : memref<1x1x128xf32, #tpu.memory_space<vmem>>, vector<1x1x128xf32>
    %12 = vector.shape_cast %11 : vector<1x1x128xf32> to vector<1x128xf32>
    %13 = vector.broadcast %12 : vector<1x128xf32> to vector<768x128xf32>
    %14 = arith.addf %10, %13 : vector<768x128xf32>
    %c1_i32 = arith.constant 1 : i32
    %15 = arith.cmpi ne, %arg0, %c1_i32 : i32
    %cst_10 = arith.constant 0.000000e+00 : f32
    %16 = vector.broadcast %cst_10 : f32 to vector<768x128xf32>
    %17 = arith.cmpf olt, %14, %16 : vector<768x128xf32>
    %18 = vector.broadcast %15 : i1 to vector<768x128xi1>
    %19 = arith.andi %18, %17 : vector<768x128xi1>
    %cst_11 = arith.constant 0.000000e+00 : f32
    %20 = vector.broadcast %cst_11 : f32 to vector<768x128xf32>
    %21 = arith.select %19, %20, %14 : vector<768x128xi1>, vector<768x128xf32>
    %c0_12 = arith.constant 0 : index
    %c0_13 = arith.constant 0 : index
    %c0_14 = arith.constant 0 : index
    %22 = vector.load %arg5[%c0_12, %c0_13, %c0_14] : memref<1x128x128xbf16, #tpu.memory_space<vmem>>, vector<1x128x128xbf16>
    %23 = vector.shape_cast %22 : vector<1x128x128xbf16> to vector<128x128xbf16>
    %cst_15 = arith.constant dense<0.000000e+00> : vector<768x128xf32>
    %24 = tpu.matmul %4, %23, %cst_15 {dimension_numbers = #tpu.dot_dimension_numbers<[1], [0], [0], [1], [0, 0, 1, 1], [], []>} : vector<768x128xbf16>, vector<128x128xbf16>, vector<768x128xf32> -> vector<768x128xf32>
    %c0_16 = arith.constant 0 : index
    %c0_17 = arith.constant 0 : index
    %c0_18 = arith.constant 0 : index
    %25 = vector.load %arg6[%c0_16, %c0_17, %c0_18] : memref<1x1x128xf32, #tpu.memory_space<vmem>>, vector<1x1x128xf32>
    %26 = vector.shape_cast %25 : vector<1x1x128xf32> to vector<1x128xf32>
    %27 = vector.broadcast %26 : vector<1x128xf32> to vector<768x128xf32>
    %28 = arith.addf %24, %27 : vector<768x128xf32>
    %29 = arith.negf %28 : vector<768x128xf32>
    %30 = math.exp %29 : vector<768x128xf32>
    %cst_19 = arith.constant 1.000000e+00 : f32
    %31 = vector.broadcast %cst_19 : f32 to vector<768x128xf32>
    %32 = arith.addf %31, %30 : vector<768x128xf32>
    %33 = arith.divf %31, %32 : vector<768x128xf32>
    %34 = arith.mulf %21, %33 : vector<768x128xf32>
    %cst_20 = arith.constant 1.000000e+00 : f32
    %35 = vector.broadcast %cst_20 : f32 to vector<768x128xf32>
    %36 = arith.subf %35, %33 : vector<768x128xf32>
    %37 = arith.mulf %3, %36 : vector<768x128xf32>
    %38 = arith.addf %34, %37 : vector<768x128xf32>
    %c0_21 = arith.constant 0 : index
    %c0_22 = arith.constant 0 : index
    %39 = vector.load %arg7[%c0_21, %c0_22] : memref<768x128xf32, #tpu.memory_space<vmem>>, vector<768x128xf32>
    tpu.vector_store %arg7[%c0_21, %c0_22], %38 {strides = array<i32>} : memref<768x128xf32, #tpu.memory_space<vmem>>, vector<768x128xf32>,
    return
  }
  func.func @transform_0(%arg0: i32) -> (i32, i32) {
    %c0_i32 = arith.constant 0 : i32
    %c0_i32_0 = arith.constant 0 : i32
    %c0_i32_1 = arith.constant 0 : i32
    return %c0_i32, %c0_i32_0 : i32, i32
  }
  func.func @transform_1(%arg0: i32) -> (i32, i32) {
    %c0_i32 = arith.constant 0 : i32
    %c0_i32_0 = arith.constant 0 : i32
    %c0_i32_1 = arith.constant 0 : i32
    return %c0_i32, %c0_i32_0 : i32, i32
  }
  func.func @transform_2(%arg0: i32) -> (i32, i32, i32) {
    %c0_i32 = arith.constant 0 : i32
    %c0_i32_0 = arith.constant 0 : i32
    %c0_i32_1 = arith.constant 0 : i32
    return %arg0, %c0_i32, %c0_i32_0 : i32, i32, i32
  }
  func.func @transform_3(%arg0: i32) -> (i32, i32, i32) {
    %c0_i32 = arith.constant 0 : i32
    %c0_i32_0 = arith.constant 0 : i32
    %c0_i32_1 = arith.constant 0 : i32
    return %arg0, %c0_i32, %c0_i32_0 : i32, i32, i32
  }
  func.func @transform_4(%arg0: i32) -> (i32, i32, i32) {
    %c0_i32 = arith.constant 0 : i32
    %c0_i32_0 = arith.constant 0 : i32
    %c0_i32_1 = arith.constant 0 : i32
    return %arg0, %c0_i32, %c0_i32_0 : i32, i32, i32
  }
  func.func @transform_5(%arg0: i32) -> (i32, i32, i32) {
    %c0_i32 = arith.constant 0 : i32
    %c0_i32_0 = arith.constant 0 : i32
    %c0_i32_1 = arith.constant 0 : i32
    return %arg0, %c0_i32, %c0_i32_0 : i32, i32, i32
  }
  func.func @transform_6(%arg0: i32) -> (i32, i32) {
    %c0_i32 = arith.constant 0 : i32
    %c0_i32_0 = arith.constant 0 : i32
    %c0_i32_1 = arith.constant 0 : i32
    return %c0_i32, %c0_i32_0 : i32, i32
  }
}

</mosaic_0001>

<bundles_post_ra>
// kernel: tpu_custom_call.1
= control target key start
LH: loop header
LB: loop body
LE: loop exit
PB: predicated region body
PF: predicated region fallthrough
CT: control target
= control target key end

     0   :  { %s11569_s0 = inlined_call_operand.hbm [shape: bf16[768,768], index: 0, kind: input, shape index: {}]   ;;  %s11570_s1 = inlined_call_operand.hbm [shape: f32[768,128], index: 1, kind: input, shape index: {}]   ;;  %s11571_s2 = inlined_call_operand.hbm [shape: f32[2,1,128], index: 2, kind: input, shape index: {}]   ;;  %s11572_s3 = inlined_call_operand.hbm [shape: f32[2,1,128], index: 3, kind: input, shape index: {}]   ;;  %s11573_s4 = inlined_call_operand.hbm [shape: bf16[2,128,128], index: 4, kind: input, shape index: {}]   ;;  %s11574_s5 = inlined_call_operand.hbm [shape: f32[2,1,128], index: 5, kind: input, shape index: {}]   ;;  %s11575_s6 = inlined_call_operand.hbm [shape: f32[768,128], index: 6, kind: output, shape index: {}]  }
   0x1   :  { %11767 = sst [smem:[#allocation122_spill]] %s11569_s0 }
   0x2   :  { %11768 = sst [smem:[#allocation123_spill]] %s11571_s2 }
   0x3   :  { %11 = vsyncpa [#allocation3], 0 }
   0x4   :  { %12 = vsyncpa [#allocation6], 0 }
   0x5   :  { %13 = vsyncpa [#allocation4], 0  ;;  %s8094_s21 = smov 0   ;;  %s8096_s22 = smov 0  }
   0x6   :  { %s8098_s23 = smov 0   ;;  %s8100_s24 = smov 0  }
   0x7 LB: > { %s8113_s25 = sadd.s32 4294967295, %s8041_s24   ;;  %p81_p0 = scmp.ne.s32.totalorder %s8033_s22, %s8029_s21  ;;  %s8041_s24 = sphi %s8100_s24, %s12604_s24   ;;  %s8037_s23 = sphi %s8098_s23, %s12603_s23   ;;  %s8033_s22 = sphi %s8096_s22, %s12602_s22   ;;  %s8029_s21 = sphi %s8094_s21, %s12601_s21  }
   0x8   : > { %p11576_p1 = scmp.eq.s32.totalorder %s8113_s25, 0  ;;  %p5870_p2 = scmp.ge.s32.totalorder %s8041_s24, 1 }
   0x9   : > { %p191_p3 = scmp.lt.s32.totalorder %s8041_s24, 3  ;;  %s8043_s28 = smov [#allocation2]  }
   0xa   : > { %p8122_p5 = por %p11576_p1, %p81_p0  ;;  %s203_s29 = sshll.u32 %s8043_s28, 4  ;;  %s204_s29 = int_to_ptr.vmem [resolvable:$true] %s203_s29 }
   0xb   : > { %p8126_p6 = pnand %p5870_p2, %p191_p3  ;;  %s8139_s7 = sadd.s32 1, %s8041_s24  }
   0xc   : > { %s11769_s26 = scalar_select %p8122_p5, 1, 0 }
   0xd   : > { %s11770_s27 = scalar_select %p8126_p6, 1, 0 }
   0xe   : > { %p6793_p7 = pneg %p8126_p6  ;;  %s68_s8 = sadd.s32 1, %s8037_s23 }
   0xf   : > { %s65_s9 = ssub.s32 %s8041_s24, %s8139_s7  ;;  %s11772_s0 = sld [smem:[#allocation122_spill]] }
  0x10   : > { %p8134_p8 = pnand %p6793_p7, %p11576_p1 }
  0x12   : > { %s11771_s30 = scalar_select %p8134_p8, 1, 0 }
  0x13   : > { %p11579_p10 = pneg %p8134_p8 }
  0x15   : > { %s7793_s12 = scalar_lea.hbm %s11772_s0, 36864 }
  0x16   : > { %p7794_p9 = scmp.ne.s32.totalorder %s11772_s0, %s7793_s12  ;;  %p7800_p13 = scmp.lt.u32.totalorder %s7793_s12, %s11772_s0 }
  0x18   : > { %p7796_p11 = pnand %p11579_p10, %p7794_p9 }
  0x1a   : > { %p7797_p12 = pneg %p7796_p11 }
  0x1c   : > { %p7802_p0 = pnand %p7800_p13, %p7797_p12 }
  0x1e   : > { %7805 = shalt.err (!%p7802_p0)
}
  0x1f   : > { %s7806_s17 = scalar_lea.vmem %s204_s29, 36864  ;;  %p7814_p4 = scmp.lt.s32.totalorder %s204_s29, %s204_s29 }
  0x20   : > { %p7807_p2 = scmp.ne.s32.totalorder %s204_s29, %s7806_s17  ;;  %p7815_p1 = scmp.lt.s32.totalorder %s7806_s17, %s7806_s17 }
  0x22   : > { %p7809_p3 = pnand %p7807_p2, %p11579_p10  ;;  %p7816_p5 = por %p7815_p1, %p7814_p4 }
  0x24   : > { %p7810_p7 = pneg %p7809_p3 }
  0x26   : > { %p7817_p6 = pnand %p7816_p5, %p7810_p7 }
  0x28   : > { %7820 = shalt.err (!%p7817_p6)
}
  0x29   : > { %s8044_s18 = smov 384   ;;  %s8045_s19 = smov 24  }
  0x2a   : > { %6796 = dma.hbm_to_vmem [thread:$0]  (!%p8134_p8), %s11772_s0, 36864, %s204_s29, [#allocation3], %s8044_s18, %s8044_s18, %s8045_s19  }
  0x2b   : > { %p66_p9 = scmp.eq.s32.totalorder %s65_s9, 0  ;;  %p75_p1 = scmp.ne.s32.totalorder %s8037_s23, %s8033_s22 }
  0x2c   : > { %p76_p4 = scmp.eq.s32.totalorder %s8041_s24, 0  ;;  %p6815_p5 = scmp.lt.s32.totalorder %s8041_s24, 2 }
  0x2d   : > { %s8171_s28 = scalar_select %p66_p9, %s8037_s23, %s68_s8  }
  0x2e   : > { %p77_p6 = por %p76_p4, %p75_p1  ;;  %s230_s10 = sand.u32 1, %s8041_s24  }
  0x2f   : > { %s8175_s11 = sand.u32 1, %s8037_s23   ;;  %s8178_s12 = sshll.u32 %s8041_s24, 4 }
  0x30   : > { %s11773_s2 = sld [smem:[#allocation123_spill]]  ;;  %s233_s8 = scalar_lea.vmem [#allocation7], %s8175_s11 }
  0x31   : > { %s240_s9 = sshll.u32 %s233_s8, 4  ;;  %p8189_p11 = pnand %p6815_p5, %p77_p6  ;;  %s8187_s9 = int_to_ptr.vmem [resolvable:$true] %s240_s9 }
  0x32   : > { %s8197_s18 = scalar_lea.hbm %s11572_s3, %s8178_s12  ;;  %s250_s19 = scalar_lea.vmem [#allocation8], %s8175_s11 }
  0x33   : > { %s11774_s15 = scalar_select %p8189_p11, 1, 0 }
  0x34   : > { %s8200_s20 = sshll.u32 %s250_s19, 4  ;;  %s8202_s21 = scalar_lea.sflag [#allocation3], %s230_s10  ;;  %s258_s20 = int_to_ptr.vmem [resolvable:$true] %s8200_s20 }
  0x35   : > { %p8208_p13 = pneg %p8189_p11 }
  0x36   : > { %s8184_s29 = scalar_lea.hbm %s11773_s2, %s8178_s12  ;;  %s7826_s17 = scalar_lea.hbm %s11773_s2, 32 }
  0x37   : > { %s7821_s13 = scalar_lea.hbm %s8184_s29, 16  ;;  %p7827_p3 = scmp.lt.u32.totalorder %s8184_s29, %s11773_s2 }
  0x38   : > { %p7822_p12 = scmp.ne.s32.totalorder %s8184_s29, %s7821_s13  ;;  %p7828_p7 = scmp.lt.u32.totalorder %s7826_s17, %s7821_s13 }
  0x39   : > { %s11775_s14 = scalar_select %p8208_p13, 1, 0 }
  0x3a   : > { %p7824_p0 = pnand %p8208_p13, %p7822_p12  ;;  %p7829_p9 = por %p7828_p7, %p7827_p3 }
  0x3b   : > { %p7830_p1 = scmp.lt.u32.totalorder %s7821_s13, %s8184_s29 }
  0x3c   : > { %p7825_p2 = pneg %p7824_p0 }
  0x3d   : > { %p7831_p4 = por %p7830_p1, %p7829_p9 }
  0x3f   : > { %p7832_p5 = pnand %p7831_p4, %p7825_p2 }
  0x41   : > { %7835 = shalt.err (!%p7832_p5)
}
  0x42   : > { %s7836_s10 = scalar_lea.vmem %s8187_s9, 16  ;;  %s8046_s8 = smov [#allocation7]  }
  0x43   : > { %p7837_p6 = scmp.ne.s32.totalorder %s8187_s9, %s7836_s10  ;;  %s7841_s16 = sshll.u32 %s8046_s8, 4  ;;  %s7842_s16 = int_to_ptr.vmem [resolvable:$false] %s7841_s16 }
  0x44   : > { %s7843_s0 = scalar_lea.vmem %s7842_s16, 32  ;;  %p7844_p10 = scmp.lt.s32.totalorder %s8187_s9, %s7842_s16 }
  0x45   : > { %p7839_p12 = pnand %p7837_p6, %p8208_p13  ;;  %p7845_p8 = scmp.lt.s32.totalorder %s7843_s0, %s7836_s10 }
  0x47   : > { %p7840_p0 = pneg %p7839_p12  ;;  %p7846_p3 = por %p7845_p8, %p7844_p10 }
  0x49   : > { %p7847_p7 = pnand %p7846_p3, %p7840_p0 }
  0x4b   : > { %7850 = shalt.err (!%p7847_p7)
}
  0x4c   : > { %6803 = dma.hbm_to_vmem [thread:$0]  (!%p8189_p11), %s8184_s29, 16, %s8187_s9, %s8202_s21  }
  0x4d   : > { %s7851_s17 = scalar_lea.hbm %s8197_s18, 16  ;;  %s7856_s8 = scalar_lea.hbm %s11572_s3, 32 }
  0x4e   : > { %p7852_p2 = scmp.ne.s32.totalorder %s8197_s18, %s7851_s17  ;;  %p7857_p9 = scmp.lt.u32.totalorder %s8197_s18, %s11572_s3 }
  0x4f   : > { %p7858_p1 = scmp.lt.u32.totalorder %s7856_s8, %s7851_s17  ;;  %p7860_p5 = scmp.lt.u32.totalorder %s7851_s17, %s8197_s18 }
  0x50   : > { %p7854_p8 = pnand %p7852_p2, %p8208_p13 }
  0x51   : > { %p7859_p4 = por %p7858_p1, %p7857_p9 }
  0x52   : > { %p7855_p10 = pneg %p7854_p8 }
  0x53   : > { %p7861_p6 = por %p7860_p5, %p7859_p4 }
  0x55   : > { %p7862_p12 = pnand %p7861_p6, %p7855_p10 }
  0x57   : > { %7865 = shalt.err (!%p7862_p12)
}
  0x58   : > { %s7866_s29 = scalar_lea.vmem %s258_s20, 16  ;;  %s8047_s9 = smov [#allocation8]  }
  0x59   : > { %p7867_p0 = scmp.ne.s32.totalorder %s258_s20, %s7866_s29  ;;  %s7871_s13 = sshll.u32 %s8047_s9, 4  ;;  %s7872_s13 = int_to_ptr.vmem [resolvable:$false] %s7871_s13 }
  0x5a   : > { %s7873_s19 = scalar_lea.vmem %s7872_s13, 32  ;;  %p7874_p2 = scmp.lt.s32.totalorder %s258_s20, %s7872_s13 }
  0x5b   : > { %p7869_p3 = pnand %p7867_p0, %p8208_p13  ;;  %p7875_p8 = scmp.lt.s32.totalorder %s7873_s19, %s7866_s29 }
  0x5d   : > { %p7870_p7 = pneg %p7869_p3  ;;  %p7876_p11 = por %p7875_p8, %p7874_p2 }
  0x5f   : > { %p7877_p1 = pnand %p7876_p11, %p7870_p7 }
  0x61   : > { %7880 = shalt.err (!%p7877_p1)
}
  0x62   : > { %p11776_p9 = scmp.ne.s32.totalorder %s11774_s15, 0  ;;  %s6284_s17 = sshll.u32 %s8041_s24, 10 }
  0x63   : > { %s8256_s16 = scalar_lea.hbm %s11573_s4, %s6284_s17  ;;  %s11777_s0 = sshll.u32 %s8175_s11, 6 }
  0x64   : > { %6806 = dma.hbm_to_vmem [thread:$0]  (!%p11776_p9), %s8197_s18, 16, %s258_s20, %s8202_s21  }
  0x65   : > { %s268_s13 = scalar_lea.vmem [#allocation9], %s11777_s0  ;;  %s7881_s9 = scalar_lea.hbm %s8256_s16, 1024 }
  0x66   : > { %s275_s29 = sshll.u32 %s268_s13, 4  ;;  %p7882_p11 = scmp.ne.s32.totalorder %s8256_s16, %s7881_s9  ;;  %s8260_s29 = int_to_ptr.vmem [resolvable:$true] %s275_s29 }
  0x67   : > { %s7886_s20 = scalar_lea.hbm %s11573_s4, 2048  ;;  %p7887_p5 = scmp.lt.u32.totalorder %s8256_s16, %s11573_s4 }
  0x68   : > { %p7884_p10 = pnand %p7882_p11, %p8208_p13  ;;  %p7888_p6 = scmp.lt.u32.totalorder %s7886_s20, %s7881_s9 }
  0x69   : > { %p7890_p0 = scmp.lt.u32.totalorder %s7881_s9, %s8256_s16 }
  0x6a   : > { %p7885_p4 = pneg %p7884_p10  ;;  %p7889_p12 = por %p7888_p6, %p7887_p5 }
  0x6c   : > { %p7891_p3 = por %p7890_p0, %p7889_p12 }
  0x6e   : > { %p7892_p7 = pnand %p7891_p3, %p7885_p4 }
  0x70   : > { %7895 = shalt.err (!%p7892_p7)
}
  0x71   : > { %s7896_s10 = scalar_lea.vmem %s8260_s29, 1024  ;;  %s8048_s8 = smov [#allocation9]  }
  0x72   : > { %p7897_p2 = scmp.ne.s32.totalorder %s8260_s29, %s7896_s10  ;;  %s7901_s0 = sshll.u32 %s8048_s8, 4  ;;  %s7902_s0 = int_to_ptr.vmem [resolvable:$false] %s7901_s0 }
  0x73   : > { %s7903_s13 = scalar_lea.vmem %s7902_s0, 2048  ;;  %p7904_p11 = scmp.lt.s32.totalorder %s8260_s29, %s7902_s0 }
  0x74   : > { %p7899_p8 = pnand %p7897_p2, %p8208_p13  ;;  %p7905_p10 = scmp.lt.s32.totalorder %s7903_s13, %s7896_s10 }
  0x76   : > { %p7900_p1 = pneg %p7899_p8  ;;  %p7906_p5 = por %p7905_p10, %p7904_p11 }
  0x78   : > { %p7907_p6 = pnand %p7906_p5, %p7900_p1 }
  0x7a   : > { %7910 = shalt.err (!%p7907_p6)
}
  0x7b   : > { %s8049_s9 = smov 64   ;;  %s8050_s24 = smov 4  }
  0x7c   : > { %6809 = dma.hbm_to_vmem [thread:$0]  (!%p11776_p9), %s8256_s16, 1024, %s8260_s29, %s8202_s21, %s8049_s9, %s8049_s9, %s8050_s24  }
  0x7d   : > { %s8051_s18 = smov [#allocation5]   ;;  %s7911_s8 = scalar_lea.hbm %s11570_s1, 12288 }
  0x7e   : > { %s216_s20 = sshll.u32 %s8051_s18, 4  ;;  %p7912_p4 = scmp.ne.s32.totalorder %s11570_s1, %s7911_s8  ;;  %s217_s20 = int_to_ptr.vmem [resolvable:$true] %s216_s20 }
  0x7f   : > { %p11778_p12 = scmp.ne.s32.totalorder %s11771_s30, 0  ;;  %p7918_p2 = scmp.lt.u32.totalorder %s7911_s8, %s11570_s1 }
  0x81   : > { %p11779_p0 = pneg %p11778_p12 }
  0x83   : > { %p7914_p3 = pnand %p7912_p4, %p11779_p0 }
  0x85   : > { %p7915_p7 = pneg %p7914_p3 }
  0x87   : > { %p7920_p8 = pnand %p7918_p2, %p7915_p7 }
  0x89   : > { %7923 = shalt.err (!%p7920_p8)
}
  0x8a   : > { %s7924_s16 = scalar_lea.vmem %s217_s20, 12288  ;;  %p11780_p11 = pmov %p11779_p0 }
  0x8b   : > { %p7925_p1 = scmp.ne.s32.totalorder %s217_s20, %s7924_s16  ;;  %p7932_p6 = scmp.lt.s32.totalorder %s217_s20, %s217_s20 }
  0x8c   : > { %p7933_p9 = scmp.lt.s32.totalorder %s7924_s16, %s7924_s16 }
  0x8d   : > { %p7927_p10 = pnand %p7925_p1, %p11780_p11 }
  0x8e   : > { %p7934_p13 = por %p7933_p9, %p7932_p6 }
  0x8f   : > { %p7928_p5 = pneg %p7927_p10 }
  0x91   : > { %p7935_p0 = pnand %p7934_p13, %p7928_p5 }
  0x93   : > { %7938 = shalt.err (!%p7935_p0)
}
  0x94   : > { %s8052_s29 = smov 128   ;;  %s8053_s2 = smov 8  }
  0x95   : > { %6799 = dma.hbm_to_vmem [thread:$0]  (!%p11778_p12), %s11570_s1, 12288, %s217_s20, [#allocation6], %s8052_s29, %s8052_s29, %s8053_s2  }
  0x96   : > { %s8308_s17 = scalar_lea.hbm %s11574_s5, %s8178_s12  ;;  %s288_s8 = scalar_lea.vmem [#allocation10], %s8175_s11 }
  0x97   : > { %s295_s10 = sshll.u32 %s288_s8, 4  ;;  %s7939_s0 = scalar_lea.hbm %s8308_s17, 16  ;;  %s296_s10 = int_to_ptr.vmem [resolvable:$true] %s295_s10 }
  0x98   : > { %p7940_p13 = scmp.ne.s32.totalorder %s8308_s17, %s7939_s0  ;;  %p11781_p9 = scmp.ne.s32.totalorder %s11775_s14, 0 }
  0x99   : > { %s7944_s20 = scalar_lea.hbm %s11574_s5, 32  ;;  %p7945_p12 = scmp.lt.u32.totalorder %s8308_s17, %s11574_s5 }
  0x9a   : > { %p7942_p4 = pnand %p7940_p13, %p11781_p9  ;;  %p7946_p7 = scmp.lt.u32.totalorder %s7944_s20, %s7939_s0 }
  0x9b   : > { %p7948_p8 = scmp.lt.u32.totalorder %s7939_s0, %s8308_s17 }
  0x9c   : > { %p7943_p3 = pneg %p7942_p4  ;;  %p7947_p2 = por %p7946_p7, %p7945_p12 }
  0x9e   : > { %p7949_p1 = por %p7948_p8, %p7947_p2 }
  0xa0   : > { %p7950_p11 = pnand %p7949_p1, %p7943_p3 }
  0xa2   : > { %7953 = shalt.err (!%p7950_p11)
}
  0xa3   : > { %s7954_s11 = scalar_lea.vmem %s296_s10, 16  ;;  %s8054_s12 = smov [#allocation10]  }
  0xa4   : > { %p7955_p10 = scmp.ne.s32.totalorder %s296_s10, %s7954_s11  ;;  %s7959_s2 = sshll.u32 %s8054_s12, 4  ;;  %s7960_s2 = int_to_ptr.vmem [resolvable:$false] %s7959_s2 }
  0xa5   : > { %s7961_s9 = scalar_lea.vmem %s7960_s2, 32  ;;  %p7962_p0 = scmp.lt.s32.totalorder %s296_s10, %s7960_s2 }
  0xa6   : > { %p7957_p5 = pnand %p7955_p10, %p11781_p9  ;;  %p7963_p13 = scmp.lt.s32.totalorder %s7961_s9, %s7954_s11 }
  0xa8   : > { %p7958_p6 = pneg %p7957_p5  ;;  %p7964_p4 = por %p7963_p13, %p7962_p0 }
  0xaa   : > { %p7965_p7 = pnand %p7964_p4, %p7958_p6 }
  0xac   : > { %7968 = shalt.err (!%p7965_p7)
}
  0xad   : > { %p11782_p12 = scmp.ne.s32.totalorder %s11774_s15, 0  ;;  %p11783_p3 = scmp.ne.s32.totalorder %s11770_s27, 0 }
  0xaf   : > { %6812 = dma.hbm_to_vmem [thread:$0]  (!%p11782_p12), %s8308_s17, 16, %s296_s10, %s8202_s21  }
  0xb0   : > { %304 = sbr.rel (%p11783_p3) target bundleno = 1366 (0x556), region = 44 }
  0xb7   : > { %p11784_p9 = scmp.eq.s32.totalorder %s8113_s25, 0 }
  0xb9   : > { %8012 = dma.done.wait (%p11784_p9), [#allocation3], 36864   ;;  %p11785_p2 = pmov %p11784_p9 }
  0xbb   : > { %8014 = vsyncadd (%p11785_p2), [#allocation3], 4294930432  ;;  %p11786_p8 = pmov %p11785_p2 }
  0xbc   : > { %p11787_p1 = pmov %p11785_p2 }
  0xbd   : > { %8016 = dma.done.wait (%p11786_p8), [#allocation6], 12288  }
  0xbe   : > { %8018 = vsyncadd (%p11787_p1), [#allocation6], 4294955008  ;;  %s314_s15 = sand.u32 1, %s8113_s25   ;;  %s316_s21 = sand.u32 1, %s8033_s22  }
  0xbf   : > { %s315_s14 = scalar_lea.sflag [#allocation3], %s314_s15  ;;  %s8341_s27 = scalar_lea.vmem [#allocation7], %s316_s21 }
  0xc0   : > { %p11788_p11 = scmp.ne.s32.totalorder %s11769_s26, 0 }
  0xc2   : > { %8020 = dma.done.wait (%p11788_p11), %s315_s14, 1072  }
  0xc3   : > { %8022 = vsyncadd (%p11788_p11), %s315_s14, 4294966224  ;;  %s5883_s24 = sshll.u32 %s316_s21, 6  ;;  %s8347_s18 = scalar_lea.vmem [#allocation8], %s316_s21 }
  0xc4   : > { %s8349_s19 = scalar_lea.vmem [#allocation9], %s5883_s24  ;;  %s8351_s17 = scalar_lea.vmem [#allocation10], %s316_s21 }
  0xc5   : > { %p11789_p10 = scmp.ne.s32.totalorder %s8113_s25, 0 }
  0xc6   : > { %v383_v0 = vld [vmem:[#allocation5] sm:$0xff] (!%p11789_p10)  ;;  %v384_v1 = vld [vmem:[#allocation5 + $0x8] sm:$0xff] (!%p11789_p10)  ;;  %v385_v2 = vld [vmem:[#allocation5 + $0x10] sm:$0xff] (!%p11789_p10) }
  0xc7   : > { %382 = sbr.rel (%p11789_p10) target bundleno = 247 (0xf7), region = 72  ;;  %479 = vst [vmem:[#allocation11] sm:$0xff] (!%p11789_p10), %v383_v0  ;;  %480 = vst [vmem:[#allocation11 + $0x8] sm:$0xff] (!%p11789_p10), %v384_v1  ;;  %v386_v3 = vld [vmem:[#allocation5 + $0x18] sm:$0xff] (!%p11789_p10)  ;;  %v387_v4 = vld [vmem:[#allocation5 + $0x20] sm:$0xff] (!%p11789_p10) }
  0xc8   : > { %481 = vst [vmem:[#allocation11 + $0x10] sm:$0xff] (!%p11789_p10), %v385_v2  ;;  %v388_v5 = vld [vmem:[#allocation5 + $0x28] sm:$0xff] (!%p11789_p10)  ;;  %482 = vst [vmem:[#allocation11 + $0x18] sm:$0xff] (!%p11789_p10), %v386_v3  ;;  %v389_v6 = vld [vmem:[#allocation5 + $0x30] sm:$0xff] (!%p11789_p10) }
  0xc9   : > { %483 = vst [vmem:[#allocation11 + $0x20] sm:$0xff] (!%p11789_p10), %v387_v4  ;;  %484 = vst [vmem:[#allocation11 + $0x28] sm:$0xff] (!%p11789_p10), %v388_v5  ;;  %v390_v7 = vld [vmem:[#allocation5 + $0x38] sm:$0xff] (!%p11789_p10)  ;;  %v391_v8 = vld [vmem:[#allocation5 + $0x40] sm:$0xff] (!%p11789_p10) }
  0xca   : > { %485 = vst [vmem:[#allocation11 + $0x30] sm:$0xff] (!%p11789_p10), %v389_v6  ;;  %486 = vst [vmem:[#allocation11 + $0x38] sm:$0xff] (!%p11789_p10), %v390_v7  ;;  %v392_v9 = vld [vmem:[#allocation5 + $0x48] sm:$0xff] (!%p11789_p10)  ;;  %v393_v10 = vld [vmem:[#allocation5 + $0x50] sm:$0xff] (!%p11789_p10) }
  0xcb   : > { %487 = vst [vmem:[#allocation11 + $0x40] sm:$0xff] (!%p11789_p10), %v391_v8  ;;  %v394_v11 = vld [vmem:[#allocation5 + $0x58] sm:$0xff] (!%p11789_p10)  ;;  %488 = vst [vmem:[#allocation11 + $0x48] sm:$0xff] (!%p11789_p10), %v392_v9  ;;  %v395_v12 = vld [vmem:[#allocation5 + $0x60] sm:$0xff] (!%p11789_p10) }
  0xcc   : > { %489 = vst [vmem:[#allocation11 + $0x50] sm:$0xff] (!%p11789_p10), %v393_v10  ;;  %490 = vst [vmem:[#allocation11 + $0x58] sm:$0xff] (!%p11789_p10), %v394_v11  ;;  %v396_v13 = vld [vmem:[#allocation5 + $0x68] sm:$0xff] (!%p11789_p10)  ;;  %v397_v14 = vld [vmem:[#allocation5 + $0x70] sm:$0xff] (!%p11789_p10) }
  0xcd   : > { %491 = vst [vmem:[#allocation11 + $0x60] sm:$0xff] (!%p11789_p10), %v395_v12  ;;  %492 = vst [vmem:[#allocation11 + $0x68] sm:$0xff] (!%p11789_p10), %v396_v13  ;;  %v398_v15 = vld [vmem:[#allocation5 + $0x78] sm:$0xff] (!%p11789_p10)  ;;  %v399_v16 = vld [vmem:[#allocation5 + $0x80] sm:$0xff] (!%p11789_p10) }
  0xce   : > { %493 = vst [vmem:[#allocation11 + $0x70] sm:$0xff] %v397_v14  ;;  %v400_v17 = vld [vmem:[#allocation5 + $0x88] sm:$0xff]  ;;  %494 = vst [vmem:[#allocation11 + $0x78] sm:$0xff] %v398_v15  ;;  %v401_v18 = vld [vmem:[#allocation5 + $0x90] sm:$0xff] }
  0xcf   : > { %495 = vst [vmem:[#allocation11 + $0x80] sm:$0xff] %v399_v16  ;;  %496 = vst [vmem:[#allocation11 + $0x88] sm:$0xff] %v400_v17  ;;  %v402_v19 = vld [vmem:[#allocation5 + $0x98] sm:$0xff]  ;;  %v403_v20 = vld [vmem:[#allocation5 + $0xa0] sm:$0xff] }
  0xd0   : > { %497 = vst [vmem:[#allocation11 + $0x90] sm:$0xff] %v401_v18  ;;  %498 = vst [vmem:[#allocation11 + $0x98] sm:$0xff] %v402_v19  ;;  %v404_v21 = vld [vmem:[#allocation5 + $0xa8] sm:$0xff]  ;;  %v405_v22 = vld [vmem:[#allocation5 + $0xb0] sm:$0xff] }
  0xd1   : > { %499 = vst [vmem:[#allocation11 + $0xa0] sm:$0xff] %v403_v20  ;;  %v406_v23 = vld [vmem:[#allocation5 + $0xb8] sm:$0xff]  ;;  %500 = vst [vmem:[#allocation11 + $0xa8] sm:$0xff] %v404_v21  ;;  %v407_v24 = vld [vmem:[#allocation5 + $0xc0] sm:$0xff] }
  0xd2   : > { %501 = vst [vmem:[#allocation11 + $0xb0] sm:$0xff] %v405_v22  ;;  %502 = vst [vmem:[#allocation11 + $0xb8] sm:$0xff] %v406_v23  ;;  %v408_v25 = vld [vmem:[#allocation5 + $0xc8] sm:$0xff]  ;;  %v409_v26 = vld [vmem:[#allocation5 + $0xd0] sm:$0xff] }
  0xd3   : > { %503 = vst [vmem:[#allocation11 + $0xc0] sm:$0xff] %v407_v24  ;;  %504 = vst [vmem:[#allocation11 + $0xc8] sm:$0xff] %v408_v25  ;;  %v410_v27 = vld [vmem:[#allocation5 + $0xd8] sm:$0xff]  ;;  %v411_v28 = vld [vmem:[#allocation5 + $0xe0] sm:$0xff] }
  0xd4   : > { %505 = vst [vmem:[#allocation11 + $0xd0] sm:$0xff] %v409_v26  ;;  %v412_v29 = vld [vmem:[#allocation5 + $0xe8] sm:$0xff]  ;;  %506 = vst [vmem:[#allocation11 + $0xd8] sm:$0xff] %v410_v27  ;;  %v413_v30 = vld [vmem:[#allocation5 + $0xf0] sm:$0xff] }
  0xd5   : > { %507 = vst [vmem:[#allocation11 + $0xe0] sm:$0xff] %v411_v28  ;;  %508 = vst [vmem:[#allocation11 + $0xe8] sm:$0xff] %v412_v29  ;;  %v414_v31 = vld [vmem:[#allocation5 + $0xf8] sm:$0xff]  ;;  %v415_v32 = vld [vmem:[#allocation5 + $0x100] sm:$0xff] }
  0xd6   : > { %509 = vst [vmem:[#allocation11 + $0xf0] sm:$0xff] %v413_v30  ;;  %510 = vst [vmem:[#allocation11 + $0xf8] sm:$0xff] %v414_v31  ;;  %v416_v33 = vld [vmem:[#allocation5 + $0x108] sm:$0xff]  ;;  %v417_v34 = vld [vmem:[#allocation5 + $0x110] sm:$0xff] }
  0xd7   : > { %511 = vst [vmem:[#allocation11 + $0x100] sm:$0xff] %v415_v32  ;;  %v418_v35 = vld [vmem:[#allocation5 + $0x118] sm:$0xff]  ;;  %512 = vst [vmem:[#allocation11 + $0x108] sm:$0xff] %v416_v33  ;;  %v419_v36 = vld [vmem:[#allocation5 + $0x120] sm:$0xff] }
  0xd8   : > { %513 = vst [vmem:[#allocation11 + $0x110] sm:$0xff] %v417_v34  ;;  %514 = vst [vmem:[#allocation11 + $0x118] sm:$0xff] %v418_v35  ;;  %v420_v37 = vld [vmem:[#allocation5 + $0x128] sm:$0xff]  ;;  %v421_v38 = vld [vmem:[#allocation5 + $0x130] sm:$0xff] }
  0xd9   : > { %515 = vst [vmem:[#allocation11 + $0x120] sm:$0xff] %v419_v36  ;;  %516 = vst [vmem:[#allocation11 + $0x128] sm:$0xff] %v420_v37  ;;  %v422_v39 = vld [vmem:[#allocation5 + $0x138] sm:$0xff]  ;;  %v423_v40 = vld [vmem:[#allocation5 + $0x140] sm:$0xff] }
  0xda   : > { %517 = vst [vmem:[#allocation11 + $0x130] sm:$0xff] %v421_v38  ;;  %v424_v41 = vld [vmem:[#allocation5 + $0x148] sm:$0xff]  ;;  %518 = vst [vmem:[#allocation11 + $0x138] sm:$0xff] %v422_v39  ;;  %v425_v42 = vld [vmem:[#allocation5 + $0x150] sm:$0xff] }
  0xdb   : > { %519 = vst [vmem:[#allocation11 + $0x140] sm:$0xff] %v423_v40  ;;  %520 = vst [vmem:[#allocation11 + $0x148] sm:$0xff] %v424_v41  ;;  %v426_v43 = vld [vmem:[#allocation5 + $0x158] sm:$0xff]  ;;  %v427_v44 = vld [vmem:[#allocation5 + $0x160] sm:$0xff] }
  0xdc   : > { %521 = vst [vmem:[#allocation11 + $0x150] sm:$0xff] %v425_v42  ;;  %522 = vst [vmem:[#allocation11 + $0x158] sm:$0xff] %v426_v43  ;;  %v428_v45 = vld [vmem:[#allocation5 + $0x168] sm:$0xff]  ;;  %v429_v46 = vld [vmem:[#allocation5 + $0x170] sm:$0xff] }
  0xdd   : > { %523 = vst [vmem:[#allocation11 + $0x160] sm:$0xff] %v427_v44  ;;  %v430_v47 = vld [vmem:[#allocation5 + $0x178] sm:$0xff]  ;;  %524 = vst [vmem:[#allocation11 + $0x168] sm:$0xff] %v428_v45  ;;  %v431_v48 = vld [vmem:[#allocation5 + $0x180] sm:$0xff] }
  0xde   : > { %525 = vst [vmem:[#allocation11 + $0x170] sm:$0xff] %v429_v46  ;;  %526 = vst [vmem:[#allocation11 + $0x178] sm:$0xff] %v430_v47  ;;  %v432_v49 = vld [vmem:[#allocation5 + $0x188] sm:$0xff]  ;;  %v433_v50 = vld [vmem:[#allocation5 + $0x190] sm:$0xff] }
  0xdf   : > { %527 = vst [vmem:[#allocation11 + $0x180] sm:$0xff] %v431_v48  ;;  %528 = vst [vmem:[#allocation11 + $0x188] sm:$0xff] %v432_v49  ;;  %v434_v51 = vld [vmem:[#allocation5 + $0x198] sm:$0xff]  ;;  %v435_v52 = vld [vmem:[#allocation5 + $0x1a0] sm:$0xff] }
  0xe0   : > { %529 = vst [vmem:[#allocation11 + $0x190] sm:$0xff] %v433_v50  ;;  %v436_v53 = vld [vmem:[#allocation5 + $0x1a8] sm:$0xff]  ;;  %530 = vst [vmem:[#allocation11 + $0x198] sm:$0xff] %v434_v51  ;;  %v437_v54 = vld [vmem:[#allocation5 + $0x1b0] sm:$0xff] }
  0xe1   : > { %531 = vst [vmem:[#allocation11 + $0x1a0] sm:$0xff] %v435_v52  ;;  %532 = vst [vmem:[#allocation11 + $0x1a8] sm:$0xff] %v436_v53  ;;  %v438_v55 = vld [vmem:[#allocation5 + $0x1b8] sm:$0xff]  ;;  %v439_v56 = vld [vmem:[#allocation5 + $0x1c0] sm:$0xff] }
  0xe2   : > { %533 = vst [vmem:[#allocation11 + $0x1b0] sm:$0xff] %v437_v54  ;;  %534 = vst [vmem:[#allocation11 + $0x1b8] sm:$0xff] %v438_v55  ;;  %v440_v57 = vld [vmem:[#allocation5 + $0x1c8] sm:$0xff]  ;;  %v441_v58 = vld [vmem:[#allocation5 + $0x1d0] sm:$0xff] }
  0xe3   : > { %535 = vst [vmem:[#allocation11 + $0x1c0] sm:$0xff] %v439_v56  ;;  %v442_v59 = vld [vmem:[#allocation5 + $0x1d8] sm:$0xff]  ;;  %536 = vst [vmem:[#allocation11 + $0x1c8] sm:$0xff] %v440_v57  ;;  %v443_v60 = vld [vmem:[#allocation5 + $0x1e0] sm:$0xff] }
  0xe4   : > { %537 = vst [vmem:[#allocation11 + $0x1d0] sm:$0xff] %v441_v58  ;;  %538 = vst [vmem:[#allocation11 + $0x1d8] sm:$0xff] %v442_v59  ;;  %v444_v61 = vld [vmem:[#allocation5 + $0x1e8] sm:$0xff]  ;;  %v445_v62 = vld [vmem:[#allocation5 + $0x1f0] sm:$0xff] }
  0xe5   : > { %539 = vst [vmem:[#allocation11 + $0x1e0] sm:$0xff] %v443_v60  ;;  %540 = vst [vmem:[#allocation11 + $0x1e8] sm:$0xff] %v444_v61  ;;  %v446_v63 = vld [vmem:[#allocation5 + $0x1f8] sm:$0xff]  ;;  %v447_v0 = vld [vmem:[#allocation5 + $0x200] sm:$0xff] }
  0xe6   : > { %541 = vst [vmem:[#allocation11 + $0x1f0] sm:$0xff] %v445_v62  ;;  %v448_v1 = vld [vmem:[#allocation5 + $0x208] sm:$0xff]  ;;  %542 = vst [vmem:[#allocation11 + $0x1f8] sm:$0xff] %v446_v63  ;;  %v449_v2 = vld [vmem:[#allocation5 + $0x210] sm:$0xff] }
  0xe7   : > { %543 = vst [vmem:[#allocation11 + $0x200] sm:$0xff] %v447_v0  ;;  %544 = vst [vmem:[#allocation11 + $0x208] sm:$0xff] %v448_v1  ;;  %v450_v3 = vld [vmem:[#allocation5 + $0x218] sm:$0xff]  ;;  %v451_v4 = vld [vmem:[#allocation5 + $0x220] sm:$0xff] }
  0xe8   : > { %545 = vst [vmem:[#allocation11 + $0x210] sm:$0xff] %v449_v2  ;;  %546 = vst [vmem:[#allocation11 + $0x218] sm:$0xff] %v450_v3  ;;  %v452_v5 = vld [vmem:[#allocation5 + $0x228] sm:$0xff]  ;;  %v453_v6 = vld [vmem:[#allocation5 + $0x230] sm:$0xff] }
  0xe9   : > { %547 = vst [vmem:[#allocation11 + $0x220] sm:$0xff] %v451_v4  ;;  %v454_v7 = vld [vmem:[#allocation5 + $0x238] sm:$0xff]  ;;  %548 = vst [vmem:[#allocation11 + $0x228] sm:$0xff] %v452_v5  ;;  %v455_v8 = vld [vmem:[#allocation5 + $0x240] sm:$0xff] }
  0xea   : > { %549 = vst [vmem:[#allocation11 + $0x230] sm:$0xff] %v453_v6  ;;  %550 = vst [vmem:[#allocation11 + $0x238] sm:$0xff] %v454_v7  ;;  %v456_v9 = vld [vmem:[#allocation5 + $0x248] sm:$0xff]  ;;  %v457_v10 = vld [vmem:[#allocation5 + $0x250] sm:$0xff] }
  0xeb   : > { %551 = vst [vmem:[#allocation11 + $0x240] sm:$0xff] %v455_v8  ;;  %552 = vst [vmem:[#allocation11 + $0x248] sm:$0xff] %v456_v9  ;;  %v458_v11 = vld [vmem:[#allocation5 + $0x258] sm:$0xff]  ;;  %v459_v12 = vld [vmem:[#allocation5 + $0x260] sm:$0xff] }
  0xec   : > { %553 = vst [vmem:[#allocation11 + $0x250] sm:$0xff] %v457_v10  ;;  %v460_v13 = vld [vmem:[#allocation5 + $0x268] sm:$0xff]  ;;  %554 = vst [vmem:[#allocation11 + $0x258] sm:$0xff] %v458_v11  ;;  %v461_v14 = vld [vmem:[#allocation5 + $0x270] sm:$0xff] }
  0xed   : > { %555 = vst [vmem:[#allocation11 + $0x260] sm:$0xff] %v459_v12  ;;  %556 = vst [vmem:[#allocation11 + $0x268] sm:$0xff] %v460_v13  ;;  %v462_v15 = vld [vmem:[#allocation5 + $0x278] sm:$0xff]  ;;  %v463_v16 = vld [vmem:[#allocation5 + $0x280] sm:$0xff] }
  0xee   : > { %557 = vst [vmem:[#allocation11 + $0x270] sm:$0xff] %v461_v14  ;;  %558 = vst [vmem:[#allocation11 + $0x278] sm:$0xff] %v462_v15  ;;  %v464_v17 = vld [vmem:[#allocation5 + $0x288] sm:$0xff]  ;;  %v465_v18 = vld [vmem:[#allocation5 + $0x290] sm:$0xff] }
  0xef   : > { %559 = vst [vmem:[#allocation11 + $0x280] sm:$0xff] %v463_v16  ;;  %v466_v19 = vld [vmem:[#allocation5 + $0x298] sm:$0xff]  ;;  %560 = vst [vmem:[#allocation11 + $0x288] sm:$0xff] %v464_v17  ;;  %v467_v20 = vld [vmem:[#allocation5 + $0x2a0] sm:$0xff] }
  0xf0   : > { %561 = vst [vmem:[#allocation11 + $0x290] sm:$0xff] %v465_v18  ;;  %562 = vst [vmem:[#allocation11 + $0x298] sm:$0xff] %v466_v19  ;;  %v468_v21 = vld [vmem:[#allocation5 + $0x2a8] sm:$0xff]  ;;  %v469_v22 = vld [vmem:[#allocation5 + $0x2b0] sm:$0xff] }
  0xf1   : > { %563 = vst [vmem:[#allocation11 + $0x2a0] sm:$0xff] %v467_v20  ;;  %564 = vst [vmem:[#allocation11 + $0x2a8] sm:$0xff] %v468_v21  ;;  %v470_v23 = vld [vmem:[#allocation5 + $0x2b8] sm:$0xff]  ;;  %v471_v24 = vld [vmem:[#allocation5 + $0x2c0] sm:$0xff] }
  0xf2   : > { %565 = vst [vmem:[#allocation11 + $0x2b0] sm:$0xff] %v469_v22  ;;  %v472_v25 = vld [vmem:[#allocation5 + $0x2c8] sm:$0xff]  ;;  %566 = vst [vmem:[#allocation11 + $0x2b8] sm:$0xff] %v470_v23  ;;  %v473_v26 = vld [vmem:[#allocation5 + $0x2d0] sm:$0xff] }
  0xf3   : > { %567 = vst [vmem:[#allocation11 + $0x2c0] sm:$0xff] %v471_v24  ;;  %568 = vst [vmem:[#allocation11 + $0x2c8] sm:$0xff] %v472_v25  ;;  %v474_v27 = vld [vmem:[#allocation5 + $0x2d8] sm:$0xff]  ;;  %v475_v28 = vld [vmem:[#allocation5 + $0x2e0] sm:$0xff] }
  0xf4   : > { %569 = vst [vmem:[#allocation11 + $0x2d0] sm:$0xff] %v473_v26  ;;  %570 = vst [vmem:[#allocation11 + $0x2d8] sm:$0xff] %v474_v27  ;;  %v476_v29 = vld [vmem:[#allocation5 + $0x2e8] sm:$0xff]  ;;  %v477_v30 = vld [vmem:[#allocation5 + $0x2f0] sm:$0xff] }
  0xf5   : > { %571 = vst [vmem:[#allocation11 + $0x2e0] sm:$0xff] %v475_v28  ;;  %v478_v31 = vld [vmem:[#allocation5 + $0x2f8] sm:$0xff]  ;;  %572 = vst [vmem:[#allocation11 + $0x2e8] sm:$0xff] %v476_v29 }
  0xf6   : > { %573 = vst [vmem:[#allocation11 + $0x2f0] sm:$0xff] %v477_v30  ;;  %574 = vst [vmem:[#allocation11 + $0x2f8] sm:$0xff] %v478_v31 }
  0xf7 PF: > { %v575_v32 = vld [vmem:[#allocation11] sm:$0xff]  ;;  %v576_v33 = vld [vmem:[#allocation11 + $0x8] sm:$0xff]  ;;  %v8055_v35 = vmov 0   ;;  %v609_v41 = vld [vmem:[#allocation11 + $0x110] sm:$0xff]  ;;  %p3904_p5 = scmp.ne.s32.totalorder %s8113_s25, 1  ;;  %s8056_s8 = smov [#allocation11]  }
  0xf8   : > { %v607_v34 = vld [vmem:[#allocation11 + $0x100] sm:$0xff]  ;;  %2447 = vmatprep.subr.bf16.mxu1 %v8055_v35  ;;  %2864 = vmatprep.subr.bf16.mxu0 %v8055_v35  ;;  %v8357_v36 = vpack.c.bf16 %v576_v33, %v575_v32  ;;  %v608_v37 = vld [vmem:[#allocation11 + $0x108] sm:$0xff]  ;;  %v577_v38 = vld [vmem:[#allocation11 + $0x10] sm:$0xff]  ;;  %s5746_s10 = sshll.u32 %s8056_s8, 4  ;;  %p6818_p6 = scmp.eq.s32.totalorder %s8113_s25, 1  ;;  %s5747_s10 = int_to_ptr.vmem [resolvable:$true] %s5746_s10 }
  0xf9   : > { %v578_v39 = vld [vmem:[#allocation11 + $0x18] sm:$0xff]  ;;  %v8359_v40 = vpack.c.bf16 %v608_v37, %v607_v34  ;;  %v579_v45 = vld [vmem:[#allocation11 + $0x20] sm:$0xff]  ;;  %v580_v46 = vld [vmem:[#allocation11 + $0x28] sm:$0xff]  ;;  %s4001_s26 = scalar_select %p3904_p5, 1, 0 }
  0xfa   : > { %v610_v42 = vld [vmem:[#allocation11 + $0x118] sm:$0xff]  ;;  %2448 = vmatpush1.bf16.msra.mxu1 %v8357_v36  ;;  %v8362_v43 = vpack.c.bf16 %v578_v39, %v577_v38  ;;  %v611_v47 = vld [vmem:[#allocation11 + $0x120] sm:$0xff]  ;;  %v612_v48 = vld [vmem:[#allocation11 + $0x128] sm:$0xff]  ;;  %v8370_v49 = vpack.c.bf16 %v580_v46, %v579_v45  ;;  %s7969_s0 = scalar_lea.vmem %s5747_s10, 12288  ;;  %p7976_p7 = scmp.lt.s32.totalorder %s5747_s10, %s5747_s10 }
  0xfb   : > { %2865 = vmatpush1.bf16.msra.mxu0 %v8359_v40  ;;  %2449 = vmatprep.subr.bf16.mxu1 %v8055_v35  ;;  %v8366_v44 = vpack.c.bf16 %v610_v42, %v609_v41  ;;  %v8374_v50 = vpack.c.bf16 %v612_v48, %v611_v47  ;;  %v581_v51 = vld [vmem:[#allocation11 + $0x30] sm:$0xff]  ;;  %v582_v52 = vld [vmem:[#allocation11 + $0x38] sm:$0xff]  ;;  %v583_v57 = vld [vmem:[#allocation11 + $0x40] sm:$0xff]  ;;  %p7970_p0 = scmp.ne.s32.totalorder %s5747_s10, %s7969_s0  ;;  %p7977_p12 = scmp.lt.s32.totalorder %s7969_s0, %s7969_s0 }
  0xfc   : > { %2866 = vmatprep.subr.bf16.mxu0 %v8055_v35  ;;  %v613_v53 = vld [vmem:[#allocation11 + $0x130] sm:$0xff]  ;;  %v614_v54 = vld [vmem:[#allocation11 + $0x138] sm:$0xff]  ;;  %v8378_v55 = vpack.c.bf16 %v582_v52, %v581_v51  ;;  %v584_v58 = vld [vmem:[#allocation11 + $0x48] sm:$0xff] }
  0xfd   : > { %v8382_v56 = vpack.c.bf16 %v614_v54, %v613_v53  ;;  %v615_v59 = vld [vmem:[#allocation11 + $0x140] sm:$0xff]  ;;  %v616_v60 = vld [vmem:[#allocation11 + $0x148] sm:$0xff]  ;;  %v8386_v61 = vpack.c.bf16 %v584_v58, %v583_v57  ;;  %v585_v63 = vld [vmem:[#allocation11 + $0x50] sm:$0xff]  ;;  %p7971_p13 = pnand %p7970_p0, %p6818_p6  ;;  %p7978_p3 = por %p7977_p12, %p7976_p7 }
  0xfe   : > { %2450 = vmatpush1.bf16.msra.mxu1 %v8362_v43  ;;  %v8390_v62 = vpack.c.bf16 %v616_v60, %v615_v59  ;;  %v586_v0 = vld [vmem:[#allocation11 + $0x58] sm:$0xff]  ;;  %v617_v1 = vld [vmem:[#allocation11 + $0x150] sm:$0xff]  ;;  %v587_v5 = vld [vmem:[#allocation11 + $0x60] sm:$0xff] }
  0xff   : > { %2867 = vmatpush1.bf16.msra.mxu0 %v8366_v44  ;;  %2451 = vmatprep.subr.bf16.mxu1 %v8055_v35  ;;  %v618_v2 = vld [vmem:[#allocation11 + $0x158] sm:$0xff]  ;;  %v8394_v3 = vpack.c.bf16 %v586_v0, %v585_v63  ;;  %v588_v6 = vld [vmem:[#allocation11 + $0x68] sm:$0xff]  ;;  %v619_v7 = vld [vmem:[#allocation11 + $0x160] sm:$0xff]  ;;  %p7972_p4 = pneg %p7971_p13 }
 0x100   : > { %2868 = vmatprep.subr.bf16.mxu0 %v8055_v35  ;;  %v8398_v4 = vpack.c.bf16 %v618_v2, %v617_v1  ;;  %v620_v8 = vld [vmem:[#allocation11 + $0x168] sm:$0xff]  ;;  %v589_v9 = vld [vmem:[#allocation11 + $0x70] sm:$0xff]  ;;  %v8402_v11 = vpack.c.bf16 %v588_v6, %v587_v5  ;;  %v590_v12 = vld [vmem:[#allocation11 + $0x78] sm:$0xff] }
 0x101   : > { %v6866_v10 = vld [vmem:[#allocation2 + $0x4] ss:$24 sps:$4 sm:$0xff]   ;;  %v8406_v14 = vpack.c.bf16 %v620_v8, %v619_v7  ;;  %v8410_v17 = vpack.c.bf16 %v590_v12, %v589_v9  ;;  %v592_v20 = vld [vmem:[#allocation11 + $0x88] sm:$0xff]  ;;  %p7979_p9 = pnand %p7978_p3, %p7972_p4 }
 0x102   : > { %2452 = vmatpush1.bf16.msra.mxu1 %v8370_v49  ;;  %v6869_v13 = vld [vmem:[#allocation2 + $0xc] ss:$24 sps:$4 sm:$0xff]   ;;  %v621_v15 = vld [vmem:[#allocation11 + $0x170] sm:$0xff]  ;;  %2479 = vmatprep.mubr.bf16.mxu1 %v6866_v10 }
 0x103   : > { %2869 = vmatpush1.bf16.msra.mxu0 %v8374_v50  ;;  %2453 = vmatprep.subr.bf16.mxu1 %v8055_v35  ;;  %v622_v16 = vld [vmem:[#allocation11 + $0x178] sm:$0xff]  ;;  %v591_v18 = vld [vmem:[#allocation11 + $0x80] sm:$0xff]  ;;  %v624_v22 = vld [vmem:[#allocation11 + $0x188] sm:$0xff] }
 0x104   : > { %2870 = vmatprep.subr.bf16.mxu0 %v8055_v35  ;;  %2896 = vmatprep.mubr.bf16.mxu0 %v6869_v13  ;;  %v8414_v19 = vpack.c.bf16 %v622_v16, %v621_v15  ;;  %v623_v21 = vld [vmem:[#allocation11 + $0x180] sm:$0xff]  ;;  %v8418_v23 = vpack.c.bf16 %v592_v20, %v591_v18  ;;  %v593_v24 = vld [vmem:[#allocation11 + $0x90] sm:$0xff]  ;;  %v594_v26 = vld [vmem:[#allocation11 + $0x98] sm:$0xff] }
 0x105   : > { %v8422_v25 = vpack.c.bf16 %v624_v22, %v623_v21  ;;  %v625_v27 = vld [vmem:[#allocation11 + $0x190] sm:$0xff]  ;;  %v626_v28 = vld [vmem:[#allocation11 + $0x198] sm:$0xff]  ;;  %v8426_v29 = vpack.c.bf16 %v594_v26, %v593_v24  ;;  %v595_v30 = vld [vmem:[#allocation11 + $0xa0] sm:$0xff] }
 0x106   : > { %2454 = vmatpush1.bf16.msra.mxu1 %v8378_v55  ;;  %v8430_v31 = vpack.c.bf16 %v626_v28, %v625_v27  ;;  %v596_v32 = vld [vmem:[#allocation11 + $0xa8] sm:$0xff]  ;;  %v627_v33 = vld [vmem:[#allocation11 + $0x1a0] sm:$0xff]  ;;  %v597_v38 = vld [vmem:[#allocation11 + $0xb0] sm:$0xff] }
 0x107   : > { %2871 = vmatpush1.bf16.msra.mxu0 %v8382_v56  ;;  %2455 = vmatprep.subr.bf16.mxu1 %v8055_v35  ;;  %v628_v34 = vld [vmem:[#allocation11 + $0x1a8] sm:$0xff]  ;;  %v8434_v37 = vpack.c.bf16 %v596_v32, %v595_v30  ;;  %v598_v41 = vld [vmem:[#allocation11 + $0xb8] sm:$0xff]  ;;  %v629_v42 = vld [vmem:[#allocation11 + $0x1b0] sm:$0xff] }
 0x108   : > { %2872 = vmatprep.subr.bf16.mxu0 %v8055_v35  ;;  %v8438_v39 = vpack.c.bf16 %v628_v34, %v627_v33  ;;  %v630_v45 = vld [vmem:[#allocation11 + $0x1b8] sm:$0xff]  ;;  %v8442_v46 = vpack.c.bf16 %v598_v41, %v597_v38  ;;  %v599_v47 = vld [vmem:[#allocation11 + $0xc0] sm:$0xff]  ;;  %v600_v51 = vld [vmem:[#allocation11 + $0xc8] sm:$0xff] }
 0x109   : > { %v8446_v48 = vpack.c.bf16 %v630_v45, %v629_v42  ;;  %v631_v52 = vld [vmem:[#allocation11 + $0x1c0] sm:$0xff]  ;;  %v632_v53 = vld [vmem:[#allocation11 + $0x1c8] sm:$0xff]  ;;  %v8450_v54 = vpack.c.bf16 %v600_v51, %v599_v47  ;;  %v601_v57 = vld [vmem:[#allocation11 + $0xd0] sm:$0xff] }
 0x10a   : > { %2456 = vmatpush1.bf16.msra.mxu1 %v8386_v61  ;;  %v8454_v58 = vpack.c.bf16 %v632_v53, %v631_v52  ;;  %v602_v59 = vld [vmem:[#allocation11 + $0xd8] sm:$0xff]  ;;  %v633_v60 = vld [vmem:[#allocation11 + $0x1d0] sm:$0xff]  ;;  %v603_v1 = vld [vmem:[#allocation11 + $0xe0] sm:$0xff] }
 0x10b   : > { %2873 = vmatpush1.bf16.msra.mxu0 %v8390_v62  ;;  %2457 = vmatprep.subr.bf16.mxu1 %v8055_v35  ;;  %11790 = vst [vmem:[#allocation16_spill] sm:$0xff] %v8446_v48  ;;  %v634_v63 = vld [vmem:[#allocation11 + $0x1d8] sm:$0xff]  ;;  %v8458_v0 = vpack.c.bf16 %v602_v59, %v601_v57  ;;  %v604_v5 = vld [vmem:[#allocation11 + $0xe8] sm:$0xff]  ;;  %v635_v6 = vld [vmem:[#allocation11 + $0x1e0] sm:$0xff] }
 0x10c   : > { %2874 = vmatprep.subr.bf16.mxu0 %v8055_v35  ;;  %11791 = vst [vmem:[#allocation17_spill] sm:$0xff] %v8454_v58  ;;  %v8462_v2 = vpack.c.bf16 %v634_v63, %v633_v60  ;;  %v636_v7 = vld [vmem:[#allocation11 + $0x1e8] sm:$0xff]  ;;  %v8466_v8 = vpack.c.bf16 %v604_v5, %v603_v1  ;;  %v605_v9 = vld [vmem:[#allocation11 + $0xf0] sm:$0xff]  ;;  %v606_v10 = vld [vmem:[#allocation11 + $0xf8] sm:$0xff] }
 0x10d   : > { %v8470_v12 = vpack.c.bf16 %v636_v7, %v635_v6  ;;  %v637_v13 = vld [vmem:[#allocation11 + $0x1f0] sm:$0xff]  ;;  %v638_v15 = vld [vmem:[#allocation11 + $0x1f8] sm:$0xff]  ;;  %v8474_v16 = vpack.c.bf16 %v606_v10, %v605_v9  ;;  %v639_v21 = vld [vmem:[#allocation11 + $0x200] sm:$0xff] }
 0x10e   : > { %2458 = vmatpush1.bf16.msra.mxu1 %v8394_v3  ;;  %11792 = vst [vmem:[#allocation18_spill] sm:$0xff] %v8462_v2  ;;  %v8478_v18 = vpack.c.bf16 %v638_v15, %v637_v13  ;;  %v6864_v20 = vld [vmem:[#allocation2] ss:$24 sps:$4 sm:$0xff]   ;;  %v640_v22 = vld [vmem:[#allocation11 + $0x208] sm:$0xff]  ;;  %v643_v41 = vld [vmem:[#allocation11 + $0x220] sm:$0xff] }
 0x10f   : > { %2875 = vmatpush1.bf16.msra.mxu0 %v8398_v4  ;;  %2459 = vmatprep.subr.bf16.mxu1 %v8055_v35  ;;  %11793 = vst [vmem:[#allocation19_spill] sm:$0xff] %v8470_v12  ;;  %v6867_v24 = vld [vmem:[#allocation2 + $0x8] ss:$24 sps:$4 sm:$0xff]   ;;  %v6870_v26 = vld [vmem:[#allocation2 + $0x34] ss:$24 sps:$4 sm:$0xff]   ;;  %v8485_v28 = vpack.c.bf16 %v640_v22, %v639_v21 }
 0x110   : > { %2876 = vmatprep.subr.bf16.mxu0 %v8055_v35  ;;  %11794 = vst [vmem:[#allocation20_spill] sm:$0xff] %v8478_v18  ;;  %v6872_v27 = vld [vmem:[#allocation2 + $0x3c] ss:$24 sps:$4 sm:$0xff]   ;;  %v6874_v33 = vld [vmem:[#allocation2 + $0x30] ss:$24 sps:$4 sm:$0xff]  }
 0x111   : > { %11795 = vst [vmem:[#allocation21_spill] sm:$0xff] %v8485_v28  ;;  %v641_v30 = vld [vmem:[#allocation11 + $0x210] sm:$0xff]  ;;  %v642_v32 = vld [vmem:[#allocation11 + $0x218] sm:$0xff]  ;;  %v644_v42 = vld [vmem:[#allocation11 + $0x228] sm:$0xff] }
 0x112   : > { %2460 = vmatpush1.bf16.msra.mxu1 %v8402_v11  ;;  %v8490_v34 = vpack.c.bf16 %v642_v32, %v641_v30  ;;  %v6875_v38 = vld [vmem:[#allocation2 + $0x38] ss:$24 sps:$4 sm:$0xff]   ;;  %v6876_v45 = vld [vmem:[#allocation2 + $0x64] ss:$24 sps:$4 sm:$0xff]   ;;  %v8496_v51 = vpack.c.bf16 %v644_v42, %v643_v41  ;;  %v6881_v63 = vld [vmem:[#allocation2 + $0x68] ss:$24 sps:$4 sm:$0xff]  }
 0x113   : > { %2877 = vmatpush1.bf16.msra.mxu0 %v8406_v14  ;;  %2461 = vmatprep.subr.bf16.mxu1 %v8055_v35  ;;  %v6878_v47 = vld [vmem:[#allocation2 + $0x6c] ss:$24 sps:$4 sm:$0xff]   ;;  %v645_v52 = vld [vmem:[#allocation11 + $0x230] sm:$0xff]  ;;  %v6886_v13 = vld [vmem:[#allocation2 + $0x90] ss:$24 sps:$4 sm:$0xff]  }
 0x114   : > { %2878 = vmatprep.subr.bf16.mxu0 %v8055_v35  ;;  %11796 = vst [vmem:[#allocation22_spill] sm:$0xff] %v8490_v34  ;;  %11797 = vst [vmem:[#allocation23_spill] sm:$0xff] %v8496_v51  ;;  %v646_v53 = vld [vmem:[#allocation11 + $0x238] sm:$0xff]  ;;  %v647_v59 = vld [vmem:[#allocation11 + $0x240] sm:$0xff] }
 0x115   : > { %v6880_v57 = vld [vmem:[#allocation2 + $0x60] ss:$24 sps:$4 sm:$0xff]   ;;  %v648_v60 = vld [vmem:[#allocation11 + $0x248] sm:$0xff]  ;;  %v8502_v5 = vpack.c.bf16 %v646_v53, %v645_v52  ;;  %v651_v15 = vld [vmem:[#allocation11 + $0x260] sm:$0xff] }
 0x116   : > { %2462 = vmatpush1.bf16.msra.mxu1 %v8410_v17  ;;  %v6882_v1 = vld [vmem:[#allocation2 + $0x94] ss:$24 sps:$4 sm:$0xff]   ;;  %v8507_v9 = vpack.c.bf16 %v648_v60, %v647_v59  ;;  %v650_v10 = vld [vmem:[#allocation11 + $0x258] sm:$0xff]  ;;  %v6887_v21 = vld [vmem:[#allocation2 + $0x98] ss:$24 sps:$4 sm:$0xff]  }
 0x117   : > { %2879 = vmatpush1.bf16.msra.mxu0 %v8414_v19  ;;  %2463 = vmatprep.subr.bf16.mxu1 %v8055_v35  ;;  %11798 = vst [vmem:[#allocation24_spill] sm:$0xff] %v8502_v5  ;;  %v6884_v6 = vld [vmem:[#allocation2 + $0x9c] ss:$24 sps:$4 sm:$0xff]   ;;  %v655_v52 = vld [vmem:[#allocation11 + $0x280] sm:$0xff] }
 0x118   : > { %2880 = vmatprep.subr.bf16.mxu0 %v8055_v35  ;;  %v649_v7 = vld [vmem:[#allocation11 + $0x250] sm:$0xff]  ;;  %11799 = vst [vmem:[#allocation25_spill] sm:$0xff] %v8507_v9  ;;  %v654_v32 = vld [vmem:[#allocation11 + $0x278] sm:$0xff]  ;;  %v656_v53 = vld [vmem:[#allocation11 + $0x288] sm:$0xff] }
 0x119   : > { %v6888_v22 = vld [vmem:[#allocation2 + $0xc4] ss:$24 sps:$4 sm:$0xff]   ;;  %v6894_v41 = vld [vmem:[#allocation2 + $0xf4] ss:$24 sps:$4 sm:$0xff]   ;;  %v8534_v60 = vpack.c.bf16 %v656_v53, %v655_v52 }
 0x11a   : > { %2464 = vmatpush1.bf16.msra.mxu1 %v8418_v23  ;;  %v6900_v59 = vld [vmem:[#allocation2 + $0x124] ss:$24 sps:$4 sm:$0xff]  }
 0x11b   : > { %2881 = vmatpush1.bf16.msra.mxu0 %v8422_v25  ;;  %2465 = vmatprep.subr.bf16.mxu1 %v8055_v35  ;;  %11803 = vst [vmem:[#allocation29_spill] sm:$0xff] %v8534_v60  ;;  %v6924_v52 = vld [vmem:[#allocation2 + $0x1e4] ss:$24 sps:$4 sm:$0xff]  }
 0x11c   : > { %2882 = vmatprep.subr.bf16.mxu0 %v8055_v35  ;;  %v6926_v53 = vld [vmem:[#allocation2 + $0x1ec] ss:$24 sps:$4 sm:$0xff]  }
 0x11e   : > { %2466 = vmatpush1.bf16.msra.mxu1 %v8426_v29 }
 0x11f   : > { %2883 = vmatpush1.bf16.msra.mxu0 %v8430_v31  ;;  %2467 = vmatprep.subr.bf16.mxu1 %v8055_v35 }
 0x120   : > { %2884 = vmatprep.subr.bf16.mxu0 %v8055_v35 }
 0x122   : > { %2468 = vmatpush1.bf16.msra.mxu1 %v8434_v37 }
 0x123   : > { %2885 = vmatpush1.bf16.msra.mxu0 %v8438_v39  ;;  %2469 = vmatprep.subr.bf16.mxu1 %v8055_v35 }
 0x124   : > { %2886 = vmatprep.subr.bf16.mxu0 %v8055_v35 }
 0x126   : > { %2470 = vmatpush1.bf16.msra.mxu1 %v8442_v46 }
 0x127   : > { %2887 = vmatpush1.bf16.msra.mxu0 %v8446_v48  ;;  %2471 = vmatprep.subr.bf16.mxu1 %v8055_v35 }
 0x128   : > { %2888 = vmatprep.subr.bf16.mxu0 %v8055_v35 }
 0x12a   : > { %2472 = vmatpush1.bf16.msra.mxu1 %v8450_v54 }
 0x12b   : > { %2889 = vmatpush1.bf16.msra.mxu0 %v8454_v58  ;;  %2473 = vmatprep.subr.bf16.mxu1 %v8055_v35 }
 0x12c   : > { %2890 = vmatprep.subr.bf16.mxu0 %v8055_v35 }
 0x12e   : > { %2474 = vmatpush1.bf16.msra.mxu1 %v8458_v0 }
 0x12f   : > { %2891 = vmatpush1.bf16.msra.mxu0 %v8462_v2  ;;  %2475 = vmatprep.subr.bf16.mxu1 %v8055_v35 }
 0x130   : > { %2892 = vmatprep.subr.bf16.mxu0 %v8055_v35 }
 0x132   : > { %2476 = vmatpush1.bf16.msra.mxu1 %v8466_v8 }
 0x133   : > { %2893 = vmatpush1.bf16.msra.mxu0 %v8470_v12  ;;  %2477 = vmatprep.subr.bf16.mxu1 %v8055_v35 }
 0x134   : > { %2894 = vmatprep.subr.bf16.mxu0 %v8055_v35 }
 0x136   : > { %2478 = vmatpush1.bf16.msra.mxu1 %v8474_v16 }
 0x137   : > { %2895 = vmatpush1.bf16.msra.mxu0 %v8478_v18  ;;  %6453 = vmatprep.subr.bf16.mxu1 %v8055_v35 }
 0x138   : > { %3281 = vmatprep.subr.bf16.mxu0 %v8055_v35 }
 0x139   : > { %2480 = vmatmul.mubr.bf16.vlgmr.msra.gmra.mrb[0].mxu1 %v6864_v20  ;;  %v652_v20 = vld [vmem:[#allocation11 + $0x268] sm:$0xff] }
 0x13a   : > { %2897 = vmatmul.mubr.bf16.vlgmr.msra.gmra.mrb[0].mxu0 %v6867_v24  ;;  %6469 = vmatpush1.bf16.msra.mxu1 %v8359_v40  ;;  %v8513_v24 = vpack.c.bf16 %v650_v10, %v649_v7  ;;  %v8519_v30 = vpack.c.bf16 %v652_v20, %v651_v15  ;;  %v6906_v7 = vld [vmem:[#allocation2 + $0x154] ss:$24 sps:$4 sm:$0xff]   ;;  %v6911_v15 = vld [vmem:[#allocation2 + $0x158] ss:$24 sps:$4 sm:$0xff]   ;;  %v6912_v20 = vld [vmem:[#allocation2 + $0x184] ss:$24 sps:$4 sm:$0xff]  }
 0x13b   : > { %2487 = vmatprep.mubr.bf16.mxu1 %v6870_v26  ;;  %2904 = vmatprep.mubr.bf16.mxu0 %v6872_v27  ;;  %v6890_v26 = vld [vmem:[#allocation2 + $0xcc] ss:$24 sps:$4 sm:$0xff]   ;;  %v653_v27 = vld [vmem:[#allocation11 + $0x270] sm:$0xff] }
 0x13c   : > { %3282 = vmatpush1.bf16.msra.mxu0 %v8485_v28  ;;  %6454 = vmatprep.subr.bf16.mxu1 %v8055_v35  ;;  %11800 = vst [vmem:[#allocation26_spill] sm:$0xff] %v8513_v24  ;;  %11801 = vst [vmem:[#allocation27_spill] sm:$0xff] %v8519_v30  ;;  %v8525_v42 = vpack.c.bf16 %v654_v32, %v653_v27  ;;  %v6908_v10 = vld [vmem:[#allocation2 + $0x15c] ss:$24 sps:$4 sm:$0xff]   ;;  %v6916_v27 = vld [vmem:[#allocation2 + $0x180] ss:$24 sps:$4 sm:$0xff]  }
 0x13d   : > { %3283 = vmatprep.subr.bf16.mxu0 %v8055_v35  ;;  %v7088_v28 = vld [vmem:[#allocation2 + $0x44] ss:$24 sps:$4 sm:$0xff]  }
 0x13e   : > { %6470 = vmatpush1.bf16.msra.mxu1 %v8366_v44  ;;  %11802 = vst [vmem:[#allocation28_spill] sm:$0xff] %v8525_v42 }
 0x13f   : > { %6455 = vmatprep.subr.bf16.mxu1 %v8055_v35 }
 0x140   : > { %3284 = vmatpush1.bf16.msra.mxu0 %v8490_v34  ;;  %v7086_v34 = vld [vmem:[#allocation2 + $0x6f4] ss:$24 sps:$4 sm:$0xff]  }
 0x141   : > { %2488 = vmatmul.mubr.bf16.gmra.mrb[4].mxu1 %v6874_v33  ;;  %3285 = vmatprep.subr.bf16.mxu0 %v8055_v35  ;;  %v6892_v33 = vld [vmem:[#allocation2 + $0xc0] ss:$24 sps:$4 sm:$0xff]  }
 0x142   : > { %2905 = vmatmul.mubr.bf16.gmra.mrb[4].mxu0 %v6875_v38  ;;  %2495 = vmatprep.mubr.bf16.mxu1 %v6876_v45  ;;  %v6893_v38 = vld [vmem:[#allocation2 + $0xc8] ss:$24 sps:$4 sm:$0xff]   ;;  %v6896_v45 = vld [vmem:[#allocation2 + $0xfc] ss:$24 sps:$4 sm:$0xff]  }
 0x143   : > { %2912 = vmatprep.mubr.bf16.mxu0 %v6878_v47  ;;  %6471 = vmatpush1.bf16.msra.mxu1 %v8374_v50  ;;  %v6898_v47 = vld [vmem:[#allocation2 + $0xf0] ss:$24 sps:$4 sm:$0xff]  }
 0x144   : > { %3286 = vmatpush1.bf16.msra.mxu0 %v8496_v51  ;;  %6456 = vmatprep.subr.bf16.mxu1 %v8055_v35  ;;  %v7084_v51 = vld [vmem:[#allocation2 + $0x14] ss:$24 sps:$4 sm:$0xff]  }
 0x145   : > { %3287 = vmatprep.subr.bf16.mxu0 %v8055_v35 }
 0x147   : > { %6472 = vmatpush1.bf16.msra.mxu1 %v8382_v56 }
 0x148   : > { %3288 = vmatpush1.bf16.msra.mxu0 %v8502_v5  ;;  %6457 = vmatprep.subr.bf16.mxu1 %v8055_v35  ;;  %v7080_v5 = vld [vmem:[#allocation2 + $0x6c4] ss:$24 sps:$4 sm:$0xff]  }
 0x149   : > { %2496 = vmatmul.mubr.bf16.gmra.mrb[8].mxu1 %v6880_v57  ;;  %3289 = vmatprep.subr.bf16.mxu0 %v8055_v35  ;;  %v6899_v57 = vld [vmem:[#allocation2 + $0xf8] ss:$24 sps:$4 sm:$0xff]  }
 0x14a   : > { %2913 = vmatmul.mubr.bf16.gmra.mrb[8].mxu0 %v6881_v63  ;;  %2503 = vmatprep.mubr.bf16.mxu1 %v6882_v1  ;;  %v6902_v63 = vld [vmem:[#allocation2 + $0x12c] ss:$24 sps:$4 sm:$0xff]   ;;  %v6904_v1 = vld [vmem:[#allocation2 + $0x120] ss:$24 sps:$4 sm:$0xff]  }
 0x14b   : > { %2920 = vmatprep.mubr.bf16.mxu0 %v6884_v6  ;;  %6473 = vmatpush1.bf16.msra.mxu1 %v8390_v62  ;;  %v6905_v6 = vld [vmem:[#allocation2 + $0x128] ss:$24 sps:$4 sm:$0xff]  }
 0x14c   : > { %3290 = vmatpush1.bf16.msra.mxu0 %v8507_v9  ;;  %6458 = vmatprep.subr.bf16.mxu1 %v8055_v35  ;;  %v7076_v9 = vld [vmem:[#allocation2 + $0x69c] ss:$24 sps:$4 sm:$0xff]  }
 0x14d   : > { %3291 = vmatprep.subr.bf16.mxu0 %v8055_v35 }
 0x14f   : > { %6474 = vmatpush1.bf16.msra.mxu1 %v8398_v4 }
 0x150   : > { %3292 = vmatpush1.bf16.msra.mxu0 %v8513_v24  ;;  %6459 = vmatprep.subr.bf16.mxu1 %v8055_v35  ;;  %v7074_v24 = vld [vmem:[#allocation2 + $0x694] ss:$24 sps:$4 sm:$0xff]  }
 0x151   : > { %2504 = vmatmul.mubr.bf16.gmra.mrb[12].mxu1 %v6886_v13  ;;  %3293 = vmatprep.subr.bf16.mxu0 %v8055_v35  ;;  %v6910_v13 = vld [vmem:[#allocation2 + $0x150] ss:$24 sps:$4 sm:$0xff]  }
 0x152   : > { %2921 = vmatmul.mubr.bf16.gmra.mrb[12].mxu0 %v6887_v21  ;;  %2511 = vmatprep.mubr.bf16.mxu1 %v6888_v22  ;;  %v6914_v21 = vld [vmem:[#allocation2 + $0x18c] ss:$24 sps:$4 sm:$0xff]   ;;  %v657_v22 = vld [vmem:[#allocation11 + $0x290] sm:$0xff] }
 0x153   : > { %2928 = vmatprep.mubr.bf16.mxu0 %v6890_v26  ;;  %6475 = vmatpush1.bf16.msra.mxu1 %v8406_v14  ;;  %v658_v26 = vld [vmem:[#allocation11 + $0x298] sm:$0xff] }
 0x154   : > { %3294 = vmatpush1.bf16.msra.mxu0 %v8519_v30  ;;  %6460 = vmatprep.subr.bf16.mxu1 %v8055_v35  ;;  %v8549_v32 = vpack.c.bf16 %v658_v26, %v657_v22  ;;  %v6940_v22 = vld [vmem:[#allocation2 + $0x240] ss:$24 sps:$4 sm:$0xff]   ;;  %v7070_v30 = vld [vmem:[#allocation2 + $0x66c] ss:$24 sps:$4 sm:$0xff]  }
 0x155   : > { %3295 = vmatprep.subr.bf16.mxu0 %v8055_v35  ;;  %v6941_v26 = vld [vmem:[#allocation2 + $0x248] ss:$24 sps:$4 sm:$0xff]  }
 0x156   : > { %11804 = vst [vmem:[#allocation30_spill] sm:$0xff] %v8549_v32 }
 0x157   : > { %6476 = vmatpush1.bf16.msra.mxu1 %v8414_v19 }
 0x158   : > { %3296 = vmatpush1.bf16.msra.mxu0 %v8525_v42  ;;  %6461 = vmatprep.subr.bf16.mxu1 %v8055_v35 }
 0x159   : > { %2512 = vmatmul.mubr.bf16.gmra.mrb[16].mxu1 %v6892_v33  ;;  %3297 = vmatprep.subr.bf16.mxu0 %v8055_v35  ;;  %v6917_v33 = vld [vmem:[#allocation2 + $0x188] ss:$24 sps:$4 sm:$0xff]  }
 0x15a   : > { %2929 = vmatmul.mubr.bf16.gmra.mrb[16].mxu0 %v6893_v38  ;;  %2519 = vmatprep.mubr.bf16.mxu1 %v6894_v41  ;;  %v6918_v38 = vld [vmem:[#allocation2 + $0x1b4] ss:$24 sps:$4 sm:$0xff]  }
 0x15b   : > { %2936 = vmatprep.mubr.bf16.mxu0 %v6896_v45  ;;  %6477 = vmatpush1.bf16.msra.mxu1 %v8422_v25  ;;  %v6920_v41 = vld [vmem:[#allocation2 + $0x1bc] ss:$24 sps:$4 sm:$0xff]   ;;  %v6922_v45 = vld [vmem:[#allocation2 + $0x1b0] ss:$24 sps:$4 sm:$0xff]  }
 0x15c   : > { %6462 = vmatprep.subr.bf16.mxu1 %v8055_v35  ;;  %3298 = vmatpush1.bf16.msra.mxu0 %v8534_v60  ;;  %v7068_v60 = vld [vmem:[#allocation2 + $0x664] ss:$24 sps:$4 sm:$0xff]  }
 0x15d   : > { %3299 = vmatprep.subr.bf16.mxu0 %v8055_v35 }
 0x15f   : > { %6478 = vmatpush1.bf16.msra.mxu1 %v8430_v31 }
 0x160   : > { %6463 = vmatprep.subr.bf16.mxu1 %v8055_v35  ;;  %3300 = vmatpush1.bf16.msra.mxu0 %v8549_v32  ;;  %v7064_v32 = vld [vmem:[#allocation2 + $0x63c] ss:$24 sps:$4 sm:$0xff]  }
 0x161   : > { %2520 = vmatmul.mubr.bf16.gmra.mrb[20].mxu1 %v6898_v47  ;;  %3301 = vmatprep.subr.bf16.mxu0 %v8055_v35  ;;  %v6923_v47 = vld [vmem:[#allocation2 + $0x1b8] ss:$24 sps:$4 sm:$0xff]  }
 0x162   : > { %2937 = vmatmul.mubr.bf16.gmra.mrb[20].mxu0 %v6899_v57  ;;  %2527 = vmatprep.mubr.bf16.mxu1 %v6900_v59  ;;  %v659_v57 = vld [vmem:[#allocation11 + $0x2a0] sm:$0xff]  ;;  %v660_v59 = vld [vmem:[#allocation11 + $0x2a8] sm:$0xff] }
 0x163   : > { %2944 = vmatprep.mubr.bf16.mxu0 %v6902_v63  ;;  %6479 = vmatpush1.bf16.msra.mxu1 %v8438_v39  ;;  %v6928_v63 = vld [vmem:[#allocation2 + $0x1e0] ss:$24 sps:$4 sm:$0xff]  }
 0x164   : > { %6464 = vmatprep.subr.bf16.mxu1 %v8055_v35 }
 0x167   : > { %6480 = vmatpush1.bf16.msra.mxu1 %v8446_v48  ;;  %v7106_v48 = vld [vmem:[#allocation2 + $0xd4] ss:$24 sps:$4 sm:$0xff]  }
 0x168   : > { %6465 = vmatprep.subr.bf16.mxu1 %v8055_v35 }
 0x169   : > { %2528 = vmatmul.mubr.bf16.gmra.mrb[24].mxu1 %v6904_v1  ;;  %v8556_v1 = vpack.c.bf16 %v660_v59, %v659_v57  ;;  %v6950_v57 = vld [vmem:[#allocation2 + $0x2ac] ss:$24 sps:$4 sm:$0xff]   ;;  %v6952_v59 = vld [vmem:[#allocation2 + $0x2a0] ss:$24 sps:$4 sm:$0xff]  }
 0x16a   : > { %2945 = vmatmul.mubr.bf16.gmra.mrb[24].mxu0 %v6905_v6  ;;  %2535 = vmatprep.mubr.bf16.mxu1 %v6906_v7  ;;  %v6929_v6 = vld [vmem:[#allocation2 + $0x1e8] ss:$24 sps:$4 sm:$0xff]   ;;  %v6930_v7 = vld [vmem:[#allocation2 + $0x214] ss:$24 sps:$4 sm:$0xff]  }
 0x16b   : > { %2952 = vmatprep.mubr.bf16.mxu0 %v6908_v10  ;;  %6481 = vmatpush1.bf16.msra.mxu1 %v8454_v58  ;;  %11805 = vst [vmem:[#allocation31_spill] sm:$0xff] %v8556_v1  ;;  %v6932_v10 = vld [vmem:[#allocation2 + $0x21c] ss:$24 sps:$4 sm:$0xff]  }
 0x16c   : > { %6466 = vmatprep.subr.bf16.mxu1 %v8055_v35  ;;  %3302 = vmatpush1.bf16.msra.mxu0 %v8556_v1  ;;  %v7100_v58 = vld [vmem:[#allocation2 + $0xa4] ss:$24 sps:$4 sm:$0xff]  }
 0x16d   : > { %3303 = vmatprep.subr.bf16.mxu0 %v8055_v35 }
 0x16f   : > { %6482 = vmatpush1.bf16.msra.mxu1 %v8462_v2  ;;  %v7098_v2 = vld [vmem:[#allocation2 + $0x754] ss:$24 sps:$4 sm:$0xff]  }
 0x170   : > { %6467 = vmatprep.subr.bf16.mxu1 %v8055_v35 }
 0x171   : > { %2536 = vmatmul.mubr.bf16.gmra.mrb[28].mxu1 %v6910_v13  ;;  %v6934_v13 = vld [vmem:[#allocation2 + $0x210] ss:$24 sps:$4 sm:$0xff]  }
 0x172   : > { %2953 = vmatmul.mubr.bf16.gmra.mrb[28].mxu0 %v6911_v15  ;;  %2543 = vmatprep.mubr.bf16.mxu1 %v6912_v20  ;;  %v6935_v15 = vld [vmem:[#allocation2 + $0x218] ss:$24 sps:$4 sm:$0xff]   ;;  %v6936_v20 = vld [vmem:[#allocation2 + $0x244] ss:$24 sps:$4 sm:$0xff]  }
 0x173   : > { %2960 = vmatprep.mubr.bf16.mxu0 %v6914_v21  ;;  %6483 = vmatpush1.bf16.msra.mxu1 %v8470_v12  ;;  %v6938_v21 = vld [vmem:[#allocation2 + $0x24c] ss:$24 sps:$4 sm:$0xff]  }
 0x174   : > { %6468 = vmatprep.subr.bf16.mxu1 %v8055_v35  ;;  %v7094_v12 = vld [vmem:[#allocation2 + $0x74] ss:$24 sps:$4 sm:$0xff]  }
 0x177   : > { %6484 = vmatpush1.bf16.msra.mxu1 %v8478_v18  ;;  %v7092_v18 = vld [vmem:[#allocation2 + $0x724] ss:$24 sps:$4 sm:$0xff]  }
 0x179   : > { %2544 = vmatmul.mubr.bf16.gmra.mrb[32].mxu1 %v6916_v27  ;;  %v6942_v27 = vld [vmem:[#allocation2 + $0x274] ss:$24 sps:$4 sm:$0xff]  }
 0x17a   : > { %2961 = vmatmul.mubr.bf16.gmra.mrb[32].mxu0 %v6917_v33  ;;  %2551 = vmatprep.mubr.bf16.mxu1 %v6918_v38  ;;  %v661_v33 = vld [vmem:[#allocation11 + $0x2b0] sm:$0xff]  ;;  %v662_v38 = vld [vmem:[#allocation11 + $0x2b8] sm:$0xff] }
 0x17b   : > { %2968 = vmatprep.mubr.bf16.mxu0 %v6920_v41  ;;  %v6944_v41 = vld [vmem:[#allocation2 + $0x27c] ss:$24 sps:$4 sm:$0xff]  }
 0x181   : > { %2552 = vmatmul.mubr.bf16.gmra.mrb[36].mxu1 %v6922_v45  ;;  %v8560_v45 = vpack.c.bf16 %v662_v38, %v661_v33  ;;  %v6965_v33 = vld [vmem:[#allocation2 + $0x308] ss:$24 sps:$4 sm:$0xff]   ;;  %v6966_v38 = vld [vmem:[#allocation2 + $0x334] ss:$24 sps:$4 sm:$0xff]  }
 0x182   : > { %2969 = vmatmul.mubr.bf16.gmra.mrb[36].mxu0 %v6923_v47  ;;  %2559 = vmatprep.mubr.bf16.mxu1 %v6924_v52  ;;  %v6946_v47 = vld [vmem:[#allocation2 + $0x270] ss:$24 sps:$4 sm:$0xff]  }
 0x183   : > { %2976 = vmatprep.mubr.bf16.mxu0 %v6926_v53  ;;  %11806 = vst [vmem:[#allocation32_spill] sm:$0xff] %v8560_v45  ;;  %3304 = vmatpush1.bf16.msra.mxu0 %v8560_v45  ;;  %v6947_v52 = vld [vmem:[#allocation2 + $0x278] ss:$24 sps:$4 sm:$0xff]   ;;  %v6948_v53 = vld [vmem:[#allocation2 + $0x2a4] ss:$24 sps:$4 sm:$0xff]  }
 0x184   : > { %3305 = vmatprep.subr.bf16.mxu0 %v8055_v35  ;;  %v7058_v45 = vld [vmem:[#allocation2 + $0x60c] ss:$24 sps:$4 sm:$0xff]  }
 0x189   : > { %2560 = vmatmul.mubr.bf16.gmra.mrb[40].mxu1 %v6928_v63  ;;  %v6953_v63 = vld [vmem:[#allocation2 + $0x2a8] ss:$24 sps:$4 sm:$0xff]  }
 0x18a   : > { %2977 = vmatmul.mubr.bf16.gmra.mrb[40].mxu0 %v6929_v6  ;;  %2567 = vmatprep.mubr.bf16.mxu1 %v6930_v7  ;;  %v6954_v6 = vld [vmem:[#allocation2 + $0x2d4] ss:$24 sps:$4 sm:$0xff]  }
 0x18b   : > { %2984 = vmatprep.mubr.bf16.mxu0 %v6932_v10  ;;  %v6956_v7 = vld [vmem:[#allocation2 + $0x2dc] ss:$24 sps:$4 sm:$0xff]   ;;  %v663_v10 = vld [vmem:[#allocation11 + $0x2c0] sm:$0xff] }
 0x191   : > { %2568 = vmatmul.mubr.bf16.gmra.mrb[44].mxu1 %v6934_v13  ;;  %v664_v13 = vld [vmem:[#allocation11 + $0x2c8] sm:$0xff] }
 0x192   : > { %2985 = vmatmul.mubr.bf16.gmra.mrb[44].mxu0 %v6935_v15  ;;  %2575 = vmatprep.mubr.bf16.mxu1 %v6936_v20  ;;  %v8564_v15 = vpack.c.bf16 %v664_v13, %v663_v10  ;;  %v6958_v20 = vld [vmem:[#allocation2 + $0x2d0] ss:$24 sps:$4 sm:$0xff]   ;;  %v6978_v13 = vld [vmem:[#allocation2 + $0x394] ss:$24 sps:$4 sm:$0xff]  }
 0x193   : > { %2992 = vmatprep.mubr.bf16.mxu0 %v6938_v21  ;;  %v6959_v21 = vld [vmem:[#allocation2 + $0x2d8] ss:$24 sps:$4 sm:$0xff]   ;;  %v6977_v10 = vld [vmem:[#allocation2 + $0x368] ss:$24 sps:$4 sm:$0xff]  }
 0x194   : > { %11807 = vst [vmem:[#allocation33_spill] sm:$0xff] %v8564_v15  ;;  %3306 = vmatpush1.bf16.msra.mxu0 %v8564_v15  ;;  %v7056_v15 = vld [vmem:[#allocation2 + $0x604] ss:$24 sps:$4 sm:$0xff]  }
 0x195   : > { %3307 = vmatprep.subr.bf16.mxu0 %v8055_v35 }
 0x199   : > { %2576 = vmatmul.mubr.bf16.gmra.mrb[48].mxu1 %v6940_v22  ;;  %v6960_v22 = vld [vmem:[#allocation2 + $0x304] ss:$24 sps:$4 sm:$0xff]  }
 0x19a   : > { %2993 = vmatmul.mubr.bf16.gmra.mrb[48].mxu0 %v6941_v26  ;;  %2583 = vmatprep.mubr.bf16.mxu1 %v6942_v27  ;;  %v6962_v26 = vld [vmem:[#allocation2 + $0x30c] ss:$24 sps:$4 sm:$0xff]   ;;  %v6964_v27 = vld [vmem:[#allocation2 + $0x300] ss:$24 sps:$4 sm:$0xff]  }
 0x19b   : > { %3000 = vmatprep.mubr.bf16.mxu0 %v6944_v41  ;;  %v6968_v41 = vld [vmem:[#allocation2 + $0x33c] ss:$24 sps:$4 sm:$0xff]  }
 0x1a1   : > { %2584 = vmatmul.mubr.bf16.gmra.mrb[52].mxu1 %v6946_v47  ;;  %v665_v47 = vld [vmem:[#allocation11 + $0x2d0] sm:$0xff] }
 0x1a2   : > { %3001 = vmatmul.mubr.bf16.gmra.mrb[52].mxu0 %v6947_v52  ;;  %2591 = vmatprep.mubr.bf16.mxu1 %v6948_v53  ;;  %v666_v52 = vld [vmem:[#allocation11 + $0x2d8] sm:$0xff] }
 0x1a3   : > { %3008 = vmatprep.mubr.bf16.mxu0 %v6950_v57  ;;  %v8568_v53 = vpack.c.bf16 %v666_v52, %v665_v47  ;;  %v6970_v57 = vld [vmem:[#allocation2 + $0x330] ss:$24 sps:$4 sm:$0xff]   ;;  %v669_v47 = vld [vmem:[#allocation11 + $0x2f0] sm:$0xff]  ;;  %v670_v52 = vld [vmem:[#allocation11 + $0x2f8] sm:$0xff] }
 0x1a5   : > { %11808 = vst [vmem:[#allocation34_spill] sm:$0xff] %v8568_v53  ;;  %3308 = vmatpush1.bf16.msra.mxu0 %v8568_v53  ;;  %v7052_v53 = vld [vmem:[#allocation2 + $0x5dc] ss:$24 sps:$4 sm:$0xff]  }
 0x1a6   : > { %3309 = vmatprep.subr.bf16.mxu0 %v8055_v35 }
 0x1a9   : > { %2592 = vmatmul.mubr.bf16.gmra.mrb[56].mxu1 %v6952_v59  ;;  %v6971_v59 = vld [vmem:[#allocation2 + $0x338] ss:$24 sps:$4 sm:$0xff]  }
 0x1aa   : > { %3009 = vmatmul.mubr.bf16.gmra.mrb[56].mxu0 %v6953_v63  ;;  %2599 = vmatprep.mubr.bf16.mxu1 %v6954_v6  ;;  %v6972_v63 = vld [vmem:[#allocation2 + $0x364] ss:$24 sps:$4 sm:$0xff]  }
 0x1ab   : > { %3016 = vmatprep.mubr.bf16.mxu0 %v6956_v7  ;;  %v6974_v6 = vld [vmem:[#allocation2 + $0x36c] ss:$24 sps:$4 sm:$0xff]   ;;  %v6976_v7 = vld [vmem:[#allocation2 + $0x360] ss:$24 sps:$4 sm:$0xff]  }
 0x1b1   : > { %2600 = vmatmul.mubr.bf16.gmra.mrb[60].mxu1 %v6958_v20  ;;  %v6980_v20 = vld [vmem:[#allocation2 + $0x39c] ss:$24 sps:$4 sm:$0xff]  }
 0x1b2   : > { %3017 = vmatmul.mubr.bf16.gmra.mrb[60].mxu0 %v6959_v21  ;;  %2607 = vmatprep.mubr.bf16.mxu1 %v6960_v22  ;;  %v667_v21 = vld [vmem:[#allocation11 + $0x2e0] sm:$0xff]  ;;  %v668_v22 = vld [vmem:[#allocation11 + $0x2e8] sm:$0xff] }
 0x1b3   : > { %3024 = vmatprep.mubr.bf16.mxu0 %v6962_v26  ;;  %v6982_v26 = vld [vmem:[#allocation2 + $0x390] ss:$24 sps:$4 sm:$0xff]  }
 0x1b9   : > { %2608 = vmatmul.mubr.bf16.gmra.mrb[64].mxu1 %v6964_v27  ;;  %v8572_v27 = vpack.c.bf16 %v668_v22, %v667_v21  ;;  %v7000_v21 = vld [vmem:[#allocation2 + $0x420] ss:$24 sps:$4 sm:$0xff]  }
 0x1ba   : > { %3025 = vmatmul.mubr.bf16.gmra.mrb[64].mxu0 %v6965_v33  ;;  %2615 = vmatprep.mubr.bf16.mxu1 %v6966_v38  ;;  %v6983_v33 = vld [vmem:[#allocation2 + $0x398] ss:$24 sps:$4 sm:$0xff]   ;;  %v6984_v38 = vld [vmem:[#allocation2 + $0x3c4] ss:$24 sps:$4 sm:$0xff]   ;;  %v7001_v22 = vld [vmem:[#allocation2 + $0x428] ss:$24 sps:$4 sm:$0xff]  }
 0x1bb   : > { %3032 = vmatprep.mubr.bf16.mxu0 %v6968_v41  ;;  %11809 = vst [vmem:[#allocation35_spill] sm:$0xff] %v8572_v27  ;;  %v6986_v41 = vld [vmem:[#allocation2 + $0x3cc] ss:$24 sps:$4 sm:$0xff]   ;;  %3310 = vmatpush1.bf16.msra.mxu0 %v8572_v27 }
 0x1bc   : > { %3311 = vmatprep.subr.bf16.mxu0 %v8055_v35  ;;  %v6995_v35 = vld [vmem:[#allocation2 + $0x3f8] ss:$24 sps:$4 sm:$0xff]   ;;  %v7050_v27 = vld [vmem:[#allocation2 + $0x5d4] ss:$24 sps:$4 sm:$0xff]  }
 0x1c1   : > { %2616 = vmatmul.mubr.bf16.gmra.mrb[68].mxu1 %v6970_v57  ;;  %v6988_v57 = vld [vmem:[#allocation2 + $0x3c0] ss:$24 sps:$4 sm:$0xff]  }
 0x1c2   : > { %3033 = vmatmul.mubr.bf16.gmra.mrb[68].mxu0 %v6971_v59  ;;  %2623 = vmatprep.mubr.bf16.mxu1 %v6972_v63  ;;  %v8576_v59 = vpack.c.bf16 %v670_v52, %v669_v47  ;;  %v6989_v63 = vld [vmem:[#allocation2 + $0x3c8] ss:$24 sps:$4 sm:$0xff]   ;;  %v7008_v47 = vld [vmem:[#allocation2 + $0x484] ss:$24 sps:$4 sm:$0xff]  }
 0x1c3   : > { %3040 = vmatprep.mubr.bf16.mxu0 %v6974_v6  ;;  %v6990_v6 = vld [vmem:[#allocation2 + $0x3f4] ss:$24 sps:$4 sm:$0xff]  }
 0x1c4   : > { %11810 = vst [vmem:[#allocation36_spill] sm:$0xff] %v8576_v59  ;;  %3312 = vmatpush1.bf16.msra.mxu0 %v8576_v59  ;;  %v7010_v52 = vld [vmem:[#allocation2 + $0x48c] ss:$24 sps:$4 sm:$0xff]  }
 0x1c5   : > { %v7046_v59 = vld [vmem:[#allocation2 + $0x5ac] ss:$24 sps:$4 sm:$0xff]  }
 0x1c9   : > { %2624 = vmatmul.mubr.bf16.gmra.mrb[72].mxu1 %v6976_v7  ;;  %v6992_v7 = vld [vmem:[#allocation2 + $0x3fc] ss:$24 sps:$4 sm:$0xff]  }
 0x1ca   : > { %3041 = vmatmul.mubr.bf16.gmra.mrb[72].mxu0 %v6977_v10  ;;  %2631 = vmatprep.mubr.bf16.mxu1 %v6978_v13  ;;  %v6994_v10 = vld [vmem:[#allocation2 + $0x3f0] ss:$24 sps:$4 sm:$0xff]   ;;  %v6996_v13 = vld [vmem:[#allocation2 + $0x424] ss:$24 sps:$4 sm:$0xff]  }
 0x1cb   : > { %3048 = vmatprep.mubr.bf16.mxu0 %v6980_v20  ;;  %v6998_v20 = vld [vmem:[#allocation2 + $0x42c] ss:$24 sps:$4 sm:$0xff]  }
 0x1d1   : > { %2632 = vmatmul.mubr.bf16.gmra.mrb[76].mxu1 %v6982_v26  ;;  %v7002_v26 = vld [vmem:[#allocation2 + $0x454] ss:$24 sps:$4 sm:$0xff]  }
 0x1d2   : > { %3049 = vmatmul.mubr.bf16.gmra.mrb[76].mxu0 %v6983_v33  ;;  %2639 = vmatprep.mubr.bf16.mxu1 %v6984_v38  ;;  %v7004_v33 = vld [vmem:[#allocation2 + $0x45c] ss:$24 sps:$4 sm:$0xff]   ;;  %v7006_v38 = vld [vmem:[#allocation2 + $0x450] ss:$24 sps:$4 sm:$0xff]  }
 0x1d3   : > { %3056 = vmatprep.mubr.bf16.mxu0 %v6986_v41  ;;  %v7007_v41 = vld [vmem:[#allocation2 + $0x458] ss:$24 sps:$4 sm:$0xff]  }
 0x1d9   : > { %2640 = vmatmul.mubr.bf16.gmra.mrb[80].mxu1 %v6988_v57  ;;  %v7012_v57 = vld [vmem:[#allocation2 + $0x480] ss:$24 sps:$4 sm:$0xff]  }
 0x1da   : > { %3057 = vmatmul.mubr.bf16.gmra.mrb[80].mxu0 %v6989_v63  ;;  %2647 = vmatprep.mubr.bf16.mxu1 %v6990_v6  ;;  %v7013_v63 = vld [vmem:[#allocation2 + $0x488] ss:$24 sps:$4 sm:$0xff]   ;;  %v7014_v6 = vld [vmem:[#allocation2 + $0x4b4] ss:$24 sps:$4 sm:$0xff]  }
 0x1db   : > { %3064 = vmatprep.mubr.bf16.mxu0 %v6992_v7  ;;  %v7016_v7 = vld [vmem:[#allocation2 + $0x4bc] ss:$24 sps:$4 sm:$0xff]  }
 0x1e1   : > { %2648 = vmatmul.mubr.bf16.gmra.mrb[84].mxu1 %v6994_v10  ;;  %v7018_v10 = vld [vmem:[#allocation2 + $0x4b0] ss:$24 sps:$4 sm:$0xff]  }
 0x1e2   : > { %3065 = vmatmul.mubr.bf16.gmra.mrb[84].mxu0 %v6995_v35  ;;  %2655 = vmatprep.mubr.bf16.mxu1 %v6996_v13  ;;  %v7019_v35 = vld [vmem:[#allocation2 + $0x4b8] ss:$24 sps:$4 sm:$0xff]   ;;  %v7020_v13 = vld [vmem:[#allocation2 + $0x4e4] ss:$24 sps:$4 sm:$0xff]  }
 0x1e3   : > { %3072 = vmatprep.mubr.bf16.mxu0 %v6998_v20  ;;  %v7022_v20 = vld [vmem:[#allocation2 + $0x4ec] ss:$24 sps:$4 sm:$0xff]  }
 0x1e9   : > { %2656 = vmatmul.mubr.bf16.gmra.mrb[88].mxu1 %v7000_v21  ;;  %v7024_v21 = vld [vmem:[#allocation2 + $0x4e0] ss:$24 sps:$4 sm:$0xff]  }
 0x1ea   : > { %3073 = vmatmul.mubr.bf16.gmra.mrb[88].mxu0 %v7001_v22  ;;  %2663 = vmatprep.mubr.bf16.mxu1 %v7002_v26  ;;  %v7025_v22 = vld [vmem:[#allocation2 + $0x4e8] ss:$24 sps:$4 sm:$0xff]   ;;  %v7026_v26 = vld [vmem:[#allocation2 + $0x514] ss:$24 sps:$4 sm:$0xff]  }
 0x1eb   : > { %3080 = vmatprep.mubr.bf16.mxu0 %v7004_v33  ;;  %v7028_v33 = vld [vmem:[#allocation2 + $0x51c] ss:$24 sps:$4 sm:$0xff]  }
 0x1f1   : > { %2664 = vmatmul.mubr.bf16.gmra.mrb[92].mxu1 %v7006_v38 }
 0x1f2   : > { %3081 = vmatmul.mubr.bf16.gmra.mrb[92].mxu0 %v7007_v41  ;;  %2671 = vmatprep.mubr.bf16.mxu1 %v7008_v47  ;;  %v7030_v47 = vld [vmem:[#allocation2 + $0x510] ss:$24 sps:$4 sm:$0xff]  }
 0x1f3   : > { %3088 = vmatprep.mubr.bf16.mxu0 %v7010_v52 }
 0x1f9   : > { %2672 = vmatmul.mubr.bf16.gmra.mrb[96].mxu1 %v7012_v57  ;;  %v7031_v57 = vld [vmem:[#allocation2 + $0x518] ss:$24 sps:$4 sm:$0xff]  }
 0x1fa   : > { %3089 = vmatmul.mubr.bf16.gmra.mrb[96].mxu0 %v7013_v63  ;;  %2679 = vmatprep.mubr.bf16.mxu1 %v7014_v6  ;;  %v7032_v63 = vld [vmem:[#allocation2 + $0x544] ss:$24 sps:$4 sm:$0xff]  }
 0x1fb   : > { %3096 = vmatprep.mubr.bf16.mxu0 %v7016_v7  ;;  %v7034_v7 = vld [vmem:[#allocation2 + $0x54c] ss:$24 sps:$4 sm:$0xff]  }
 0x201   : > { %2680 = vmatmul.mubr.bf16.gmra.mrb[100].mxu1 %v7018_v10 }
 0x202   : > { %3097 = vmatmul.mubr.bf16.gmra.mrb[100].mxu0 %v7019_v35  ;;  %2687 = vmatprep.mubr.bf16.mxu1 %v7020_v13  ;;  %v7036_v13 = vld [vmem:[#allocation2 + $0x540] ss:$24 sps:$4 sm:$0xff]  }
 0x203   : > { %3104 = vmatprep.mubr.bf16.mxu0 %v7022_v20 }
 0x209   : > { %2688 = vmatmul.mubr.bf16.gmra.mrb[104].mxu1 %v7024_v21  ;;  %v7037_v21 = vld [vmem:[#allocation2 + $0x548] ss:$24 sps:$4 sm:$0xff]  }
 0x20a   : > { %3105 = vmatmul.mubr.bf16.gmra.mrb[104].mxu0 %v7025_v22  ;;  %2695 = vmatprep.mubr.bf16.mxu1 %v7026_v26  ;;  %v7038_v22 = vld [vmem:[#allocation2 + $0x574] ss:$24 sps:$4 sm:$0xff]  }
 0x20b   : > { %3112 = vmatprep.mubr.bf16.mxu0 %v7028_v33  ;;  %v7040_v33 = vld [vmem:[#allocation2 + $0x57c] ss:$24 sps:$4 sm:$0xff]  }
 0x20c   : > { %v8579_v38 = vpop.f32.mrb[0].mxu1 }
 0x20d   : > { %v2483_v41 = vpop.f32.mrb[1].mxu1 }
 0x20e   : > { %v8581_v52 = vpop.f32.mrb[2].mxu1 }
 0x20f   : > { %v2486_v6 = vpop.f32.mrb[3].mxu1 }
 0x210   : > { %v7043_v6 = vld [vmem:[#allocation2 + $0x578] ss:$24 sps:$4 sm:$0xff]  }
 0x211   : > { %2696 = vmatmul.mubr.bf16.gmra.mrb[108].mxu1 %v7030_v47 }
 0x212   : > { %3113 = vmatmul.mubr.bf16.gmra.mrb[108].mxu0 %v7031_v57  ;;  %2703 = vmatprep.mubr.bf16.mxu1 %v7032_v63  ;;  %v7042_v57 = vld [vmem:[#allocation2 + $0x570] ss:$24 sps:$4 sm:$0xff]  }
 0x213   : > { %3120 = vmatprep.mubr.bf16.mxu0 %v7034_v7  ;;  %v7044_v7 = vld [vmem:[#allocation2 + $0x5a4] ss:$24 sps:$4 sm:$0xff]  }
 0x214   : > { %v8583_v10 = vpop.f32.mrb[4].mxu1 }
 0x215   : > { %v2491_v35 = vpop.f32.mrb[5].mxu1 }
 0x216   : > { %v8585_v20 = vpop.f32.mrb[6].mxu1 }
 0x217   : > { %v2494_v26 = vpop.f32.mrb[7].mxu1 }
 0x219   : > { %2704 = vmatmul.mubr.bf16.gmra.mrb[112].mxu1 %v7036_v13 }
 0x21a   : > { %3121 = vmatmul.mubr.bf16.gmra.mrb[112].mxu0 %v7037_v21  ;;  %2711 = vmatprep.mubr.bf16.mxu1 %v7038_v22  ;;  %v7048_v21 = vld [vmem:[#allocation2 + $0x5a0] ss:$24 sps:$4 sm:$0xff]  }
 0x21b   : > { %3128 = vmatprep.mubr.bf16.mxu0 %v7040_v33  ;;  %v7049_v33 = vld [vmem:[#allocation2 + $0x5a8] ss:$24 sps:$4 sm:$0xff]  }
 0x21c   : > { %v8587_v41 = vpop.f32.mrb[8].mxu1 }
 0x21d   : > { %v2499_v47 = vpop.f32.mrb[9].mxu1 }
 0x21e   : > { %v8589_v63 = vpop.f32.mrb[10].mxu1 }
 0x21f   : > { %v2502_v35 = vpop.f32.mrb[11].mxu1 }
 0x221   : > { %2712 = vmatmul.mubr.bf16.gmra.mrb[116].mxu1 %v7042_v57 }
 0x222   : > { %3129 = vmatmul.mubr.bf16.gmra.mrb[116].mxu0 %v7043_v6  ;;  %2719 = vmatprep.mubr.bf16.mxu1 %v7044_v7  ;;  %v7054_v6 = vld [vmem:[#allocation2 + $0x5d0] ss:$24 sps:$4 sm:$0xff]  }
 0x223   : > { %3136 = vmatprep.mubr.bf16.mxu0 %v7046_v59  ;;  %v7055_v59 = vld [vmem:[#allocation2 + $0x5d8] ss:$24 sps:$4 sm:$0xff]  }
 0x224   : > { %v8591_v26 = vpop.f32.mrb[12].mxu1 }
 0x225   : > { %v2507_v13 = vpop.f32.mrb[13].mxu1 }
 0x226   : > { %v8593_v22 = vpop.f32.mrb[14].mxu1 }
 0x227   : > { %v2510_v47 = vpop.f32.mrb[15].mxu1 }
 0x229   : > { %2720 = vmatmul.mubr.bf16.gmra.mrb[120].mxu1 %v7048_v21 }
 0x22a   : > { %3137 = vmatmul.mubr.bf16.gmra.mrb[120].mxu0 %v7049_v33  ;;  %2727 = vmatprep.mubr.bf16.mxu1 %v7050_v27  ;;  %v7060_v27 = vld [vmem:[#allocation2 + $0x600] ss:$24 sps:$4 sm:$0xff]  }
 0x22b   : > { %3144 = vmatprep.mubr.bf16.mxu0 %v7052_v53  ;;  %v7061_v33 = vld [vmem:[#allocation2 + $0x608] ss:$24 sps:$4 sm:$0xff]  }
 0x22c   : > { %v8595_v35 = vpop.f32.mrb[16].mxu1 }
 0x22d   : > { %v2515_v57 = vpop.f32.mrb[17].mxu1 }
 0x22e   : > { %v8597_v7 = vpop.f32.mrb[18].mxu1  ;;  %v7062_v57 = vld [vmem:[#allocation2 + $0x634] ss:$24 sps:$4 sm:$0xff]  }
 0x22f   : > { %v2518_v13 = vpop.f32.mrb[19].mxu1 }
 0x230   : > { %v8604_v13 = vld [vmem:[%s8349_s19] sm:$0xff]  }
 0x231   : > { %2728 = vmatmul.mubr.bf16.gmra.mrb[124].mxu1 %v7054_v6  ;;  %6341 = vmatprep.subr.bf16.mxu1 %v8604_v13 }
 0x232   : > { %3145 = vmatmul.mubr.bf16.gmra.mrb[124].mxu0 %v7055_v59  ;;  %2735 = vmatprep.mubr.bf16.mxu1 %v7056_v15  ;;  %v7066_v15 = vld [vmem:[#allocation2 + $0x630] ss:$24 sps:$4 sm:$0xff]  }
 0x233   : > { %3152 = vmatprep.mubr.bf16.mxu0 %v7058_v45 }
 0x234   : > { %v8599_v47 = vpop.f32.mrb[20].mxu1 }
 0x235   : > { %v2523_v21 = vpop.f32.mrb[21].mxu1 }
 0x236   : > { %v8601_v53 = vpop.f32.mrb[22].mxu1  ;;  %v7067_v21 = vld [vmem:[#allocation2 + $0x638] ss:$24 sps:$4 sm:$0xff]  }
 0x237   : > { %v2526_v1 = vpop.f32.mrb[23].mxu1 }
 0x239   : > { %2736 = vmatmul.mubr.bf16.gmra.mrb[128].mxu1 %v7060_v27 }
 0x23a   : > { %3153 = vmatmul.mubr.bf16.gmra.mrb[128].mxu0 %v7061_v33  ;;  %2743 = vmatprep.mubr.bf16.mxu1 %v7062_v57  ;;  %v7073_v57 = vld [vmem:[#allocation2 + $0x668] ss:$24 sps:$4 sm:$0xff]  }
 0x23b   : > { %3160 = vmatprep.mubr.bf16.mxu0 %v7064_v32  ;;  %v7072_v32 = vld [vmem:[#allocation2 + $0x660] ss:$24 sps:$4 sm:$0xff]  }
 0x23c   : > { %v8606_v6 = vpop.f32.mrb[24].mxu1 }
 0x23d   : > { %v2531_v45 = vpop.f32.mrb[25].mxu1 }
 0x23e   : > { %v8609_v59 = vpop.f32.mrb[26].mxu1 }
 0x23f   : > { %v2534_v42 = vpop.f32.mrb[27].mxu1 }
 0x241   : > { %2744 = vmatmul.mubr.bf16.gmra.mrb[132].mxu1 %v7066_v15 }
 0x242   : > { %3161 = vmatmul.mubr.bf16.gmra.mrb[132].mxu0 %v7067_v21  ;;  %2751 = vmatprep.mubr.bf16.mxu1 %v7068_v60  ;;  %v7078_v21 = vld [vmem:[#allocation2 + $0x690] ss:$24 sps:$4 sm:$0xff]  }
 0x243   : > { %3168 = vmatprep.mubr.bf16.mxu0 %v7070_v30  ;;  %v7079_v30 = vld [vmem:[#allocation2 + $0x698] ss:$24 sps:$4 sm:$0xff]  }
 0x244   : > { %v8611_v1 = vpop.f32.mrb[28].mxu1 }
 0x245   : > { %v2539_v27 = vpop.f32.mrb[29].mxu1 }
 0x246   : > { %v8613_v33 = vpop.f32.mrb[30].mxu1 }
 0x247   : > { %v2542_v45 = vpop.f32.mrb[31].mxu1 }
 0x249   : > { %2752 = vmatmul.mubr.bf16.gmra.mrb[136].mxu1 %v7072_v32 }
 0x24a   : > { %3169 = vmatmul.mubr.bf16.gmra.mrb[136].mxu0 %v7073_v57  ;;  %2759 = vmatprep.mubr.bf16.mxu1 %v7074_v24  ;;  %v7085_v57 = vld [vmem:[#allocation2 + $0x6c0] ss:$24 sps:$4 sm:$0xff]  }
 0x24b   : > { %3176 = vmatprep.mubr.bf16.mxu0 %v7076_v9  ;;  %v7082_v9 = vld [vmem:[#allocation2 + $0x10] ss:$24 sps:$4 sm:$0xff]  }
 0x24c   : > { %v8615_v42 = vpop.f32.mrb[32].mxu1 }
 0x24d   : > { %v2547_v15 = vpop.f32.mrb[33].mxu1 }
 0x24e   : > { %v8617_v60 = vpop.f32.mrb[34].mxu1 }
 0x24f   : > { %v2550_v27 = vpop.f32.mrb[35].mxu1 }
 0x251   : > { %2760 = vmatmul.mubr.bf16.gmra.mrb[140].mxu1 %v7078_v21 }
 0x252   : > { %3177 = vmatmul.mubr.bf16.gmra.mrb[140].mxu0 %v7079_v30  ;;  %2767 = vmatprep.mubr.bf16.mxu1 %v7080_v5  ;;  %v7090_v30 = vld [vmem:[#allocation2 + $0x6f0] ss:$24 sps:$4 sm:$0xff]  }
 0x253   : > { %3313 = vmatprep.mubr.bf16.mxu0 %v7084_v51  ;;  %v7091_v51 = vld [vmem:[#allocation2 + $0x40] ss:$24 sps:$4 sm:$0xff]  }
 0x254   : > { %v8619_v45 = vpop.f32.mrb[36].mxu1 }
 0x255   : > { %v2555_v32 = vpop.f32.mrb[37].mxu1 }
 0x256   : > { %v8621_v24 = vpop.f32.mrb[38].mxu1 }
 0x257   : > { %v2558_v15 = vpop.f32.mrb[39].mxu1 }
 0x259   : > { %2768 = vmatmul.mubr.bf16.gmra.mrb[144].mxu1 %v7085_v57 }
 0x25a   : > { %3314 = vmatmul.mubr.bf16.vlgmr.msra.gmra.mrb[0].mxu0 %v7082_v9  ;;  %2775 = vmatprep.mubr.bf16.mxu1 %v7086_v34  ;;  %v7096_v9 = vld [vmem:[#allocation2 + $0x720] ss:$24 sps:$4 sm:$0xff]  }
 0x25b   : > { %3321 = vmatprep.mubr.bf16.mxu0 %v7088_v28  ;;  %v7097_v28 = vld [vmem:[#allocation2 + $0x70] ss:$24 sps:$4 sm:$0xff]  }
 0x25c   : > { %v8623_v27 = vpop.f32.mrb[40].mxu1 }
 0x25d   : > { %v2563_v21 = vpop.f32.mrb[41].mxu1 }
 0x25e   : > { %v8625_v5 = vpop.f32.mrb[42].mxu1 }
 0x25f   : > { %v2566_v32 = vpop.f32.mrb[43].mxu1 }
 0x261   : > { %2776 = vmatmul.mubr.bf16.gmra.mrb[148].mxu1 %v7090_v30 }
 0x262   : > { %3322 = vmatmul.mubr.bf16.gmra.mrb[4].mxu0 %v7091_v51  ;;  %2783 = vmatprep.mubr.bf16.mxu1 %v7092_v18  ;;  %v7102_v51 = vld [vmem:[#allocation2 + $0x750] ss:$24 sps:$4 sm:$0xff]  }
 0x263   : > { %3329 = vmatprep.mubr.bf16.mxu0 %v7094_v12  ;;  %v7103_v12 = vld [vmem:[#allocation2 + $0xa0] ss:$24 sps:$4 sm:$0xff]  }
 0x264   : > { %v8627_v15 = vpop.f32.mrb[44].mxu1 }
 0x265   : > { %11811 = vst [vmem:[#allocation37_spill] sm:$0xff] %v8627_v15  ;;  %v2571_v57 = vpop.f32.mrb[45].mxu1  ;;  %v7104_v15 = vld [vmem:[#allocation2 + $0x784] ss:$24 sps:$4 sm:$0xff]  }
 0x266   : > { %v8629_v34 = vpop.f32.mrb[46].mxu1 }
 0x267   : > { %11812 = vst [vmem:[#allocation38_spill] sm:$0xff] %v8629_v34  ;;  %v2574_v21 = vpop.f32.mrb[47].mxu1  ;;  %v7112_v34 = vld [vmem:[#allocation2 + $0x104] ss:$24 sps:$4 sm:$0xff]  }
 0x269   : > { %2784 = vmatmul.mubr.bf16.gmra.mrb[152].mxu1 %v7096_v9 }
 0x26a   : > { %3330 = vmatmul.mubr.bf16.gmra.mrb[8].mxu0 %v7097_v28  ;;  %2791 = vmatprep.mubr.bf16.mxu1 %v7098_v2  ;;  %v7108_v28 = vld [vmem:[#allocation2 + $0x780] ss:$24 sps:$4 sm:$0xff]  }
 0x26b   : > { %3337 = vmatprep.mubr.bf16.mxu0 %v7100_v58  ;;  %v7109_v58 = vld [vmem:[#allocation2 + $0xd0] ss:$24 sps:$4 sm:$0xff]  }
 0x26c   : > { %v8631_v32 = vpop.f32.mrb[48].mxu1 }
 0x26d   : > { %11813 = vst [vmem:[#allocation39_spill] sm:$0xff] %v8631_v32  ;;  %v2579_v30 = vpop.f32.mrb[49].mxu1  ;;  %v7110_v32 = vld [vmem:[#allocation2 + $0x7b4] ss:$24 sps:$4 sm:$0xff]  }
 0x26e   : > { %v8633_v18 = vpop.f32.mrb[50].mxu1 }
 0x26f   : > { %11814 = vst [vmem:[#allocation40_spill] sm:$0xff] %v8633_v18  ;;  %v2582_v57 = vpop.f32.mrb[51].mxu1  ;;  %v7118_v18 = vld [vmem:[#allocation2 + $0x134] ss:$24 sps:$4 sm:$0xff]  }
 0x271   : > { %2792 = vmatmul.mubr.bf16.gmra.mrb[156].mxu1 %v7102_v51 }
 0x272   : > { %3338 = vmatmul.mubr.bf16.gmra.mrb[12].mxu0 %v7103_v12  ;;  %2799 = vmatprep.mubr.bf16.mxu1 %v7104_v15  ;;  %v7114_v12 = vld [vmem:[#allocation2 + $0x7b0] ss:$24 sps:$4 sm:$0xff]  }
 0x273   : > { %3345 = vmatprep.mubr.bf16.mxu0 %v7106_v48  ;;  %v7115_v48 = vld [vmem:[#allocation2 + $0x100] ss:$24 sps:$4 sm:$0xff]  }
 0x274   : > { %v8635_v21 = vpop.f32.mrb[52].mxu1 }
 0x275   : > { %11815 = vst [vmem:[#allocation41_spill] sm:$0xff] %v8635_v21  ;;  %v2587_v9 = vpop.f32.mrb[53].mxu1  ;;  %v7116_v21 = vld [vmem:[#allocation2 + $0x7e4] ss:$24 sps:$4 sm:$0xff]  }
 0x276   : > { %v8637_v2 = vpop.f32.mrb[54].mxu1 }
 0x277   : > { %11816 = vst [vmem:[#allocation42_spill] sm:$0xff] %v8637_v2  ;;  %v2590_v30 = vpop.f32.mrb[55].mxu1  ;;  %v7124_v2 = vld [vmem:[#allocation2 + $0x164] ss:$24 sps:$4 sm:$0xff]  }
 0x279   : > { %2800 = vmatmul.mubr.bf16.gmra.mrb[160].mxu1 %v7108_v28 }
 0x27a   : > { %3346 = vmatmul.mubr.bf16.gmra.mrb[16].mxu0 %v7109_v58  ;;  %2807 = vmatprep.mubr.bf16.mxu1 %v7110_v32  ;;  %v7120_v58 = vld [vmem:[#allocation2 + $0x7e0] ss:$24 sps:$4 sm:$0xff]  }
 0x27b   : > { %3353 = vmatprep.mubr.bf16.mxu0 %v7112_v34  ;;  %v7121_v34 = vld [vmem:[#allocation2 + $0x130] ss:$24 sps:$4 sm:$0xff]  }
 0x27c   : > { %v8639_v57 = vpop.f32.mrb[56].mxu1 }
 0x27d   : > { %11817 = vst [vmem:[#allocation43_spill] sm:$0xff] %v8639_v57  ;;  %v2595_v51 = vpop.f32.mrb[57].mxu1  ;;  %v7122_v57 = vld [vmem:[#allocation2 + $0x814] ss:$24 sps:$4 sm:$0xff]  }
 0x27e   : > { %v8641_v15 = vpop.f32.mrb[58].mxu1 }
 0x27f   : > { %11818 = vst [vmem:[#allocation44_spill] sm:$0xff] %v8641_v15  ;;  %v2598_v9 = vpop.f32.mrb[59].mxu1  ;;  %v7130_v15 = vld [vmem:[#allocation2 + $0x194] ss:$24 sps:$4 sm:$0xff]  }
 0x281   : > { %2808 = vmatmul.mubr.bf16.gmra.mrb[164].mxu1 %v7114_v12 }
 0x282   : > { %3354 = vmatmul.mubr.bf16.gmra.mrb[20].mxu0 %v7115_v48  ;;  %2815 = vmatprep.mubr.bf16.mxu1 %v7116_v21  ;;  %v7126_v48 = vld [vmem:[#allocation2 + $0x810] ss:$24 sps:$4 sm:$0xff]  }
 0x283   : > { %3361 = vmatprep.mubr.bf16.mxu0 %v7118_v18  ;;  %v7127_v18 = vld [vmem:[#allocation2 + $0x160] ss:$24 sps:$4 sm:$0xff]  }
 0x284   : > { %v8643_v30 = vpop.f32.mrb[60].mxu1 }
 0x285   : > { %11819 = vst [vmem:[#allocation45_spill] sm:$0xff] %v8643_v30  ;;  %v2603_v28 = vpop.f32.mrb[61].mxu1  ;;  %v7128_v30 = vld [vmem:[#allocation2 + $0x844] ss:$24 sps:$4 sm:$0xff]  }
 0x286   : > { %v8645_v32 = vpop.f32.mrb[62].mxu1 }
 0x287   : > { %11820 = vst [vmem:[#allocation46_spill] sm:$0xff] %v8645_v32  ;;  %v2606_v51 = vpop.f32.mrb[63].mxu1  ;;  %v7136_v32 = vld [vmem:[#allocation2 + $0x1c4] ss:$24 sps:$4 sm:$0xff]  }
 0x289   : > { %2816 = vmatmul.mubr.bf16.gmra.mrb[168].mxu1 %v7120_v58 }
 0x28a   : > { %3362 = vmatmul.mubr.bf16.gmra.mrb[24].mxu0 %v7121_v34  ;;  %2823 = vmatprep.mubr.bf16.mxu1 %v7122_v57  ;;  %v7132_v34 = vld [vmem:[#allocation2 + $0x840] ss:$24 sps:$4 sm:$0xff]  }
 0x28b   : > { %3369 = vmatprep.mubr.bf16.mxu0 %v7124_v2  ;;  %v7133_v2 = vld [vmem:[#allocation2 + $0x190] ss:$24 sps:$4 sm:$0xff]  }
 0x28c   : > { %v8647_v9 = vpop.f32.mrb[64].mxu1 }
 0x28d   : > { %11821 = vst [vmem:[#allocation47_spill] sm:$0xff] %v8647_v9  ;;  %v2611_v12 = vpop.f32.mrb[65].mxu1  ;;  %v7134_v9 = vld [vmem:[#allocation2 + $0x874] ss:$24 sps:$4 sm:$0xff]  }
 0x28e   : > { %v8649_v21 = vpop.f32.mrb[66].mxu1 }
 0x28f   : > { %11822 = vst [vmem:[#allocation48_spill] sm:$0xff] %v8649_v21  ;;  %v2614_v28 = vpop.f32.mrb[67].mxu1  ;;  %v7142_v21 = vld [vmem:[#allocation2 + $0x1f4] ss:$24 sps:$4 sm:$0xff]  }
 0x291   : > { %2824 = vmatmul.mubr.bf16.gmra.mrb[172].mxu1 %v7126_v48 }
 0x292   : > { %3370 = vmatmul.mubr.bf16.gmra.mrb[28].mxu0 %v7127_v18  ;;  %2831 = vmatprep.mubr.bf16.mxu1 %v7128_v30  ;;  %v7138_v18 = vld [vmem:[#allocation2 + $0x870] ss:$24 sps:$4 sm:$0xff]  }
 0x293   : > { %3377 = vmatprep.mubr.bf16.mxu0 %v7130_v15  ;;  %v7139_v15 = vld [vmem:[#allocation2 + $0x1c0] ss:$24 sps:$4 sm:$0xff]  }
 0x294   : > { %v8651_v51 = vpop.f32.mrb[68].mxu1 }
 0x295   : > { %11823 = vst [vmem:[#allocation49_spill] sm:$0xff] %v8651_v51  ;;  %v2619_v58 = vpop.f32.mrb[69].mxu1  ;;  %v7140_v51 = vld [vmem:[#allocation2 + $0x8a4] ss:$24 sps:$4 sm:$0xff]  }
 0x296   : > { %v8653_v57 = vpop.f32.mrb[70].mxu1 }
 0x297   : > { %11824 = vst [vmem:[#allocation50_spill] sm:$0xff] %v8653_v57  ;;  %v2622_v12 = vpop.f32.mrb[71].mxu1  ;;  %v7148_v57 = vld [vmem:[#allocation2 + $0x224] ss:$24 sps:$4 sm:$0xff]  }
 0x299   : > { %2832 = vmatmul.mubr.bf16.gmra.mrb[176].mxu1 %v7132_v34 }
 0x29a   : > { %3378 = vmatmul.mubr.bf16.gmra.mrb[32].mxu0 %v7133_v2  ;;  %2839 = vmatprep.mubr.bf16.mxu1 %v7134_v9  ;;  %v7144_v2 = vld [vmem:[#allocation2 + $0x8a0] ss:$24 sps:$4 sm:$0xff]  }
 0x29b   : > { %3385 = vmatprep.mubr.bf16.mxu0 %v7136_v32  ;;  %v7145_v32 = vld [vmem:[#allocation2 + $0x1f0] ss:$24 sps:$4 sm:$0xff]  }
 0x29c   : > { %v8655_v28 = vpop.f32.mrb[72].mxu1 }
 0x29d   : > { %11825 = vst [vmem:[#allocation51_spill] sm:$0xff] %v8655_v28  ;;  %v2627_v48 = vpop.f32.mrb[73].mxu1  ;;  %v7146_v28 = vld [vmem:[#allocation2 + $0x8d4] ss:$24 sps:$4 sm:$0xff]  }
 0x29e   : > { %v8657_v30 = vpop.f32.mrb[74].mxu1 }
 0x29f   : > { %11826 = vst [vmem:[#allocation52_spill] sm:$0xff] %v8657_v30  ;;  %v2630_v58 = vpop.f32.mrb[75].mxu1  ;;  %v7155_v30 = vld [vmem:[#allocation2 + $0x254] ss:$24 sps:$4 sm:$0xff]  }
 0x2a1   : > { %2840 = vmatmul.mubr.bf16.gmra.mrb[180].mxu1 %v7138_v18 }
 0x2a2   : > { %3386 = vmatmul.mubr.bf16.gmra.mrb[36].mxu0 %v7139_v15  ;;  %2847 = vmatprep.mubr.bf16.mxu1 %v7140_v51  ;;  %v7150_v15 = vld [vmem:[#allocation2 + $0x8d0] ss:$24 sps:$4 sm:$0xff]  }
 0x2a3   : > { %3393 = vmatprep.mubr.bf16.mxu0 %v7142_v21  ;;  %v7151_v21 = vld [vmem:[#allocation2 + $0x220] ss:$24 sps:$4 sm:$0xff]  }
 0x2a4   : > { %v8659_v12 = vpop.f32.mrb[76].mxu1 }
 0x2a5   : > { %11827 = vst [vmem:[#allocation53_spill] sm:$0xff] %v8659_v12  ;;  %v2635_v34 = vpop.f32.mrb[77].mxu1 }
 0x2a6   : > { %v8661_v9 = vpop.f32.mrb[78].mxu1  ;;  %v7154_v34 = vld [vmem:[#allocation2 + $0x6cc] ss:$24 sps:$4 sm:$0xff]  }
 0x2a7   : > { %11828 = vst [vmem:[#allocation54_spill] sm:$0xff] %v8661_v9  ;;  %v2638_v48 = vpop.f32.mrb[79].mxu1  ;;  %v7165_v9 = vld [vmem:[%s8349_s19 + $0x8] sm:$0xff]  }
 0x2a8   : > { %v7157_v48 = vld [vmem:[#allocation2 + $0x250] ss:$24 sps:$4 sm:$0xff]  }
 0x2a9   : > { %2848 = vmatmul.mubr.bf16.gmra.mrb[184].mxu1 %v7144_v2 }
 0x2aa   : > { %3394 = vmatmul.mubr.bf16.gmra.mrb[40].mxu0 %v7145_v32  ;;  %2855 = vmatprep.mubr.bf16.mxu1 %v7146_v28 }
 0x2ab   : > { %3401 = vmatprep.mubr.bf16.mxu0 %v7148_v57  ;;  %v7152_v57 = vld [vmem:[#allocation2 + $0x6c8] ss:$24 sps:$4 sm:$0xff]  }
 0x2ac   : > { %v8663_v58 = vpop.f32.mrb[80].mxu1 }
 0x2ad   : > { %11829 = vst [vmem:[#allocation55_spill] sm:$0xff] %v8663_v58  ;;  %v2643_v18 = vpop.f32.mrb[81].mxu1  ;;  %v7159_v58 = vld [vmem:[#allocation2 + $0x6fc] ss:$24 sps:$4 sm:$0xff]  }
 0x2ae   : > { %v8665_v51 = vpop.f32.mrb[82].mxu1 }
 0x2af   : > { %11830 = vst [vmem:[#allocation56_spill] sm:$0xff] %v8665_v51  ;;  %v2646_v12 = vpop.f32.mrb[83].mxu1  ;;  %v7161_v51 = vld [vmem:[#allocation2 + $0x284] ss:$24 sps:$4 sm:$0xff]  }
 0x2b0   : > { %v7178_v12 = vld [vmem:[%s8349_s19 + $0x10] sm:$0xff]  }
 0x2b1   : > { %2856 = vmatmul.mubr.bf16.gmra.mrb[188].mxu1 %v7150_v15 }
 0x2b2   : > { %3402 = vmatmul.mubr.bf16.gmra.mrb[44].mxu0 %v7151_v21  ;;  %3184 = vmatprep.mubr.bf16.mxu1 %v7154_v34  ;;  %v7163_v21 = vld [vmem:[#allocation2 + $0x6f8] ss:$24 sps:$4 sm:$0xff]  }
 0x2b3   : > { %3409 = vmatprep.mubr.bf16.mxu0 %v7155_v30 }
 0x2b4   : > { %v8667_v2 = vpop.f32.mrb[84].mxu1 }
 0x2b5   : > { %11831 = vst [vmem:[#allocation57_spill] sm:$0xff] %v8667_v2  ;;  %v2651_v28 = vpop.f32.mrb[85].mxu1  ;;  %v7174_v2 = vld [vmem:[#allocation2 + $0x2e4] ss:$24 sps:$4 sm:$0xff]  }
 0x2b6   : > { %v8669_v32 = vpop.f32.mrb[86].mxu1  ;;  %v7164_v28 = vld [vmem:[#allocation2 + $0x280] ss:$24 sps:$4 sm:$0xff]  }
 0x2b7   : > { %11832 = vst [vmem:[#allocation58_spill] sm:$0xff] %v8669_v32  ;;  %v2654_v18 = vpop.f32.mrb[87].mxu1 }
 0x2b8   : > { %v7166_v18 = vld [vmem:[#allocation2 + $0x72c] ss:$24 sps:$4 sm:$0xff]  }
 0x2b9   : > { %3185 = vmatmul.mubr.bf16.vlgmr.msra.gmra.mrb[144].mxu1 %v7152_v57  ;;  %v7168_v57 = vld [vmem:[#allocation2 + $0x2b4] ss:$24 sps:$4 sm:$0xff]  }
 0x2ba   : > { %3410 = vmatmul.mubr.bf16.gmra.mrb[48].mxu0 %v7157_v48  ;;  %6342 = vmatpush3.bf16.msra.mxu1 %v8604_v13  ;;  %v7185_v48 = vld [vmem:[%s8349_s19 + $0x18] sm:$0xff]  }
 0x2bb   : > { %3192 = vmatprep.mubr.bf16.mxu1 %v7159_v58  ;;  %3417 = vmatprep.mubr.bf16.mxu0 %v7161_v51  ;;  %v7198_v58 = vld [vmem:[%s8349_s19 + $0x20] sm:$0xff]  }
 0x2bc   : > { %v8674_v30 = vpop.f32.mrb[88].mxu1  ;;  %6343 = vmatprep.subr.bf16.mxu1 %v7165_v9 }
 0x2bd   : > { %11833 = vst [vmem:[#allocation59_spill] sm:$0xff] %v8674_v30  ;;  %v2659_v15 = vpop.f32.mrb[89].mxu1 }
 0x2be   : > { %v8676_v34 = vpop.f32.mrb[90].mxu1  ;;  %6344 = vmatpush3.bf16.msra.mxu1 %v7165_v9  ;;  %v7170_v15 = vld [vmem:[#allocation2 + $0x728] ss:$24 sps:$4 sm:$0xff]  }
 0x2bf   : > { %11834 = vst [vmem:[#allocation60_spill] sm:$0xff] %v8676_v34  ;;  %v2662_v32 = vpop.f32.mrb[91].mxu1  ;;  %6345 = vmatprep.subr.bf16.mxu1 %v7178_v12  ;;  %v7171_v9 = vld [vmem:[#allocation2 + $0x2b0] ss:$24 sps:$4 sm:$0xff]  }
 0x2c0   : > { %v7172_v32 = vld [vmem:[#allocation2 + $0x75c] ss:$24 sps:$4 sm:$0xff]  }
 0x2c1   : > { %3193 = vmatmul.mubr.bf16.gmra.mrb[148].mxu1 %v7163_v21  ;;  %v7205_v21 = vld [vmem:[%s8349_s19 + $0x28] sm:$0xff]  }
 0x2c2   : > { %3418 = vmatmul.mubr.bf16.gmra.mrb[52].mxu0 %v7164_v28  ;;  %3200 = vmatprep.mubr.bf16.mxu1 %v7166_v18  ;;  %v7218_v28 = vld [vmem:[%s8349_s19 + $0x30] sm:$0xff]  }
 0x2c3   : > { %3425 = vmatprep.mubr.bf16.mxu0 %v7168_v57  ;;  %6346 = vmatpush3.bf16.msra.mxu1 %v7178_v12  ;;  %v7176_v57 = vld [vmem:[#allocation2 + $0x758] ss:$24 sps:$4 sm:$0xff]  }
 0x2c4   : > { %v8679_v13 = vpop.f32.mrb[92].mxu1  ;;  %6347 = vmatprep.subr.bf16.mxu1 %v7185_v48 }
 0x2c5   : > { %11835 = vst [vmem:[#allocation61_spill] sm:$0xff] %v8679_v13  ;;  %v2667_v51 = vpop.f32.mrb[93].mxu1 }
 0x2c6   : > { %v8682_v34 = vpop.f32.mrb[94].mxu1 }
 0x2c7   : > { %11836 = vst [vmem:[#allocation62_spill] sm:$0xff] %v8682_v34  ;;  %v2670_v30 = vpop.f32.mrb[95].mxu1  ;;  %6348 = vmatpush3.bf16.msra.mxu1 %v7185_v48  ;;  %v7177_v34 = vld [vmem:[#allocation2 + $0x2e0] ss:$24 sps:$4 sm:$0xff]   ;;  %v7181_v48 = vld [vmem:[#allocation2 + $0x314] ss:$24 sps:$4 sm:$0xff]  }
 0x2c8   : > { %6349 = vmatprep.subr.bf16.mxu1 %v7198_v58  ;;  %v7179_v30 = vld [vmem:[#allocation2 + $0x78c] ss:$24 sps:$4 sm:$0xff]  }
 0x2c9   : > { %3201 = vmatmul.mubr.bf16.gmra.mrb[152].mxu1 %v7170_v15  ;;  %v7225_v15 = vld [vmem:[%s8349_s19 + $0x38] sm:$0xff]  }
 0x2ca   : > { %3426 = vmatmul.mubr.bf16.gmra.mrb[56].mxu0 %v7171_v9  ;;  %3208 = vmatprep.mubr.bf16.mxu1 %v7172_v32  ;;  %v7183_v9 = vld [vmem:[#allocation2 + $0x788] ss:$24 sps:$4 sm:$0xff]  }
 0x2cb   : > { %3433 = vmatprep.mubr.bf16.mxu0 %v7174_v2  ;;  %6350 = vmatpush3.bf16.msra.mxu1 %v7198_v58 }
 0x2cc   : > { %v8685_v12 = vpop.f32.mrb[96].mxu1  ;;  %6351 = vmatprep.subr.bf16.mxu1 %v7205_v21 }
 0x2cd   : > { %11837 = vst [vmem:[#allocation63_spill] sm:$0xff] %v8685_v12  ;;  %v2675_v18 = vpop.f32.mrb[97].mxu1 }
 0x2ce   : > { %v8688_v51 = vpop.f32.mrb[98].mxu1  ;;  %v7184_v18 = vld [vmem:[#allocation2 + $0x310] ss:$24 sps:$4 sm:$0xff]  }
 0x2cf   : > { %11838 = vst [vmem:[#allocation64_spill] sm:$0xff] %v8688_v51  ;;  %v2678_v13 = vpop.f32.mrb[99].mxu1  ;;  %6352 = vmatpush3.bf16.msra.mxu1 %v7205_v21  ;;  %v7186_v51 = vld [vmem:[#allocation2 + $0x7bc] ss:$24 sps:$4 sm:$0xff]  }
 0x2d0   : > { %6353 = vmatprep.subr.bf16.mxu1 %v7218_v28  ;;  %v7188_v13 = vld [vmem:[#allocation2 + $0x344] ss:$24 sps:$4 sm:$0xff]  }
 0x2d1   : > { %3209 = vmatmul.mubr.bf16.gmra.mrb[156].mxu1 %v7176_v57 }
 0x2d2   : > { %3434 = vmatmul.mubr.bf16.gmra.mrb[60].mxu0 %v7177_v34  ;;  %3216 = vmatprep.mubr.bf16.mxu1 %v7179_v30  ;;  %v7191_v30 = vld [vmem:[#allocation2 + $0x340] ss:$24 sps:$4 sm:$0xff]  }
 0x2d3   : > { %3441 = vmatprep.mubr.bf16.mxu0 %v7181_v48  ;;  %6354 = vmatpush3.bf16.msra.mxu1 %v7218_v28  ;;  %v7190_v28 = vld [vmem:[#allocation2 + $0x7b8] ss:$24 sps:$4 sm:$0xff]   ;;  %v7192_v48 = vld [vmem:[#allocation2 + $0x7ec] ss:$24 sps:$4 sm:$0xff]  }
 0x2d4   : > { %v8691_v2 = vpop.f32.mrb[100].mxu1  ;;  %6355 = vmatprep.subr.bf16.mxu1 %v7225_v15 }
 0x2d5   : > { %11839 = vst [vmem:[#allocation65_spill] sm:$0xff] %v8691_v2  ;;  %v2683_v58 = vpop.f32.mrb[101].mxu1  ;;  %v7194_v2 = vld [vmem:[#allocation2 + $0x374] ss:$24 sps:$4 sm:$0xff]  }
 0x2d6   : > { %v8693_v32 = vpop.f32.mrb[102].mxu1 }
 0x2d7   : > { %v2686_v12 = vpop.f32.mrb[103].mxu1  ;;  %6356 = vmatpush3.bf16.msra.mxu1 %v7225_v15 }
 0x2d9   : > { %3217 = vmatmul.mubr.bf16.gmra.mrb[160].mxu1 %v7183_v9  ;;  %v7196_v9 = vld [vmem:[#allocation2 + $0x7e8] ss:$24 sps:$4 sm:$0xff]  }
 0x2da   : > { %3442 = vmatmul.mubr.bf16.gmra.mrb[64].mxu0 %v7184_v18  ;;  %3224 = vmatprep.mubr.bf16.mxu1 %v7186_v51  ;;  %v7197_v18 = vld [vmem:[#allocation2 + $0x370] ss:$24 sps:$4 sm:$0xff]  }
 0x2db   : > { %3449 = vmatprep.mubr.bf16.mxu0 %v7188_v13  ;;  %v7199_v13 = vld [vmem:[#allocation2 + $0x81c] ss:$24 sps:$4 sm:$0xff]  }
 0x2dc   : > { %v8695_v34 = vpop.f32.mrb[104].mxu1 }
 0x2dd   : > { %11840 = vst [vmem:[#allocation66_spill] sm:$0xff] %v8695_v34  ;;  %v2691_v21 = vpop.f32.mrb[105].mxu1  ;;  %v7201_v34 = vld [vmem:[#allocation2 + $0x3a4] ss:$24 sps:$4 sm:$0xff]  }
 0x2de   : > { %v8697_v57 = vpop.f32.mrb[106].mxu1 }
 0x2df   : > { %11841 = vst [vmem:[#allocation67_spill] sm:$0xff] %v8697_v57  ;;  %v2694_v58 = vpop.f32.mrb[107].mxu1  ;;  %v7208_v57 = vld [vmem:[#allocation2 + $0x3d4] ss:$24 sps:$4 sm:$0xff]  }
 0x2e1   : > { %3225 = vmatmul.mubr.bf16.gmra.mrb[164].mxu1 %v7190_v28 }
 0x2e2   : > { %3450 = vmatmul.mubr.bf16.gmra.mrb[68].mxu0 %v7191_v30  ;;  %3232 = vmatprep.mubr.bf16.mxu1 %v7192_v48  ;;  %v7203_v30 = vld [vmem:[#allocation2 + $0x818] ss:$24 sps:$4 sm:$0xff]  }
 0x2e3   : > { %3457 = vmatprep.mubr.bf16.mxu0 %v7194_v2  ;;  %v7204_v2 = vld [vmem:[#allocation2 + $0x3a0] ss:$24 sps:$4 sm:$0xff]  }
 0x2e4   : > { %v8699_v12 = vpop.f32.mrb[108].mxu1 }
 0x2e5   : > { %11842 = vst [vmem:[#allocation68_spill] sm:$0xff] %v8699_v12  ;;  %v2699_v15 = vpop.f32.mrb[109].mxu1  ;;  %v7206_v12 = vld [vmem:[#allocation2 + $0x84c] ss:$24 sps:$4 sm:$0xff]  }
 0x2e6   : > { %v8701_v51 = vpop.f32.mrb[110].mxu1 }
 0x2e7   : > { %11843 = vst [vmem:[#allocation69_spill] sm:$0xff] %v8701_v51  ;;  %v2702_v21 = vpop.f32.mrb[111].mxu1  ;;  %v7214_v51 = vld [vmem:[#allocation2 + $0x404] ss:$24 sps:$4 sm:$0xff]  }
 0x2e9   : > { %3233 = vmatmul.mubr.bf16.gmra.mrb[168].mxu1 %v7196_v9 }
 0x2ea   : > { %3458 = vmatmul.mubr.bf16.gmra.mrb[72].mxu0 %v7197_v18  ;;  %3240 = vmatprep.mubr.bf16.mxu1 %v7199_v13  ;;  %v7210_v18 = vld [vmem:[#allocation2 + $0x848] ss:$24 sps:$4 sm:$0xff]  }
 0x2eb   : > { %3465 = vmatprep.mubr.bf16.mxu0 %v7201_v34  ;;  %v7211_v34 = vld [vmem:[#allocation2 + $0x3d0] ss:$24 sps:$4 sm:$0xff]  }
 0x2ec   : > { %v8703_v58 = vpop.f32.mrb[112].mxu1 }
 0x2ed   : > { %11844 = vst [vmem:[#allocation70_spill] sm:$0xff] %v8703_v58  ;;  %v2707_v28 = vpop.f32.mrb[113].mxu1  ;;  %v7212_v58 = vld [vmem:[#allocation2 + $0x87c] ss:$24 sps:$4 sm:$0xff]  }
 0x2ee   : > { %v8705_v48 = vpop.f32.mrb[114].mxu1 }
 0x2ef   : > { %11845 = vst [vmem:[#allocation71_spill] sm:$0xff] %v8705_v48  ;;  %v2710_v15 = vpop.f32.mrb[115].mxu1  ;;  %v7221_v48 = vld [vmem:[#allocation2 + $0x434] ss:$24 sps:$4 sm:$0xff]  }
 0x2f1   : > { %3241 = vmatmul.mubr.bf16.gmra.mrb[172].mxu1 %v7203_v30 }
 0x2f2   : > { %3466 = vmatmul.mubr.bf16.gmra.mrb[76].mxu0 %v7204_v2  ;;  %3248 = vmatprep.mubr.bf16.mxu1 %v7206_v12  ;;  %v7216_v2 = vld [vmem:[#allocation2 + $0x878] ss:$24 sps:$4 sm:$0xff]  }
 0x2f3   : > { %3473 = vmatprep.mubr.bf16.mxu0 %v7208_v57  ;;  %v7217_v57 = vld [vmem:[#allocation2 + $0x400] ss:$24 sps:$4 sm:$0xff]  }
 0x2f4   : > { %v8707_v21 = vpop.f32.mrb[116].mxu1 }
 0x2f5   : > { %11846 = vst [vmem:[#allocation72_spill] sm:$0xff] %v8707_v21  ;;  %v2715_v9 = vpop.f32.mrb[117].mxu1  ;;  %v7219_v21 = vld [vmem:[#allocation2 + $0x8ac] ss:$24 sps:$4 sm:$0xff]  }
 0x2f6   : > { %v8709_v13 = vpop.f32.mrb[118].mxu1 }
 0x2f7   : > { %11847 = vst [vmem:[#allocation73_spill] sm:$0xff] %v8709_v13  ;;  %v2718_v28 = vpop.f32.mrb[119].mxu1  ;;  %v7228_v13 = vld [vmem:[#allocation2 + $0x464] ss:$24 sps:$4 sm:$0xff]  }
 0x2f9   : > { %3249 = vmatmul.mubr.bf16.gmra.mrb[176].mxu1 %v7210_v18 }
 0x2fa   : > { %3474 = vmatmul.mubr.bf16.gmra.mrb[80].mxu0 %v7211_v34  ;;  %3256 = vmatprep.mubr.bf16.mxu1 %v7212_v58  ;;  %v7223_v34 = vld [vmem:[#allocation2 + $0x8a8] ss:$24 sps:$4 sm:$0xff]  }
 0x2fb   : > { %3481 = vmatprep.mubr.bf16.mxu0 %v7214_v51  ;;  %v7224_v51 = vld [vmem:[#allocation2 + $0x430] ss:$24 sps:$4 sm:$0xff]  }
 0x2fc   : > { %v8711_v15 = vpop.f32.mrb[120].mxu1 }
 0x2fd   : > { %11848 = vst [vmem:[#allocation74_spill] sm:$0xff] %v8711_v15  ;;  %v2723_v30 = vpop.f32.mrb[121].mxu1  ;;  %v7226_v15 = vld [vmem:[#allocation2 + $0x8dc] ss:$24 sps:$4 sm:$0xff]  }
 0x2fe   : > { %v8713_v12 = vpop.f32.mrb[122].mxu1 }
 0x2ff   : > { %11849 = vst [vmem:[#allocation75_spill] sm:$0xff] %v8713_v12  ;;  %v2726_v9 = vpop.f32.mrb[123].mxu1  ;;  %v11962_v12 = vld [vmem:[#allocation58_spill] sm:$0xff] }
 0x301   : > { %3257 = vmatmul.mubr.bf16.gmra.mrb[180].mxu1 %v7216_v2 }
 0x302   : > { %3482 = vmatmul.mubr.bf16.gmra.mrb[84].mxu0 %v7217_v57  ;;  %3264 = vmatprep.mubr.bf16.mxu1 %v7219_v21  ;;  %v7230_v57 = vld [vmem:[#allocation2 + $0x8d8] ss:$24 sps:$4 sm:$0xff]  }
 0x303   : > { %3489 = vmatprep.mubr.bf16.mxu0 %v7221_v48  ;;  %v7231_v48 = vld [vmem:[#allocation2 + $0x460] ss:$24 sps:$4 sm:$0xff]  }
 0x304   : > { %v8715_v28 = vpop.f32.mrb[124].mxu1 }
 0x305   : > { %11850 = vst [vmem:[#allocation76_spill] sm:$0xff] %v8715_v28  ;;  %v2731_v18 = vpop.f32.mrb[125].mxu1 }
 0x306   : > { %v8717_v58 = vpop.f32.mrb[126].mxu1  ;;  %v7232_v18 = vld [vmem:[#allocation2 + $0x494] ss:$24 sps:$4 sm:$0xff]  }
 0x307   : > { %11851 = vst [vmem:[#allocation77_spill] sm:$0xff] %v8717_v58  ;;  %v2734_v30 = vpop.f32.mrb[127].mxu1  ;;  %v11958_v58 = vmov 0 }
 0x309   : > { %3265 = vmatmul.mubr.bf16.gmra.mrb[184].mxu1 %v7223_v34 }
 0x30a   : > { %3490 = vmatmul.mubr.bf16.gmra.mrb[88].mxu0 %v7224_v51  ;;  %3272 = vmatprep.mubr.bf16.mxu1 %v7226_v15 }
 0x30b   : > { %3497 = vmatprep.mubr.bf16.mxu0 %v7228_v13  ;;  %v7234_v13 = vld [vmem:[#allocation2 + $0x490] ss:$24 sps:$4 sm:$0xff]  }
 0x30c   : > { %v8719_v9 = vpop.f32.mrb[128].mxu1 }
 0x30d   : > { %11852 = vst [vmem:[#allocation78_spill] sm:$0xff] %v8719_v9  ;;  %v2739_v2 = vpop.f32.mrb[129].mxu1  ;;  %v7235_v9 = vld [vmem:[#allocation2 + $0x4c4] ss:$24 sps:$4 sm:$0xff]  }
 0x30e   : > { %v8721_v21 = vpop.f32.mrb[130].mxu1 }
 0x30f   : > { %11853 = vst [vmem:[#allocation79_spill] sm:$0xff] %v8721_v21  ;;  %v2742_v28 = vpop.f32.mrb[131].mxu1 }
 0x311   : > { %3273 = vmatmul.mubr.bf16.gmra.mrb[188].mxu1 %v7230_v57 }
 0x312   : > { %3498 = vmatmul.mubr.bf16.gmra.mrb[92].mxu0 %v7231_v48  ;;  %6357 = vmatprep.mubr.bf16.mxu1 %v8357_v36  ;;  %v7237_v36 = vld [vmem:[#allocation2 + $0x4c0] ss:$24 sps:$4 sm:$0xff]  }
 0x313   : > { %3505 = vmatprep.mubr.bf16.mxu0 %v7232_v18  ;;  %v7238_v18 = vld [vmem:[#allocation2 + $0x4f4] ss:$24 sps:$4 sm:$0xff]  }
 0x314   : > { %v8724_v30 = vpop.f32.mrb[132].mxu1 }
 0x315   : > { %11854 = vst [vmem:[#allocation80_spill] sm:$0xff] %v8724_v30  ;;  %v2747_v34 = vpop.f32.mrb[133].mxu1  ;;  %v11952_v30 = vld [vmem:[#allocation57_spill] sm:$0xff] }
 0x316   : > { %v8726_v51 = vpop.f32.mrb[134].mxu1 }
 0x317   : > { %11855 = vst [vmem:[#allocation81_spill] sm:$0xff] %v8726_v51  ;;  %v2750_v15 = vpop.f32.mrb[135].mxu1 }
 0x318   : > { %v7241_v15 = vld [vmem:[#allocation2 + $0x524] ss:$24 sps:$4 sm:$0xff]  }
 0x319   : > { %6358 = vmatmul.mubr.bf16.vlgmr.msra.gmra.mrb[192].mxu1 %v8362_v43 }
 0x31a   : > { %3506 = vmatmul.mubr.bf16.gmra.mrb[96].mxu0 %v7234_v13  ;;  %6361 = vmatprep.mubr.bf16.mxu1 %v8370_v49  ;;  %v7240_v49 = vld [vmem:[#allocation2 + $0x4f0] ss:$24 sps:$4 sm:$0xff]  }
 0x31b   : > { %3513 = vmatprep.mubr.bf16.mxu0 %v7235_v9 }
 0x31c   : > { %v8730_v28 = vpop.f32.mrb[136].mxu1 }
 0x31d   : > { %11856 = vst [vmem:[#allocation82_spill] sm:$0xff] %v8730_v28  ;;  %v2755_v2 = vpop.f32.mrb[137].mxu1 }
 0x31e   : > { %v8732_v57 = vpop.f32.mrb[138].mxu1 }
 0x31f   : > { %11857 = vst [vmem:[#allocation83_spill] sm:$0xff] %v8732_v57  ;;  %v2758_v48 = vpop.f32.mrb[139].mxu1  ;;  %v11945_v57 = vmov 0 }
 0x321   : > { %6362 = vmatmul.mubr.bf16.gmra.mrb[196].mxu1 %v8378_v55 }
 0x322   : > { %3514 = vmatmul.mubr.bf16.gmra.mrb[100].mxu0 %v7237_v36  ;;  %6365 = vmatprep.mubr.bf16.mxu1 %v8386_v61  ;;  %v7243_v36 = vld [vmem:[#allocation2 + $0x520] ss:$24 sps:$4 sm:$0xff]  }
 0x323   : > { %3521 = vmatprep.mubr.bf16.mxu0 %v7238_v18  ;;  %v7244_v18 = vld [vmem:[#allocation2 + $0x554] ss:$24 sps:$4 sm:$0xff]  }
 0x324   : > { %v8736_v34 = vpop.f32.mrb[140].mxu1 }
 0x325   : > { %11858 = vst [vmem:[#allocation84_spill] sm:$0xff] %v8736_v34  ;;  %v2763_v43 = vpop.f32.mrb[141].mxu1 }
 0x326   : > { %v8738_v13 = vpop.f32.mrb[142].mxu1 }
 0x327   : > { %11859 = vst [vmem:[#allocation85_spill] sm:$0xff] %v8738_v13  ;;  %v2766_v9 = vpop.f32.mrb[143].mxu1 }
 0x329   : > { %6366 = vmatmul.mubr.bf16.gmra.mrb[200].mxu1 %v8394_v3 }
 0x32a   : > { %3522 = vmatmul.mubr.bf16.gmra.mrb[104].mxu0 %v7240_v49  ;;  %6369 = vmatprep.mubr.bf16.mxu1 %v8402_v11  ;;  %v7246_v49 = vld [vmem:[#allocation2 + $0x550] ss:$24 sps:$4 sm:$0xff]  }
 0x32b   : > { %3529 = vmatprep.mubr.bf16.mxu0 %v7241_v15  ;;  %v7247_v15 = vld [vmem:[#allocation2 + $0x584] ss:$24 sps:$4 sm:$0xff]  }
 0x32d   : > { %v3315_v2 = vpop.f32.mrb[0].mxu0 }
 0x32e   : > { %v8743_v55 = vadd.f32 %v3315_v2, %v8579_v38  ;;  %v3317_v61 = vpop.f32.mrb[1].mxu0 }
 0x32f   : > { %v3318_v48 = vpop.f32.mrb[2].mxu0 }
 0x330   : > { %v8746_v43 = vadd.f32 %v3318_v48, %v8581_v52  ;;  %v3320_v13 = vpop.f32.mrb[3].mxu0 }
 0x331   : > { %6370 = vmatmul.mubr.bf16.gmra.mrb[204].mxu1 %v8410_v17  ;;  %v7249_v13 = vld [vmem:[#allocation2 + $0x580] ss:$24 sps:$4 sm:$0xff]  }
 0x332   : > { %3530 = vmatmul.mubr.bf16.gmra.mrb[108].mxu0 %v7243_v36  ;;  %6373 = vmatprep.mubr.bf16.mxu1 %v8418_v23  ;;  %v7250_v36 = vld [vmem:[#allocation2 + $0x5b4] ss:$24 sps:$4 sm:$0xff]  }
 0x333   : > { %3537 = vmatprep.mubr.bf16.mxu0 %v7244_v18  ;;  %v7252_v18 = vld [vmem:[#allocation2 + $0x5b0] ss:$24 sps:$4 sm:$0xff]  }
 0x335   : > { %v3323_v3 = vpop.f32.mrb[4].mxu0 }
 0x336   : > { %v8751_v11 = vadd.f32 %v3323_v3, %v8583_v10  ;;  %v3325_v38 = vpop.f32.mrb[5].mxu0 }
 0x337   : > { %v3326_v9 = vpop.f32.mrb[6].mxu0  ;;  %v7253_v38 = vld [vmem:[#allocation2 + $0x5e4] ss:$24 sps:$4 sm:$0xff]  }
 0x338   : > { %v8754_v2 = vadd.f32 %v3326_v9, %v8585_v20  ;;  %v3328_v52 = vpop.f32.mrb[7].mxu0  ;;  %v7255_v9 = vld [vmem:[#allocation2 + $0x5e0] ss:$24 sps:$4 sm:$0xff]  }
 0x339   : > { %6374 = vmatmul.mubr.bf16.gmra.mrb[208].mxu1 %v8426_v29  ;;  %v7256_v52 = vld [vmem:[#allocation2 + $0x614] ss:$24 sps:$4 sm:$0xff]  }
 0x33a   : > { %3538 = vmatmul.mubr.bf16.gmra.mrb[112].mxu0 %v7246_v49  ;;  %6377 = vmatprep.mubr.bf16.mxu1 %v8434_v37 }
 0x33b   : > { %3545 = vmatprep.mubr.bf16.mxu0 %v7247_v15 }
 0x33d   : > { %v3331_v17 = vpop.f32.mrb[8].mxu0 }
 0x33e   : > { %v8759_v23 = vadd.f32 %v3331_v17, %v8587_v41  ;;  %v3333_v10 = vpop.f32.mrb[9].mxu0 }
 0x33f   : > { %v3334_v61 = vpop.f32.mrb[10].mxu0  ;;  %v7258_v10 = vld [vmem:[#allocation2 + $0x610] ss:$24 sps:$4 sm:$0xff]  }
 0x340   : > { %v8762_v48 = vadd.f32 %v3334_v61, %v8589_v63  ;;  %v3336_v20 = vpop.f32.mrb[11].mxu0  ;;  %v7259_v61 = vld [vmem:[#allocation2 + $0x644] ss:$24 sps:$4 sm:$0xff]  }
 0x341   : > { %6378 = vmatmul.mubr.bf16.gmra.mrb[212].mxu1 %v8442_v46  ;;  %v7261_v20 = vld [vmem:[#allocation2 + $0x640] ss:$24 sps:$4 sm:$0xff]  }
 0x342   : > { %3546 = vmatmul.mubr.bf16.gmra.mrb[116].mxu0 %v7249_v13  ;;  %6381 = vmatprep.mubr.bf16.mxu1 %v8450_v54 }
 0x343   : > { %3553 = vmatprep.mubr.bf16.mxu0 %v7250_v36 }
 0x345   : > { %v3339_v29 = vpop.f32.mrb[12].mxu0 }
 0x346   : > { %v8767_v37 = vadd.f32 %v3339_v29, %v8591_v26  ;;  %v3341_v41 = vpop.f32.mrb[13].mxu0 }
 0x347   : > { %v3342_v3 = vpop.f32.mrb[14].mxu0  ;;  %v7262_v41 = vld [vmem:[#allocation2 + $0x674] ss:$24 sps:$4 sm:$0xff]  }
 0x348   : > { %v8770_v49 = vadd.f32 %v3342_v3, %v8593_v22  ;;  %v3344_v63 = vpop.f32.mrb[15].mxu0  ;;  %v7264_v3 = vld [vmem:[#allocation2 + $0x670] ss:$24 sps:$4 sm:$0xff]  }
 0x349   : > { %6382 = vmatmul.mubr.bf16.gmra.mrb[216].mxu1 %v8458_v0  ;;  %v7265_v63 = vld [vmem:[#allocation2 + $0x6a4] ss:$24 sps:$4 sm:$0xff]  }
 0x34a   : > { %3554 = vmatmul.mubr.bf16.gmra.mrb[120].mxu0 %v7252_v18  ;;  %6385 = vmatprep.mubr.bf16.mxu1 %v8466_v8 }
 0x34b   : > { %3561 = vmatprep.mubr.bf16.mxu0 %v7253_v38 }
 0x34d   : > { %v3347_v46 = vpop.f32.mrb[16].mxu0 }
 0x34e   : > { %v8775_v54 = vadd.f32 %v3347_v46, %v8595_v35  ;;  %v3349_v26 = vpop.f32.mrb[17].mxu0 }
 0x34f   : > { %v3350_v15 = vpop.f32.mrb[18].mxu0  ;;  %v7267_v26 = vld [vmem:[#allocation2 + $0x6a0] ss:$24 sps:$4 sm:$0xff]  }
 0x350   : > { %v8778_v17 = vadd.f32 %v3350_v15, %v8597_v7  ;;  %v3352_v22 = vpop.f32.mrb[19].mxu0  ;;  %v7268_v15 = vld [vmem:[#allocation2 + $0x6d4] ss:$24 sps:$4 sm:$0xff]  }
 0x351   : > { %6386 = vmatmul.mubr.bf16.gmra.mrb[220].mxu1 %v8474_v16  ;;  %v7270_v22 = vld [vmem:[#allocation2 + $0x6d0] ss:$24 sps:$4 sm:$0xff]  }
 0x352   : > { %3562 = vmatmul.mubr.bf16.gmra.mrb[124].mxu0 %v7255_v9  ;;  %6389 = vmatprep.mubr.bf16.mxu1 %v8359_v40 }
 0x353   : > { %3569 = vmatprep.mubr.bf16.mxu0 %v7256_v52 }
 0x355   : > { %v3355_v0 = vpop.f32.mrb[20].mxu0 }
 0x356   : > { %v8783_v8 = vadd.f32 %v3355_v0, %v8599_v47  ;;  %v3357_v35 = vpop.f32.mrb[21].mxu0 }
 0x357   : > { %v3358_v13 = vpop.f32.mrb[22].mxu0  ;;  %v7271_v35 = vld [vmem:[#allocation2 + $0x704] ss:$24 sps:$4 sm:$0xff]  }
 0x358   : > { %v8786_v36 = vadd.f32 %v3358_v13, %v8601_v53  ;;  %v3360_v7 = vpop.f32.mrb[23].mxu0  ;;  %v7273_v13 = vld [vmem:[#allocation2 + $0x700] ss:$24 sps:$4 sm:$0xff]  }
 0x359   : > { %6390 = vmatmul.mubr.bf16.gmra.mrb[224].mxu1 %v8366_v44  ;;  %v7274_v7 = vld [vmem:[#allocation2 + $0x734] ss:$24 sps:$4 sm:$0xff]  }
 0x35a   : > { %3570 = vmatmul.mubr.bf16.gmra.mrb[128].mxu0 %v7258_v10  ;;  %6393 = vmatprep.mubr.bf16.mxu1 %v8374_v50 }
 0x35b   : > { %3577 = vmatprep.mubr.bf16.mxu0 %v7259_v61 }
 0x35d   : > { %v3363_v40 = vpop.f32.mrb[24].mxu0 }
 0x35e   : > { %v8791_v16 = vadd.f32 %v3363_v40, %v8606_v6  ;;  %v3365_v47 = vpop.f32.mrb[25].mxu0 }
 0x35f   : > { %v3366_v29 = vpop.f32.mrb[26].mxu0  ;;  %v11860_v47 = vld [vmem:[#allocation16_spill] sm:$0xff] }
 0x360   : > { %v8794_v18 = vadd.f32 %v3366_v29, %v8609_v59  ;;  %v3368_v53 = vpop.f32.mrb[27].mxu0 }
 0x361   : > { %6394 = vmatmul.mubr.bf16.gmra.mrb[228].mxu1 %v8382_v56 }
 0x362   : > { %3578 = vmatmul.mubr.bf16.gmra.mrb[132].mxu0 %v7261_v20  ;;  %6397 = vmatprep.mubr.bf16.mxu1 %v8390_v62  ;;  %v11862_v20 = vld [vmem:[#allocation37_spill] sm:$0xff] }
 0x363   : > { %3585 = vmatprep.mubr.bf16.mxu0 %v7262_v41  ;;  %v7276_v41 = vld [vmem:[#allocation2 + $0x730] ss:$24 sps:$4 sm:$0xff]  }
 0x365   : > { %v3371_v44 = vpop.f32.mrb[28].mxu0 }
 0x366   : > { %v8799_v50 = vadd.f32 %v3371_v44, %v8611_v1  ;;  %v3373_v6 = vpop.f32.mrb[29].mxu0  ;;  %v7277_v44 = vld [vmem:[#allocation2 + $0x764] ss:$24 sps:$4 sm:$0xff]  }
 0x367   : > { %v3374_v38 = vpop.f32.mrb[30].mxu0  ;;  %v11863_v6 = vld [vmem:[#allocation38_spill] sm:$0xff] }
 0x368   : > { %v8802_v46 = vadd.f32 %v3374_v38, %v8613_v33  ;;  %v3376_v59 = vpop.f32.mrb[31].mxu0  ;;  %v11864_v38 = vld [vmem:[#allocation18_spill] sm:$0xff] }
 0x369   : > { %6398 = vmatmul.mubr.bf16.gmra.mrb[232].mxu1 %v8398_v4 }
 0x36a   : > { %3586 = vmatmul.mubr.bf16.gmra.mrb[136].mxu0 %v7264_v3  ;;  %6401 = vmatprep.mubr.bf16.mxu1 %v8406_v14 }
 0x36b   : > { %3593 = vmatprep.mubr.bf16.mxu0 %v7265_v63  ;;  %v11865_v63 = vld [vmem:[#allocation19_spill] sm:$0xff] }
 0x36d   : > { %v3379_v56 = vpop.f32.mrb[32].mxu0 }
 0x36e   : > { %v8807_v62 = vadd.f32 %v3379_v56, %v8615_v42  ;;  %v3381_v1 = vpop.f32.mrb[33].mxu0 }
 0x36f   : > { %v3382_v9 = vpop.f32.mrb[34].mxu0 }
 0x370   : > { %v8810_v52 = vadd.f32 %v3382_v9, %v8617_v60  ;;  %v3384_v33 = vpop.f32.mrb[35].mxu0 }
 0x371   : > { %6402 = vmatmul.mubr.bf16.gmra.mrb[236].mxu1 %v8414_v19 }
 0x372   : > { %3594 = vmatmul.mubr.bf16.gmra.mrb[140].mxu0 %v7267_v26  ;;  %6405 = vmatprep.mubr.bf16.mxu1 %v8422_v25  ;;  %v11867_v26 = vld [vmem:[#allocation39_spill] sm:$0xff] }
 0x373   : > { %3601 = vmatprep.mubr.bf16.mxu0 %v7268_v15 }
 0x375   : > { %v3387_v4 = vpop.f32.mrb[36].mxu0 }
 0x376   : > { %v8815_v14 = vadd.f32 %v3387_v4, %v8619_v45  ;;  %v3389_v42 = vpop.f32.mrb[37].mxu0  ;;  %v7279_v4 = vld [vmem:[#allocation2 + $0x760] ss:$24 sps:$4 sm:$0xff]  }
 0x377   : > { %v3390_v0 = vpop.f32.mrb[38].mxu0 }
 0x378   : > { %v8818_v10 = vadd.f32 %v3390_v0, %v8621_v24  ;;  %v3392_v60 = vpop.f32.mrb[39].mxu0  ;;  %v7280_v0 = vld [vmem:[#allocation2 + $0x794] ss:$24 sps:$4 sm:$0xff]  }
 0x379   : > { %6406 = vmatmul.mubr.bf16.gmra.mrb[240].mxu1 %v8430_v31  ;;  %v11861_v31 = vld [vmem:[#allocation17_spill] sm:$0xff] }
 0x37a   : > { %3602 = vmatmul.mubr.bf16.gmra.mrb[144].mxu0 %v7270_v22  ;;  %6409 = vmatprep.mubr.bf16.mxu1 %v8438_v39 }
 0x37b   : > { %3609 = vmatprep.mubr.bf16.mxu0 %v7271_v35  ;;  %v11869_v35 = vld [vmem:[#allocation40_spill] sm:$0xff] }
 0x37d   : > { %v3395_v19 = vpop.f32.mrb[40].mxu0 }
 0x37e   : > { %v8823_v25 = vadd.f32 %v3395_v19, %v8623_v27  ;;  %v3397_v45 = vpop.f32.mrb[41].mxu0 }
 0x37f   : > { %v3398_v61 = vpop.f32.mrb[42].mxu0  ;;  %v11870_v45 = vld [vmem:[#allocation20_spill] sm:$0xff] }
 0x380   : > { %v8826_v40 = vadd.f32 %v3398_v61, %v8625_v5  ;;  %v3400_v24 = vpop.f32.mrb[43].mxu0 }
 0x381   : > { %6410 = vmatmul.mubr.bf16.gmra.mrb[244].mxu1 %v11860_v47  ;;  %v11873_v47 = vld [vmem:[#allocation41_spill] sm:$0xff] }
 0x382   : > { %3610 = vmatmul.mubr.bf16.gmra.mrb[148].mxu0 %v7273_v13  ;;  %6413 = vmatprep.mubr.bf16.mxu1 %v11861_v31  ;;  %v11871_v13 = vld [vmem:[#allocation21_spill] sm:$0xff] }
 0x383   : > { %3617 = vmatprep.mubr.bf16.mxu0 %v7274_v7 }
 0x385   : > { %v3403_v39 = vpop.f32.mrb[44].mxu0 }
 0x386   : > { %v8831_v29 = vadd.f32 %v3403_v39, %v11862_v20  ;;  %v3405_v27 = vpop.f32.mrb[45].mxu0 }
 0x387   : > { %v3406_v53 = vpop.f32.mrb[46].mxu0  ;;  %v7282_v27 = vld [vmem:[#allocation2 + $0x790] ss:$24 sps:$4 sm:$0xff]  }
 0x388   : > { %v8834_v3 = vadd.f32 %v3406_v53, %v11863_v6  ;;  %v3408_v5 = vpop.f32.mrb[47].mxu0  ;;  %v11875_v6 = vld [vmem:[#allocation42_spill] sm:$0xff] }
 0x389   : > { %6414 = vmatmul.mubr.bf16.gmra.mrb[248].mxu1 %v11864_v38 }
 0x38a   : > { %3618 = vmatmul.mubr.bf16.gmra.mrb[152].mxu0 %v7276_v41  ;;  %6417 = vmatprep.mubr.bf16.mxu1 %v11865_v63  ;;  %v11876_v63 = vld [vmem:[#allocation22_spill] sm:$0xff] }
 0x38b   : > { %3625 = vmatprep.mubr.bf16.mxu0 %v7277_v44  ;;  %v7283_v44 = vld [vmem:[#allocation2 + $0x7c4] ss:$24 sps:$4 sm:$0xff]  }
 0x38c   : > { %v8838_v59 = vpop.f32.mrb[144].mxu1 }
 0x38d   : > { %11866 = vst [vmem:[#allocation16_spill] sm:$0xff] %v8838_v59  ;;  %v3411_v56 = vpop.f32.mrb[48].mxu0  ;;  %v3188_v1 = vpop.f32.mrb[145].mxu1  ;;  %v11941_v59 = vmov 0 }
 0x38e   : > { %v8841_v9 = vadd.f32 %v3411_v56, %v11867_v26  ;;  %v3413_v15 = vpop.f32.mrb[49].mxu0  ;;  %v8843_v33 = vpop.f32.mrb[146].mxu1  ;;  %v11877_v56 = vld [vmem:[#allocation23_spill] sm:$0xff] }
 0x38f   : > { %11868 = vst [vmem:[#allocation17_spill] sm:$0xff] %v8843_v33  ;;  %v3414_v42 = vpop.f32.mrb[50].mxu0  ;;  %v3191_v22 = vpop.f32.mrb[147].mxu1 }
 0x390   : > { %v8846_v60 = vadd.f32 %v3414_v42, %v11869_v35  ;;  %v3416_v19 = vpop.f32.mrb[51].mxu0  ;;  %v7285_v35 = vld [vmem:[#allocation2 + $0x7c0] ss:$24 sps:$4 sm:$0xff]  }
 0x391   : > { %6418 = vmatmul.mubr.bf16.gmra.mrb[252].mxu1 %v11870_v45 }
 0x392   : > { %3626 = vmatmul.mubr.bf16.gmra.mrb[156].mxu0 %v7279_v4  ;;  %6421 = vmatprep.mubr.bf16.mxu1 %v11871_v13  ;;  %v11879_v4 = vld [vmem:[#allocation43_spill] sm:$0xff]  ;;  %v7286_v13 = vld [vmem:[#allocation2 + $0x7f4] ss:$24 sps:$4 sm:$0xff]  }
 0x393   : > { %3633 = vmatprep.mubr.bf16.mxu0 %v7280_v0 }
 0x394   : > { %v8850_v61 = vpop.f32.mrb[148].mxu1 }
 0x395   : > { %11872 = vst [vmem:[#allocation37_spill] sm:$0xff] %v8850_v61  ;;  %v3419_v7 = vpop.f32.mrb[52].mxu0  ;;  %v3196_v24 = vpop.f32.mrb[149].mxu1  ;;  %v7301_v61 = vld [vmem:[#allocation2 + $0x8e4] ss:$24 sps:$4 sm:$0xff]  }
 0x396   : > { %v8853_v31 = vadd.f32 %v3419_v7, %v11873_v47  ;;  %v3421_v39 = vpop.f32.mrb[53].mxu0  ;;  %v8855_v20 = vpop.f32.mrb[150].mxu1  ;;  %v11881_v7 = vld [vmem:[#allocation44_spill] sm:$0xff] }
 0x397   : > { %11874 = vst [vmem:[#allocation38_spill] sm:$0xff] %v8855_v20  ;;  %v3422_v41 = vpop.f32.mrb[54].mxu0  ;;  %v3199_v53 = vpop.f32.mrb[151].mxu1  ;;  %v11882_v39 = vld [vmem:[#allocation24_spill] sm:$0xff] }
 0x398   : > { %v8858_v5 = vadd.f32 %v3422_v41, %v11875_v6  ;;  %v3424_v38 = vpop.f32.mrb[55].mxu0  ;;  %v11885_v6 = vld [vmem:[#allocation45_spill] sm:$0xff] }
 0x399   : > { %6422 = vmatmul.mubr.bf16.gmra.mrb[0].mxu1 %v11876_v63 }
 0x39a   : > { %3634 = vmatmul.mubr.bf16.gmra.mrb[160].mxu0 %v7282_v27  ;;  %6425 = vmatprep.mubr.bf16.mxu1 %v11877_v56  ;;  %v11883_v27 = vld [vmem:[#allocation25_spill] sm:$0xff] }
 0x39b   : > { %3641 = vmatprep.mubr.bf16.mxu0 %v7283_v44 }
 0x39c   : > { %v8862_v1 = vpop.f32.mrb[152].mxu1 }
 0x39d   : > { %11878 = vst [vmem:[#allocation18_spill] sm:$0xff] %v8862_v1  ;;  %v3427_v26 = vpop.f32.mrb[56].mxu0  ;;  %v3204_v15 = vpop.f32.mrb[153].mxu1  ;;  %v7298_v1 = vld [vmem:[#allocation2 + $0x8b4] ss:$24 sps:$4 sm:$0xff]  }
 0x39e   : > { %v8865_v42 = vadd.f32 %v3427_v26, %v11879_v4  ;;  %v3429_v22 = vpop.f32.mrb[57].mxu0  ;;  %v8867_v0 = vpop.f32.mrb[154].mxu1  ;;  %v7288_v26 = vld [vmem:[#allocation2 + $0x7f0] ss:$24 sps:$4 sm:$0xff]  }
 0x39f   : > { %11880 = vst [vmem:[#allocation19_spill] sm:$0xff] %v8867_v0  ;;  %v3430_v19 = vpop.f32.mrb[58].mxu0  ;;  %v3207_v45 = vpop.f32.mrb[155].mxu1  ;;  %v7289_v22 = vld [vmem:[#allocation2 + $0x824] ss:$24 sps:$4 sm:$0xff]  }
 0x3a0   : > { %v8870_v24 = vadd.f32 %v3430_v19, %v11881_v7  ;;  %v3432_v47 = vpop.f32.mrb[59].mxu0  ;;  %v11887_v19 = vld [vmem:[#allocation46_spill] sm:$0xff] }
 0x3a1   : > { %6426 = vmatmul.mubr.bf16.gmra.mrb[4].mxu1 %v11882_v39  ;;  %v11888_v7 = vld [vmem:[#allocation26_spill] sm:$0xff] }
 0x3a2   : > { %3642 = vmatmul.mubr.bf16.gmra.mrb[164].mxu0 %v7285_v35  ;;  %6429 = vmatprep.mubr.bf16.mxu1 %v11883_v27  ;;  %v11899_v0 = vld [vmem:[#allocation50_spill] sm:$0xff] }
 0x3a3   : > { %3649 = vmatprep.mubr.bf16.mxu0 %v7286_v13  ;;  %v11889_v13 = vld [vmem:[#allocation27_spill] sm:$0xff] }
 0x3a4   : > { %v8874_v41 = vpop.f32.mrb[156].mxu1 }
 0x3a5   : > { %11884 = vst [vmem:[#allocation39_spill] sm:$0xff] %v8874_v41  ;;  %v3435_v53 = vpop.f32.mrb[60].mxu0  ;;  %v3212_v44 = vpop.f32.mrb[157].mxu1  ;;  %v7294_v41 = vld [vmem:[#allocation2 + $0x850] ss:$24 sps:$4 sm:$0xff]  }
 0x3a6   : > { %v8877_v38 = vadd.f32 %v3435_v53, %v11885_v6  ;;  %v3437_v63 = vpop.f32.mrb[61].mxu0  ;;  %v8879_v56 = vpop.f32.mrb[158].mxu1  ;;  %v11891_v53 = vld [vmem:[#allocation47_spill] sm:$0xff] }
 0x3a7   : > { %11886 = vst [vmem:[#allocation40_spill] sm:$0xff] %v8879_v56  ;;  %v3438_v15 = vpop.f32.mrb[62].mxu0  ;;  %v3215_v4 = vpop.f32.mrb[159].mxu1  ;;  %v11893_v56 = vld [vmem:[#allocation48_spill] sm:$0xff] }
 0x3a8   : > { %v8882_v45 = vadd.f32 %v3438_v15, %v11887_v19  ;;  %v3440_v35 = vpop.f32.mrb[63].mxu0  ;;  %v7291_v4 = vld [vmem:[#allocation2 + $0x820] ss:$24 sps:$4 sm:$0xff]  }
 0x3a9   : > { %6430 = vmatmul.mubr.bf16.gmra.mrb[8].mxu1 %v11888_v7  ;;  %v7292_v35 = vld [vmem:[#allocation2 + $0x854] ss:$24 sps:$4 sm:$0xff]  }
 0x3aa   : > { %3650 = vmatmul.mubr.bf16.gmra.mrb[168].mxu0 %v7288_v26  ;;  %6433 = vmatprep.mubr.bf16.mxu1 %v11889_v13  ;;  %v11894_v13 = vld [vmem:[#allocation28_spill] sm:$0xff] }
 0x3ab   : > { %3657 = vmatprep.mubr.bf16.mxu0 %v7289_v22  ;;  %v11895_v22 = vld [vmem:[#allocation29_spill] sm:$0xff] }
 0x3ac   : > { %v8886_v47 = vpop.f32.mrb[160].mxu1 }
 0x3ad   : > { %11890 = vst [vmem:[#allocation20_spill] sm:$0xff] %v8886_v47  ;;  %v3443_v39 = vpop.f32.mrb[64].mxu0  ;;  %v3220_v27 = vpop.f32.mrb[161].mxu1 }
 0x3ae   : > { %v8889_v44 = vadd.f32 %v3443_v39, %v11891_v53  ;;  %v3445_v6 = vpop.f32.mrb[65].mxu0  ;;  %v8891_v63 = vpop.f32.mrb[162].mxu1 }
 0x3af   : > { %11892 = vst [vmem:[#allocation21_spill] sm:$0xff] %v8891_v63  ;;  %v3446_v15 = vpop.f32.mrb[66].mxu0  ;;  %v3223_v19 = vpop.f32.mrb[163].mxu1  ;;  %v11897_v6 = vld [vmem:[#allocation49_spill] sm:$0xff] }
 0x3b0   : > { %v8894_v7 = vadd.f32 %v3446_v15, %v11893_v56  ;;  %v3448_v26 = vpop.f32.mrb[67].mxu0 }
 0x3b1   : > { %6434 = vmatmul.mubr.bf16.gmra.mrb[12].mxu1 %v11894_v13  ;;  %v7295_v26 = vld [vmem:[#allocation2 + $0x884] ss:$24 sps:$4 sm:$0xff]  }
 0x3b2   : > { %3658 = vmatmul.mubr.bf16.gmra.mrb[172].mxu0 %v7291_v4  ;;  %6437 = vmatprep.mubr.bf16.mxu1 %v11895_v22  ;;  %v11901_v22 = vld [vmem:[#allocation31_spill] sm:$0xff] }
 0x3b3   : > { %3665 = vmatprep.mubr.bf16.mxu0 %v7292_v35  ;;  %v11900_v35 = vld [vmem:[#allocation30_spill] sm:$0xff] }
 0x3b4   : > { %v8898_v27 = vpop.f32.mrb[164].mxu1 }
 0x3b5   : > { %11896 = vst [vmem:[#allocation41_spill] sm:$0xff] %v8898_v27  ;;  %v3451_v39 = vpop.f32.mrb[68].mxu0  ;;  %v3228_v53 = vpop.f32.mrb[165].mxu1 }
 0x3b6   : > { %v8901_v63 = vadd.f32 %v3451_v39, %v11897_v6  ;;  %v3453_v47 = vpop.f32.mrb[69].mxu0  ;;  %v8903_v19 = vpop.f32.mrb[166].mxu1  ;;  %v11903_v6 = vld [vmem:[#allocation51_spill] sm:$0xff] }
 0x3b7   : > { %11898 = vst [vmem:[#allocation42_spill] sm:$0xff] %v8903_v19  ;;  %v3454_v56 = vpop.f32.mrb[70].mxu0  ;;  %v3231_v15 = vpop.f32.mrb[167].mxu1 }
 0x3b8   : > { %v8906_v13 = vadd.f32 %v3454_v56, %v11899_v0  ;;  %v3456_v4 = vpop.f32.mrb[71].mxu0  ;;  %v7297_v56 = vld [vmem:[#allocation2 + $0x880] ss:$24 sps:$4 sm:$0xff]  }
 0x3b9   : > { %6438 = vmatmul.mubr.bf16.gmra.mrb[16].mxu1 %v11900_v35  ;;  %v8918_v35 = vld [vmem:[%s8341_s27] ss:$0 sm:$0xff] }
 0x3ba   : > { %3666 = vmatmul.mubr.bf16.gmra.mrb[176].mxu0 %v7294_v41  ;;  %6441 = vmatprep.mubr.bf16.mxu1 %v11901_v22  ;;  %v11905_v41 = vld [vmem:[#allocation52_spill] sm:$0xff] }
 0x3bb   : > { %3673 = vmatprep.mubr.bf16.mxu0 %v7295_v26 }
 0x3bc   : > { %v8910_v39 = vpop.f32.mrb[168].mxu1 }
 0x3bd   : > { %11902 = vst [vmem:[#allocation22_spill] sm:$0xff] %v8910_v39  ;;  %v3459_v47 = vpop.f32.mrb[72].mxu0  ;;  %v3236_v53 = vpop.f32.mrb[169].mxu1  ;;  %v11906_v39 = vld [vmem:[#allocation32_spill] sm:$0xff] }
 0x3be   : > { %v8913_v19 = vadd.f32 %v3459_v47, %v11903_v6  ;;  %v3461_v15 = vpop.f32.mrb[73].mxu0  ;;  %v8915_v0 = vpop.f32.mrb[170].mxu1  ;;  %v11907_v47 = vld [vmem:[#allocation33_spill] sm:$0xff]  ;;  %v3705_v53 = vmul.f32 %v8743_v55, %v8918_v35  ;;  %v8929_v6 = vld [vmem:[%s8347_s18] ss:$0 sm:$0xff] }
 0x3bf   : > { %11904 = vst [vmem:[#allocation23_spill] sm:$0xff] %v8915_v0  ;;  %v3462_v4 = vpop.f32.mrb[74].mxu0  ;;  %v3239_v27 = vpop.f32.mrb[171].mxu1  ;;  %v7300_v0 = vld [vmem:[#allocation2 + $0x8b0] ss:$24 sps:$4 sm:$0xff]  }
 0x3c0   : > { %v8922_v26 = vadd.f32 %v3462_v4, %v11905_v41  ;;  %v3464_v22 = vpop.f32.mrb[75].mxu0  ;;  %v3706_v27 = vmul.f32 %v8746_v43, %v8918_v35  ;;  %v3707_v4 = vmul.f32 %v8751_v11, %v8918_v35  ;;  %v8945_v20 = vadd.f32 %v8929_v6, %v3705_v53 }
 0x3c1   : > { %6442 = vmatmul.mubr.bf16.gmra.mrb[20].mxu1 %v11906_v39  ;;  %v11909_v22 = vld [vmem:[#allocation53_spill] sm:$0xff]  ;;  %v3709_v43 = vmul.f32 %v8759_v23, %v8918_v35  ;;  %v3711_v23 = vmul.f32 %v8767_v37, %v8918_v35  ;;  %v3713_v37 = vmul.f32 %v8775_v54, %v8918_v35 }
 0x3c2   : > { %3674 = vmatmul.mubr.bf16.gmra.mrb[180].mxu0 %v7297_v56  ;;  %6445 = vmatprep.mubr.bf16.mxu1 %v11907_v47  ;;  %v3708_v56 = vmul.f32 %v8754_v2, %v8918_v35  ;;  %v8950_v33 = vadd.f32 %v8929_v6, %v3706_v27  ;;  %v3710_v2 = vmul.f32 %v8762_v48, %v8918_v35  ;;  %v11913_v48 = vld [vmem:[#allocation35_spill] sm:$0xff]  ;;  %vm3905_vm0 = vcmp.lt.f32.partialorder %v8945_v20, 0.0 }
 0x3c3   : > { %3681 = vmatprep.mubr.bf16.mxu0 %v7298_v1  ;;  %v8958_v53 = vadd.f32 %v8929_v6, %v3707_v4  ;;  %v3712_v27 = vmul.f32 %v8770_v49, %v8918_v35  ;;  %v8975_v4 = vadd.f32 %v8929_v6, %v3709_v43  ;;  %v3715_v43 = vmul.f32 %v8783_v8, %v8918_v35 }
 0x3c4   : > { %v8933_v15 = vpop.f32.mrb[172].mxu1  ;;  %vm3906_vm2 = vcmp.lt.f32.partialorder %v8950_v33, 0.0  ;;  %v8981_v49 = vadd.f32 %v8929_v6, %v3710_v2  ;;  %v3716_v2 = vmul.f32 %v8786_v36, %v8918_v35  ;;  %v3717_v36 = vmul.f32 %v8791_v16, %v8918_v35 }
 0x3c5   : > { %11908 = vst [vmem:[#allocation43_spill] sm:$0xff] %v8933_v15  ;;  %v3467_v41 = vpop.f32.mrb[76].mxu0  ;;  %v3244_v39 = vpop.f32.mrb[173].mxu1  ;;  %vm3907_vm3 = vcmp.lt.f32.partialorder %v8958_v53, 0.0  ;;  %vm3909_vm7 = vcmp.lt.f32.partialorder %v8975_v4, 0.0 }
 0x3c6   : > { %v8940_v47 = vadd.f32 %v3467_v41, %v11909_v22  ;;  %v3469_v55 = vpop.f32.mrb[77].mxu0  ;;  %v8942_v1 = vpop.f32.mrb[174].mxu1  ;;  %v4002_v39 = vstv %s4001_s26  ;;  %v11911_v41 = vld [vmem:[#allocation54_spill] sm:$0xff]  ;;  %11916 = vst [vmem:[#allocation24_spill] sm:$0xff] %v8981_v49  ;;  %vm3910_vm9 = vcmp.lt.f32.partialorder %v8981_v49, 0.0  ;;  %v11973_v49 = vmov 0 }
 0x3c7   : > { %11910 = vst [vmem:[#allocation44_spill] sm:$0xff] %v8942_v1  ;;  %v3470_v15 = vpop.f32.mrb[78].mxu0  ;;  %v3247_v11 = vpop.f32.mrb[175].mxu1  ;;  %v11912_v1 = vld [vmem:[#allocation34_spill] sm:$0xff]  ;;  %vm8970_vm1 = vcmp.eq.s32.totalorder %v4002_v39, 1  ;;  %v7689_v39 = vld [vmem:[#allocation11] sm:$0xff] }
 0x3c8   : > { %v8955_v22 = vadd.f32 %v3470_v15, %v11911_v41  ;;  %v3472_v55 = vpop.f32.mrb[79].mxu0  ;;  %v8964_v11 = vadd.f32 %v8929_v6, %v3708_v56  ;;  %vm8995_vm4 = vmand %vm8970_vm1, %vm3905_vm0  ;;  %v11921_v41 = vld [vmem:[#allocation55_spill] sm:$0xff] }
 0x3c9   : > { %6446 = vmatmul.mubr.bf16.gmra.mrb[24].mxu1 %v11912_v1  ;;  %v8989_v1 = vadd.f32 %v8929_v6, %v3711_v23  ;;  %vm9014_vm6 = vmand %vm8970_vm1, %vm3906_vm2 }
 0x3ca   : > { %3682 = vmatmul.mubr.bf16.gmra.mrb[184].mxu0 %v7300_v0  ;;  %6449 = vmatprep.mubr.bf16.mxu1 %v11913_v48  ;;  %v3714_v0 = vmul.f32 %v8778_v17, %v8918_v35  ;;  %vm3908_vm5 = vcmp.lt.f32.partialorder %v8964_v11, 0.0  ;;  %v9001_v17 = vadd.f32 %v8929_v6, %v3712_v27  ;;  %v7303_v48 = vld [vmem:[#allocation2 + $0x8e0] ss:$24 sps:$4 sm:$0xff]   ;;  %v9020_v27 = vadd.f32 %v8929_v6, %v3713_v37  ;;  %vm9028_vm8 = vmand %vm8970_vm1, %vm3907_vm3 }
 0x3cb   : > { %3689 = vmatprep.mubr.bf16.mxu0 %v7301_v61  ;;  %v3718_v37 = vmul.f32 %v8794_v18, %v8918_v35  ;;  %vm9048_vm10 = vmand %vm8970_vm1, %vm3908_vm5  ;;  %vm3911_vm11 = vcmp.lt.f32.partialorder %v8989_v1, 0.0  ;;  %v9054_v18 = vadd.f32 %v8929_v6, %v3715_v43  ;;  %v9072_v43 = vadd.f32 %v8929_v6, %v3716_v2 }
 0x3cc   : > { %v8985_v56 = vpop.f32.mrb[176].mxu1  ;;  %11920 = vst [vmem:[#allocation45_spill] sm:$0xff] %v9001_v17  ;;  %11925 = vst [vmem:[#allocation26_spill] sm:$0xff] %v9020_v27  ;;  %vm3912_vm13 = vcmp.lt.f32.partialorder %v9001_v17, 0.0  ;;  %vm3913_vm15 = vcmp.lt.f32.partialorder %v9020_v27, 0.0  ;;  %v9089_v2 = vadd.f32 %v8929_v6, %v3717_v36  ;;  %v11993_v17 = vmov 0 }
 0x3cd   : > { %11917 = vst [vmem:[#allocation25_spill] sm:$0xff] %v8985_v56  ;;  %v3475_v54 = vpop.f32.mrb[80].mxu0  ;;  %v3252_v61 = vpop.f32.mrb[177].mxu1  ;;  %v11929_v56 = vld [vmem:[#allocation56_spill] sm:$0xff]  ;;  %11932 = vst [vmem:[#allocation47_spill] sm:$0xff] %v9054_v18  ;;  %v9106_v36 = vadd.f32 %v8929_v6, %v3718_v37  ;;  %vm3915_vm5 = vcmp.lt.f32.partialorder %v9054_v18, 0.0 }
 0x3ce   : > { %v9006_v55 = vadd.f32 %v3475_v54, %v11921_v41  ;;  %v3477_v8 = vpop.f32.mrb[81].mxu0  ;;  %v9008_v23 = vpop.f32.mrb[178].mxu1  ;;  %vm9066_vm12 = vmand %vm8970_vm1, %vm3909_vm7  ;;  %11936 = vst [vmem:[#allocation48_spill] sm:$0xff] %v9072_v43  ;;  %v11985_v18 = vld [vmem:[#allocation59_spill] sm:$0xff]  ;;  %v12121_v34 = vsel %vm9014_vm6, 0.0, %v8950_v33 }
 0x3cf   : > { %11922 = vst [vmem:[#allocation46_spill] sm:$0xff] %v9008_v23  ;;  %v3478_v54 = vpop.f32.mrb[82].mxu0  ;;  %v3255_v41 = vpop.f32.mrb[179].mxu1  ;;  %v9034_v23 = vadd.f32 %v8929_v6, %v3714_v0  ;;  %v3719_v0 = vmul.f32 %v8799_v50, %v8918_v35  ;;  %v3720_v50 = vmul.f32 %v8802_v46, %v8918_v35  ;;  %vm9083_vm14 = vmand %vm8970_vm1, %vm3910_vm9  ;;  %v3721_v46 = vmul.f32 %v8807_v62, %v8918_v35 }
 0x3d0   : > { %v9039_v16 = vadd.f32 %v3478_v54, %v11929_v56  ;;  %v3480_v41 = vpop.f32.mrb[83].mxu0  ;;  %v11933_v56 = vld [vmem:[#allocation36_spill] sm:$0xff]  ;;  %v11937_v54 = vmov 0  ;;  %11940 = vst [vmem:[#allocation29_spill] sm:$0xff] %v9089_v2  ;;  %vm9100_vm0 = vmand %vm8970_vm1, %vm3911_vm11  ;;  %v3722_v62 = vmul.f32 %v8810_v52, %v8918_v35  ;;  %v3723_v52 = vmul.f32 %v8815_v14, %v8918_v35 }
 0x3d1   : > { %11928 = vst [vmem:[#allocation27_spill] sm:$0xff] %v9034_v23  ;;  %6450 = vmatmul.mubr.bf16.gmra.mrb[28].mxu1 %v11933_v56  ;;  %v11934_v41 = vmov 0  ;;  %v11938_v54 = vsel %vm9083_vm14, 4294967295, %v11937_v54  ;;  %v11942_v59 = vsel %vm9100_vm0, 4294967295, %v11941_v59  ;;  %vm3914_vm2 = vcmp.lt.f32.partialorder %v9034_v23, 0.0  ;;  %11943 = vst [vmem:[#allocation49_spill] sm:$0xff] %v9106_v36 }
 0x3d2   : > { %v11935_v41 = vsel %vm9066_vm12, 4294967295, %v11934_v41  ;;  %3690 = vmatmul.mubr.bf16.gmra.mrb[188].mxu0 %v7303_v48  ;;  %11939 = vst [vmem:[#allocation28_spill] sm:$0xff] %v11938_v54  ;;  %vm9119_vm3 = vmand %vm8970_vm1, %vm3912_vm13  ;;  %v9125_v37 = vadd.f32 %v8929_v6, %v3719_v0  ;;  %v11948_v48 = vmov 0  ;;  %vm3916_vm9 = vcmp.lt.f32.partialorder %v9072_v43, 0.0  ;;  %v11996_v43 = vld [vmem:[#allocation60_spill] sm:$0xff] }
 0x3d3   : > { %v11946_v57 = vsel %vm9119_vm3, 4294967295, %v11945_v57  ;;  %vm9133_vm7 = vmand %vm8970_vm1, %vm3913_vm15  ;;  %v9139_v51 = vadd.f32 %v8929_v6, %v3720_v50  ;;  %v3724_v0 = vmul.f32 %v8818_v10, %v8918_v35  ;;  %v11954_v50 = vmov 0 }
 0x3d4   : > { %v9110_v56 = vpop.f32.mrb[180].mxu1  ;;  %11947 = vst [vmem:[#allocation30_spill] sm:$0xff] %v11946_v57  ;;  %v11949_v48 = vsel %vm9133_vm7, 4294967295, %v11948_v48  ;;  %vm9155_vm11 = vmand %vm8970_vm1, %vm3914_vm2  ;;  %vm3917_vm13 = vcmp.lt.f32.partialorder %v9089_v2, 0.0  ;;  %v3725_v10 = vmul.f32 %v8823_v25, %v8918_v35  ;;  %v11963_v54 = vmov 0 }
 0x3d5   : > { %11944 = vst [vmem:[#allocation50_spill] sm:$0xff] %v9110_v56  ;;  %v3483_v56 = vpop.f32.mrb[84].mxu0  ;;  %v3260_v28 = vpop.f32.mrb[181].mxu1  ;;  %11950 = vst [vmem:[#allocation31_spill] sm:$0xff] %v11949_v48  ;;  %v11955_v50 = vsel %vm9155_vm11, 4294967295, %v11954_v50  ;;  %vm3919_vm2 = vcmp.lt.f32.partialorder %v9125_v37, 0.0 }
 0x3d6   : > { %11951 = vst [vmem:[#allocation51_spill] sm:$0xff] %v9139_v51  ;;  %v9144_v14 = vadd.f32 %v3483_v56, %v11952_v30  ;;  %v3485_v28 = vpop.f32.mrb[85].mxu0  ;;  %v9146_v21 = vpop.f32.mrb[182].mxu1  ;;  %11956 = vst [vmem:[#allocation32_spill] sm:$0xff] %v11955_v50  ;;  %v9161_v30 = vadd.f32 %v8929_v6, %v3721_v46  ;;  %v3726_v46 = vmul.f32 %v8826_v40, %v8918_v35  ;;  %vm11969_vm3 = vcmp.lt.f32.partialorder %v9106_v36, 0.0 }
 0x3d7   : > { %11953 = vst [vmem:[#allocation52_spill] sm:$0xff] %v9146_v21  ;;  %v3486_v56 = vpop.f32.mrb[86].mxu0  ;;  %v3263_v28 = vpop.f32.mrb[183].mxu1  ;;  %vm9169_vm15 = vmand %vm8970_vm1, %vm3915_vm5  ;;  %v9175_v21 = vadd.f32 %v8929_v6, %v3722_v62  ;;  %v9195_v40 = vadd.f32 %v8929_v6, %v3723_v52  ;;  %v9212_v52 = vadd.f32 %v8929_v6, %v3724_v0  ;;  %v11970_v62 = vmov 0 }
 0x3d8   : > { %11957 = vst [vmem:[#allocation33_spill] sm:$0xff] %v9161_v30  ;;  %v11959_v58 = vsel %vm9169_vm15, 4294967295, %v11958_v58  ;;  %v9180_v25 = vadd.f32 %v3486_v56, %v11962_v12  ;;  %v3488_v28 = vpop.f32.mrb[87].mxu0  ;;  %vm9189_vm5 = vmand %vm8970_vm1, %vm3916_vm9  ;;  %v3727_v12 = vmul.f32 %v8831_v29, %v8918_v35  ;;  %v11966_v56 = vmov 0 }
 0x3d9   : > { %11960 = vst [vmem:[#allocation53_spill] sm:$0xff] %v11959_v58  ;;  %11961 = vst [vmem:[#allocation54_spill] sm:$0xff] %v9175_v21  ;;  %v11964_v54 = vsel %vm9189_vm5, 4294967295, %v11963_v54  ;;  %v3728_v29 = vmul.f32 %v8834_v3, %v8918_v35  ;;  %v9229_v0 = vadd.f32 %v8929_v6, %v3725_v10  ;;  %v3729_v3 = vmul.f32 %v8841_v9, %v8918_v35 }
 0x3da   : > { %11965 = vst [vmem:[#allocation34_spill] sm:$0xff] %v11964_v54  ;;  %vm9206_vm9 = vmand %vm8970_vm1, %vm3917_vm13  ;;  %v9244_v27 = vadd.f32 %v8929_v6, %v3726_v46  ;;  %v3730_v10 = vmul.f32 %v8846_v60, %v8918_v35  ;;  %vm11977_vm14 = vcmp.lt.f32.partialorder %v9139_v51, 0.0  ;;  %v11978_v28 = vmov 0 }
 0x3db   : > { %v11967_v56 = vsel %vm9206_vm9, 4294967295, %v11966_v56  ;;  %vm9223_vm13 = vmand %vm8970_vm1, %vm11969_vm3  ;;  %v9263_v46 = vadd.f32 %v8929_v6, %v3727_v12  ;;  %v3731_v60 = vmul.f32 %v8853_v31, %v8918_v35  ;;  %vm11981_vm11 = vcmp.lt.f32.partialorder %v9161_v30, 0.0 }
 0x3dc   : > { %11968 = vst [vmem:[#allocation35_spill] sm:$0xff] %v11967_v56  ;;  %v11971_v62 = vsel %vm9223_vm13, 4294967295, %v11970_v62  ;;  %vm9238_vm7 = vmand %vm8970_vm1, %vm3919_vm2  ;;  %v9248_v48 = vpop.f32.mrb[184].mxu1  ;;  %v11982_v9 = vmov 0  ;;  %v9277_v50 = vadd.f32 %v8929_v6, %v3728_v29  ;;  %v3732_v12 = vmul.f32 %v8858_v5, %v8918_v35  ;;  %v12034_v56 = vld [vmem:[#allocation62_spill] sm:$0xff] }
 0x3dd   : > { %11972 = vst [vmem:[#allocation55_spill] sm:$0xff] %v11971_v62  ;;  %v11974_v49 = vsel %vm9238_vm7, 4294967295, %v11973_v49  ;;  %11975 = vst [vmem:[#allocation56_spill] sm:$0xff] %v9244_v27  ;;  %v3268_v23 = vpop.f32.mrb[185].mxu1  ;;  %v11988_v29 = vmov 0  ;;  %v9299_v5 = vadd.f32 %v8929_v6, %v3729_v3  ;;  %vm11992_vm5 = vcmp.lt.f32.partialorder %v9195_v40, 0.0 }
 0x3de   : > { %11976 = vst [vmem:[#allocation36_spill] sm:$0xff] %v9248_v48  ;;  %vm9257_vm2 = vmand %vm8970_vm1, %vm11977_vm14  ;;  %v3491_v48 = vpop.f32.mrb[88].mxu0  ;;  %v9284_v58 = vpop.f32.mrb[186].mxu1  ;;  %v3734_v3 = vmul.f32 %v8870_v24, %v8918_v35  ;;  %v11998_v57 = vmov 0  ;;  %v9333_v24 = vadd.f32 %v8929_v6, %v3731_v60  ;;  %vm12001_vm9 = vcmp.lt.f32.partialorder %v9229_v0, 0.0 }
 0x3df   : > { %v11979_v28 = vsel %vm9257_vm2, 4294967295, %v11978_v28  ;;  %vm9271_vm15 = vmand %vm8970_vm1, %vm11981_vm11  ;;  %v9282_v31 = vadd.f32 %v3491_v48, %v11985_v18  ;;  %v3493_v23 = vpop.f32.mrb[89].mxu0  ;;  %11986 = vst [vmem:[#allocation59_spill] sm:$0xff] %v9284_v58  ;;  %vm11987_vm11 = vcmp.lt.f32.partialorder %v9175_v21, 0.0  ;;  %v3733_v18 = vmul.f32 %v8865_v42, %v8918_v35 }
 0x3e0   : > { %11980 = vst [vmem:[#allocation57_spill] sm:$0xff] %v11979_v28  ;;  %v11983_v9 = vsel %vm9271_vm15, 4294967295, %v11982_v9  ;;  %vm9293_vm14 = vmand %vm8970_vm1, %vm11987_vm11  ;;  %v3494_v48 = vpop.f32.mrb[90].mxu0  ;;  %v3271_v23 = vpop.f32.mrb[187].mxu1  ;;  %v9313_v58 = vadd.f32 %v8929_v6, %v3730_v10  ;;  %vm3927_vm11 = vcmp.lt.f32.partialorder %v9263_v46, 0.0  ;;  %v9350_v60 = vadd.f32 %v8929_v6, %v3732_v12 }
 0x3e1   : > { %11984 = vst [vmem:[#allocation58_spill] sm:$0xff] %v11983_v9  ;;  %v11989_v29 = vsel %vm9293_vm14, 4294967295, %v11988_v29  ;;  %11991 = vst [vmem:[#allocation87_spill] sm:$0xff] %v9299_v5  ;;  %v9318_v42 = vadd.f32 %v3494_v48, %v11996_v43  ;;  %v3496_v23 = vpop.f32.mrb[91].mxu0  ;;  %v3735_v43 = vmul.f32 %v8877_v38, %v8918_v35  ;;  %v12002_v48 = vmov 0  ;;  %v12022_v9 = vld [vmem:[#allocation61_spill] sm:$0xff] }
 0x3e2   : > { %11990 = vst [vmem:[#allocation86_spill] sm:$0xff] %v11989_v29  ;;  %vm9307_vm12 = vmand %vm8970_vm1, %vm11992_vm5  ;;  %vm11997_vm5 = vcmp.lt.f32.partialorder %v9212_v52, 0.0  ;;  %v3736_v38 = vmul.f32 %v8882_v45, %v8918_v35  ;;  %vm12005_vm13 = vcmp.lt.f32.partialorder %v9244_v27, 0.0  ;;  %v12006_v10 = vmov 0  ;;  %v9496_v29 = vld [vmem:[%s8351_s17] ss:$0 sm:$0xff] }
 0x3e3   : > { %v11994_v17 = vsel %vm9307_vm12, 4294967295, %v11993_v17  ;;  %11995 = vst [vmem:[#allocation88_spill] sm:$0xff] %v9313_v58  ;;  %vm9327_vm3 = vmand %vm8970_vm1, %vm11997_vm5  ;;  %v9367_v12 = vadd.f32 %v8929_v6, %v3733_v18  ;;  %v3737_v45 = vmul.f32 %v8889_v44, %v8918_v35  ;;  %v9382_v36 = vadd.f32 %v8929_v6, %v3734_v3 }
 0x3e4   : > { %v11999_v57 = vsel %vm9327_vm3, 4294967295, %v11998_v57  ;;  %12000 = vst [vmem:[#allocation60_spill] sm:$0xff] %v9333_v24  ;;  %vm9344_vm5 = vmand %vm8970_vm1, %vm12001_vm9  ;;  %v3738_v18 = vmul.f32 %v8894_v7, %v8918_v35  ;;  %v9386_v62 = vpop.f32.mrb[188].mxu1  ;;  %vm12014_vm0 = vcmp.lt.f32.partialorder %v9277_v50, 0.0  ;;  %v9401_v3 = vadd.f32 %v8929_v6, %v3735_v43 }
 0x3e5   : > { %v12003_v48 = vsel %vm9344_vm5, 4294967295, %v12002_v48  ;;  %12004 = vst [vmem:[#allocation89_spill] sm:$0xff] %v9350_v60  ;;  %vm9361_vm9 = vmand %vm8970_vm1, %vm12005_vm13  ;;  %v3739_v7 = vmul.f32 %v8901_v63, %v8918_v35  ;;  %v3276_v51 = vpop.f32.mrb[189].mxu1  ;;  %vm12018_vm15 = vcmp.lt.f32.partialorder %v9299_v5, 0.0  ;;  %v12019_v44 = vmov 0 }
 0x3e6   : > { %v12007_v10 = vsel %vm9361_vm9, 4294967295, %v12006_v10  ;;  %12009 = vst [vmem:[#allocation91_spill] sm:$0xff] %v9367_v12  ;;  %vm9376_vm7 = vmand %vm8970_vm1, %vm3927_vm11  ;;  %v9415_v30 = vadd.f32 %v8929_v6, %v3736_v38  ;;  %v3740_v43 = vmul.f32 %v8906_v13, %v8918_v35  ;;  %v9422_v28 = vpop.f32.mrb[190].mxu1  ;;  %v12025_v13 = vmov 0 }
 0x3e7   : > { %12008 = vst [vmem:[#allocation90_spill] sm:$0xff] %v12007_v10  ;;  %12012 = vst [vmem:[#allocation92_spill] sm:$0xff] %v9382_v36  ;;  %v3279_v38 = vpop.f32.mrb[191].mxu1  ;;  %vm12029_vm14 = vcmp.lt.f32.partialorder %v9333_v24, 0.0  ;;  %v9452_v2 = vadd.f32 %v8929_v6, %v3738_v18  ;;  %v12036_v18 = vmov 0  ;;  %vm3935_vm13 = vcmp.lt.f32.partialorder %v9401_v3, 0.0 }
 0x3e8   : > { %12013 = vst [vmem:[#allocation93_spill] sm:$0xff] %v9386_v62  ;;  %vm9395_vm11 = vmand %vm8970_vm1, %vm12014_vm0  ;;  %v3499_v62 = vpop.f32.mrb[92].mxu0  ;;  %vm12039_vm5 = vcmp.lt.f32.partialorder %v9367_v12, 0.0  ;;  %v12064_v5 = vmov 0 }
 0x3e9   : > { %12017 = vst [vmem:[#allocation94_spill] sm:$0xff] %v9401_v3  ;;  %vm9409_vm2 = vmand %vm8970_vm1, %vm12018_vm15  ;;  %v9420_v63 = vadd.f32 %v3499_v62, %v12022_v9  ;;  %v3501_v51 = vpop.f32.mrb[93].mxu0  ;;  %vm12024_vm15 = vcmp.lt.f32.partialorder %v9313_v58, 0.0  ;;  %v9440_v62 = vadd.f32 %v8929_v6, %v3737_v45  ;;  %v3741_v45 = vmul.f32 %v8913_v19, %v8918_v35 }
 0x3ea   : > { %v12020_v44 = vsel %vm9409_vm2, 4294967295, %v12019_v44  ;;  %12023 = vst [vmem:[#allocation61_spill] sm:$0xff] %v9422_v28  ;;  %vm9434_vm0 = vmand %vm8970_vm1, %vm12024_vm15  ;;  %v3502_v9 = vpop.f32.mrb[94].mxu0  ;;  %v12030_v51 = vmov 0  ;;  %v9475_v19 = vadd.f32 %v8929_v6, %v3739_v7  ;;  %v9493_v7 = vadd.f32 %v8929_v6, %v3740_v43 }
 0x3eb   : > { %12021 = vst [vmem:[#allocation95_spill] sm:$0xff] %v12020_v44  ;;  %v12026_v13 = vsel %vm9434_vm0, 4294967295, %v12025_v13  ;;  %12028 = vst [vmem:[#allocation97_spill] sm:$0xff] %v9440_v62  ;;  %v9457_v28 = vadd.f32 %v3502_v9, %v12034_v56  ;;  %v3504_v38 = vpop.f32.mrb[95].mxu0  ;;  %v12045_v43 = vmov 0  ;;  %vm3937_vm9 = vcmp.lt.f32.partialorder %v9440_v62, 0.0 }
 0x3ec   : > { %12027 = vst [vmem:[#allocation96_spill] sm:$0xff] %v12026_v13  ;;  %vm9446_vm12 = vmand %vm8970_vm1, %vm12029_vm14  ;;  %vm12035_vm14 = vcmp.lt.f32.partialorder %v9350_v60, 0.0  ;;  %v12040_v38 = vmov 0  ;;  %v12048_v9 = vmov 0  ;;  %v9527_v21 = vadd.f32 %v8929_v6, %v3741_v45  ;;  %v6359_v13 = vpop.f32.mrb[192].mxu1 }
 0x3ed   : > { %v12031_v51 = vsel %vm9446_vm12, 4294967295, %v12030_v51  ;;  %12033 = vst [vmem:[#allocation99_spill] sm:$0xff] %v9452_v2  ;;  %vm9469_vm15 = vmand %vm8970_vm1, %vm12035_vm14  ;;  %v3742_v58 = vmul.f32 %v8922_v26, %v8918_v35  ;;  %v12053_v56 = vmov 0  ;;  %v3743_v45 = vmul.f32 %v8940_v47, %v8918_v35  ;;  %v3507_v44 = vpop.f32.mrb[96].mxu0  ;;  %v4301_v24 = vpop.f32.mrb[193].mxu1 }
 0x3ee   : > { %12032 = vst [vmem:[#allocation98_spill] sm:$0xff] %v12031_v51  ;;  %v12037_v18 = vsel %vm9469_vm15, 4294967295, %v12036_v18  ;;  %vm9487_vm14 = vmand %vm8970_vm1, %vm12039_vm5  ;;  %vm12044_vm5 = vcmp.lt.f32.partialorder %v9382_v36, 0.0  ;;  %v4310_v26 = vadd.f32 %v6359_v13, %v9496_v29  ;;  %v12055_v60 = vmov 0  ;;  %v3509_v51 = vpop.f32.mrb[97].mxu0  ;;  %v6360_v27 = vpop.f32.mrb[194].mxu1 }
 0x3ef   : > { %12038 = vst [vmem:[#allocation62_spill] sm:$0xff] %v12037_v18  ;;  %v12041_v38 = vsel %vm9487_vm14, 4294967295, %v12040_v38  ;;  %12043 = vst [vmem:[#allocation101_spill] sm:$0xff] %v9493_v7  ;;  %v12058_v18 = vld [vmem:[#allocation63_spill] sm:$0xff]  ;;  %v4302_v13 = vadd.f32 %v9496_v29, %v4301_v24  ;;  %v3510_v51 = vpop.f32.mrb[98].mxu0  ;;  %v4313_v24 = vadd.f32 %v6360_v27, %v9496_v29  ;;  %vm12063_vm14 = vcmp.lt.f32.partialorder %v9475_v19, 0.0 }
 0x3f0   : > { %12042 = vst [vmem:[#allocation100_spill] sm:$0xff] %v12041_v38  ;;  %vm9511_vm3 = vmand %vm8970_vm1, %vm12044_vm5  ;;  %vm12052_vm5 = vcmp.lt.f32.partialorder %v9415_v30, 0.0  ;;  %v9559_v47 = vadd.f32 %v3507_v44, %v12058_v18  ;;  %v12060_v38 = vmov 0  ;;  %v6186_v44 = vmul.f32 -1.442695, %v4310_v26  ;;  %v4304_v18 = vpop.f32.mrb[195].mxu1 }
 0x3f1   : > { %v12046_v43 = vsel %vm9511_vm3, 4294967295, %v12045_v43  ;;  %vm9521_vm2 = vmand %vm8970_vm1, %vm3935_vm13  ;;  %12051 = vst [vmem:[#allocation104_spill] sm:$0xff] %v9527_v21  ;;  %v9587_v12 = vadd.f32 %v8929_v6, %v3742_v58  ;;  %v6184_v36 = vmul.f32 -1.442695, %v4302_v13  ;;  %v3512_v3 = vpop.f32.mrb[99].mxu0  ;;  %v12069_v27 = vmov 0 }
 0x3f2   : > { %12047 = vst [vmem:[#allocation102_spill] sm:$0xff] %v12046_v43  ;;  %v12049_v9 = vsel %vm9521_vm2, 4294967295, %v12048_v9  ;;  %vm9538_vm13 = vmand %vm8970_vm1, %vm12052_vm5  ;;  %vm3941_vm2 = vcmp.lt.f32.partialorder %v9527_v21, 0.0  ;;  %v12067_v43 = vld [vmem:[#allocation64_spill] sm:$0xff]  ;;  %7304 = vpow2.f32 %v6186_v44  ;;  %v6187_v10 = vmul.f32 -1.442695, %v4313_v24 }
 0x3f3   : > { %12050 = vst [vmem:[#allocation103_spill] sm:$0xff] %v12049_v9  ;;  %v12054_v56 = vsel %vm9538_vm13, 4294967295, %v12053_v56  ;;  %vm9553_vm5 = vmand %vm8970_vm1, %vm3937_vm9  ;;  %vm12059_vm9 = vcmp.lt.f32.partialorder %v9452_v2, 0.0  ;;  %v9590_v26 = vadd.f32 %v3510_v51, %v12067_v43  ;;  %v9601_v9 = vadd.f32 %v8929_v6, %v3743_v45  ;;  %v12100_v21 = vld [vmem:[#allocation66_spill] sm:$0xff] }
 0x3f4   : > { %v12056_v60 = vsel %vm9553_vm5, 4294967295, %v12055_v60  ;;  %vm9572_vm0 = vmand %vm8970_vm1, %vm12059_vm9  ;;  %12066 = vst [vmem:[#allocation106_spill] sm:$0xff] %v9587_v12  ;;  %vm12068_vm9 = vcmp.lt.f32.partialorder %v9493_v7, 0.0  ;;  %v4305_v58 = vadd.f32 %v9496_v29, %v4304_v18  ;;  %v3744_v13 = vmul.f32 %v8955_v22, %v8918_v35 }
 0x3f5   : > { %12057 = vst [vmem:[#allocation105_spill] sm:$0xff] %v12056_v60  ;;  %v12061_v38 = vsel %vm9572_vm0, 4294967295, %v12060_v38  ;;  %vm9581_vm3 = vmand %vm8970_vm1, %vm12063_vm14  ;;  %7306 = vpow2.f32 %v6184_v36  ;;  %v3745_v44 = vmul.f32 %v9006_v55, %v8918_v35  ;;  %v12073_v22 = vmov 0 }
 0x3f6   : > { %12062 = vst [vmem:[#allocation63_spill] sm:$0xff] %v12061_v38  ;;  %v12065_v5 = vsel %vm9581_vm3, 4294967295, %v12064_v5  ;;  %vm9596_vm15 = vmand %vm8970_vm1, %vm12068_vm9  ;;  %7308 = vpow2.f32 %v6187_v10  ;;  %v6185_v51 = vmul.f32 -1.442695, %v4305_v58  ;;  %v3746_v55 = vmul.f32 %v9039_v16, %v8918_v35  ;;  %v6363_v10 = vpop.f32.mrb[196].mxu1  ;;  %v3515_v58 = vpop.f32.mrb[100].mxu0 }
 0x3f7   : > { %v12070_v27 = vsel %vm9596_vm15, 4294967295, %v12069_v27  ;;  %12072 = vst [vmem:[#allocation107_spill] sm:$0xff] %v9601_v9  ;;  %vm9627_vm14 = vmand %vm8970_vm1, %vm3941_vm2  ;;  %v3747_v36 = vmul.f32 %v9144_v14, %v8918_v35  ;;  %vm3942_vm9 = vcmp.lt.f32.partialorder %v9587_v12, 0.0  ;;  %vm3943_vm0 = vcmp.lt.f32.partialorder %v9601_v9, 0.0  ;;  %v4317_v18 = vpop.f32.mrb[197].mxu1  ;;  %v12077_v16 = vld [vmem:[#allocation65_spill] sm:$0xff] }
 0x3f8   : > { %12071 = vst [vmem:[#allocation64_spill] sm:$0xff] %v12070_v27  ;;  %v12074_v22 = vsel %vm9627_vm14, 4294967295, %v12073_v22  ;;  %7310 = vpow2.f32 %v6185_v51  ;;  %v4326_v45 = vadd.f32 %v6363_v10, %v9496_v29  ;;  %v9639_v3 = vadd.f32 %v8929_v6, %v3744_v13  ;;  %v3517_v14 = vpop.f32.mrb[101].mxu0  ;;  %v6364_v38 = vpop.f32.mrb[198].mxu1  ;;  %vm9658_vm2 = vmand %vm8970_vm1, %vm3942_vm9 }
 0x3f9   : > { %12075 = vst [vmem:[#allocation108_spill] sm:$0xff] %v12074_v22  ;;  %v3748_v24 = vmul.f32 %v9180_v25, %v8918_v35  ;;  %v9644_v43 = vadd.f32 %v3515_v58, %v12077_v16  ;;  %v4318_v2 = vadd.f32 %v9496_v29, %v4317_v18  ;;  %v9651_v10 = vadd.f32 %v8929_v6, %v3745_v44  ;;  %v3518_v13 = vpop.f32.mrb[102].mxu0  ;;  %v4320_v62 = vpop.f32.mrb[199].mxu1  ;;  %vm9675_vm14 = vmand %vm8970_vm1, %vm3943_vm0 }
 0x3fa   : > { %12076 = vst [vmem:[#allocation109_spill] sm:$0xff] %v9639_v3  ;;  %v6190_v7 = vmul.f32 -1.442695, %v4326_v45  ;;  %v4329_v27 = vadd.f32 %v6364_v38, %v9496_v29  ;;  %v12079_v25 = vmov 0  ;;  %v9663_v18 = vadd.f32 %v8929_v6, %v3746_v55  ;;  %v3520_v38 = vpop.f32.mrb[103].mxu0 }
 0x3fb   : > { %12078 = vst [vmem:[#allocation65_spill] sm:$0xff] %v9651_v10  ;;  %v12080_v25 = vsel %vm9658_vm2, 4294967295, %v12079_v25  ;;  %v9666_v58 = vadd.f32 %v8929_v6, %v3747_v36  ;;  %v6188_v44 = vmul.f32 -1.442695, %v4318_v2  ;;  %v9669_v45 = vadd.f32 %v3518_v13, %v8693_v32 }
 0x3fc   : > { %12081 = vst [vmem:[#allocation110_spill] sm:$0xff] %v12080_v25  ;;  %12082 = vst [vmem:[#allocation111_spill] sm:$0xff] %v9663_v18  ;;  %v12084_v16 = vmov 0  ;;  %v3749_v55 = vmul.f32 %v9282_v31, %v8918_v35  ;;  %7312 = vpow2.f32 %v6190_v7  ;;  %v6191_v14 = vmul.f32 -1.442695, %v4329_v27  ;;  %v7305_v13 = vpop.eup %7304  ;;  %v6367_v27 = vpop.f32.mrb[200].mxu1 }
 0x3fd   : > { %12083 = vst [vmem:[#allocation112_spill] sm:$0xff] %v9666_v58  ;;  %v12085_v16 = vsel %vm9675_vm14, 4294967295, %v12084_v16  ;;  %v4321_v36 = vadd.f32 %v9496_v29, %v4320_v62  ;;  %v9684_v32 = vadd.f32 %v8929_v6, %v3748_v24  ;;  %v3750_v2 = vmul.f32 %v9318_v42, %v8918_v35  ;;  %v3523_v38 = vpop.f32.mrb[104].mxu0  ;;  %v4333_v62 = vpop.f32.mrb[201].mxu1 }
 0x3fe   : > { %12086 = vst [vmem:[#allocation113_spill] sm:$0xff] %v12085_v16  ;;  %7314 = vpow2.f32 %v6188_v44  ;;  %vm3945_vm0 = vcmp.lt.f32.partialorder %v9651_v10, 0.0  ;;  %vm3946_vm9 = vcmp.lt.f32.partialorder %v9663_v18, 0.0  ;;  %v4974_v42 = vadd.f32 1.0, %v7305_v13 }
 0x3ff   : > { %12087 = vst [vmem:[#allocation114_spill] sm:$0xff] %v9684_v32  ;;  %7316 = vpow2.f32 %v6191_v14  ;;  %v6189_v31 = vmul.f32 -1.442695, %v4321_v36  ;;  %v7307_v7 = vpop.eup %7306  ;;  %vm12088_vm5 = vcmp.lt.f32.partialorder %v9639_v3, 0.0  ;;  %v12089_v44 = vmov 0  ;;  %vm9713_vm15 = vmand %vm8970_vm1, %vm3945_vm0 }
 0x400   : > { %v7309_v24 = vpop.eup %7308  ;;  %vm9701_vm2 = vmand %vm8970_vm1, %vm12088_vm5  ;;  %v9706_v14 = vadd.f32 %v8929_v6, %v3749_v55  ;;  %v4972_v36 = vadd.f32 1.0, %v7307_v7  ;;  %v4342_v51 = vadd.f32 %v6367_v27, %v9496_v29  ;;  %v12093_v13 = vmov 0  ;;  %v6368_v7 = vpop.f32.mrb[202].mxu1 }
 0x401   : > { %v12090_v44 = vsel %vm9701_vm2, 4294967295, %v12089_v44  ;;  %7318 = vpow2.f32 %v6189_v31  ;;  %v12094_v13 = vsel %vm9713_vm15, 4294967295, %v12093_v13  ;;  %v9719_v12 = vadd.f32 %v8929_v6, %v3750_v2  ;;  %v3525_v31 = vpop.f32.mrb[105].mxu0  ;;  %vm9725_vm14 = vmand %vm8970_vm1, %vm3946_vm9 }
 0x402   : > { %12091 = vst [vmem:[#allocation115_spill] sm:$0xff] %v12090_v44  ;;  %12092 = vst [vmem:[#allocation116_spill] sm:$0xff] %v9706_v14  ;;  %7320 = vrcp.f32 %v4974_v42  ;;  %v4975_v55 = vadd.f32 1.0, %v7309_v24  ;;  %v7311_v25 = vpop.eup %7310  ;;  %v12097_v27 = vmov 0  ;;  %v9730_v22 = vadd.f32 %v3523_v38, %v12100_v21  ;;  %v3526_v42 = vpop.f32.mrb[106].mxu0  ;;  %v12105_v21 = vld [vmem:[#allocation67_spill] sm:$0xff] }
 0x403   : > { %12095 = vst [vmem:[#allocation117_spill] sm:$0xff] %v12094_v13  ;;  %12096 = vst [vmem:[#allocation118_spill] sm:$0xff] %v9719_v12  ;;  %v12098_v27 = vsel %vm9725_vm14, 4294967295, %v12097_v27  ;;  %7322 = vrcp.f32 %v4972_v36  ;;  %v6194_v9 = vmul.f32 -1.442695, %v4342_v51  ;;  %v4334_v2 = vadd.f32 %v9496_v29, %v4333_v62  ;;  %v4336_v24 = vpop.f32.mrb[203].mxu1 }
 0x404   : > { %12099 = vst [vmem:[#allocation119_spill] sm:$0xff] %v12098_v27  ;;  %vm12101_vm0 = vcmp.lt.f32.partialorder %v9666_v58, 0.0  ;;  %v12102_v31 = vmov 0  ;;  %v3751_v16 = vmul.f32 %v9420_v63, %v8918_v35  ;;  %7324 = vrcp.f32 %v4975_v55  ;;  %v3528_v51 = vpop.f32.mrb[107].mxu0 }
 0x405   : > { %vm9737_vm5 = vmand %vm8970_vm1, %vm12101_vm0  ;;  %v4973_v36 = vadd.f32 1.0, %v7311_v25  ;;  %v9744_v38 = vadd.f32 %v3526_v42, %v12105_v21  ;;  %vm12106_vm9 = vcmp.lt.f32.partialorder %v9684_v32, 0.0  ;;  %v12107_v62 = vmov 0  ;;  %v3531_v18 = vpop.f32.mrb[108].mxu0 }
 0x406   : > { %v12103_v31 = vsel %vm9737_vm5, 4294967295, %v12102_v31  ;;  %vm9750_vm3 = vmand %vm8970_vm1, %vm12106_vm9  ;;  %vm3949_vm0 = vcmp.lt.f32.partialorder %v9706_v14, 0.0  ;;  %7326 = vpow2.f32 %v6194_v9  ;;  %v6192_v60 = vmul.f32 -1.442695, %v4334_v2  ;;  %v7313_v42 = vpop.eup %7312  ;;  %v6371_v9 = vpop.f32.mrb[204].mxu1 }
 0x407   : > { %12104 = vst [vmem:[#allocation66_spill] sm:$0xff] %v12103_v31  ;;  %v12108_v62 = vsel %vm9750_vm3, 4294967295, %v12107_v62  ;;  %v4345_v63 = vadd.f32 %v6368_v7, %v9496_v29  ;;  %vm3950_vm13 = vcmp.lt.f32.partialorder %v9719_v12, 0.0  ;;  %7328 = vrcp.f32 %v4973_v36  ;;  %vm9777_vm9 = vmand %vm8970_vm1, %vm3949_vm0  ;;  %v4349_v32 = vpop.f32.mrb[205].mxu1  ;;  %v3533_v13 = vpop.f32.mrb[109].mxu0  ;;  %v7688_v12 = vld [vmem:[#allocation11 + $0x10] sm:$0xff] }
 0x408   : > { %12109 = vst [vmem:[#allocation67_spill] sm:$0xff] %v12108_v62  ;;  %v4337_v55 = vadd.f32 %v9496_v29, %v4336_v24  ;;  %7330 = vpow2.f32 %v6192_v60  ;;  %v7315_v2 = vpop.eup %7314  ;;  %v12110_v36 = vmov 0  ;;  %v9782_v60 = vadd.f32 %v8929_v6, %v3751_v16  ;;  %vm9788_vm14 = vmand %vm8970_vm1, %vm3950_vm13  ;;  %v12116_v62 = vld [vmem:[#allocation68_spill] sm:$0xff]  ;;  %v6372_v58 = vpop.f32.mrb[206].mxu1 }
 0x409   : > { %v6195_v7 = vmul.f32 -1.442695, %v4345_v63  ;;  %v12111_v36 = vsel %vm9777_vm9, 4294967295, %v12110_v36  ;;  %v4978_v63 = vadd.f32 1.0, %v7313_v42  ;;  %v7317_v21 = vpop.eup %7316  ;;  %v12113_v24 = vmov 0  ;;  %v4352_v3 = vpop.f32.mrb[207].mxu1 }
 0x40a   : > { %12112 = vst [vmem:[#allocation120_spill] sm:$0xff] %v12111_v36  ;;  %v12114_v24 = vsel %vm9788_vm14, 4294967295, %v12113_v24  ;;  %v4976_v51 = vadd.f32 1.0, %v7315_v2  ;;  %v6193_v25 = vmul.f32 -1.442695, %v4337_v55  ;;  %v4358_v27 = vadd.f32 %v6371_v9, %v9496_v29  ;;  %v3534_v2 = vpop.f32.mrb[110].mxu0 }
 0x40b   : > { %12115 = vst [vmem:[#allocation121_spill] sm:$0xff] %v12114_v24  ;;  %7332 = vpow2.f32 %v6195_v7  ;;  %v3752_v16 = vmul.f32 %v9457_v28, %v8918_v35  ;;  %v4979_v42 = vadd.f32 1.0, %v7317_v21  ;;  %v9796_v10 = vadd.f32 %v3531_v18, %v12116_v62  ;;  %v7319_v31 = vpop.eup %7318  ;;  %v3536_v13 = vpop.f32.mrb[111].mxu0 }
 0x40c   : > { %7334 = vrcp.f32 %v4978_v63  ;;  %v6198_v55 = vmul.f32 -1.442695, %v4358_v27  ;;  %v4350_v9 = vadd.f32 %v9496_v29, %v4349_v32  ;;  %v7321_v44 = vpop.eup %7320  ;;  %vm3951_vm13 = vcmp.lt.f32.partialorder %v9782_v60, 0.0 }
 0x40d   : > { %7336 = vrcp.f32 %v4976_v51  ;;  %v4977_v18 = vadd.f32 1.0, %v7319_v31  ;;  %v7323_v62 = vpop.eup %7322  ;;  %v12117_v21 = vsel %vm9028_vm8, 0.0, %v8958_v53  ;;  %v5358_v51 = vsub.f32 1.0, %v7321_v44  ;;  %vm9846_vm6 = vmand %vm8970_vm1, %vm3951_vm13 }
 0x40e   : > { %7338 = vrcp.f32 %v4979_v42  ;;  %v5262_v27 = vmul.f32 %v7321_v44, %v12117_v21  ;;  %v6196_v32 = vmul.f32 -1.442695, %v4350_v9  ;;  %v7325_v63 = vpop.eup %7324  ;;  %v9811_v7 = vadd.f32 %v8929_v6, %v3752_v16 }
 0x40f   : > { %7340 = vpow2.f32 %v6193_v25  ;;  %v12119_v28 = vsel %vm8995_vm4, 0.0, %v8945_v20  ;;  %v5356_v31 = vsub.f32 1.0, %v7323_v62  ;;  %v5454_v8 = vmul.f32 %v7688_v12, %v5358_v51  ;;  %v7690_v12 = vld [vmem:[#allocation11 + $0x18] sm:$0xff] }
 0x410   : > { %12118 = vst [vmem:[#allocation68_spill] sm:$0xff] %v9811_v7  ;;  %v5260_v42 = vmul.f32 %v7323_v62, %v12119_v28  ;;  %7342 = vrcp.f32 %v4977_v18  ;;  %v7327_v13 = vpop.eup %7326  ;;  %v12120_v53 = vsel %vm9048_vm10, 0.0, %v8964_v11  ;;  %v5359_v25 = vsub.f32 1.0, %v7325_v63  ;;  %v9823_v28 = vpop.f32.mrb[208].mxu1 }
 0x411   : > { %v5263_v44 = vmul.f32 %v7325_v63, %v12120_v53  ;;  %7344 = vpow2.f32 %v6198_v55  ;;  %v7329_v9 = vpop.eup %7328  ;;  %v3753_v16 = vmul.f32 %v9559_v47, %v8918_v35  ;;  %v5452_v21 = vmul.f32 %v7689_v39, %v5356_v31  ;;  %v3539_v63 = vpop.f32.mrb[112].mxu0  ;;  %v12122_v39 = vld [vmem:[#allocation69_spill] sm:$0xff] }
 0x412   : > { %v4982_v20 = vadd.f32 1.0, %v7327_v13  ;;  %7346 = vpow2.f32 %v6196_v32  ;;  %v7331_v18 = vpop.eup %7330  ;;  %v5550_v62 = vadd.f32 %v5454_v8, %v5262_v27  ;;  %v5455_v51 = vmul.f32 %v7690_v12, %v5359_v25  ;;  %v9829_v53 = vpop.f32.mrb[209].mxu1  ;;  %v7691_v25 = vld [vmem:[#allocation11 + $0x8] sm:$0xff] }
 0x413   : > { %v5261_v11 = vmul.f32 %v7329_v9, %v12121_v34  ;;  %v5357_v55 = vsub.f32 1.0, %v7329_v9  ;;  %vm3952_vm4 = vcmp.lt.f32.partialorder %v9811_v7, 0.0  ;;  %v5548_v47 = vadd.f32 %v5452_v21, %v5260_v42  ;;  %v3541_v31 = vpop.f32.mrb[113].mxu0  ;;  %v9832_v13 = vpop.f32.mrb[210].mxu1  ;;  %v7737_v21 = vld [vmem:[#allocation11 + $0x170] sm:$0xff] }
 0x414   : > { %7348 = vrcp.f32 %v4982_v20  ;;  %v4980_v32 = vadd.f32 1.0, %v7331_v18  ;;  %5646 = vst [vmem:[#allocation11 + $0x10] sm:$0xff] %v5550_v62  ;;  %v5551_v8 = vadd.f32 %v5455_v51, %v5263_v44  ;;  %v9835_v33 = vadd.f32 %v3534_v2, %v12122_v39  ;;  %v9838_v12 = vpop.f32.mrb[114].mxu0  ;;  %v9840_v34 = vpop.f32.mrb[211].mxu1  ;;  %v12125_v20 = vld [vmem:[#allocation70_spill] sm:$0xff]  ;;  %vm9878_vm13 = vmand %vm8970_vm1, %vm3952_vm4 }
 0x415   : > { %v7333_v27 = vpop.eup %7332  ;;  %v5453_v61 = vmul.f32 %v7691_v25, %v5357_v55  ;;  %v4361_v9 = vadd.f32 %v6372_v58, %v9496_v29  ;;  %5644 = vst [vmem:[#allocation11] sm:$0xff] %v5548_v47  ;;  %v4353_v2 = vadd.f32 %v9496_v29, %v4352_v3  ;;  %v9852_v58 = vadd.f32 %v3539_v63, %v12125_v20  ;;  %v3544_v18 = vpop.f32.mrb[115].mxu0 }
 0x416   : > { %v7335_v42 = vpop.eup %7334  ;;  %7350 = vrcp.f32 %v4980_v32  ;;  %v4983_v44 = vadd.f32 1.0, %v7333_v27  ;;  %v9855_v51 = vadd.f32 %v8929_v6, %v3753_v16  ;;  %5647 = vst [vmem:[#allocation11 + $0x18] sm:$0xff] %v5551_v8  ;;  %vm12127_vm8 = vnez %v11942_v59  ;;  %v7692_v59 = vld [vmem:[#allocation11 + $0x30] sm:$0xff] }
 0x417   : > { %v7337_v62 = vpop.eup %7336  ;;  %v5549_v55 = vadd.f32 %v5453_v61, %v5261_v11  ;;  %v12128_v31 = vsel %vm12127_vm8, 0.0, %v8989_v1  ;;  %v5362_v47 = vsub.f32 1.0, %v7335_v42  ;;  %vm12129_vm10 = vnez %v11935_v41  ;;  %v12131_v1 = vld [vmem:[#allocation30_spill] sm:$0xff]  ;;  %v12133_v11 = vld [vmem:[#allocation45_spill] sm:$0xff] }
 0x418   : > { %12126 = vst [vmem:[#allocation69_spill] sm:$0xff] %v9855_v51  ;;  %v5266_v25 = vmul.f32 %v7335_v42, %v12128_v31  ;;  %v7339_v32 = vpop.eup %7338  ;;  %v12130_v3 = vsel %vm12129_vm10, 0.0, %v8975_v4  ;;  %v5360_v27 = vsub.f32 1.0, %v7337_v62  ;;  %7352 = vrcp.f32 %v4983_v44  ;;  %v7693_v4 = vld [vmem:[#allocation11 + $0x20] sm:$0xff]  ;;  %v9872_v44 = vpop.f32.mrb[212].mxu1 }
 0x419   : > { %v5264_v63 = vmul.f32 %v7337_v62, %v12130_v3  ;;  %v6199_v39 = vmul.f32 -1.442695, %v4361_v9  ;;  %v7341_v20 = vpop.eup %7340  ;;  %5645 = vst [vmem:[#allocation11 + $0x8] sm:$0xff] %v5549_v55  ;;  %v5458_v16 = vmul.f32 %v7692_v59, %v5362_v47  ;;  %vm12132_vm0 = vnez %v12131_v1  ;;  %v7694_v3 = vld [vmem:[#allocation11 + $0x38] sm:$0xff]  ;;  %v12138_v59 = vld [vmem:[#allocation28_spill] sm:$0xff]  ;;  %v9886_v1 = vpop.f32.mrb[116].mxu0 }
 0x41a   : > { %v12134_v8 = vsel %vm12132_vm0, 0.0, %v12133_v11  ;;  %v5363_v41 = vsub.f32 1.0, %v7339_v32  ;;  %v7343_v42 = vpop.eup %7342  ;;  %v5456_v18 = vmul.f32 %v7693_v4, %v5360_v27  ;;  %v4981_v62 = vadd.f32 1.0, %v7341_v20  ;;  %v12140_v27 = vld [vmem:[#allocation24_spill] sm:$0xff]  ;;  %v9888_v11 = vpop.f32.mrb[213].mxu1 }
 0x41b   : > { %v5267_v61 = vmul.f32 %v7339_v32, %v12134_v8  ;;  %7354 = vpow2.f32 %v6199_v39  ;;  %v6197_v9 = vmul.f32 -1.442695, %v4353_v2  ;;  %v7345_v31 = vpop.eup %7344  ;;  %v12135_v55 = vmov 0  ;;  %v3549_v24 = vpop.f32.mrb[117].mxu0 }
 0x41c   : > { %v12136_v55 = vsel %vm9878_vm13, 4294967295, %v12135_v55  ;;  %v5554_v47 = vadd.f32 %v5458_v16, %v5266_v25  ;;  %v5459_v32 = vmul.f32 %v7694_v3, %v5363_v41  ;;  %vm12139_vm8 = vnez %v12138_v59  ;;  %v7347_v8 = vpop.eup %7346  ;;  %v9891_v25 = vpop.f32.mrb[214].mxu1  ;;  %v7695_v41 = vld [vmem:[#allocation11 + $0x28] sm:$0xff] }
 0x41d   : > { %12137 = vst [vmem:[#allocation70_spill] sm:$0xff] %v12136_v55  ;;  %v12141_v20 = vsel %vm12139_vm8, 0.0, %v12140_v27  ;;  %v5361_v2 = vsub.f32 1.0, %v7343_v42  ;;  %vm3953_vm10 = vcmp.lt.f32.partialorder %v9855_v51, 0.0  ;;  %v5552_v4 = vadd.f32 %v5456_v18, %v5264_v63  ;;  %v9895_v27 = vpop.f32.mrb[215].mxu1  ;;  %v12171_v55 = vld [vmem:[#allocation29_spill] sm:$0xff] }
 0x41e   : > { %v5265_v39 = vmul.f32 %v7343_v42, %v12141_v20  ;;  %7356 = vrcp.f32 %v4981_v62  ;;  %v4986_v6 = vadd.f32 1.0, %v7345_v31  ;;  %5650 = vst [vmem:[#allocation11 + $0x30] sm:$0xff] %v5554_v47  ;;  %v5555_v16 = vadd.f32 %v5459_v32, %v5267_v61  ;;  %v9893_v42 = vpop.f32.mrb[118].mxu0  ;;  %v7349_v20 = vpop.eup %7348  ;;  %vm9908_vm4 = vmand %vm8970_vm1, %vm3953_vm10  ;;  %v12145_v31 = vld [vmem:[#allocation53_spill] sm:$0xff]  ;;  %v12147_v47 = vld [vmem:[#allocation47_spill] sm:$0xff] }
 0x41f   : > { %v5457_v3 = vmul.f32 %v7695_v41, %v5361_v2  ;;  %v4984_v59 = vadd.f32 1.0, %v7347_v8  ;;  %7358 = vpow2.f32 %v6197_v9  ;;  %v3754_v24 = vmul.f32 %v9590_v26, %v8918_v35  ;;  %5648 = vst [vmem:[#allocation11 + $0x20] sm:$0xff] %v5552_v4  ;;  %v3552_v18 = vpop.f32.mrb[119].mxu0  ;;  %v9917_v32 = vld [vmem:[%s8341_s27] ss:$0 sm:$0xff]  ;;  %v7697_v41 = vld [vmem:[#allocation11 + $0x50] sm:$0xff] }
 0x420   : > { %7360 = vrcp.f32 %v4986_v6  ;;  %v4374_v61 = vadd.f32 %v9823_v28, %v9496_v29  ;;  %v12142_v62 = vmov 0  ;;  %5651 = vst [vmem:[#allocation11 + $0x38] sm:$0xff] %v5555_v16  ;;  %vm12146_vm0 = vnez %v12145_v31  ;;  %v7351_v28 = vpop.eup %7350  ;;  %v12149_v16 = vld [vmem:[#allocation71_spill] sm:$0xff] }
 0x421   : > { %v12143_v62 = vsel %vm9908_vm4, 4294967295, %v12142_v62  ;;  %v5553_v9 = vadd.f32 %v5457_v3, %v5265_v39  ;;  %v12148_v35 = vsel %vm12146_vm0, 0.0, %v12147_v47  ;;  %v5366_v6 = vsub.f32 1.0, %v7349_v20 }
 0x422   : > { %12144 = vst [vmem:[#allocation30_spill] sm:$0xff] %v12143_v62  ;;  %v5270_v26 = vmul.f32 %v7349_v20, %v12148_v35  ;;  %7362 = vrcp.f32 %v4984_v59  ;;  %v3755_v2 = vmul.f32 %v9917_v32, %v9644_v43  ;;  %v6202_v8 = vmul.f32 -1.442695, %v4374_v61  ;;  %v12150_v20 = vld [vmem:[#allocation31_spill] sm:$0xff]  ;;  %v12152_v59 = vld [vmem:[#allocation26_spill] sm:$0xff]  ;;  %v7353_v61 = vpop.eup %7352  ;;  %v9948_v62 = vpop.f32.mrb[120].mxu0 }
 0x423   : > { %v4366_v4 = vadd.f32 %v9496_v29, %v9829_v53  ;;  %v9925_v39 = vadd.f32 %v9838_v12, %v12149_v16  ;;  %5649 = vst [vmem:[#allocation11 + $0x28] sm:$0xff] %v5553_v9  ;;  %v5462_v3 = vmul.f32 %v7697_v41, %v5366_v6  ;;  %vm12151_vm8 = vnez %v12150_v20  ;;  %v9937_v35 = vld [vmem:[%s8347_s18] ss:$0 sm:$0xff]  ;;  %v9942_v6 = vpop.f32.mrb[216].mxu1  ;;  %v7699_v41 = vld [vmem:[#allocation11 + $0x40] sm:$0xff]  ;;  %v12155_v20 = vld [vmem:[#allocation34_spill] sm:$0xff] }
 0x424   : > { %v12153_v18 = vsel %vm12151_vm8, 0.0, %v12152_v59  ;;  %v5364_v47 = vsub.f32 1.0, %v7351_v28  ;;  %v4377_v43 = vadd.f32 %v9832_v13, %v9496_v29  ;;  %v9940_v12 = vadd.f32 %v9937_v35, %v3754_v24  ;;  %v12157_v13 = vld [vmem:[#allocation48_spill] sm:$0xff]  ;;  %v9950_v53 = vpop.f32.mrb[217].mxu1 }
 0x425   : > { %v5268_v31 = vmul.f32 %v7351_v28, %v12153_v18  ;;  %7364 = vpow2.f32 %v6202_v8  ;;  %v6200_v9 = vmul.f32 -1.442695, %v4366_v4  ;;  %v5558_v16 = vadd.f32 %v5462_v3, %v5270_v26  ;;  %v7355_v51 = vpop.eup %7354  ;;  %v3557_v4 = vpop.f32.mrb[121].mxu0 }
 0x426   : > { %12154 = vst [vmem:[#allocation45_spill] sm:$0xff] %v9940_v12  ;;  %v5460_v28 = vmul.f32 %v7699_v41, %v5364_v47  ;;  %vm12156_vm10 = vnez %v12155_v20  ;;  %v5367_v63 = vsub.f32 1.0, %v7353_v61  ;;  %v9953_v24 = vadd.f32 %v9937_v35, %v3755_v2  ;;  %v9957_v3 = vpop.f32.mrb[218].mxu1  ;;  %v7700_v41 = vld [vmem:[#allocation11 + $0x58] sm:$0xff] }
 0x427   : > { %v12158_v59 = vsel %vm12156_vm10, 0.0, %v12157_v13  ;;  %v3756_v8 = vmul.f32 %v9917_v32, %v9669_v45  ;;  %7366 = vpow2.f32 %v6200_v9  ;;  %v6203_v26 = vmul.f32 -1.442695, %v4377_v43  ;;  %5654 = vst [vmem:[#allocation11 + $0x50] sm:$0xff] %v5558_v16  ;;  %v9963_v2 = vpop.f32.mrb[219].mxu1  ;;  %v12160_v43 = vld [vmem:[#allocation72_spill] sm:$0xff] }
 0x428   : > { %v5271_v18 = vmul.f32 %v7353_v61, %v12158_v59  ;;  %12159 = vst [vmem:[#allocation28_spill] sm:$0xff] %v9953_v24  ;;  %v5556_v47 = vadd.f32 %v5460_v28, %v5268_v31  ;;  %v5463_v61 = vmul.f32 %v7700_v41, %v5367_v63  ;;  %v4987_v20 = vadd.f32 1.0, %v7355_v51  ;;  %v9961_v59 = vpop.f32.mrb[122].mxu0  ;;  %v7357_v7 = vpop.eup %7356  ;;  %v12161_v16 = vld [vmem:[#allocation32_spill] sm:$0xff]  ;;  %v12163_v28 = vld [vmem:[#allocation27_spill] sm:$0xff] }
 0x429   : > { %v4369_v13 = vadd.f32 %v9496_v29, %v9840_v34  ;;  %v3757_v45 = vmul.f32 %v9917_v32, %v9730_v22  ;;  %7368 = vpow2.f32 %v6203_v26  ;;  %v9969_v9 = vadd.f32 %v9886_v1, %v12160_v43  ;;  %v3560_v51 = vpop.f32.mrb[123].mxu0  ;;  %v7359_v31 = vpop.eup %7358 }
 0x42a   : > { %v4390_v63 = vadd.f32 %v9872_v44, %v9496_v29  ;;  %vm3954_vm0 = vcmp.lt.f32.partialorder %v9940_v12, 0.0  ;;  %5652 = vst [vmem:[#allocation11 + $0x40] sm:$0xff] %v5556_v47  ;;  %v5559_v34 = vadd.f32 %v5463_v61, %v5271_v18  ;;  %vm12162_vm8 = vnez %v12161_v16  ;;  %v7361_v26 = vpop.eup %7360  ;;  %v7701_v18 = vld [vmem:[#allocation11 + $0x48] sm:$0xff] }
 0x42b   : > { %v12164_v4 = vsel %vm12162_vm8, 0.0, %v12163_v28  ;;  %v5365_v22 = vsub.f32 1.0, %v7357_v7  ;;  %7370 = vrcp.f32 %v4987_v20  ;;  %v9980_v1 = vadd.f32 %v9937_v35, %v3756_v8  ;;  %v12169_v8 = vld [vmem:[#allocation35_spill] sm:$0xff] }
 0x42c   : > { %v5269_v41 = vmul.f32 %v7357_v7, %v12164_v4  ;;  %v3758_v44 = vmul.f32 %v9917_v32, %v9744_v38  ;;  %v4985_v43 = vadd.f32 1.0, %v7359_v31  ;;  %v6201_v51 = vmul.f32 -1.442695, %v4369_v13  ;;  %v7363_v47 = vpop.eup %7362  ;;  %5655 = vst [vmem:[#allocation11 + $0x58] sm:$0xff] %v5559_v34  ;;  %v9995_v34 = vpop.f32.mrb[220].mxu1 }
 0x42d   : > { %12165 = vst [vmem:[#allocation24_spill] sm:$0xff] %v9980_v1  ;;  %v5461_v61 = vmul.f32 %v7701_v18, %v5365_v22  ;;  %vm12166_vm8 = vnez %v11974_v49  ;;  %v5370_v16 = vsub.f32 1.0, %v7361_v26  ;;  %v6206_v28 = vmul.f32 -1.442695, %v4390_v63  ;;  %v7702_v18 = vld [vmem:[#allocation11 + $0x70] sm:$0xff]  ;;  %v9999_v63 = vpop.f32.mrb[124].mxu0 }
 0x42e   : > { %v12167_v7 = vsel %vm12166_vm8, 0.0, %v9125_v37  ;;  %v9989_v4 = vadd.f32 %v9937_v35, %v3757_v45  ;;  %vm12170_vm10 = vnez %v12169_v8  ;;  %v5368_v13 = vsub.f32 1.0, %v7363_v47  ;;  %v10001_v45 = vpop.f32.mrb[221].mxu1 }
 0x42f   : > { %v5274_v20 = vmul.f32 %v7361_v26, %v12167_v7  ;;  %v12172_v38 = vsel %vm12170_vm10, 0.0, %v12171_v55  ;;  %7372 = vrcp.f32 %v4985_v43  ;;  %v5557_v22 = vadd.f32 %v5461_v61, %v5269_v41  ;;  %v7365_v26 = vpop.eup %7364  ;;  %v7703_v7 = vld [vmem:[#allocation11 + $0x60] sm:$0xff]  ;;  %v12173_v43 = vld [vmem:[#allocation73_spill] sm:$0xff]  ;;  %v3565_v61 = vpop.f32.mrb[125].mxu0  ;;  %vm10039_vm10 = vmand %vm8970_vm1, %vm3954_vm0 }
 0x430   : > { %12168 = vst [vmem:[#allocation53_spill] sm:$0xff] %v9989_v4  ;;  %v5272_v31 = vmul.f32 %v7363_v47, %v12172_v38  ;;  %v5466_v49 = vmul.f32 %v7702_v18, %v5370_v16  ;;  %7374 = vpow2.f32 %v6201_v51  ;;  %v4382_v37 = vadd.f32 %v9496_v29, %v9888_v11  ;;  %v10009_v51 = vpop.f32.mrb[222].mxu1  ;;  %v10013_v18 = vpop.f32.mrb[126].mxu0 }
 0x431   : > { %v3759_v55 = vmul.f32 %v9917_v32, %v9796_v10  ;;  %v5464_v47 = vmul.f32 %v7703_v7, %v5368_v13  ;;  %7376 = vpow2.f32 %v6206_v28  ;;  %v10007_v41 = vadd.f32 %v9893_v42, %v12173_v43  ;;  %5653 = vst [vmem:[#allocation11 + $0x48] sm:$0xff] %v5557_v22  ;;  %v10015_v10 = vpop.f32.mrb[223].mxu1  ;;  %v7367_v13 = vpop.eup %7366 }
 0x432   : > { %v5562_v11 = vadd.f32 %v5466_v49, %v5274_v20  ;;  %v4990_v16 = vadd.f32 1.0, %v7365_v26  ;;  %v6204_v8 = vmul.f32 -1.442695, %v4382_v37  ;;  %v4393_v38 = vadd.f32 %v9891_v25, %v9496_v29  ;;  %v3568_v20 = vpop.f32.mrb[127].mxu0  ;;  %v12175_v25 = vld [vmem:[#allocation74_spill] sm:$0xff] }
 0x433   : > { %v10019_v42 = vadd.f32 %v9937_v35, %v3758_v44  ;;  %v5560_v28 = vadd.f32 %v5464_v47, %v5272_v31  ;;  %v4385_v22 = vadd.f32 %v9496_v29, %v9895_v27  ;;  %v4988_v49 = vadd.f32 1.0, %v7367_v13  ;;  %v7369_v7 = vpop.eup %7368  ;;  %v10060_v20 = vpop.f32.mrb[128].mxu0 }
 0x434   : > { %5658 = vst [vmem:[#allocation11 + $0x70] sm:$0xff] %v5562_v11  ;;  %7378 = vrcp.f32 %v4990_v16  ;;  %v6207_v37 = vmul.f32 -1.442695, %v4393_v38  ;;  %v10025_v26 = vadd.f32 %v9948_v62, %v12175_v25  ;;  %v10028_v43 = vadd.f32 %v9937_v35, %v3759_v55  ;;  %v12180_v55 = vld [vmem:[#allocation57_spill] sm:$0xff]  ;;  %v10048_v38 = vpop.f32.mrb[224].mxu1 }
 0x435   : > { %12174 = vst [vmem:[#allocation47_spill] sm:$0xff] %v10019_v42  ;;  %5656 = vst [vmem:[#allocation11 + $0x60] sm:$0xff] %v5560_v28  ;;  %7380 = vpow2.f32 %v6204_v8  ;;  %v6205_v44 = vmul.f32 -1.442695, %v4385_v22  ;;  %v4406_v31 = vadd.f32 %v9942_v6, %v9496_v29  ;;  %v7371_v27 = vpop.eup %7370  ;;  %v4991_v47 = vadd.f32 1.0, %v7369_v7  ;;  %v12182_v6 = vld [vmem:[#allocation51_spill] sm:$0xff] }
 0x436   : > { %12176 = vst [vmem:[#allocation71_spill] sm:$0xff] %v10028_v43  ;;  %7382 = vrcp.f32 %v4988_v49  ;;  %v4398_v61 = vadd.f32 %v9496_v29, %v9950_v53  ;;  %v12177_v62 = vmov 0  ;;  %vm12181_vm14 = vnez %v12180_v55  ;;  %v10062_v49 = vpop.f32.mrb[225].mxu1  ;;  %v7704_v7 = vld [vmem:[#allocation11 + $0x78] sm:$0xff] }
 0x437   : > { %v12178_v62 = vsel %vm10039_vm10, 4294967295, %v12177_v62  ;;  %v12183_v11 = vsel %vm12181_vm14, 0.0, %v12182_v6  ;;  %v5371_v8 = vsub.f32 1.0, %v7371_v27  ;;  %7384 = vpow2.f32 %v6207_v37 }
 0x438   : > { %12179 = vst [vmem:[#allocation31_spill] sm:$0xff] %v12178_v62  ;;  %v5275_v16 = vmul.f32 %v7371_v27, %v12183_v11  ;;  %vm12184_vm8 = vcmp.lt.f32.partialorder %v9953_v24, 0.0  ;;  %v12185_v53 = vmov 0  ;;  %v3760_v13 = vmul.f32 %v9917_v32, %v9835_v33  ;;  %v7705_v62 = vld [vmem:[#allocation11 + $0x68] sm:$0xff] }
 0x439   : > { %vm10054_vm13 = vmand %vm8970_vm1, %vm12184_vm8  ;;  %7386 = vrcp.f32 %v4991_v47  ;;  %v6210_v28 = vmul.f32 -1.442695, %v4406_v31  ;;  %v6208_v22 = vmul.f32 -1.442695, %v4398_v61  ;;  %v7373_v37 = vpop.eup %7372  ;;  %vm12188_vm14 = vcmp.lt.f32.partialorder %v9980_v1, 0.0  ;;  %v12192_v31 = vld [vmem:[#allocation75_spill] sm:$0xff] }
 0x43a   : > { %v12186_v53 = vsel %vm10054_vm13, 4294967295, %v12185_v53  ;;  %vm10068_vm0 = vmand %vm8970_vm1, %vm12188_vm14  ;;  %v12189_v25 = vmov 0  ;;  %v5467_v33 = vmul.f32 %v7704_v7, %v5371_v8  ;;  %7388 = vpow2.f32 %v6205_v44  ;;  %v3573_v47 = vpop.f32.mrb[129].mxu0  ;;  %v10077_v61 = vpop.f32.mrb[226].mxu1  ;;  %v12197_v44 = vld [vmem:[#allocation55_spill] sm:$0xff] }
 0x43b   : > { %12187 = vst [vmem:[#allocation26_spill] sm:$0xff] %v12186_v53  ;;  %v12190_v25 = vsel %vm10068_vm0, 4294967295, %v12189_v25  ;;  %v10075_v27 = vadd.f32 %v9961_v59, %v12192_v31  ;;  %v7375_v55 = vpop.eup %7374  ;;  %vm12193_vm14 = vcmp.lt.f32.partialorder %v9989_v4, 0.0  ;;  %v12194_v11 = vmov 0  ;;  %v12199_v59 = vld [vmem:[#allocation49_spill] sm:$0xff]  ;;  %v10094_v47 = vpop.f32.mrb[130].mxu0 }
 0x43c   : > { %12191 = vst [vmem:[#allocation34_spill] sm:$0xff] %v12190_v25  ;;  %vm10086_vm8 = vmand %vm8970_vm1, %vm12193_vm14  ;;  %vm12198_vm4 = vnez %v12197_v44  ;;  %v5369_v31 = vsub.f32 1.0, %v7373_v37  ;;  %7390 = vpow2.f32 %v6210_v28  ;;  %v10096_v14 = vpop.f32.mrb[227].mxu1  ;;  %v7377_v6 = vpop.eup %7376  ;;  %vm12201_vm14 = vcmp.lt.f32.partialorder %v10019_v42, 0.0 }
 0x43d   : > { %v12195_v11 = vsel %vm10086_vm8, 4294967295, %v12194_v11  ;;  %v12200_v8 = vsel %vm12198_vm4, 0.0, %v12199_v59  ;;  %vm10105_vm10 = vmand %vm8970_vm1, %vm12201_vm14  ;;  %v12202_v44 = vmov 0  ;;  %v5563_v59 = vadd.f32 %v5467_v33, %v5275_v16  ;;  %v3576_v28 = vpop.f32.mrb[131].mxu0 }
 0x43e   : > { %12196 = vst [vmem:[#allocation48_spill] sm:$0xff] %v12195_v11  ;;  %v5273_v7 = vmul.f32 %v7373_v37, %v12200_v8  ;;  %v12203_v44 = vsel %vm10105_vm10, 4294967295, %v12202_v44  ;;  %v4989_v37 = vadd.f32 1.0, %v7375_v55  ;;  %7392 = vpow2.f32 %v6208_v22  ;;  %v12210_v55 = vld [vmem:[#allocation76_spill] sm:$0xff]  ;;  %v10144_v22 = vpop.f32.mrb[228].mxu1 }
 0x43f   : > { %12204 = vst [vmem:[#allocation72_spill] sm:$0xff] %v12203_v44  ;;  %vm12205_vm4 = vcmp.lt.f32.partialorder %v10028_v43, 0.0  ;;  %v12206_v8 = vmov 0  ;;  %v10118_v12 = vadd.f32 %v9937_v35, %v3760_v13  ;;  %v5465_v24 = vmul.f32 %v7705_v62, %v5369_v31  ;;  %5659 = vst [vmem:[#allocation11 + $0x78] sm:$0xff] %v5563_v59  ;;  %v7379_v13 = vpop.eup %7378  ;;  %v10151_v59 = vpop.f32.mrb[229].mxu1  ;;  %v7706_v62 = vld [vmem:[#allocation11 + $0x90] sm:$0xff] }
 0x440   : > { %vm10113_vm9 = vmand %vm8970_vm1, %vm12205_vm4  ;;  %v4994_v53 = vadd.f32 1.0, %v7377_v6  ;;  %v4409_v16 = vadd.f32 %v9957_v3, %v9496_v29  ;;  %7394 = vrcp.f32 %v4989_v37  ;;  %v4401_v33 = vadd.f32 %v9496_v29, %v9963_v2  ;;  %v7381_v31 = vpop.eup %7380 }
 0x441   : > { %v12207_v8 = vsel %vm10113_vm9, 4294967295, %v12206_v8  ;;  %12209 = vst [vmem:[#allocation27_spill] sm:$0xff] %v10118_v12  ;;  %v10129_v28 = vadd.f32 %v9999_v63, %v12210_v55  ;;  %v5561_v6 = vadd.f32 %v5465_v24, %v5273_v7  ;;  %vm12211_vm14 = vnez %v11994_v17  ;;  %v7383_v24 = vpop.eup %7382 }
 0x442   : > { %12208 = vst [vmem:[#allocation32_spill] sm:$0xff] %v12207_v8  ;;  %7396 = vrcp.f32 %v4994_v53  ;;  %v6211_v3 = vmul.f32 -1.442695, %v4409_v16  ;;  %v12212_v63 = vsel %vm12211_vm14, 0.0, %v9195_v40  ;;  %v5374_v55 = vsub.f32 1.0, %v7379_v13  ;;  %v10149_v16 = vpop.f32.mrb[132].mxu0  ;;  %v7385_v17 = vpop.eup %7384 }
 0x443   : > { %v5278_v37 = vmul.f32 %v7379_v13, %v12212_v63  ;;  %vm3960_vm4 = vcmp.lt.f32.partialorder %v10118_v12, 0.0  ;;  %5657 = vst [vmem:[#allocation11 + $0x68] sm:$0xff] %v5561_v6  ;;  %v4992_v53 = vadd.f32 1.0, %v7381_v31  ;;  %v4422_v7 = vadd.f32 %v9995_v34, %v9496_v29  ;;  %v12213_v63 = vld [vmem:[#allocation58_spill] sm:$0xff]  ;;  %v12215_v13 = vld [vmem:[#allocation33_spill] sm:$0xff]  ;;  %v3581_v6 = vpop.f32.mrb[133].mxu0 }
 0x444   : > { %7398 = vpow2.f32 %v6211_v3  ;;  %v5470_v40 = vmul.f32 %v7706_v62, %v5374_v55  ;;  %vm12214_vm14 = vnez %v12213_v63  ;;  %v5372_v44 = vsub.f32 1.0, %v7383_v24  ;;  %v10157_v31 = vpop.f32.mrb[230].mxu1  ;;  %v7387_v3 = vpop.eup %7386 }
 0x445   : > { %v12216_v2 = vsel %vm12214_vm14, 0.0, %v12215_v13  ;;  %v6209_v4 = vmul.f32 -1.442695, %v4401_v33  ;;  %v3761_v34 = vmul.f32 %v9917_v32, %v9852_v58  ;;  %7400 = vrcp.f32 %v4992_v53  ;;  %v10163_v62 = vpop.f32.mrb[134].mxu0  ;;  %v10165_v55 = vpop.f32.mrb[231].mxu1 }
 0x446   : > { %v5276_v42 = vmul.f32 %v7383_v24, %v12216_v2  ;;  %v4995_v11 = vadd.f32 1.0, %v7385_v17  ;;  %v4414_v43 = vadd.f32 %v9496_v29, %v10001_v45  ;;  %v7389_v63 = vpop.eup %7388  ;;  %v5566_v2 = vadd.f32 %v5470_v40, %v5278_v37  ;;  %v7707_v24 = vld [vmem:[#allocation11 + $0x80] sm:$0xff]  ;;  %v3584_v58 = vpop.f32.mrb[135].mxu0  ;;  %v7708_v37 = vld [vmem:[#allocation11 + $0x98] sm:$0xff] }
 0x447   : > { %v5468_v33 = vmul.f32 %v7707_v24, %v5372_v44  ;;  %vm12217_vm14 = vnez %v11999_v57  ;;  %v5375_v8 = vsub.f32 1.0, %v7387_v3  ;;  %v7391_v53 = vpop.eup %7390  ;;  %v3762_v17 = vmul.f32 %v9917_v32, %v9925_v39  ;;  %v12219_v24 = vld [vmem:[#allocation77_spill] sm:$0xff] }
 0x448   : > { %v12218_v13 = vsel %vm12217_vm14, 0.0, %v9212_v52  ;;  %7402 = vrcp.f32 %v4995_v11  ;;  %v4993_v45 = vadd.f32 1.0, %v7389_v63  ;;  %v6214_v1 = vmul.f32 -1.442695, %v4422_v7  ;;  %v7393_v25 = vpop.eup %7392  ;;  %5662 = vst [vmem:[#allocation11 + $0x90] sm:$0xff] %v5566_v2  ;;  %v10190_v2 = vpop.f32.mrb[136].mxu0 }
 0x449   : > { %v5279_v6 = vmul.f32 %v7387_v3, %v12218_v13  ;;  %v5564_v36 = vadd.f32 %v5468_v33, %v5276_v42  ;;  %v5471_v40 = vmul.f32 %v7708_v37, %v5375_v8  ;;  %v4998_v44 = vadd.f32 1.0, %v7391_v53  ;;  %v10181_v8 = vpop.f32.mrb[232].mxu1  ;;  %v7709_v37 = vld [vmem:[#allocation11 + $0x88] sm:$0xff] }
 0x44a   : > { %7404 = vpow2.f32 %v6209_v4  ;;  %v4996_v57 = vadd.f32 1.0, %v7393_v25  ;;  %v6212_v52 = vmul.f32 -1.442695, %v4414_v43  ;;  %v10175_v3 = vadd.f32 %v10013_v18, %v12219_v24  ;;  %v7395_v13 = vpop.eup %7394  ;;  %v12221_v43 = vld [vmem:[#allocation86_spill] sm:$0xff]  ;;  %v10192_v33 = vpop.f32.mrb[233].mxu1 }
 0x44b   : > { %7406 = vrcp.f32 %v4993_v45  ;;  %5660 = vst [vmem:[#allocation11 + $0x80] sm:$0xff] %v5564_v36  ;;  %v5567_v39 = vadd.f32 %v5471_v40, %v5279_v6  ;;  %v4425_v11 = vadd.f32 %v10009_v51, %v9496_v29  ;;  %v4417_v42 = vadd.f32 %v9496_v29, %v10015_v10  ;;  %v12223_v18 = vld [vmem:[#allocation54_spill] sm:$0xff]  ;;  %v3589_v6 = vpop.f32.mrb[137].mxu0  ;;  %v10198_v58 = vpop.f32.mrb[234].mxu1 }
 0x44c   : > { %7408 = vrcp.f32 %v4998_v44  ;;  %v7397_v4 = vpop.eup %7396  ;;  %v10184_v25 = vadd.f32 %v9937_v35, %v3761_v34  ;;  %vm12222_vm14 = vnez %v12221_v43  ;;  %v5373_v36 = vsub.f32 1.0, %v7395_v13  ;;  %v10205_v23 = vpop.f32.mrb[235].mxu1  ;;  %v10222_v43 = vld [vmem:[%s8351_s17] ss:$0 sm:$0xff] }
 0x44d   : > { %v12224_v7 = vsel %vm12222_vm14, 0.0, %v12223_v18  ;;  %7410 = vrcp.f32 %v4996_v57  ;;  %5663 = vst [vmem:[#allocation11 + $0x98] sm:$0xff] %v5567_v39  ;;  %v12225_v29 = vsel %vm9376_vm7, 0.0, %v9263_v46  ;;  %v5378_v10 = vsub.f32 1.0, %v7397_v4  ;;  %v10203_v57 = vpop.f32.mrb[138].mxu0  ;;  %vm10211_vm7 = vmand %vm8970_vm1, %vm3960_vm4 }
 0x44e   : > { %12220 = vst [vmem:[#allocation35_spill] sm:$0xff] %v10184_v25  ;;  %v5277_v63 = vmul.f32 %v7395_v13, %v12224_v7  ;;  %v5282_v51 = vmul.f32 %v7397_v4, %v12225_v29  ;;  %7412 = vpow2.f32 %v6214_v1  ;;  %v6215_v34 = vmul.f32 -1.442695, %v4425_v11  ;;  %v7399_v53 = vpop.eup %7398  ;;  %v7710_v1 = vld [vmem:[#allocation11 + $0xb0] sm:$0xff]  ;;  %v3592_v39 = vpop.f32.mrb[139].mxu0 }
 0x44f   : > { %v10201_v45 = vadd.f32 %v9937_v35, %v3762_v17  ;;  %v5469_v40 = vmul.f32 %v7709_v37, %v5373_v36  ;;  %7414 = vpow2.f32 %v6212_v52  ;;  %v6213_v44 = vmul.f32 -1.442695, %v4417_v42  ;;  %v12230_v13 = vld [vmem:[#allocation78_spill] sm:$0xff]  ;;  %v7401_v11 = vpop.eup %7400  ;;  %v12234_v37 = vld [vmem:[#allocation79_spill] sm:$0xff] }
 0x450   : > { %v12227_v46 = vmov 0  ;;  %v5474_v17 = vmul.f32 %v7710_v1, %v5378_v10  ;;  %v4999_v24 = vadd.f32 1.0, %v7399_v53  ;;  %7416 = vpow2.f32 %v6215_v34 }
 0x451   : > { %12226 = vst [vmem:[#allocation29_spill] sm:$0xff] %v10201_v45  ;;  %v12228_v46 = vsel %vm10211_vm7, 4294967295, %v12227_v46  ;;  %v10217_v52 = vadd.f32 %v10060_v20, %v12230_v13  ;;  %v5565_v42 = vadd.f32 %v5469_v40, %v5277_v63  ;;  %v3763_v4 = vmul.f32 %v9917_v32, %v9969_v9  ;;  %v10250_v13 = vpop.f32.mrb[140].mxu0 }
 0x452   : > { %12229 = vst [vmem:[#allocation73_spill] sm:$0xff] %v12228_v46  ;;  %7418 = vpow2.f32 %v6213_v44  ;;  %v4438_v18 = vadd.f32 %v10222_v43, %v10048_v38  ;;  %v5570_v7 = vadd.f32 %v5474_v17, %v5282_v51  ;;  %vm12231_vm4 = vnez %v12003_v48  ;;  %v7403_v10 = vpop.eup %7402  ;;  %v10245_v44 = vpop.f32.mrb[236].mxu1 }
 0x453   : > { %v12232_v36 = vsel %vm12231_vm4, 0.0, %v9229_v0  ;;  %v5376_v20 = vsub.f32 1.0, %v7401_v11  ;;  %7420 = vrcp.f32 %v4999_v24  ;;  %vm3961_vm14 = vcmp.lt.f32.partialorder %v10184_v25, 0.0  ;;  %5661 = vst [vmem:[#allocation11 + $0x88] sm:$0xff] %v5565_v42  ;;  %v7712_v0 = vld [vmem:[#allocation11 + $0xa0] sm:$0xff]  ;;  %v10252_v54 = vpop.f32.mrb[237].mxu1 }
 0x454   : > { %v5280_v29 = vmul.f32 %v7401_v11, %v12232_v36  ;;  %v6218_v9 = vmul.f32 -1.442695, %v4438_v18  ;;  %v4430_v38 = vadd.f32 %v10222_v43, %v10062_v49  ;;  %v7405_v51 = vpop.eup %7404  ;;  %vm3962_vm10 = vcmp.lt.f32.partialorder %v10201_v45, 0.0  ;;  %5666 = vst [vmem:[#allocation11 + $0xb0] sm:$0xff] %v5570_v7  ;;  %v7713_v11 = vld [vmem:[#allocation11 + $0xb8] sm:$0xff]  ;;  %v12236_v18 = vld [vmem:[#allocation90_spill] sm:$0xff] }
 0x455   : > { %v5472_v48 = vmul.f32 %v7712_v0, %v5376_v20  ;;  %v12233_v34 = vsel %vm9395_vm11, 0.0, %v9277_v50  ;;  %v5379_v53 = vsub.f32 1.0, %v7403_v10  ;;  %v10243_v40 = vadd.f32 %v10094_v47, %v12234_v37  ;;  %v7407_v1 = vpop.eup %7406  ;;  %v12238_v47 = vld [vmem:[#allocation56_spill] sm:$0xff] }
 0x456   : > { %v5283_v6 = vmul.f32 %v7403_v10, %v12233_v34  ;;  %v10248_v49 = vadd.f32 %v9937_v35, %v3763_v4  ;;  %v4997_v17 = vadd.f32 1.0, %v7405_v51  ;;  %7422 = vpow2.f32 %v6218_v9  ;;  %v7409_v50 = vpop.eup %7408  ;;  %v3597_v10 = vpop.f32.mrb[141].mxu0  ;;  %v12241_v0 = vld [vmem:[#allocation60_spill] sm:$0xff] }
 0x457   : > { %v6216_v24 = vmul.f32 -1.442695, %v4430_v38  ;;  %v5568_v39 = vadd.f32 %v5472_v48, %v5280_v29  ;;  %v5475_v42 = vmul.f32 %v7713_v11, %v5379_v53  ;;  %vm12237_vm11 = vnez %v12236_v18  ;;  %v10258_v4 = vpop.f32.mrb[238].mxu1  ;;  %v7411_v51 = vpop.eup %7410  ;;  %v7714_v18 = vld [vmem:[#allocation11 + $0xa8] sm:$0xff]  ;;  %v12245_v10 = vld [vmem:[#allocation87_spill] sm:$0xff]  ;;  %v12280_v25 = vld [vmem:[#allocation100_spill] sm:$0xff] }
 0x458   : > { %12235 = vst [vmem:[#allocation74_spill] sm:$0xff] %v10248_v49  ;;  %v12239_v7 = vsel %vm12237_vm11, 0.0, %v12238_v47  ;;  %v5377_v20 = vsub.f32 1.0, %v7407_v1  ;;  %v3764_v9 = vmul.f32 %v9917_v32, %v10007_v41  ;;  %v12242_v34 = vsel %vm9446_vm12, 0.0, %v12241_v0  ;;  %v10266_v53 = vpop.f32.mrb[142].mxu0  ;;  %v10268_v37 = vpop.f32.mrb[239].mxu1  ;;  %vm10288_vm11 = vmand %vm8970_vm1, %vm3961_vm14 }
 0x459   : > { %v5281_v36 = vmul.f32 %v7407_v1, %v12239_v7  ;;  %v5286_v29 = vmul.f32 %v7409_v50, %v12242_v34  ;;  %v5382_v48 = vsub.f32 1.0, %v7409_v50  ;;  %7424 = vrcp.f32 %v4997_v17  ;;  %v7413_v11 = vpop.eup %7412  ;;  %5664 = vst [vmem:[#allocation11 + $0xa0] sm:$0xff] %v5568_v39  ;;  %v12243_v7 = vld [vmem:[#allocation95_spill] sm:$0xff]  ;;  %v3600_v12 = vpop.f32.mrb[143].mxu0  ;;  %v7715_v17 = vld [vmem:[#allocation11 + $0xd0] sm:$0xff]  ;;  %vm10315_vm14 = vmand %vm8970_vm1, %vm3962_vm10 }
 0x45a   : > { %v5571_v1 = vadd.f32 %v5475_v42, %v5283_v6  ;;  %v5473_v47 = vmul.f32 %v7714_v18, %v5377_v20  ;;  %vm12244_vm4 = vnez %v12243_v7  ;;  %v5380_v38 = vsub.f32 1.0, %v7411_v51  ;;  %v7415_v0 = vpop.eup %7414  ;;  %v7716_v42 = vld [vmem:[#allocation11 + $0xc0] sm:$0xff] }
 0x45b   : > { %v12246_v41 = vsel %vm12244_vm4, 0.0, %v12245_v10  ;;  %vm3963_vm12 = vcmp.lt.f32.partialorder %v10248_v49, 0.0  ;;  %v5478_v50 = vmul.f32 %v7715_v17, %v5382_v48  ;;  %v5002_v34 = vadd.f32 1.0, %v7413_v11  ;;  %v7417_v46 = vpop.eup %7416  ;;  %v10282_v11 = vpop.f32.mrb[240].mxu1  ;;  %v12287_v49 = vld [vmem:[#allocation102_spill] sm:$0xff] }
 0x45c   : > { %v5284_v63 = vmul.f32 %v7411_v51, %v12246_v41  ;;  %7426 = vpow2.f32 %v6216_v24  ;;  %5667 = vst [vmem:[#allocation11 + $0xb8] sm:$0xff] %v5571_v1  ;;  %v5569_v39 = vadd.f32 %v5473_v47, %v5281_v36  ;;  %v3765_v6 = vmul.f32 %v9917_v32, %v10025_v26  ;;  %v7419_v7 = vpop.eup %7418  ;;  %v10296_v47 = vpop.f32.mrb[144].mxu0 }
 0x45d   : > { %v5476_v20 = vmul.f32 %v7716_v42, %v5380_v38  ;;  %v5000_v18 = vadd.f32 1.0, %v7415_v0  ;;  %v5574_v10 = vadd.f32 %v5478_v50, %v5286_v29  ;;  %7428 = vrcp.f32 %v5002_v34  ;;  %v7421_v41 = vpop.eup %7420  ;;  %v10298_v38 = vpop.f32.mrb[241].mxu1  ;;  %v12256_v50 = vld [vmem:[#allocation80_spill] sm:$0xff] }
 0x45e   : > { %v5003_v12 = vadd.f32 1.0, %v7417_v46  ;;  %v4441_v51 = vadd.f32 %v10222_v43, %v10077_v61  ;;  %v10280_v48 = vadd.f32 %v9937_v35, %v3764_v9  ;;  %5665 = vst [vmem:[#allocation11 + $0xa8] sm:$0xff] %v5569_v39  ;;  %v5001_v36 = vadd.f32 1.0, %v7419_v7  ;;  %v12251_v61 = vld [vmem:[#allocation62_spill] sm:$0xff]  ;;  %v12253_v46 = vld [vmem:[#allocation89_spill] sm:$0xff]  ;;  %v3605_v39 = vpop.f32.mrb[145].mxu0 }
 0x45f   : > { %v5572_v24 = vadd.f32 %v5476_v20, %v5284_v63  ;;  %7430 = vrcp.f32 %v5000_v18  ;;  %v12248_v26 = vmov 0  ;;  %5670 = vst [vmem:[#allocation11 + $0xd0] sm:$0xff] %v5574_v10  ;;  %vm12252_vm4 = vnez %v12251_v61  ;;  %v10309_v42 = vpop.f32.mrb[242].mxu1  ;;  %v7717_v18 = vld [vmem:[#allocation11 + $0xd8] sm:$0xff]  ;;  %v10323_v10 = vpop.f32.mrb[146].mxu0  ;;  %v12266_v39 = vld [vmem:[#allocation88_spill] sm:$0xff] }
 0x460   : > { %12247 = vst [vmem:[#allocation57_spill] sm:$0xff] %v10280_v48  ;;  %v12249_v26 = vsel %vm10288_vm11, 4294967295, %v12248_v26  ;;  %v12254_v9 = vsel %vm12252_vm4, 0.0, %v12253_v46  ;;  %v5383_v1 = vsub.f32 1.0, %v7421_v41  ;;  %7432 = vrcp.f32 %v5003_v12  ;;  %v7423_v20 = vpop.eup %7422  ;;  %v10325_v12 = vpop.f32.mrb[243].mxu1  ;;  %vm10335_vm4 = vmand %vm8970_vm1, %vm3963_vm12 }
 0x461   : > { %12250 = vst [vmem:[#allocation51_spill] sm:$0xff] %v12249_v26  ;;  %v5287_v29 = vmul.f32 %v7421_v41, %v12254_v9  ;;  %v6219_v63 = vmul.f32 -1.442695, %v4441_v51  ;;  %v10301_v0 = vadd.f32 %v9937_v35, %v3765_v6  ;;  %5668 = vst [vmem:[#allocation11 + $0xc0] sm:$0xff] %v5572_v24  ;;  %7434 = vrcp.f32 %v5001_v36  ;;  %v3608_v36 = vpop.f32.mrb[147].mxu0 }
 0x462   : > { %v4433_v17 = vadd.f32 %v10222_v43, %v10096_v14  ;;  %v10307_v34 = vadd.f32 %v10149_v16, %v12256_v50  ;;  %v12257_v6 = vmov 0  ;;  %v5479_v7 = vmul.f32 %v7717_v18, %v5383_v1  ;;  %v12263_v1 = vld [vmem:[#allocation81_spill] sm:$0xff]  ;;  %v12264_v50 = vld [vmem:[#allocation96_spill] sm:$0xff] }
 0x463   : > { %12255 = vst [vmem:[#allocation75_spill] sm:$0xff] %v10301_v0  ;;  %v12258_v6 = vsel %vm10315_vm14, 4294967295, %v12257_v6  ;;  %7436 = vpow2.f32 %v6219_v63  ;;  %v4454_v14 = vadd.f32 %v10222_v43, %v10144_v22  ;;  %v4446_v16 = vadd.f32 %v10222_v43, %v10151_v59  ;;  %v7425_v61 = vpop.eup %7424 }
 0x464   : > { %12259 = vst [vmem:[#allocation55_spill] sm:$0xff] %v12258_v6  ;;  %v5006_v41 = vadd.f32 1.0, %v7423_v20  ;;  %v6217_v24 = vmul.f32 -1.442695, %v4433_v17  ;;  %v12260_v22 = vmov 0  ;;  %v5575_v59 = vadd.f32 %v5479_v7, %v5287_v29 }
 0x465   : > { %v12261_v22 = vsel %vm10335_vm4, 4294967295, %v12260_v22  ;;  %v6222_v46 = vmul.f32 -1.442695, %v4454_v14  ;;  %v6220_v9 = vmul.f32 -1.442695, %v4446_v16  ;;  %v10341_v63 = vadd.f32 %v10163_v62, %v12263_v1  ;;  %v7718_v16 = vld [vmem:[#allocation11 + $0xc8] sm:$0xff] }
 0x466   : > { %12262 = vst [vmem:[#allocation49_spill] sm:$0xff] %v12261_v22  ;;  %vm12265_vm10 = vnez %v12264_v50  ;;  %v5381_v36 = vsub.f32 1.0, %v7425_v61  ;;  %7438 = vrcp.f32 %v5006_v41  ;;  %v7427_v51 = vpop.eup %7426  ;;  %vm3965_vm12 = vcmp.lt.f32.partialorder %v10301_v0, 0.0  ;;  %5671 = vst [vmem:[#allocation11 + $0xd8] sm:$0xff] %v5575_v59  ;;  %v10368_v1 = vpop.f32.mrb[148].mxu0 }
 0x467   : > { %v12267_v20 = vsel %vm12265_vm10, 0.0, %v12266_v39  ;;  %7440 = vpow2.f32 %v6217_v24  ;;  %v4457_v62 = vadd.f32 %v10222_v43, %v10157_v31  ;;  %v4449_v29 = vadd.f32 %v10222_v43, %v10165_v55  ;;  %v10366_v31 = vpop.f32.mrb[244].mxu1 }
 0x468   : > { %v5285_v18 = vmul.f32 %v7425_v61, %v12267_v20  ;;  %vm12268_vm10 = vcmp.lt.f32.partialorder %v10280_v48, 0.0  ;;  %v12269_v14 = vmov 0  ;;  %v5477_v41 = vmul.f32 %v7718_v16, %v5381_v36  ;;  %v7429_v61 = vpop.eup %7428  ;;  %v10370_v50 = vpop.f32.mrb[245].mxu1  ;;  %v12277_v36 = vld [vmem:[#allocation94_spill] sm:$0xff] }
 0x469   : > { %vm10362_vm14 = vmand %vm8970_vm1, %vm12268_vm10  ;;  %v5004_v24 = vadd.f32 1.0, %v7427_v51  ;;  %7442 = vpow2.f32 %v6222_v46  ;;  %v6223_v55 = vmul.f32 -1.442695, %v4457_v62  ;;  %v6221_v59 = vmul.f32 -1.442695, %v4449_v29  ;;  %v7431_v39 = vpop.eup %7430  ;;  %v12275_v46 = vld [vmem:[#allocation103_spill] sm:$0xff] }
 0x46a   : > { %v12270_v14 = vsel %vm10362_vm14, 4294967295, %v12269_v14  ;;  %7444 = vpow2.f32 %v6220_v9  ;;  %vm10376_vm10 = vmand %vm8970_vm1, %vm3965_vm12  ;;  %v12272_v20 = vmov 0  ;;  %v5573_v51 = vadd.f32 %v5477_v41, %v5285_v18  ;;  %v3613_v16 = vpop.f32.mrb[149].mxu0  ;;  %v10384_v17 = vpop.f32.mrb[246].mxu1  ;;  %v12282_v18 = vld [vmem:[#allocation91_spill] sm:$0xff] }
 0x46b   : > { %12271 = vst [vmem:[#allocation76_spill] sm:$0xff] %v12270_v14  ;;  %v12273_v20 = vsel %vm10376_vm10, 4294967295, %v12272_v20  ;;  %vm12276_vm11 = vnez %v12275_v46  ;;  %v5386_v29 = vsub.f32 1.0, %v7429_v61  ;;  %7446 = vrcp.f32 %v5004_v24  ;;  %12279 = vst [vmem:[#allocation33_spill] sm:$0xff] %v10384_v17  ;;  %v7433_v7 = vpop.eup %7432  ;;  %v10397_v24 = vpop.f32.mrb[247].mxu1  ;;  %v7719_v16 = vld [vmem:[#allocation11 + $0xf0] sm:$0xff] }
 0x46c   : > { %12274 = vst [vmem:[#allocation58_spill] sm:$0xff] %v12273_v20  ;;  %v12278_v9 = vsel %vm12276_vm11, 0.0, %v12277_v36  ;;  %v3766_v6 = vmul.f32 %v9917_v32, %v10075_v27  ;;  %vm12281_vm12 = vnez %v12280_v25  ;;  %v5384_v36 = vsub.f32 1.0, %v7431_v39  ;;  %12284 = vst [vmem:[#allocation77_spill] sm:$0xff] %v10397_v24  ;;  %v7721_v24 = vld [vmem:[#allocation11 + $0xf8] sm:$0xff]  ;;  %v12291_v17 = vld [vmem:[#allocation82_spill] sm:$0xff] }
 0x46d   : > { %v5290_v62 = vmul.f32 %v7429_v61, %v12278_v9  ;;  %v12283_v41 = vsel %vm12281_vm12, 0.0, %v12282_v18  ;;  %v10395_v9 = vpop.f32.mrb[150].mxu0  ;;  %v7435_v61 = vpop.eup %7434  ;;  %5669 = vst [vmem:[#allocation11 + $0xc8] sm:$0xff] %v5573_v51  ;;  %v5482_v26 = vmul.f32 %v7719_v16, %v5386_v29  ;;  %vm12285_vm11 = vnez %v12054_v56  ;;  %v7720_v18 = vld [vmem:[#allocation11 + $0xe0] sm:$0xff] }
 0x46e   : > { %v5288_v46 = vmul.f32 %v7431_v39, %v12283_v41  ;;  %v12286_v45 = vsel %vm12285_vm11, 0.0, %v9415_v30  ;;  %v5387_v27 = vsub.f32 1.0, %v7433_v7  ;;  %7448 = vpow2.f32 %v6223_v55  ;;  %v3616_v25 = vpop.f32.mrb[151].mxu0  ;;  %v7437_v14 = vpop.eup %7436  ;;  %v12289_v51 = vld [vmem:[#allocation92_spill] sm:$0xff]  ;;  %v7722_v55 = vld [vmem:[#allocation11 + $0xe8] sm:$0xff] }
 0x46f   : > { %v5291_v48 = vmul.f32 %v7433_v7, %v12286_v45  ;;  %v5480_v41 = vmul.f32 %v7720_v18, %v5384_v36  ;;  %vm12288_vm12 = vnez %v12287_v49  ;;  %v5385_v16 = vsub.f32 1.0, %v7435_v61 }
 0x470   : > { %v12290_v22 = vsel %vm12288_vm12, 0.0, %v12289_v51  ;;  %v5578_v56 = vadd.f32 %v5482_v26, %v5290_v62  ;;  %v5483_v30 = vmul.f32 %v7721_v24, %v5387_v27  ;;  %v5007_v45 = vadd.f32 1.0, %v7437_v14  ;;  %v7439_v49 = vpop.eup %7438  ;;  %v10431_v24 = vpop.f32.mrb[152].mxu0  ;;  %v7723_v51 = vld [vmem:[#allocation11 + $0x110] sm:$0xff] }
 0x471   : > { %v5289_v29 = vmul.f32 %v7435_v61, %v12290_v22  ;;  %7450 = vpow2.f32 %v6221_v59  ;;  %v5576_v7 = vadd.f32 %v5480_v41, %v5288_v46  ;;  %v5481_v25 = vmul.f32 %v7722_v55, %v5385_v16  ;;  %v12292_v22 = vld [vmem:[#allocation83_spill] sm:$0xff]  ;;  %v10422_v59 = vpop.f32.mrb[248].mxu1  ;;  %v7441_v62 = vpop.eup %7440 }
 0x472   : > { %v10412_v20 = vadd.f32 %v10190_v2, %v12291_v17  ;;  %v4470_v36 = vadd.f32 %v10222_v43, %v10181_v8  ;;  %5674 = vst [vmem:[#allocation11 + $0xf0] sm:$0xff] %v5578_v56  ;;  %v5579_v18 = vadd.f32 %v5483_v30, %v5291_v48  ;;  %7452 = vrcp.f32 %v5007_v45  ;;  %v3621_v41 = vpop.f32.mrb[153].mxu0 }
 0x473   : > { %v4462_v26 = vadd.f32 %v10222_v43, %v10192_v33  ;;  %v10420_v14 = vadd.f32 %v10203_v57, %v12292_v22  ;;  %v10425_v2 = vadd.f32 %v9937_v35, %v3766_v6  ;;  %5672 = vst [vmem:[#allocation11 + $0xe0] sm:$0xff] %v5576_v7  ;;  %v5577_v17 = vadd.f32 %v5481_v25, %v5289_v29  ;;  %v10433_v33 = vpop.f32.mrb[249].mxu1  ;;  %v7443_v57 = vpop.eup %7442  ;;  %v12296_v22 = vld [vmem:[#allocation105_spill] sm:$0xff] }
 0x474   : > { %vm12294_vm11 = vnez %v12065_v5  ;;  %v5390_v46 = vsub.f32 1.0, %v7439_v49  ;;  %v3767_v61 = vmul.f32 %v9917_v32, %v10129_v28  ;;  %v3768_v6 = vmul.f32 %v9917_v32, %v10175_v3  ;;  %5675 = vst [vmem:[#allocation11 + $0xf8] sm:$0xff] %v5579_v18  ;;  %v10443_v45 = vpop.f32.mrb[154].mxu0  ;;  %v10445_v28 = vpop.f32.mrb[250].mxu1 }
 0x475   : > { %12293 = vst [vmem:[#allocation86_spill] sm:$0xff] %v10425_v2  ;;  %v12295_v8 = vsel %vm12294_vm11, 0.0, %v9475_v19  ;;  %v3769_v27 = vmul.f32 %v9917_v32, %v10217_v52  ;;  %v5005_v5 = vadd.f32 1.0, %v7441_v62  ;;  %v7445_v19 = vpop.eup %7444  ;;  %5673 = vst [vmem:[#allocation11 + $0xe8] sm:$0xff] %v5577_v17  ;;  %v5010_v16 = vadd.f32 1.0, %v7443_v57  ;;  %v10449_v25 = vpop.f32.mrb[251].mxu1 }
 0x476   : > { %v5294_v48 = vmul.f32 %v7439_v49, %v12295_v8  ;;  %v5486_v29 = vmul.f32 %v7723_v51, %v5390_v46  ;;  %v6226_v56 = vmul.f32 -1.442695, %v4470_v36  ;;  %v4473_v30 = vadd.f32 %v10222_v43, %v10198_v58  ;;  %v7447_v3 = vpop.eup %7446  ;;  %v3624_v49 = vpop.f32.mrb[155].mxu0  ;;  %v12298_v36 = vld [vmem:[#allocation97_spill] sm:$0xff]  ;;  %v12302_v51 = vld [vmem:[#allocation84_spill] sm:$0xff] }
 0x477   : > { %7454 = vrcp.f32 %v5005_v5  ;;  %v5008_v7 = vadd.f32 1.0, %v7445_v19  ;;  %v6224_v55 = vmul.f32 -1.442695, %v4462_v26  ;;  %v4465_v52 = vadd.f32 %v10222_v43, %v10205_v23 }
 0x478   : > { %v5582_v18 = vadd.f32 %v5486_v29, %v5294_v48  ;;  %vm12297_vm12 = vnez %v12296_v22  ;;  %v5388_v17 = vsub.f32 1.0, %v7447_v3  ;;  %7456 = vrcp.f32 %v5010_v16  ;;  %v7449_v8 = vpop.eup %7448  ;;  %v7724_v48 = vld [vmem:[#allocation11 + $0x100] sm:$0xff]  ;;  %v10468_v16 = vpop.f32.mrb[252].mxu1 }
 0x479   : > { %v12299_v62 = vsel %vm12297_vm12, 0.0, %v12298_v36  ;;  %v10457_v46 = vadd.f32 %v9937_v35, %v3767_v61  ;;  %7458 = vrcp.f32 %v5008_v7  ;;  %v6227_v26 = vmul.f32 -1.442695, %v4473_v30  ;;  %v10473_v7 = vpop.f32.mrb[156].mxu0 }
 0x47a   : > { %v5292_v58 = vmul.f32 %v7447_v3, %v12299_v62  ;;  %v10460_v23 = vadd.f32 %v9937_v35, %v3768_v6  ;;  %5678 = vst [vmem:[#allocation11 + $0x110] sm:$0xff] %v5582_v18  ;;  %v5484_v57 = vmul.f32 %v7724_v48, %v5388_v17  ;;  %v5011_v5 = vadd.f32 1.0, %v7449_v8  ;;  %v12306_v18 = vld [vmem:[#allocation101_spill] sm:$0xff] }
 0x47b   : > { %12300 = vst [vmem:[#allocation54_spill] sm:$0xff] %v10457_v46  ;;  %7460 = vpow2.f32 %v6226_v56  ;;  %v7451_v41 = vpop.eup %7450  ;;  %v6225_v19 = vmul.f32 -1.442695, %v4465_v52  ;;  %v10464_v29 = vadd.f32 %v10250_v13, %v12302_v51  ;;  %v4486_v61 = vadd.f32 %v10222_v43, %v10245_v44  ;;  %v10475_v56 = vpop.f32.mrb[253].mxu1  ;;  %v7725_v51 = vld [vmem:[#allocation11 + $0x118] sm:$0xff] }
 0x47c   : > { %12301 = vst [vmem:[#allocation78_spill] sm:$0xff] %v10460_v23  ;;  %7462 = vpow2.f32 %v6224_v55  ;;  %v10471_v6 = vadd.f32 %v9937_v35, %v3769_v27  ;;  %v5580_v30 = vadd.f32 %v5484_v57, %v5292_v58  ;;  %v5009_v3 = vadd.f32 1.0, %v7451_v41  ;;  %v7453_v55 = vpop.eup %7452  ;;  %v3629_v52 = vpop.f32.mrb[157].mxu0  ;;  %v12304_v27 = vld [vmem:[#allocation64_spill] sm:$0xff]  ;;  %v12308_v58 = vld [vmem:[#allocation85_spill] sm:$0xff] }
 0x47d   : > { %7464 = vrcp.f32 %v5011_v5  ;;  %v6230_v13 = vmul.f32 -1.442695, %v4486_v61  ;;  %v4478_v44 = vadd.f32 %v10222_v43, %v10252_v54  ;;  %v10480_v49 = vpop.f32.mrb[254].mxu1  ;;  %vm12305_vm11 = vnez %v12304_v27  ;;  %v10490_v8 = vpop.f32.mrb[158].mxu0  ;;  %v12336_v52 = vld [vmem:[#allocation104_spill] sm:$0xff] }
 0x47e   : > { %12303 = vst [vmem:[#allocation79_spill] sm:$0xff] %v10471_v6  ;;  %7466 = vpow2.f32 %v6227_v26  ;;  %5676 = vst [vmem:[#allocation11 + $0x100] sm:$0xff] %v5580_v30  ;;  %v12307_v22 = vsel %vm12305_vm11, 0.0, %v12306_v18  ;;  %v5391_v62 = vsub.f32 1.0, %v7453_v55  ;;  %v10488_v17 = vadd.f32 %v10266_v53, %v12308_v58  ;;  %v10492_v26 = vpop.f32.mrb[255].mxu1  ;;  %v3632_v57 = vpop.f32.mrb[159].mxu0 }
 0x47f   : > { %v5295_v36 = vmul.f32 %v7453_v55, %v12307_v22  ;;  %7468 = vrcp.f32 %v5009_v3  ;;  %vm12309_vm12 = vcmp.lt.f32.partialorder %v10425_v2, 0.0  ;;  %v12310_v54 = vmov 0  ;;  %v12317_v3 = vld [vmem:[#allocation16_spill] sm:$0xff]  ;;  %v10561_v2 = vpop.f32.mrb[160].mxu0 }
 0x480   : > { %vm10498_vm10 = vmand %vm8970_vm1, %vm12309_vm12  ;;  %vm3968_vm11 = vcmp.lt.f32.partialorder %v10460_v23, 0.0  ;;  %7470 = vpow2.f32 %v6225_v19  ;;  %v6228_v48 = vmul.f32 -1.442695, %v4478_v44  ;;  %v4489_v53 = vadd.f32 %v10222_v43, %v10258_v4 }
 0x481   : > { %v12311_v54 = vsel %vm10498_vm10, 4294967295, %v12310_v54  ;;  %vm12313_vm14 = vcmp.lt.f32.partialorder %v10457_v46, 0.0  ;;  %v12314_v5 = vmov 0  ;;  %v3770_v41 = vmul.f32 %v9917_v32, %v10243_v40  ;;  %v7455_v61 = vpop.eup %7454 }
 0x482   : > { %12312 = vst [vmem:[#allocation90_spill] sm:$0xff] %v12311_v54  ;;  %vm10509_vm4 = vmand %vm8970_vm1, %vm12313_vm14  ;;  %v5487_v19 = vmul.f32 %v7725_v51, %v5391_v62  ;;  %7472 = vpow2.f32 %v6230_v13  ;;  %v6231_v4 = vmul.f32 -1.442695, %v4489_v53  ;;  %v4481_v30 = vadd.f32 %v10222_v43, %v10268_v37  ;;  %v7457_v44 = vpop.eup %7456  ;;  %v12321_v13 = vld [vmem:[#allocation63_spill] sm:$0xff] }
 0x483   : > { %v12315_v5 = vsel %vm10509_vm4, 4294967295, %v12314_v5  ;;  %7474 = vpow2.f32 %v6228_v48  ;;  %v10520_v55 = vadd.f32 %v10296_v47, %v12317_v3  ;;  %vm10529_vm14 = vmand %vm8970_vm1, %vm3968_vm11  ;;  %v12318_v32 = vmov 0  ;;  %v12323_v37 = vld [vmem:[#allocation99_spill] sm:$0xff]  ;;  %v7459_v22 = vpop.eup %7458 }
 0x484   : > { %12316 = vst [vmem:[#allocation56_spill] sm:$0xff] %v12315_v5  ;;  %v12319_v32 = vsel %vm10529_vm14, 4294967295, %v12318_v32  ;;  %v5583_v40 = vadd.f32 %v5487_v19, %v5295_v36  ;;  %vm12322_vm12 = vnez %v12321_v13  ;;  %v5389_v18 = vsub.f32 1.0, %v7455_v61  ;;  %v12329_v36 = vld [vmem:[#allocation113_spill] sm:$0xff]  ;;  %v12331_v48 = vld [vmem:[#allocation107_spill] sm:$0xff]  ;;  %v10552_v19 = vpop.f32.mrb[0].mxu1 }
 0x485   : > { %12320 = vst [vmem:[#allocation98_spill] sm:$0xff] %v12319_v32  ;;  %v12324_v27 = vsel %vm12322_vm12, 0.0, %v12323_v37  ;;  %vm12325_vm10 = vcmp.lt.f32.partialorder %v10471_v6, 0.0  ;;  %v12326_v58 = vmov 0  ;;  %vm12330_vm7 = vnez %v12329_v36  ;;  %v7726_v13 = vld [vmem:[#allocation11 + $0x108] sm:$0xff] }
 0x486   : > { %v5293_v47 = vmul.f32 %v7455_v61, %v12324_v27  ;;  %vm10544_vm11 = vmand %vm8970_vm1, %vm12325_vm10  ;;  %v12332_v53 = vsel %vm12330_vm7, 0.0, %v12331_v48  ;;  %v5394_v51 = vsub.f32 1.0, %v7457_v44  ;;  %7476 = vpow2.f32 %v6231_v4  ;;  %v7461_v61 = vpop.eup %7460  ;;  %5679 = vst [vmem:[#allocation11 + $0x118] sm:$0xff] %v5583_v40  ;;  %v12334_v27 = vld [vmem:[#allocation108_spill] sm:$0xff]  ;;  %v10563_v48 = vpop.f32.mrb[1].mxu1 }
 0x487   : > { %v12327_v58 = vsel %vm10544_vm11, 4294967295, %v12326_v58  ;;  %v5298_v57 = vmul.f32 %v7457_v44, %v12332_v53  ;;  %v10555_v3 = vadd.f32 %v9937_v35, %v3770_v41  ;;  %v5485_v37 = vmul.f32 %v7726_v13, %v5389_v18  ;;  %v7463_v4 = vpop.eup %7462  ;;  %v7727_v35 = vld [vmem:[#allocation11 + $0x130] sm:$0xff]  ;;  %v3637_v18 = vpop.f32.mrb[161].mxu0 }
 0x488   : > { %12328 = vst [vmem:[#allocation60_spill] sm:$0xff] %v12327_v58  ;;  %vm12335_vm10 = vnez %v12334_v27  ;;  %v5392_v36 = vsub.f32 1.0, %v7459_v22  ;;  %v5490_v41 = vmul.f32 %v7727_v35, %v5394_v51  ;;  %v5014_v40 = vadd.f32 1.0, %v7461_v61  ;;  %v10568_v13 = vpop.f32.mrb[2].mxu1  ;;  %v7465_v27 = vpop.eup %7464 }
 0x489   : > { %12333 = vst [vmem:[#allocation95_spill] sm:$0xff] %v10555_v3  ;;  %v12337_v39 = vsel %vm12335_vm10, 0.0, %v12336_v52  ;;  %v6229_v53 = vmul.f32 -1.442695, %v4481_v30  ;;  %v5581_v52 = vadd.f32 %v5485_v37, %v5293_v47  ;;  %v5012_v0 = vadd.f32 1.0, %v7463_v4  ;;  %v10573_v46 = vpop.f32.mrb[162].mxu0  ;;  %v7467_v44 = vpop.eup %7466 }
 0x48a   : > { %v5296_v62 = vmul.f32 %v7459_v22, %v12337_v39  ;;  %v7728_v22 = vld [vmem:[#allocation11 + $0x120] sm:$0xff]  ;;  %v10575_v32 = vpop.f32.mrb[3].mxu1  ;;  %v5586_v51 = vadd.f32 %v5490_v41, %v5298_v57  ;;  %v12339_v30 = vld [vmem:[#allocation109_spill] sm:$0xff]  ;;  %v5395_v23 = vsub.f32 1.0, %v7465_v27  ;;  %7478 = vrcp.f32 %v5014_v40  ;;  %v3640_v58 = vpop.f32.mrb[163].mxu0  ;;  %v7729_v4 = vld [vmem:[#allocation11 + $0x138] sm:$0xff] }
 0x48b   : > { %v5488_v54 = vmul.f32 %v7728_v22, %v5392_v36  ;;  %v12340_v35 = vsel %vm9701_vm2, 0.0, %v12339_v30  ;;  %v7469_v39 = vpop.eup %7468  ;;  %vm3970_vm7 = vcmp.lt.f32.partialorder %v10555_v3, 0.0  ;;  %5677 = vst [vmem:[#allocation11 + $0x108] sm:$0xff] %v5581_v52  ;;  %7480 = vrcp.f32 %v5012_v0  ;;  %v12341_v41 = vld [vmem:[#allocation110_spill] sm:$0xff]  ;;  %v10587_v58 = vld [vmem:[%s8341_s27] ss:$0 sm:$0xff] }
 0x48c   : > { %v5299_v18 = vmul.f32 %v7465_v27, %v12340_v35  ;;  %v5015_v37 = vadd.f32 1.0, %v7467_v44  ;;  %v7471_v36 = vpop.eup %7470  ;;  %5682 = vst [vmem:[#allocation11 + $0x130] sm:$0xff] %v5586_v51  ;;  %v5491_v57 = vmul.f32 %v7729_v4, %v5395_v23  ;;  %vm12342_vm12 = vnez %v12341_v41  ;;  %v12343_v22 = vld [vmem:[#allocation106_spill] sm:$0xff]  ;;  %v7731_v44 = vld [vmem:[#allocation11 + $0x128] sm:$0xff]  ;;  %vm10640_vm2 = vmand %vm8970_vm1, %vm3970_vm7 }
 0x48d   : > { %v5584_v47 = vadd.f32 %v5488_v54, %v5296_v62  ;;  %v12344_v61 = vsel %vm12342_vm12, 0.0, %v12343_v22  ;;  %v5393_v27 = vsub.f32 1.0, %v7469_v39  ;;  %7482 = vpow2.f32 %v6229_v53  ;;  %v7473_v40 = vpop.eup %7472  ;;  %v12345_v41 = vld [vmem:[#allocation17_spill] sm:$0xff]  ;;  %v12368_v3 = vld [vmem:[#allocation119_spill] sm:$0xff] }
 0x48e   : > { %v5297_v30 = vmul.f32 %v7469_v39, %v12344_v61  ;;  %v3771_v52 = vmul.f32 %v10587_v58, %v10307_v34  ;;  %7484 = vrcp.f32 %v5015_v37  ;;  %v5013_v0 = vadd.f32 1.0, %v7471_v36  ;;  %v7475_v23 = vpop.eup %7474  ;;  %v10595_v39 = vpop.f32.mrb[4].mxu1 }
 0x48f   : > { %5680 = vst [vmem:[#allocation11 + $0x120] sm:$0xff] %v5584_v47  ;;  %v4502_v54 = vadd.f32 %v10222_v43, %v10282_v11  ;;  %v5587_v62 = vadd.f32 %v5491_v57, %v5299_v18  ;;  %v5489_v51 = vmul.f32 %v7731_v44, %v5393_v27  ;;  %v5018_v35 = vadd.f32 1.0, %v7473_v40  ;;  %v10599_v37 = vpop.f32.mrb[164].mxu0  ;;  %v10601_v36 = vpop.f32.mrb[5].mxu1 }
 0x490   : > { %v4494_v53 = vadd.f32 %v10222_v43, %v10298_v38  ;;  %v3772_v4 = vmul.f32 %v10587_v58, %v10341_v63  ;;  %7486 = vrcp.f32 %v5013_v0  ;;  %v5016_v34 = vadd.f32 1.0, %v7475_v23  ;;  %v7477_v11 = vpop.eup %7476  ;;  %v3645_v22 = vpop.f32.mrb[165].mxu0 }
 0x491   : > { %v6234_v47 = vmul.f32 -1.442695, %v4502_v54  ;;  %5683 = vst [vmem:[#allocation11 + $0x138] sm:$0xff] %v5587_v62  ;;  %v5585_v18 = vadd.f32 %v5489_v51, %v5297_v30  ;;  %7488 = vrcp.f32 %v5018_v35  ;;  %v10605_v38 = vadd.f32 %v10323_v10, %v12345_v41  ;;  %v10607_v61 = vpop.f32.mrb[6].mxu1  ;;  %v10613_v0 = vpop.f32.mrb[166].mxu0  ;;  %v12346_v54 = vld [vmem:[#allocation37_spill] sm:$0xff] }
 0x492   : > { %v6232_v57 = vmul.f32 -1.442695, %v4494_v53  ;;  %7490 = vrcp.f32 %v5016_v34  ;;  %v5019_v63 = vadd.f32 1.0, %v7477_v11  ;;  %v4505_v27 = vadd.f32 %v10222_v43, %v10309_v42  ;;  %v10615_v30 = vpop.f32.mrb[7].mxu1  ;;  %v3648_v42 = vpop.f32.mrb[167].mxu0  ;;  %v12351_v11 = vld [vmem:[#allocation112_spill] sm:$0xff] }
 0x493   : > { %v4497_v40 = vadd.f32 %v10222_v43, %v10325_v12  ;;  %5681 = vst [vmem:[#allocation11 + $0x128] sm:$0xff] %v5585_v18  ;;  %v3773_v10 = vmul.f32 %v10587_v58, %v10412_v20  ;;  %7492 = vpow2.f32 %v6234_v47  ;;  %v10621_v23 = vadd.f32 %v10368_v1, %v12346_v54  ;;  %v10628_v53 = vld [vmem:[%s8347_s18] ss:$0 sm:$0xff]  ;;  %v10657_v42 = vpop.f32.mrb[8].mxu1 }
 0x494   : > { %v4518_v62 = vadd.f32 %v10222_v43, %v10366_v31  ;;  %7494 = vrcp.f32 %v5019_v63  ;;  %v6235_v44 = vmul.f32 -1.442695, %v4505_v27  ;;  %v4510_v51 = vadd.f32 %v10222_v43, %v10370_v50  ;;  %v7479_v35 = vpop.eup %7478  ;;  %v12355_v27 = vld [vmem:[#allocation65_spill] sm:$0xff]  ;;  %12357 = vst [vmem:[#allocation89_spill] sm:$0xff] %v10657_v42  ;;  %v10661_v6 = vpop.f32.mrb[9].mxu1  ;;  %v7734_v63 = vld [vmem:[#allocation11 + $0x140] sm:$0xff] }
 0x495   : > { %v6233_v12 = vmul.f32 -1.442695, %v4497_v40  ;;  %v10631_v20 = vadd.f32 %v10628_v53, %v3771_v52  ;;  %v10634_v34 = vadd.f32 %v10628_v53, %v3772_v4  ;;  %7496 = vpow2.f32 %v6232_v57  ;;  %v7481_v47 = vpop.eup %7480  ;;  %12359 = vst [vmem:[#allocation81_spill] sm:$0xff] %v10661_v6 }
 0x496   : > { %v6238_v1 = vmul.f32 -1.442695, %v4518_v62  ;;  %v12347_v31 = vmov 0  ;;  %v12352_v18 = vsel %vm9737_vm5, 0.0, %v12351_v11  ;;  %v5398_v41 = vsub.f32 1.0, %v7479_v35  ;;  %v7733_v11 = vld [vmem:[#allocation11 + $0x150] sm:$0xff] }
 0x497   : > { %v12348_v31 = vsel %vm10640_vm2, 4294967295, %v12347_v31  ;;  %v5302_v52 = vmul.f32 %v7479_v35, %v12352_v18  ;;  %v3774_v4 = vmul.f32 %v10587_v58, %v10420_v14  ;;  %7498 = vpow2.f32 %v6235_v44  ;;  %v7483_v57 = vpop.eup %7482  ;;  %v10659_v44 = vpop.f32.mrb[168].mxu0 }
 0x498   : > { %12349 = vst [vmem:[#allocation87_spill] sm:$0xff] %v12348_v31  ;;  %v10651_v22 = vadd.f32 %v10628_v53, %v3773_v10  ;;  %v12356_v40 = vsel %vm9713_vm15, 0.0, %v12355_v27  ;;  %v5396_v62 = vsub.f32 1.0, %v7481_v47  ;;  %7500 = vpow2.f32 %v6233_v12  ;;  %v7485_v50 = vpop.eup %7484  ;;  %12358 = vst [vmem:[#allocation80_spill] sm:$0xff] %v10659_v44  ;;  %v12361_v12 = vld [vmem:[#allocation114_spill] sm:$0xff] }
 0x499   : > { %v5300_v54 = vmul.f32 %v7481_v47, %v12356_v40  ;;  %v5494_v35 = vmul.f32 %v7733_v11, %v5398_v41  ;;  %v5017_v18 = vadd.f32 1.0, %v7483_v57  ;;  %7502 = vpow2.f32 %v6238_v1  ;;  %v3653_v41 = vpop.f32.mrb[169].mxu0  ;;  %v10670_v57 = vpop.f32.mrb[10].mxu1  ;;  %v12365_v10 = vld [vmem:[#allocation38_spill] sm:$0xff] }
 0x49a   : > { %12353 = vst [vmem:[#allocation62_spill] sm:$0xff] %v10651_v22  ;;  %v6236_v14 = vmul.f32 -1.442695, %v4510_v51  ;;  %v5492_v27 = vmul.f32 %v7734_v63, %v5396_v62  ;;  %v12362_v40 = vsel %vm9750_vm3, 0.0, %v12361_v12  ;;  %v5399_v5 = vsub.f32 1.0, %v7485_v50  ;;  %12363 = vst [vmem:[#allocation96_spill] sm:$0xff] %v10670_v57  ;;  %v7487_v51 = vpop.eup %7486 }
 0x49b   : > { %v5303_v42 = vmul.f32 %v7485_v50, %v12362_v40  ;;  %vm3971_vm15 = vcmp.lt.f32.partialorder %v10631_v20, 0.0  ;;  %v5590_v1 = vadd.f32 %v5494_v35, %v5302_v52  ;;  %v10674_v11 = vadd.f32 %v10628_v53, %v3774_v4  ;;  %v10680_v63 = vpop.f32.mrb[170].mxu0  ;;  %v10682_v47 = vpop.f32.mrb[11].mxu1  ;;  %v7735_v40 = vld [vmem:[#allocation11 + $0x158] sm:$0xff] }
 0x49c   : > { %7504 = vrcp.f32 %v5017_v18  ;;  %v10678_v62 = vadd.f32 %v10395_v9, %v12365_v10  ;;  %12366 = vst [vmem:[#allocation103_spill] sm:$0xff] %v10680_v63  ;;  %12367 = vst [vmem:[#allocation94_spill] sm:$0xff] %v10682_v47  ;;  %v7489_v50 = vpop.eup %7488  ;;  %vm3972_vm3 = vcmp.lt.f32.partialorder %v10634_v34, 0.0  ;;  %v5588_v12 = vadd.f32 %v5492_v27, %v5300_v54  ;;  %v12370_v52 = vld [vmem:[#allocation111_spill] sm:$0xff]  ;;  %v3656_v31 = vpop.f32.mrb[171].mxu0 }
 0x49d   : > { %12364 = vst [vmem:[#allocation88_spill] sm:$0xff] %v10674_v11  ;;  %v5495_v41 = vmul.f32 %v7735_v40, %v5399_v5  ;;  %vm12369_vm5 = vnez %v12368_v3  ;;  %v5397_v18 = vsub.f32 1.0, %v7487_v51  ;;  %v7491_v57 = vpop.eup %7490  ;;  %vm3973_vm10 = vcmp.lt.f32.partialorder %v10651_v22, 0.0  ;;  %5686 = vst [vmem:[#allocation11 + $0x150] sm:$0xff] %v5590_v1  ;;  %v7736_v40 = vld [vmem:[#allocation11 + $0x148] sm:$0xff]  ;;  %v12373_v31 = vld [vmem:[#allocation120_spill] sm:$0xff] }
 0x49e   : > { %v12371_v4 = vsel %vm12369_vm5, 0.0, %v12370_v52  ;;  %v3775_v9 = vmul.f32 %v10587_v58, %v10464_v29  ;;  %v12372_v54 = vsel %vm9846_vm6, 0.0, %v9782_v60  ;;  %v5402_v5 = vsub.f32 1.0, %v7489_v50  ;;  %v7493_v3 = vpop.eup %7492  ;;  %5684 = vst [vmem:[#allocation11 + $0x140] sm:$0xff] %v5588_v12  ;;  %v12375_v52 = vld [vmem:[#allocation116_spill] sm:$0xff]  ;;  %vm10739_vm5 = vmand %vm8970_vm1, %vm3971_vm15 }
 0x49f   : > { %v5301_v35 = vmul.f32 %v7487_v51, %v12371_v4  ;;  %v5306_v10 = vmul.f32 %v7489_v50, %v12372_v54  ;;  %7506 = vpow2.f32 %v6236_v14  ;;  %v5591_v27 = vadd.f32 %v5495_v41, %v5303_v42  ;;  %v7495_v63 = vpop.eup %7494  ;;  %v12377_v54 = vld [vmem:[#allocation33_spill] sm:$0xff]  ;;  %v7738_v12 = vld [vmem:[#allocation11 + $0x160] sm:$0xff]  ;;  %vm10752_vm12 = vmand %vm8970_vm1, %vm3972_vm3 }
 0x4a0   : > { %v5493_v51 = vmul.f32 %v7736_v40, %v5397_v18  ;;  %vm12374_vm7 = vnez %v12373_v31  ;;  %v5400_v47 = vsub.f32 1.0, %v7491_v57  ;;  %v5498_v29 = vmul.f32 %v7737_v21, %v5402_v5  ;;  %v7497_v50 = vpop.eup %7496  ;;  %v12378_v18 = vld [vmem:[#allocation70_spill] sm:$0xff]  ;;  %v12380_v40 = vld [vmem:[#allocation68_spill] sm:$0xff]  ;;  %v10711_v21 = vpop.f32.mrb[172].mxu0  ;;  %vm10766_vm15 = vmand %vm8970_vm1, %vm3973_vm10 }
 0x4a1   : > { %v12376_v4 = vsel %vm12374_vm7, 0.0, %v12375_v52  ;;  %v5022_v60 = vadd.f32 1.0, %v7493_v3  ;;  %v4521_v14 = vadd.f32 %v10222_v43, %v12377_v54  ;;  %5687 = vst [vmem:[#allocation11 + $0x158] sm:$0xff] %v5591_v27  ;;  %vm12379_vm6 = vnez %v12378_v18  ;;  %v7499_v6 = vpop.eup %7498  ;;  %v3661_v18 = vpop.f32.mrb[173].mxu0  ;;  %v10851_v22 = vld [vmem:[%s8351_s17] ss:$0 sm:$0xff] }
 0x4a2   : > { %v5304_v1 = vmul.f32 %v7491_v57, %v12376_v4  ;;  %v5589_v42 = vadd.f32 %v5493_v51, %v5301_v35  ;;  %v5496_v41 = vmul.f32 %v7738_v12, %v5400_v47  ;;  %v12381_v31 = vsel %vm12379_vm6, 0.0, %v12380_v40  ;;  %v10707_v4 = vpop.f32.mrb[12].mxu1  ;;  %v7501_v47 = vpop.eup %7500 }
 0x4a3   : > { %v5307_v52 = vmul.f32 %v7495_v63, %v12381_v31  ;;  %v5403_v57 = vsub.f32 1.0, %v7495_v63  ;;  %v5594_v44 = vadd.f32 %v5498_v29, %v5306_v10  ;;  %v3776_v5 = vmul.f32 %v10587_v58, %v10488_v17  ;;  %v10713_v35 = vpop.f32.mrb[13].mxu1  ;;  %v7739_v63 = vld [vmem:[#allocation11 + $0x178] sm:$0xff]  ;;  %v7503_v29 = vpop.eup %7502 }
 0x4a4   : > { %7508 = vrcp.f32 %v5022_v60  ;;  %v5020_v3 = vadd.f32 1.0, %v7497_v50  ;;  %5685 = vst [vmem:[#allocation11 + $0x148] sm:$0xff] %v5589_v42  ;;  %v10716_v27 = vadd.f32 %v10628_v53, %v3775_v9  ;;  %v5592_v51 = vadd.f32 %v5496_v41, %v5304_v1  ;;  %v10718_v10 = vpop.f32.mrb[14].mxu1  ;;  %v12383_v50 = vld [vmem:[#allocation77_spill] sm:$0xff]  ;;  %v10722_v31 = vpop.f32.mrb[174].mxu0 }
 0x4a5   : > { %v5499_v54 = vmul.f32 %v7739_v63, %v5403_v57  ;;  %v5023_v12 = vadd.f32 1.0, %v7499_v6  ;;  %5690 = vst [vmem:[#allocation11 + $0x170] sm:$0xff] %v5594_v44  ;;  %v5021_v17 = vadd.f32 1.0, %v7501_v47  ;;  %v6239_v60 = vmul.f32 -1.442695, %v4521_v14  ;;  %v10724_v42 = vpop.f32.mrb[15].mxu1 }
 0x4a6   : > { %12382 = vst [vmem:[#allocation100_spill] sm:$0xff] %v10716_v27  ;;  %7510 = vrcp.f32 %v5020_v3  ;;  %v4513_v40 = vadd.f32 %v10222_v43, %v12383_v50  ;;  %5688 = vst [vmem:[#allocation11 + $0x160] sm:$0xff] %v5592_v51  ;;  %v5026_v1 = vadd.f32 1.0, %v7503_v29  ;;  %v12384_v6 = vld [vmem:[#allocation18_spill] sm:$0xff]  ;;  %v3664_v57 = vpop.f32.mrb[175].mxu0  ;;  %v7505_v44 = vpop.eup %7504  ;;  %v10731_v3 = vadd.f32 %v10628_v53, %v3776_v5 }
 0x4a7   : > { %v5595_v9 = vadd.f32 %v5499_v54, %v5307_v52  ;;  %7512 = vrcp.f32 %v5023_v12  ;;  %v10728_v41 = vadd.f32 %v10431_v24, %v12384_v6  ;;  %v4534_v47 = vadd.f32 %v10222_v43, %v10422_v59  ;;  %v12388_v24 = vld [vmem:[#allocation121_spill] sm:$0xff]  ;;  %v12390_v5 = vld [vmem:[#allocation118_spill] sm:$0xff] }
 0x4a8   : > { %12385 = vst [vmem:[#allocation91_spill] sm:$0xff] %v10731_v3  ;;  %7514 = vrcp.f32 %v5021_v17  ;;  %v6237_v14 = vmul.f32 -1.442695, %v4513_v40  ;;  %vm3975_vm7 = vcmp.lt.f32.partialorder %v10716_v27, 0.0  ;;  %vm12389_vm6 = vnez %v12388_v24  ;;  %v12394_v17 = vld [vmem:[#allocation19_spill] sm:$0xff] }
 0x4a9   : > { %5691 = vst [vmem:[#allocation11 + $0x178] sm:$0xff] %v5595_v9  ;;  %v12391_v51 = vsel %vm12389_vm6, 0.0, %v12390_v5  ;;  %v5401_v54 = vsub.f32 1.0, %v7505_v44  ;;  %7516 = vrcp.f32 %v5026_v1  ;;  %v7507_v12 = vpop.eup %7506  ;;  %v6242_v18 = vmul.f32 -1.442695, %v4534_v47  ;;  %v7740_v9 = vld [vmem:[#allocation11 + $0x168] sm:$0xff] }
 0x4aa   : > { %v5305_v63 = vmul.f32 %v7505_v44, %v12391_v51  ;;  %7518 = vpow2.f32 %v6239_v60  ;;  %v4526_v29 = vadd.f32 %v10222_v43, %v10433_v33  ;;  %v10760_v50 = vadd.f32 %v10443_v45, %v12394_v17  ;;  %v10772_v33 = vpop.f32.mrb[16].mxu1  ;;  %v12409_v17 = vld [vmem:[#allocation39_spill] sm:$0xff] }
 0x4ab   : > { %v12395_v40 = vmov 0  ;;  %v5497_v1 = vmul.f32 %v7740_v9, %v5401_v54  ;;  %v3777_v60 = vmul.f32 %v10587_v58, %v10520_v55  ;;  %v5024_v6 = vadd.f32 1.0, %v7507_v12  ;;  %12398 = vst [vmem:[#allocation92_spill] sm:$0xff] %v10772_v33  ;;  %v10785_v55 = vpop.f32.mrb[176].mxu0  ;;  %v12431_v27 = vld [vmem:[#allocation71_spill] sm:$0xff] }
 0x4ac   : > { %v12396_v40 = vsel %vm10766_vm15, 4294967295, %v12395_v40  ;;  %7520 = vpow2.f32 %v6237_v14  ;;  %vm12399_vm3 = vcmp.lt.f32.partialorder %v10674_v11, 0.0  ;;  %v12400_v45 = vmov 0  ;;  %12403 = vst [vmem:[#allocation83_spill] sm:$0xff] %v10785_v55  ;;  %v10787_v14 = vpop.f32.mrb[17].mxu1  ;;  %v3669_v51 = vpop.f32.mrb[177].mxu0 }
 0x4ad   : > { %12397 = vst [vmem:[#allocation102_spill] sm:$0xff] %v12396_v40  ;;  %vm10778_vm6 = vmand %vm8970_vm1, %vm12399_vm3  ;;  %vm3976_vm10 = vcmp.lt.f32.partialorder %v10731_v3, 0.0  ;;  %7522 = vpow2.f32 %v6242_v18  ;;  %v6240_v57 = vmul.f32 -1.442695, %v4526_v29  ;;  %v4537_v44 = vadd.f32 %v10222_v43, %v10445_v28  ;;  %v10802_v54 = vpop.f32.mrb[18].mxu1  ;;  %v10811_v47 = vpop.f32.mrb[178].mxu0 }
 0x4ae   : > { %v12401_v45 = vsel %vm10778_vm6, 4294967295, %v12400_v45  ;;  %12404 = vst [vmem:[#allocation105_spill] sm:$0xff] %v10787_v14  ;;  %vm10796_vm3 = vmand %vm8970_vm1, %vm3975_vm7  ;;  %v12405_v24 = vmov 0  ;;  %v5593_v5 = vadd.f32 %v5497_v1, %v5305_v63  ;;  %7524 = vrcp.f32 %v5024_v6  ;;  %v7509_v12 = vpop.eup %7508  ;;  %v10813_v63 = vpop.f32.mrb[19].mxu1 }
 0x4af   : > { %12402 = vst [vmem:[#allocation82_spill] sm:$0xff] %v12401_v45  ;;  %v12406_v24 = vsel %vm10796_vm3, 4294967295, %v12405_v24  ;;  %v4529_v28 = vadd.f32 %v10222_v43, %v10449_v25  ;;  %12408 = vst [vmem:[#allocation84_spill] sm:$0xff] %v10802_v54  ;;  %7526 = vpow2.f32 %v6240_v57  ;;  %v6243_v29 = vmul.f32 -1.442695, %v4537_v44  ;;  %v12423_v45 = vld [vmem:[#allocation24_spill] sm:$0xff] }
 0x4b0   : > { %12407 = vst [vmem:[#allocation97_spill] sm:$0xff] %v12406_v24  ;;  %v10809_v9 = vadd.f32 %v10473_v7, %v12409_v17  ;;  %12410 = vst [vmem:[#allocation64_spill] sm:$0xff] %v10811_v47  ;;  %v12412_v43 = vmov 0  ;;  %v10824_v25 = vadd.f32 %v10628_v53, %v3777_v60  ;;  %v12416_v7 = vld [vmem:[#allocation28_spill] sm:$0xff]  ;;  %v5406_v44 = vsub.f32 1.0, %v7509_v12  ;;  %v3672_v17 = vpop.f32.mrb[179].mxu0  ;;  %v7511_v18 = vpop.eup %7510 }
 0x4b1   : > { %12411 = vst [vmem:[#allocation101_spill] sm:$0xff] %v10813_v63  ;;  %vm10819_vm7 = vmand %vm8970_vm1, %vm3976_vm10  ;;  %v12417_v6 = vsel %vm10054_vm13, 0.0, %v12416_v7  ;;  %v6241_v51 = vmul.f32 -1.442695, %v4529_v28  ;;  %7528 = vpow2.f32 %v6243_v29  ;;  %v7513_v1 = vpop.eup %7512  ;;  %v7741_v7 = vld [vmem:[#allocation11 + $0x190] sm:$0xff]  ;;  %v5404_v14 = vsub.f32 1.0, %v7511_v18 }
 0x4b2   : > { %v12413_v43 = vsel %vm10819_vm7, 4294967295, %v12412_v43  ;;  %5689 = vst [vmem:[#allocation11 + $0x168] sm:$0xff] %v5593_v5  ;;  %v5310_v57 = vmul.f32 %v7509_v12, %v12417_v6  ;;  %v5502_v12 = vmul.f32 %v7741_v7, %v5406_v44  ;;  %v12418_v28 = vld [vmem:[#allocation30_spill] sm:$0xff]  ;;  %v12420_v6 = vld [vmem:[#allocation69_spill] sm:$0xff]  ;;  %v7515_v63 = vpop.eup %7514  ;;  %v12424_v60 = vsel %vm10068_vm0, 0.0, %v12423_v45  ;;  %v10860_v45 = vpop.f32.mrb[20].mxu1 }
 0x4b3   : > { %12414 = vst [vmem:[#allocation85_spill] sm:$0xff] %v12413_v43  ;;  %vm12419_vm13 = vnez %v12418_v28  ;;  %7530 = vpow2.f32 %v6241_v51  ;;  %v5311_v29 = vmul.f32 %v7513_v1, %v12424_v60  ;;  %v5407_v47 = vsub.f32 1.0, %v7513_v1  ;;  %v7517_v7 = vpop.eup %7516  ;;  %v7743_v51 = vld [vmem:[#allocation11 + $0x180] sm:$0xff]  ;;  %12429 = vst [vmem:[#allocation16_spill] sm:$0xff] %v10860_v45  ;;  %v7744_v43 = vld [vmem:[#allocation11 + $0x198] sm:$0xff] }
 0x4b4   : > { %v12421_v17 = vsel %vm12419_vm13, 0.0, %v12420_v6  ;;  %v4550_v44 = vadd.f32 %v10851_v22, %v10468_v16  ;;  %vm3977_vm10 = vcmp.lt.f32.partialorder %v10824_v25, 0.0  ;;  %v5500_v28 = vmul.f32 %v7743_v51, %v5404_v14  ;;  %v12425_v6 = vld [vmem:[#allocation31_spill] sm:$0xff]  ;;  %v7519_v60 = vpop.eup %7518  ;;  %v10868_v51 = vpop.f32.mrb[180].mxu0 }
 0x4b5   : > { %v5308_v54 = vmul.f32 %v7511_v18, %v12421_v17  ;;  %v5598_v18 = vadd.f32 %v5502_v12, %v5310_v57  ;;  %vm12426_vm13 = vnez %v12425_v6  ;;  %v12427_v17 = vld [vmem:[#allocation45_spill] sm:$0xff]  ;;  %v5405_v3 = vsub.f32 1.0, %v7515_v63  ;;  %12433 = vst [vmem:[#allocation63_spill] sm:$0xff] %v10868_v51  ;;  %v10870_v6 = vpop.f32.mrb[21].mxu1 }
 0x4b6   : > { %v12428_v5 = vsel %vm12426_vm13, 0.0, %v12427_v17  ;;  %v3778_v1 = vmul.f32 %v10587_v58, %v10605_v38  ;;  %v5503_v16 = vmul.f32 %v7744_v43, %v5407_v47  ;;  %v12432_v57 = vsel %vm10113_vm9, 0.0, %v12431_v27  ;;  %12434 = vst [vmem:[#allocation99_spill] sm:$0xff] %v10870_v6  ;;  %v7745_v17 = vld [vmem:[#allocation11 + $0x188] sm:$0xff]  ;;  %v3677_v47 = vpop.f32.mrb[181].mxu0  ;;  %v10874_v43 = vpop.f32.mrb[22].mxu1  ;;  %vm10918_vm9 = vmand %vm8970_vm1, %vm3977_vm10 }
 0x4b7   : > { %v5309_v11 = vmul.f32 %v7515_v63, %v12428_v5  ;;  %v5314_v12 = vmul.f32 %v7517_v7, %v12432_v57  ;;  %v5410_v14 = vsub.f32 1.0, %v7517_v7  ;;  %v7521_v5 = vpop.eup %7520  ;;  %5694 = vst [vmem:[#allocation11 + $0x190] sm:$0xff] %v5598_v18  ;;  %v5596_v63 = vadd.f32 %v5500_v28, %v5308_v54  ;;  %v7746_v57 = vld [vmem:[#allocation11 + $0x1b0] sm:$0xff]  ;;  %v10876_v55 = vpop.f32.mrb[182].mxu0  ;;  %v7747_v47 = vld [vmem:[#allocation11 + $0x1a0] sm:$0xff] }
 0x4b8   : > { %v5501_v45 = vmul.f32 %v7745_v17, %v5405_v3  ;;  %v3779_v38 = vmul.f32 %v10587_v58, %v10621_v23  ;;  %v5027_v24 = vadd.f32 1.0, %v7519_v60  ;;  %v7523_v40 = vpop.eup %7522  ;;  %v5599_v27 = vadd.f32 %v5503_v16, %v5311_v29  ;;  %v10878_v6 = vpop.f32.mrb[23].mxu1 }
 0x4b9   : > { %v5506_v7 = vmul.f32 %v7746_v57, %v5410_v14  ;;  %v5025_v33 = vadd.f32 1.0, %v7521_v5  ;;  %v6246_v51 = vmul.f32 -1.442695, %v4550_v44  ;;  %v7525_v54 = vpop.eup %7524  ;;  %5692 = vst [vmem:[#allocation11 + $0x180] sm:$0xff] %v5596_v63  ;;  %v5030_v18 = vadd.f32 1.0, %v7523_v40  ;;  %v3680_v28 = vpop.f32.mrb[183].mxu0 }
 0x4ba   : > { %v5597_v3 = vadd.f32 %v5501_v45, %v5309_v11  ;;  %7532 = vrcp.f32 %v5027_v24  ;;  %v4542_v23 = vadd.f32 %v10851_v22, %v10475_v56  ;;  %v7527_v60 = vpop.eup %7526  ;;  %5695 = vst [vmem:[#allocation11 + $0x198] sm:$0xff] %v5599_v27  ;;  %v12436_v14 = vld [vmem:[#allocation53_spill] sm:$0xff]  ;;  %v5408_v17 = vsub.f32 1.0, %v7525_v54  ;;  %v12438_v24 = vld [vmem:[#allocation40_spill] sm:$0xff] }
 0x4bb   : > { %v5602_v29 = vadd.f32 %v5506_v7, %v5314_v12  ;;  %v12437_v44 = vsel %vm10086_vm8, 0.0, %v12436_v14  ;;  %7534 = vrcp.f32 %v5025_v33  ;;  %v5028_v63 = vadd.f32 1.0, %v7527_v60  ;;  %v7529_v56 = vpop.eup %7528  ;;  %v12443_v14 = vld [vmem:[#allocation21_spill] sm:$0xff] }
 0x4bc   : > { %v5312_v5 = vmul.f32 %v7525_v54, %v12437_v44  ;;  %5693 = vst [vmem:[#allocation11 + $0x188] sm:$0xff] %v5597_v3  ;;  %7536 = vrcp.f32 %v5030_v18  ;;  %v6244_v11 = vmul.f32 -1.442695, %v4542_v23  ;;  %v10888_v45 = vadd.f32 %v10490_v8, %v12438_v24  ;;  %v12439_v54 = vld [vmem:[#allocation20_spill] sm:$0xff]  ;;  %v10900_v3 = vpop.f32.mrb[24].mxu1 }
 0x4bd   : > { %5698 = vst [vmem:[#allocation11 + $0x1b0] sm:$0xff] %v5602_v29  ;;  %v5504_v40 = vmul.f32 %v7747_v47, %v5408_v17  ;;  %7538 = vpow2.f32 %v6246_v51  ;;  %v4553_v12 = vadd.f32 %v10851_v22, %v10480_v49  ;;  %v4545_v27 = vadd.f32 %v10851_v22, %v10492_v26  ;;  %v7531_v33 = vpop.eup %7530  ;;  %v10902_v49 = vpop.f32.mrb[184].mxu0 }
 0x4be   : > { %v3780_v57 = vmul.f32 %v10587_v58, %v10678_v62  ;;  %7540 = vrcp.f32 %v5028_v63  ;;  %v5031_v7 = vadd.f32 1.0, %v7529_v56  ;;  %v10898_v8 = vadd.f32 %v10561_v2, %v12439_v54  ;;  %v10904_v28 = vpop.f32.mrb[25].mxu1  ;;  %v3685_v2 = vpop.f32.mrb[185].mxu0 }
 0x4bf   : > { %v5600_v18 = vadd.f32 %v5504_v40, %v5312_v5  ;;  %v5029_v51 = vadd.f32 1.0, %v7531_v33  ;;  %7542 = vpow2.f32 %v6244_v11  ;;  %v6247_v23 = vmul.f32 -1.442695, %v4553_v12  ;;  %v10912_v29 = vpop.f32.mrb[26].mxu1  ;;  %v10930_v5 = vpop.f32.mrb[186].mxu0 }
 0x4c0   : > { %v10907_v26 = vadd.f32 %v10628_v53, %v3778_v1  ;;  %v10910_v62 = vadd.f32 %v10628_v53, %v3779_v38  ;;  %7544 = vrcp.f32 %v5031_v7  ;;  %v6245_v60 = vmul.f32 -1.442695, %v4545_v27  ;;  %12440 = vst [vmem:[#allocation113_spill] sm:$0xff] %v10912_v29  ;;  %12444 = vst [vmem:[#allocation107_spill] sm:$0xff] %v10930_v5  ;;  %v10932_v17 = vpop.f32.mrb[27].mxu1  ;;  %v3688_v24 = vpop.f32.mrb[187].mxu0 }
 0x4c1   : > { %v12441_v16 = vmov 0  ;;  %5696 = vst [vmem:[#allocation11 + $0x1a0] sm:$0xff] %v5600_v18  ;;  %7546 = vrcp.f32 %v5029_v51  ;;  %v4566_v1 = vadd.f32 %v10851_v22, %v10552_v19  ;;  %v4558_v38 = vadd.f32 %v10851_v22, %v10563_v48  ;;  %12445 = vst [vmem:[#allocation108_spill] sm:$0xff] %v10932_v17  ;;  %v12450_v18 = vld [vmem:[#allocation72_spill] sm:$0xff]  ;;  %v12452_v51 = vld [vmem:[#allocation47_spill] sm:$0xff] }
 0x4c2   : > { %v12442_v16 = vsel %vm10918_vm9, 4294967295, %v12441_v16  ;;  %v10928_v44 = vadd.f32 %v10573_v46, %v12443_v14  ;;  %v10935_v63 = vadd.f32 %v10628_v53, %v3780_v57  ;;  %v3781_v11 = vmul.f32 %v10587_v58, %v10728_v41  ;;  %v7748_v14 = vld [vmem:[#allocation11 + $0x1b8] sm:$0xff]  ;;  %v12455_v24 = vld [vmem:[#allocation49_spill] sm:$0xff] }
 0x4c3   : > { %7548 = vpow2.f32 %v6247_v23  ;;  %v4569_v19 = vadd.f32 %v10851_v22, %v10568_v13  ;;  %v3782_v48 = vmul.f32 %v10587_v58, %v10760_v50  ;;  %v6250_v46 = vmul.f32 -1.442695, %v4566_v1  ;;  %v12446_v13 = vld [vmem:[#allocation73_spill] sm:$0xff]  ;;  %v12448_v50 = vld [vmem:[#allocation27_spill] sm:$0xff]  ;;  %v10962_v1 = vpop.f32.mrb[28].mxu1 }
 0x4c4   : > { %7550 = vpow2.f32 %v6245_v60  ;;  %v6248_v56 = vmul.f32 -1.442695, %v4558_v38  ;;  %v7533_v47 = vpop.eup %7532  ;;  %vm3978_vm0 = vcmp.lt.f32.partialorder %v10907_v26, 0.0  ;;  %v4561_v41 = vadd.f32 %v10851_v22, %v10575_v32  ;;  %12454 = vst [vmem:[#allocation104_spill] sm:$0xff] %v10962_v1  ;;  %v12462_v1 = vld [vmem:[#allocation51_spill] sm:$0xff] }
 0x4c5   : > { %v6251_v12 = vmul.f32 -1.442695, %v4569_v19  ;;  %v7535_v27 = vpop.eup %7534  ;;  %vm3979_vm8 = vcmp.lt.f32.partialorder %v10910_v62, 0.0  ;;  %vm12447_vm10 = vnez %v12446_v13  ;;  %v5411_v7 = vsub.f32 1.0, %v7533_v47 }
 0x4c6   : > { %v12449_v33 = vsel %vm12447_vm10, 0.0, %v12448_v50  ;;  %7552 = vpow2.f32 %v6250_v46  ;;  %v7537_v54 = vpop.eup %7536  ;;  %vm3980_vm13 = vcmp.lt.f32.partialorder %v10935_v63, 0.0  ;;  %vm12451_vm9 = vnez %v12450_v18  ;;  %v12457_v46 = vld [vmem:[#allocation74_spill] sm:$0xff]  ;;  %v10971_v18 = vpop.f32.mrb[188].mxu0 }
 0x4c7   : > { %v5315_v57 = vmul.f32 %v7533_v47, %v12449_v33  ;;  %v12453_v23 = vsel %vm12451_vm9, 0.0, %v12452_v51  ;;  %v5409_v2 = vsub.f32 1.0, %v7535_v27  ;;  %v10960_v32 = vadd.f32 %v10628_v53, %v3781_v11  ;;  %v7539_v38 = vpop.eup %7538  ;;  %12459 = vst [vmem:[#allocation115_spill] sm:$0xff] %v10971_v18 }
 0x4c8   : > { %v5313_v60 = vmul.f32 %v7535_v27, %v12453_v23  ;;  %7554 = vpow2.f32 %v6248_v56  ;;  %v5507_v19 = vmul.f32 %v7748_v14, %v5411_v7  ;;  %vm12456_vm10 = vnez %v12455_v24  ;;  %v10973_v27 = vpop.f32.mrb[29].mxu1  ;;  %v7541_v11 = vpop.eup %7540  ;;  %v7749_v56 = vld [vmem:[#allocation11 + $0x1a8] sm:$0xff] }
 0x4c9   : > { %v12458_v47 = vsel %vm12456_vm10, 0.0, %v12457_v46  ;;  %v5414_v50 = vsub.f32 1.0, %v7537_v54  ;;  %v10969_v33 = vadd.f32 %v10628_v53, %v3782_v48  ;;  %12460 = vst [vmem:[#allocation109_spill] sm:$0xff] %v10973_v27  ;;  %v5505_v51 = vmul.f32 %v7749_v56, %v5409_v2  ;;  %v3693_v7 = vpop.f32.mrb[189].mxu0  ;;  %v10975_v14 = vpop.f32.mrb[30].mxu1  ;;  %v12464_v48 = vld [vmem:[#allocation35_spill] sm:$0xff] }
 0x4ca   : > { %v5318_v13 = vmul.f32 %v7537_v54, %v12458_v47  ;;  %v5034_v23 = vadd.f32 1.0, %v7539_v38  ;;  %7556 = vpow2.f32 %v6251_v12  ;;  %v6249_v40 = vmul.f32 -1.442695, %v4561_v41  ;;  %12461 = vst [vmem:[#allocation110_spill] sm:$0xff] %v10975_v14  ;;  %v7543_v24 = vpop.eup %7542  ;;  %v7750_v47 = vld [vmem:[#allocation11 + $0x1d0] sm:$0xff]  ;;  %v10981_v27 = vpop.f32.mrb[190].mxu0 }
 0x4cb   : > { %v5603_v46 = vadd.f32 %v5507_v19, %v5315_v57  ;;  %v5510_v54 = vmul.f32 %v7750_v47, %v5414_v50  ;;  %vm12463_vm9 = vnez %v12462_v1  ;;  %v5412_v29 = vsub.f32 1.0, %v7541_v11  ;;  %12466 = vst [vmem:[#allocation106_spill] sm:$0xff] %v10981_v27  ;;  %v10983_v5 = vpop.f32.mrb[31].mxu1  ;;  %v7545_v2 = vpop.eup %7544  ;;  %v7751_v1 = vld [vmem:[#allocation11 + $0x1c0] sm:$0xff] }
 0x4cc   : > { %v12465_v17 = vsel %vm12463_vm9, 0.0, %v12464_v48  ;;  %12467 = vst [vmem:[#allocation17_spill] sm:$0xff] %v10983_v5  ;;  %v5601_v12 = vadd.f32 %v5505_v51, %v5313_v60  ;;  %v3783_v41 = vmul.f32 %v10587_v58, %v10809_v9  ;;  %7558 = vrcp.f32 %v5034_v23  ;;  %v3696_v57 = vpop.f32.mrb[191].mxu0  ;;  %v7547_v19 = vpop.eup %7546  ;;  %v12468_v7 = vld [vmem:[#allocation76_spill] sm:$0xff]  ;;  %v12472_v60 = vld [vmem:[#allocation55_spill] sm:$0xff]  ;;  %v12474_v51 = vld [vmem:[#allocation29_spill] sm:$0xff] }
 0x4cd   : > { %v5316_v18 = vmul.f32 %v7541_v11, %v12465_v17  ;;  %v5032_v38 = vadd.f32 1.0, %v7543_v24  ;;  %5699 = vst [vmem:[#allocation11 + $0x1b8] sm:$0xff] %v5603_v46  ;;  %v5606_v50 = vadd.f32 %v5510_v54, %v5318_v13  ;;  %v5508_v56 = vmul.f32 %v7751_v1, %v5412_v29  ;;  %v12470_v17 = vld [vmem:[#allocation57_spill] sm:$0xff]  ;;  %v7549_v5 = vpop.eup %7548  ;;  %v7752_v54 = vld [vmem:[#allocation11 + $0x1d8] sm:$0xff] }
 0x4ce   : > { %vm12469_vm10 = vnez %v12468_v7  ;;  %v5415_v48 = vsub.f32 1.0, %v7545_v2  ;;  %5697 = vst [vmem:[#allocation11 + $0x1a8] sm:$0xff] %v5601_v12  ;;  %vm12473_vm9 = vnez %v12472_v60  ;;  %v5413_v24 = vsub.f32 1.0, %v7547_v19  ;;  %v12476_v57 = vld [vmem:[#allocation41_spill] sm:$0xff]  ;;  %v7551_v29 = vpop.eup %7550 }
 0x4cf   : > { %v12471_v11 = vsel %vm12469_vm10, 0.0, %v12470_v17  ;;  %v12475_v9 = vsel %vm12473_vm9, 0.0, %v12474_v51  ;;  %7560 = vrcp.f32 %v5032_v38  ;;  %v10997_v13 = vadd.f32 %v10599_v37, %v12476_v57  ;;  %5702 = vst [vmem:[#allocation11 + $0x1d0] sm:$0xff] %v5606_v50  ;;  %vm11003_vm10 = vmand %vm8970_vm1, %vm3978_vm0  ;;  %v7753_v12 = vld [vmem:[#allocation11 + $0x1c8] sm:$0xff]  ;;  %v12479_v50 = vld [vmem:[#allocation42_spill] sm:$0xff] }
 0x4d0   : > { %v5319_v47 = vmul.f32 %v7545_v2, %v12471_v11  ;;  %v5317_v23 = vmul.f32 %v7547_v19, %v12475_v9  ;;  %v5604_v46 = vadd.f32 %v5508_v56, %v5316_v18  ;;  %v5511_v1 = vmul.f32 %v7752_v54, %v5415_v48  ;;  %v7553_v19 = vpop.eup %7552  ;;  %vm11020_vm0 = vmand %vm8970_vm1, %vm3979_vm8  ;;  %v12487_v54 = vld [vmem:[#allocation22_spill] sm:$0xff] }
 0x4d1   : > { %v5035_v7 = vadd.f32 1.0, %v7549_v5  ;;  %7562 = vpow2.f32 %v6249_v40  ;;  %v12477_v2 = vmov 0  ;;  %v5509_v37 = vmul.f32 %v7753_v12, %v5413_v24  ;;  %vm11034_vm9 = vmand %vm8970_vm1, %vm3980_vm13 }
 0x4d2   : > { %v12478_v2 = vsel %vm11003_vm10, 4294967295, %v12477_v2  ;;  %v5033_v38 = vadd.f32 1.0, %v7551_v29  ;;  %v4582_v18 = vadd.f32 %v10851_v22, %v10595_v39  ;;  %5700 = vst [vmem:[#allocation11 + $0x1c0] sm:$0xff] %v5604_v46  ;;  %v5607_v5 = vadd.f32 %v5511_v1, %v5319_v47  ;;  %v7555_v17 = vpop.eup %7554  ;;  %v12488_v1 = vld [vmem:[#allocation80_spill] sm:$0xff] }
 0x4d3   : > { %7564 = vrcp.f32 %v5035_v7  ;;  %v4574_v40 = vadd.f32 %v10851_v22, %v10601_v36  ;;  %v11014_v56 = vadd.f32 %v10613_v0, %v12479_v50  ;;  %v12480_v11 = vmov 0  ;;  %v12561_v0 = vld [vmem:[#allocation16_spill] sm:$0xff] }
 0x4d4   : > { %v12481_v11 = vsel %vm11020_vm0, 4294967295, %v12480_v11  ;;  %v5605_v39 = vadd.f32 %v5509_v37, %v5317_v23  ;;  %v11025_v47 = vadd.f32 %v10628_v53, %v3783_v41  ;;  %7566 = vrcp.f32 %v5033_v38  ;;  %5703 = vst [vmem:[#allocation11 + $0x1d8] sm:$0xff] %v5607_v5  ;;  %v7557_v51 = vpop.eup %7556  ;;  %v7773_v29 = vld [vmem:[#allocation11 + $0x260] sm:$0xff] }
 0x4d5   : > { %v5038_v48 = vadd.f32 1.0, %v7553_v19  ;;  %v5036_v60 = vadd.f32 1.0, %v7555_v17  ;;  %v6254_v41 = vmul.f32 -1.442695, %v4582_v18  ;;  %v6252_v9 = vmul.f32 -1.442695, %v4574_v40 }
 0x4d6   : > { %5701 = vst [vmem:[#allocation11 + $0x1c8] sm:$0xff] %v5605_v39  ;;  %v4585_v23 = vadd.f32 %v10851_v22, %v10607_v61  ;;  %v4577_v24 = vadd.f32 %v10851_v22, %v10615_v30  ;;  %vm12484_vm13 = vcmp.lt.f32.partialorder %v10960_v32, 0.0  ;;  %v5039_v46 = vadd.f32 1.0, %v7557_v51  ;;  %v7559_v7 = vpop.eup %7558  ;;  %v12493_v18 = vld [vmem:[#allocation54_spill] sm:$0xff]  ;;  %v12496_v51 = vld [vmem:[#allocation81_spill] sm:$0xff]  ;;  %v7755_v30 = vld [vmem:[#allocation11 + $0x1e0] sm:$0xff] }
 0x4d7   : > { %7568 = vrcp.f32 %v5038_v48  ;;  %vm11050_vm8 = vmand %vm8970_vm1, %vm12484_vm13  ;;  %v11056_v61 = vadd.f32 %v12488_v1, %v12487_v54  ;;  %vm12489_vm10 = vcmp.lt.f32.partialorder %v10969_v33, 0.0  ;;  %vm3983_vm13 = vcmp.lt.f32.partialorder %v11025_v47, 0.0  ;;  %v12495_v48 = vld [vmem:[#allocation89_spill] sm:$0xff] }
 0x4d8   : > { %7570 = vrcp.f32 %v5036_v60  ;;  %vm11065_vm0 = vmand %vm8970_vm1, %vm12489_vm10  ;;  %v6255_v37 = vmul.f32 -1.442695, %v4585_v23  ;;  %v12494_v19 = vsel %vm10509_vm4, 0.0, %v12493_v18  ;;  %v5418_v40 = vsub.f32 1.0, %v7559_v7 }
 0x4d9   : > { %7572 = vpow2.f32 %v6254_v41  ;;  %v5322_v5 = vmul.f32 %v7559_v7, %v12494_v19  ;;  %v6253_v50 = vmul.f32 -1.442695, %v4577_v24  ;;  %v7561_v17 = vpop.eup %7560  ;;  %v4598_v60 = vadd.f32 %v10851_v22, %v12495_v48  ;;  %vm11086_vm4 = vmand %vm8970_vm1, %vm3983_vm13  ;;  %v12501_v7 = vld [vmem:[#allocation75_spill] sm:$0xff] }
 0x4da   : > { %7574 = vrcp.f32 %v5039_v46  ;;  %v4590_v41 = vadd.f32 %v10851_v22, %v12496_v51  ;;  %v7754_v46 = vld [vmem:[#allocation11 + $0x1f0] sm:$0xff]  ;;  %v5416_v19 = vsub.f32 1.0, %v7561_v17  ;;  %v3784_v48 = vmul.f32 %v10587_v58, %v10888_v45 }
 0x4db   : > { %7576 = vpow2.f32 %v6252_v9  ;;  %v7563_v23 = vpop.eup %7562  ;;  %v5514_v1 = vmul.f32 %v7754_v46, %v5418_v40  ;;  %v12499_v9 = vld [vmem:[#allocation58_spill] sm:$0xff]  ;;  %v6258_v54 = vmul.f32 -1.442695, %v4598_v60  ;;  %v4178_v40 = vsel %vm11086_vm4, 0.0, %v11025_v47  ;;  %v12510_v46 = vld [vmem:[#allocation23_spill] sm:$0xff] }
 0x4dc   : > { %vm12500_vm10 = vnez %v12499_v9  ;;  %v5037_v51 = vadd.f32 1.0, %v7563_v23  ;;  %7578 = vpow2.f32 %v6255_v37  ;;  %v5512_v57 = vmul.f32 %v7755_v30, %v5416_v19  ;;  %v12506_v60 = vld [vmem:[#allocation90_spill] sm:$0xff] }
 0x4dd   : > { %v12502_v38 = vsel %vm12500_vm10, 0.0, %v12501_v7  ;;  %v7565_v39 = vpop.eup %7564  ;;  %v5610_v36 = vadd.f32 %v5514_v1, %v5322_v5  ;;  %7580 = vpow2.f32 %v6253_v50  ;;  %v6256_v14 = vmul.f32 -1.442695, %v4590_v41  ;;  %v12508_v5 = vld [vmem:[#allocation86_spill] sm:$0xff] }
 0x4de   : > { %v5320_v18 = vmul.f32 %v7561_v17, %v12502_v38  ;;  %v7567_v27 = vpop.eup %7566  ;;  %v12504_v17 = vld [vmem:[#allocation78_spill] sm:$0xff]  ;;  %v5419_v45 = vsub.f32 1.0, %v7565_v39  ;;  %7582 = vrcp.f32 %v5037_v51  ;;  %vm12507_vm13 = vnez %v12506_v60  ;;  %v7756_v38 = vld [vmem:[#allocation11 + $0x1f8] sm:$0xff] }
 0x4df   : > { %v12505_v9 = vsel %vm10529_vm14, 0.0, %v12504_v17  ;;  %5706 = vst [vmem:[#allocation11 + $0x1f0] sm:$0xff] %v5610_v36  ;;  %v12509_v30 = vsel %vm12507_vm13, 0.0, %v12508_v5  ;;  %v5417_v41 = vsub.f32 1.0, %v7567_v27  ;;  %7584 = vpow2.f32 %v6258_v54  ;;  %v12511_v17 = vld [vmem:[#allocation103_spill] sm:$0xff]  ;;  %v7772_v47 = vld [vmem:[#allocation11 + $0x270] sm:$0xff] }
 0x4e0   : > { %v5323_v7 = vmul.f32 %v7565_v39, %v12505_v9  ;;  %v5608_v37 = vadd.f32 %v5512_v57, %v5320_v18  ;;  %v5321_v50 = vmul.f32 %v7567_v27, %v12509_v30  ;;  %v11108_v1 = vadd.f32 %v10628_v53, %v3784_v48  ;;  %v7757_v57 = vld [vmem:[#allocation11 + $0x1e8] sm:$0xff]  ;;  %v12513_v9 = vld [vmem:[#allocation96_spill] sm:$0xff]  ;;  %v12515_v30 = vld [vmem:[#allocation79_spill] sm:$0xff] }
 0x4e1   : > { %v7569_v23 = vpop.eup %7568  ;;  %v5515_v19 = vmul.f32 %v7756_v38, %v5419_v45  ;;  %7586 = vpow2.f32 %v6256_v14  ;;  %v11112_v39 = vadd.f32 %v12511_v17, %v12510_v46  ;;  %v5513_v18 = vmul.f32 %v7757_v57, %v5417_v41  ;;  %v7758_v17 = vld [vmem:[#allocation11 + $0x210] sm:$0xff] }
 0x4e2   : > { %v7571_v36 = vpop.eup %7570  ;;  %5704 = vst [vmem:[#allocation11 + $0x1e0] sm:$0xff] %v5608_v37  ;;  %v12512_v27 = vsel %vm10739_vm5, 0.0, %v10631_v20  ;;  %v5422_v51 = vsub.f32 1.0, %v7569_v23  ;;  %v4601_v48 = vadd.f32 %v10851_v22, %v12513_v9  ;;  %v3785_v14 = vmul.f32 %v10587_v58, %v10898_v8 }
 0x4e3   : > { %v5326_v54 = vmul.f32 %v7569_v23, %v12512_v27  ;;  %v7573_v60 = vpop.eup %7572  ;;  %v5611_v45 = vadd.f32 %v5515_v19, %v5323_v7  ;;  %v12516_v37 = vsel %vm10544_vm11, 0.0, %v12515_v30  ;;  %v5420_v41 = vsub.f32 1.0, %v7571_v36  ;;  %v7759_v7 = vld [vmem:[#allocation11 + $0x200] sm:$0xff]  ;;  %v7760_v30 = vld [vmem:[#allocation11 + $0x218] sm:$0xff] }
 0x4e4   : > { %v5324_v38 = vmul.f32 %v7571_v36, %v12516_v37  ;;  %v7575_v46 = vpop.eup %7574  ;;  %v5609_v52 = vadd.f32 %v5513_v18, %v5321_v50  ;;  %v5518_v20 = vmul.f32 %v7758_v17, %v5422_v51  ;;  %v5042_v57 = vadd.f32 1.0, %v7573_v60  ;;  %v12518_v18 = vld [vmem:[#allocation94_spill] sm:$0xff] }
 0x4e5   : > { %v6259_v23 = vmul.f32 -1.442695, %v4601_v48  ;;  %v7577_v27 = vpop.eup %7576  ;;  %vm3984_vm14 = vcmp.lt.f32.partialorder %v11108_v1, 0.0  ;;  %5707 = vst [vmem:[#allocation11 + $0x1f8] sm:$0xff] %v5611_v45  ;;  %v5516_v19 = vmul.f32 %v7759_v7, %v5420_v41  ;;  %v12517_v8 = vsel %vm10752_vm12, 0.0, %v10634_v34 }
 0x4e6   : > { %v5327_v9 = vmul.f32 %v7575_v46, %v12517_v8  ;;  %v5423_v5 = vsub.f32 1.0, %v7575_v46  ;;  %5705 = vst [vmem:[#allocation11 + $0x1e8] sm:$0xff] %v5609_v52  ;;  %v5614_v36 = vadd.f32 %v5518_v20, %v5326_v54  ;;  %7588 = vrcp.f32 %v5042_v57  ;;  %v7579_v48 = vpop.eup %7578  ;;  %v12519_v46 = vld [vmem:[#allocation43_spill] sm:$0xff]  ;;  %vm11144_vm11 = vmand %vm8970_vm1, %vm3984_vm14 }
 0x4e7   : > { %v5040_v50 = vadd.f32 1.0, %v7577_v27  ;;  %v4593_v51 = vadd.f32 %v10851_v22, %v12518_v18  ;;  %v11134_v60 = vadd.f32 %v10628_v53, %v3785_v14  ;;  %v5612_v45 = vadd.f32 %v5516_v19, %v5324_v38  ;;  %v7581_v59 = vpop.eup %7580  ;;  %v12523_v27 = vld [vmem:[#allocation95_spill] sm:$0xff]  ;;  %v7761_v18 = vld [vmem:[#allocation11 + $0x208] sm:$0xff] }
 0x4e8   : > { %v5519_v37 = vmul.f32 %v7760_v30, %v5423_v5  ;;  %7590 = vpow2.f32 %v6259_v23  ;;  %5710 = vst [vmem:[#allocation11 + $0x210] sm:$0xff] %v5614_v36  ;;  %v5043_v34 = vadd.f32 1.0, %v7579_v48  ;;  %v11138_v54 = vadd.f32 %v10711_v21, %v12519_v46  ;;  %v7583_v52 = vpop.eup %7582  ;;  %v7774_v14 = vld [vmem:[#allocation11 + $0x278] sm:$0xff] }
 0x4e9   : > { %7592 = vrcp.f32 %v5040_v50  ;;  %v6257_v41 = vmul.f32 -1.442695, %v4593_v51  ;;  %5708 = vst [vmem:[#allocation11 + $0x200] sm:$0xff] %v5612_v45  ;;  %v3786_v38 = vmul.f32 %v10587_v58, %v10928_v44  ;;  %v5041_v20 = vadd.f32 1.0, %v7581_v59  ;;  %v7585_v21 = vpop.eup %7584 }
 0x4ea   : > { %v5615_v17 = vadd.f32 %v5519_v37, %v5327_v9  ;;  %v4614_v57 = vadd.f32 %v10851_v22, %v10707_v4  ;;  %v12524_v7 = vsel %vm10640_vm2, 0.0, %v12523_v27  ;;  %v5421_v8 = vsub.f32 1.0, %v7583_v52  ;;  %v12530_v27 = vld [vmem:[#allocation100_spill] sm:$0xff] }
 0x4eb   : > { %v5325_v19 = vmul.f32 %v7583_v52, %v12524_v7  ;;  %v3787_v5 = vmul.f32 %v10587_v58, %v10997_v13  ;;  %7594 = vrcp.f32 %v5043_v34  ;;  %v7587_v36 = vpop.eup %7586  ;;  %v5046_v44 = vadd.f32 1.0, %v7585_v21  ;;  %v12525_v13 = vld [vmem:[#allocation44_spill] sm:$0xff]  ;;  %v12526_v52 = vld [vmem:[#allocation25_spill] sm:$0xff] }
 0x4ec   : > { %5711 = vst [vmem:[#allocation11 + $0x218] sm:$0xff] %v5615_v17  ;;  %7596 = vrcp.f32 %v5041_v20  ;;  %v6262_v9 = vmul.f32 -1.442695, %v4614_v57  ;;  %v4606_v50 = vadd.f32 %v10851_v22, %v10713_v35  ;;  %v4179_v4 = vsel %vm11144_vm11, 0.0, %v11108_v1  ;;  %v12528_v57 = vld [vmem:[#allocation92_spill] sm:$0xff] }
 0x4ed   : > { %v5517_v51 = vmul.f32 %v7761_v18, %v5421_v8  ;;  %v5044_v48 = vadd.f32 1.0, %v7587_v36  ;;  %7598 = vpow2.f32 %v6257_v41  ;;  %v11165_v30 = vadd.f32 %v10722_v31, %v12525_v13  ;;  %v12527_v31 = vld [vmem:[#allocation83_spill] sm:$0xff]  ;;  %v12533_v18 = vld [vmem:[#allocation62_spill] sm:$0xff] }
 0x4ee   : > { %7600 = vrcp.f32 %v5046_v44  ;;  %v6260_v45 = vmul.f32 -1.442695, %v4606_v50  ;;  %v4617_v37 = vadd.f32 %v10851_v22, %v10718_v10  ;;  %v11170_v59 = vadd.f32 %v10628_v53, %v3786_v38  ;;  %v11192_v36 = vld [vmem:[%s8341_s27] ss:$0 sm:$0xff]  ;;  %v7763_v44 = vld [vmem:[#allocation11 + $0x230] sm:$0xff] }
 0x4ef   : > { %v5613_v35 = vadd.f32 %v5517_v51, %v5325_v19  ;;  %7602 = vrcp.f32 %v5044_v48  ;;  %v4609_v34 = vadd.f32 %v10851_v22, %v10724_v42  ;;  %v11175_v46 = vadd.f32 %v10628_v53, %v3787_v5 }
 0x4f0   : > { %7604 = vpow2.f32 %v6262_v9  ;;  %v6263_v41 = vmul.f32 -1.442695, %v4617_v37  ;;  %v11179_v17 = vadd.f32 %v12527_v31, %v12526_v52  ;;  %v7589_v20 = vpop.eup %7588  ;;  %v3788_v10 = vmul.f32 %v10587_v58, %v11014_v56 }
 0x4f1   : > { %5709 = vst [vmem:[#allocation11 + $0x208] sm:$0xff] %v5613_v35  ;;  %7606 = vpow2.f32 %v6260_v45  ;;  %v6261_v38 = vmul.f32 -1.442695, %v4609_v34  ;;  %v4630_v42 = vadd.f32 %v10851_v22, %v12528_v57  ;;  %vm3985_vm2 = vcmp.lt.f32.partialorder %v11134_v60, 0.0  ;;  %v12535_v34 = vld [vmem:[#allocation46_spill] sm:$0xff] }
 0x4f2   : > { %v7591_v21 = vpop.eup %7590  ;;  %v12531_v7 = vsel %vm10796_vm3, 0.0, %v12530_v27  ;;  %v5426_v8 = vsub.f32 1.0, %v7589_v20  ;;  %7608 = vpow2.f32 %v6263_v41  ;;  %vm3986_vm12 = vcmp.lt.f32.partialorder %v11170_v59, 0.0  ;;  %vm11237_vm10 = vmand %vm8970_vm1, %vm3985_vm2 }
 0x4f3   : > { %v5330_v19 = vmul.f32 %v7589_v20, %v12531_v7  ;;  %v7593_v5 = vpop.eup %7592  ;;  %v3789_v58 = vmul.f32 %v11192_v36, %v11056_v61  ;;  %v5047_v56 = vadd.f32 1.0, %v7591_v21  ;;  %7610 = vpow2.f32 %v6261_v38  ;;  %v12536_v61 = vld [vmem:[#allocation64_spill] sm:$0xff]  ;;  %v12538_v21 = vld [vmem:[#allocation91_spill] sm:$0xff]  ;;  %vm11247_vm13 = vmand %vm8970_vm1, %vm3986_vm12 }
 0x4f4   : > { %v5522_v9 = vmul.f32 %v7763_v44, %v5426_v8  ;;  %v12534_v51 = vsel %vm10766_vm15, 0.0, %v12533_v18  ;;  %v5424_v45 = vsub.f32 1.0, %v7593_v5  ;;  %v6266_v13 = vmul.f32 -1.442695, %v4630_v42  ;;  %v7764_v20 = vld [vmem:[#allocation11 + $0x220] sm:$0xff]  ;;  %v12543_v18 = vld [vmem:[#allocation105_spill] sm:$0xff] }
 0x4f5   : > { %v5328_v48 = vmul.f32 %v7593_v5, %v12534_v51  ;;  %v7595_v37 = vpop.eup %7594  ;;  %vm3987_vm5 = vcmp.lt.f32.partialorder %v11175_v46, 0.0  ;;  %v11202_v35 = vadd.f32 %v10628_v53, %v3788_v10  ;;  %7612 = vrcp.f32 %v5047_v56  ;;  %v12541_v10 = vld [vmem:[#allocation88_spill] sm:$0xff] }
 0x4f6   : > { %v11206_v41 = vadd.f32 %v12536_v61, %v12535_v34  ;;  %v7597_v52 = vpop.eup %7596  ;;  %v5618_v31 = vadd.f32 %v5522_v9, %v5330_v19  ;;  %v5520_v38 = vmul.f32 %v7764_v20, %v5424_v45  ;;  %v12539_v23 = vsel %vm10819_vm7, 0.0, %v12538_v21  ;;  %v7765_v45 = vld [vmem:[#allocation11 + $0x238] sm:$0xff]  ;;  %v7766_v20 = vld [vmem:[#allocation11 + $0x228] sm:$0xff]  ;;  %vm11257_vm14 = vmand %vm8970_vm1, %vm3987_vm5 }
 0x4f7   : > { %v5331_v42 = vmul.f32 %v7595_v37, %v12539_v23  ;;  %v5427_v27 = vsub.f32 1.0, %v7595_v37  ;;  %v7599_v7 = vpop.eup %7598  ;;  %v12542_v5 = vsel %vm10778_vm6, 0.0, %v12541_v10  ;;  %v5425_v44 = vsub.f32 1.0, %v7597_v52  ;;  %v7768_v10 = vld [vmem:[#allocation11 + $0x240] sm:$0xff] }
 0x4f8   : > { %v5329_v56 = vmul.f32 %v7597_v52, %v12542_v5  ;;  %v11217_v50 = vadd.f32 %v10628_v53, %v3789_v58  ;;  %v4622_v19 = vadd.f32 %v10851_v22, %v12543_v18  ;;  %v7601_v9 = vpop.eup %7600  ;;  %5714 = vst [vmem:[#allocation11 + $0x230] sm:$0xff] %v5618_v31  ;;  %v5616_v51 = vadd.f32 %v5520_v38, %v5328_v48  ;;  %v12548_v18 = vld [vmem:[#allocation84_spill] sm:$0xff] }
 0x4f9   : > { %v5523_v34 = vmul.f32 %v7765_v45, %v5427_v27  ;;  %v5045_v61 = vadd.f32 1.0, %v7599_v7  ;;  %7614 = vpow2.f32 %v6266_v13  ;;  %v7603_v37 = vpop.eup %7602  ;;  %vm3988_vm15 = vcmp.lt.f32.partialorder %v11202_v35, 0.0  ;;  %v7767_v7 = vld [vmem:[#allocation11 + $0x250] sm:$0xff]  ;;  %v12551_v45 = vld [vmem:[#allocation101_spill] sm:$0xff] }
 0x4fa   : > { %v5521_v57 = vmul.f32 %v7766_v20, %v5425_v44  ;;  %vm12544_vm6 = vnez %v12481_v11  ;;  %v5430_v52 = vsub.f32 1.0, %v7601_v9  ;;  %v7605_v21 = vpop.eup %7604  ;;  %5712 = vst [vmem:[#allocation11 + $0x220] sm:$0xff] %v5616_v51  ;;  %vm12546_vm3 = vnez %v12442_v16  ;;  %vm11279_vm2 = vmand %vm8970_vm1, %vm3988_vm15 }
 0x4fb   : > { %v12545_v53 = vsel %vm12544_vm6, 0.0, %v10910_v62  ;;  %v5619_v23 = vadd.f32 %v5523_v34, %v5331_v42  ;;  %v12547_v48 = vsel %vm12546_vm3, 0.0, %v10824_v25  ;;  %v5428_v13 = vsub.f32 1.0, %v7603_v37  ;;  %v7607_v38 = vpop.eup %7606 }
 0x4fc   : > { %v5334_v58 = vmul.f32 %v7601_v9, %v12545_v53  ;;  %v5332_v31 = vmul.f32 %v7603_v37, %v12547_v48  ;;  %7616 = vrcp.f32 %v5045_v61  ;;  %v5617_v27 = vadd.f32 %v5521_v57, %v5329_v56  ;;  %v7609_v62 = vpop.eup %7608  ;;  %v7776_v53 = vld [vmem:[#allocation11 + $0x290] sm:$0xff] }
 0x4fd   : > { %vm3989_vm7 = vcmp.lt.f32.partialorder %v11217_v50, 0.0  ;;  %v5526_v11 = vmul.f32 %v7767_v7, %v5430_v52  ;;  %v5050_v8 = vadd.f32 1.0, %v7605_v21  ;;  %5715 = vst [vmem:[#allocation11 + $0x238] sm:$0xff] %v5619_v23  ;;  %v5524_v5 = vmul.f32 %v7768_v10, %v5428_v13  ;;  %v7611_v25 = vpop.eup %7610  ;;  %v12556_v21 = vld [vmem:[#allocation50_spill] sm:$0xff]  ;;  %v12557_v23 = vld [vmem:[#allocation63_spill] sm:$0xff] }
 0x4fe   : > { %v5048_v44 = vadd.f32 1.0, %v7607_v38  ;;  %v6264_v42 = vmul.f32 -1.442695, %v4622_v19  ;;  %v4633_v16 = vadd.f32 %v10851_v22, %v12548_v18  ;;  %5713 = vst [vmem:[#allocation11 + $0x228] sm:$0xff] %v5617_v27  ;;  %v5051_v51 = vadd.f32 1.0, %v7609_v62  ;;  %v12565_v18 = vld [vmem:[#allocation52_spill] sm:$0xff] }
 0x4ff   : > { %v5622_v9 = vadd.f32 %v5526_v11, %v5334_v58  ;;  %7618 = vrcp.f32 %v5050_v8  ;;  %v4625_v34 = vadd.f32 %v10851_v22, %v12551_v45  ;;  %v5620_v61 = vadd.f32 %v5524_v5, %v5332_v31  ;;  %v7613_v57 = vpop.eup %7612  ;;  %v12562_v11 = vld [vmem:[#allocation99_spill] sm:$0xff]  ;;  %v12588_v19 = vld [vmem:[#allocation17_spill] sm:$0xff] }
 0x500   : > { %v3790_v37 = vmul.f32 %v11192_v36, %v11112_v39  ;;  %7620 = vrcp.f32 %v5048_v44  ;;  %v5049_v20 = vadd.f32 1.0, %v7611_v25  ;;  %v6267_v58 = vmul.f32 -1.442695, %v4633_v16  ;;  %v7769_v44 = vld [vmem:[#allocation11 + $0x258] sm:$0xff] }
 0x501   : > { %5718 = vst [vmem:[#allocation11 + $0x250] sm:$0xff] %v5622_v9  ;;  %7622 = vrcp.f32 %v5051_v51  ;;  %v6265_v52 = vmul.f32 -1.442695, %v4625_v34  ;;  %v11263_v48 = vadd.f32 %v12557_v23, %v12556_v21  ;;  %v4180_v39 = vsel %vm11237_vm10, 0.0, %v11134_v60  ;;  %5716 = vst [vmem:[#allocation11 + $0x240] sm:$0xff] %v5620_v61 }
 0x502   : > { %v12558_v31 = vsel %vm11034_vm9, 0.0, %v10935_v63  ;;  %v5431_v38 = vsub.f32 1.0, %v7613_v57  ;;  %7624 = vrcp.f32 %v5049_v20  ;;  %v4181_v27 = vsel %vm11247_vm13, 0.0, %v11170_v59  ;;  %vm11294_vm9 = vmand %vm8970_vm1, %vm3989_vm7  ;;  %v11303_v25 = vld [vmem:[%s8347_s18] ss:$0 sm:$0xff] }
 0x503   : > { %v5335_v13 = vmul.f32 %v7613_v57, %v12558_v31  ;;  %7626 = vpow2.f32 %v6264_v42  ;;  %v4646_v63 = vadd.f32 %v10851_v22, %v12561_v0  ;;  %v4638_v8 = vadd.f32 %v10851_v22, %v12562_v11  ;;  %v7615_v62 = vpop.eup %7614 }
 0x504   : > { %v4182_v10 = vsel %vm11257_vm14, 0.0, %v11175_v46  ;;  %v5527_v42 = vmul.f32 %v7769_v44, %v5431_v38  ;;  %7628 = vpow2.f32 %v6267_v58  ;;  %v11300_v16 = vadd.f32 %v10876_v55, %v12565_v18  ;;  %v7771_v38 = vld [vmem:[#allocation11 + $0x248] sm:$0xff] }
 0x505   : > { %v11306_v9 = vadd.f32 %v11303_v25, %v3790_v37  ;;  %v5054_v51 = vadd.f32 1.0, %v7615_v62  ;;  %7630 = vpow2.f32 %v6265_v52  ;;  %v6270_v45 = vmul.f32 -1.442695, %v4646_v63 }
 0x506   : > { %v7617_v34 = vpop.eup %7616  ;;  %v4183_v61 = vsel %vm11279_vm2, 0.0, %v11202_v35  ;;  %v5623_v20 = vadd.f32 %v5527_v42, %v5335_v13  ;;  %v6268_v57 = vmul.f32 -1.442695, %v4638_v8  ;;  %v4649_v58 = vadd.f32 %v10851_v22, %v10874_v43  ;;  %v7779_v35 = vld [vmem:[#allocation11 + $0x298] sm:$0xff] }
 0x507   : > { %v4184_v55 = vsel %vm11294_vm9, 0.0, %v11217_v50  ;;  %vm12566_vm12 = vnez %v12478_v2  ;;  %v5429_v21 = vsub.f32 1.0, %v7617_v34  ;;  %7632 = vrcp.f32 %v5054_v51  ;;  %v12568_v2 = vld [vmem:[#allocation36_spill] sm:$0xff] }
 0x508   : > { %v12567_v37 = vsel %vm12566_vm12, 0.0, %v10907_v26  ;;  %5719 = vst [vmem:[#allocation11 + $0x258] sm:$0xff] %v5623_v20  ;;  %v3791_v23 = vmul.f32 %v11192_v36, %v11138_v54  ;;  %7634 = vpow2.f32 %v6270_v45  ;;  %v6271_v31 = vmul.f32 -1.442695, %v4649_v58 }
 0x509   : > { %v5333_v52 = vmul.f32 %v7617_v34, %v12567_v37  ;;  %v4641_v43 = vadd.f32 %v10851_v22, %v10878_v6  ;;  %v7619_v13 = vpop.eup %7618  ;;  %vm3990_vm5 = vcmp.lt.f32.partialorder %v11306_v9, 0.0  ;;  %v5525_v0 = vmul.f32 %v7771_v38, %v5429_v21 }
 0x50a   : > { %7636 = vpow2.f32 %v6268_v57  ;;  %v11327_v26 = vadd.f32 %v10902_v49, %v12568_v2  ;;  %v7621_v63 = vpop.eup %7620  ;;  %v5338_v54 = vmul.f32 %v7619_v13, %v4178_v40  ;;  %v5434_v11 = vsub.f32 1.0, %v7619_v13 }
 0x50b   : > { %v3792_v6 = vmul.f32 %v11192_v36, %v11165_v30  ;;  %7638 = vpow2.f32 %v6271_v31  ;;  %v7623_v8 = vpop.eup %7622  ;;  %v5621_v62 = vadd.f32 %v5525_v0, %v5333_v52  ;;  %v12569_v44 = vsel %vm11050_vm8, 0.0, %v10960_v32  ;;  %vm11357_vm8 = vmand %vm8970_vm1, %vm3990_vm5  ;;  %v7775_v31 = vld [vmem:[#allocation11 + $0x268] sm:$0xff] }
 0x50c   : > { %v5336_v42 = vmul.f32 %v7621_v63, %v12569_v44  ;;  %v5432_v49 = vsub.f32 1.0, %v7621_v63  ;;  %v6269_v18 = vmul.f32 -1.442695, %v4641_v43  ;;  %v7625_v51 = vpop.eup %7624  ;;  %v11340_v24 = vadd.f32 %v11303_v25, %v3791_v23 }
 0x50d   : > { %v5530_v40 = vmul.f32 %v7772_v47, %v5434_v11  ;;  %v5339_v30 = vmul.f32 %v7623_v8, %v4179_v4  ;;  %v5435_v45 = vsub.f32 1.0, %v7623_v8  ;;  %v7627_v34 = vpop.eup %7626  ;;  %5717 = vst [vmem:[#allocation11 + $0x248] sm:$0xff] %v5621_v62  ;;  %v12570_v32 = vsel %vm11065_vm0, 0.0, %v10969_v33 }
 0x50e   : > { %v5528_v20 = vmul.f32 %v7773_v29, %v5432_v49  ;;  %v5337_v57 = vmul.f32 %v7625_v51, %v12570_v32  ;;  %v5433_v58 = vsub.f32 1.0, %v7625_v51  ;;  %7640 = vpow2.f32 %v6269_v18  ;;  %v7629_v37 = vpop.eup %7628  ;;  %v12574_v18 = vld [vmem:[#allocation107_spill] sm:$0xff]  ;;  %v12578_v32 = vld [vmem:[#allocation108_spill] sm:$0xff] }
 0x50f   : > { %v5626_v52 = vadd.f32 %v5530_v40, %v5338_v54  ;;  %v11351_v21 = vadd.f32 %v11303_v25, %v3792_v6  ;;  %v5531_v1 = vmul.f32 %v7774_v14, %v5435_v45  ;;  %v5052_v4 = vadd.f32 1.0, %v7627_v34  ;;  %v7631_v23 = vpop.eup %7630  ;;  %v12577_v45 = vld [vmem:[#allocation113_spill] sm:$0xff]  ;;  %v12580_v14 = vld [vmem:[#allocation115_spill] sm:$0xff] }
 0x510   : > { %v5624_v33 = vadd.f32 %v5528_v20, %v5336_v42  ;;  %v5529_v43 = vmul.f32 %v7775_v31, %v5433_v58  ;;  %v5055_v13 = vadd.f32 1.0, %v7629_v37  ;;  %v4662_v38 = vadd.f32 %v10851_v22, %v10900_v3  ;;  %v12583_v31 = vld [vmem:[#allocation104_spill] sm:$0xff] }
 0x511   : > { %vm3991_vm0 = vcmp.lt.f32.partialorder %v11340_v24, 0.0  ;;  %5722 = vst [vmem:[#allocation11 + $0x270] sm:$0xff] %v5626_v52  ;;  %v5627_v0 = vadd.f32 %v5531_v1, %v5339_v30  ;;  %7642 = vrcp.f32 %v5052_v4  ;;  %v5053_v2 = vadd.f32 1.0, %v7631_v23  ;;  %v7633_v63 = vpop.eup %7632  ;;  %v12579_v52 = vld [vmem:[#allocation93_spill] sm:$0xff] }
 0x512   : > { %5720 = vst [vmem:[#allocation11 + $0x260] sm:$0xff] %v5624_v33  ;;  %v5625_v54 = vadd.f32 %v5529_v43, %v5337_v57  ;;  %7644 = vrcp.f32 %v5055_v13  ;;  %v6274_v11 = vmul.f32 -1.442695, %v4662_v38  ;;  %v4654_v6 = vadd.f32 %v10851_v22, %v10904_v28  ;;  %v7635_v8 = vpop.eup %7634  ;;  %v12573_v28 = vld [vmem:[#allocation59_spill] sm:$0xff]  ;;  %vm11382_vm11 = vmand %vm8970_vm1, %vm3991_vm0 }
 0x513   : > { %v4185_v62 = vsel %vm11357_vm8, 0.0, %v11306_v9  ;;  %5723 = vst [vmem:[#allocation11 + $0x278] sm:$0xff] %v5627_v0  ;;  %v5342_v3 = vmul.f32 %v7633_v63, %v4182_v10  ;;  %v5438_v44 = vsub.f32 1.0, %v7633_v63  ;;  %7646 = vrcp.f32 %v5053_v2  ;;  %v7784_v9 = vld [vmem:[#allocation11 + $0x2a8] sm:$0xff] }
 0x514   : > { %v7637_v42 = vpop.eup %7636  ;;  %vm3992_vm4 = vcmp.lt.f32.partialorder %v11351_v21, 0.0  ;;  %5721 = vst [vmem:[#allocation11 + $0x268] sm:$0xff] %v5625_v54  ;;  %v5058_v49 = vadd.f32 1.0, %v7635_v8  ;;  %7648 = vpow2.f32 %v6274_v11  ;;  %v11376_v51 = vadd.f32 %v12574_v18, %v12573_v28  ;;  %v12585_v54 = vld [vmem:[#allocation61_spill] sm:$0xff]  ;;  %v12586_v11 = vld [vmem:[#allocation106_spill] sm:$0xff] }
 0x515   : > { %v7639_v47 = vpop.eup %7638  ;;  %v5534_v10 = vmul.f32 %v7776_v53, %v5438_v44  ;;  %v5056_v40 = vadd.f32 1.0, %v7637_v42  ;;  %v6272_v30 = vmul.f32 -1.442695, %v4654_v6  ;;  %v4665_v34 = vadd.f32 %v10851_v22, %v12577_v45  ;;  %vm11403_vm15 = vmand %vm8970_vm1, %vm3992_vm4  ;;  %v7777_v28 = vld [vmem:[%s8351_s17] ss:$0 sm:$0xff]  ;;  %v12587_v18 = vld [vmem:[#allocation110_spill] sm:$0xff] }
 0x516   : > { %v3793_v29 = vmul.f32 %v11192_v36, %v11179_v17  ;;  %7650 = vrcp.f32 %v5058_v49  ;;  %v5059_v20 = vadd.f32 1.0, %v7639_v47  ;;  %v4657_v57 = vadd.f32 %v10851_v22, %v12578_v32 }
 0x517   : > { %v5630_v58 = vadd.f32 %v5534_v10, %v5342_v3  ;;  %7652 = vrcp.f32 %v5056_v40  ;;  %v6275_v37 = vmul.f32 -1.442695, %v4665_v34  ;;  %v11394_v1 = vadd.f32 %v12580_v14, %v12579_v52  ;;  %v7778_v10 = vld [vmem:[#allocation11 + $0x280] sm:$0xff] }
 0x518   : > { %v7641_v4 = vpop.eup %7640  ;;  %v4186_v23 = vsel %vm11382_vm11, 0.0, %v11340_v24  ;;  %7654 = vrcp.f32 %v5059_v20  ;;  %v6273_v33 = vmul.f32 -1.442695, %v4657_v57  ;;  %v4678_v43 = vadd.f32 %v10851_v22, %v12583_v31  ;;  %v12584_v24 = vld [vmem:[#allocation109_spill] sm:$0xff]  ;;  %v7781_v31 = vld [vmem:[#allocation11 + $0x2b0] sm:$0xff] }
 0x519   : > { %5726 = vst [vmem:[#allocation11 + $0x290] sm:$0xff] %v5630_v58  ;;  %v3795_v13 = vmul.f32 %v11192_v36, %v11263_v48  ;;  %v5057_v38 = vadd.f32 1.0, %v7641_v4  ;;  %7656 = vpow2.f32 %v6272_v30  ;;  %v4670_v0 = vadd.f32 %v10851_v22, %v12584_v24  ;;  %v7780_v20 = vld [vmem:[#allocation11 + $0x288] sm:$0xff]  ;;  %v7782_v24 = vld [vmem:[#allocation11 + $0x2a0] sm:$0xff] }
 0x51a   : > { %v11414_v2 = vadd.f32 %v11303_v25, %v3793_v29  ;;  %7658 = vpow2.f32 %v6275_v37  ;;  %v6278_v63 = vmul.f32 -1.442695, %v4678_v43  ;;  %v11418_v6 = vadd.f32 %v12586_v11, %v12585_v54 }
 0x51b   : > { %v7643_v8 = vpop.eup %7642  ;;  %v4187_v48 = vsel %vm11403_vm15, 0.0, %v11351_v21  ;;  %v3794_v3 = vmul.f32 %v11192_v36, %v11206_v41  ;;  %7660 = vrcp.f32 %v5057_v38  ;;  %v6276_v44 = vmul.f32 -1.442695, %v4670_v0 }
 0x51c   : > { %v7645_v22 = vpop.eup %7644  ;;  %v5340_v42 = vmul.f32 %v7643_v8, %v4180_v39  ;;  %v5436_v49 = vsub.f32 1.0, %v7643_v8  ;;  %7662 = vpow2.f32 %v6273_v33  ;;  %v4681_v47 = vadd.f32 %v7777_v28, %v12587_v18 }
 0x51d   : > { %v7647_v46 = vpop.eup %7646  ;;  %v5343_v21 = vmul.f32 %v7645_v22, %v4183_v61  ;;  %v5439_v41 = vsub.f32 1.0, %v7645_v22  ;;  %v11436_v53 = vadd.f32 %v11303_v25, %v3795_v13  ;;  %7664 = vpow2.f32 %v6278_v63 }
 0x51e   : > { %v7649_v56 = vpop.eup %7648  ;;  %v5532_v60 = vmul.f32 %v7778_v10, %v5436_v49  ;;  %v5341_v39 = vmul.f32 %v7647_v46, %v4181_v27  ;;  %v5437_v40 = vsub.f32 1.0, %v7647_v46  ;;  %7666 = vpow2.f32 %v6276_v44 }
 0x51f   : > { %v11443_v7 = vadd.f32 %v11303_v25, %v3794_v3  ;;  %v5535_v61 = vmul.f32 %v7779_v35, %v5439_v41  ;;  %v3796_v30 = vmul.f32 %v11192_v36, %v11300_v16  ;;  %v5062_v45 = vadd.f32 1.0, %v7649_v56 }
 0x520   : > { %v7651_v34 = vpop.eup %7650  ;;  %v5628_v29 = vadd.f32 %v5532_v60, %v5340_v42  ;;  %v5533_v32 = vmul.f32 %v7780_v20, %v5437_v40  ;;  %v6279_v57 = vmul.f32 -1.442695, %v4681_v47  ;;  %v4673_v58 = vadd.f32 %v7777_v28, %v12588_v19 }
 0x521   : > { %v7653_v59 = vpop.eup %7652  ;;  %v5631_v27 = vadd.f32 %v5535_v61, %v5343_v21  ;;  %v5346_v37 = vmul.f32 %v7651_v34, %v4186_v23  ;;  %v5442_v52 = vsub.f32 1.0, %v7651_v34  ;;  %7668 = vrcp.f32 %v5062_v45 }
 0x522   : > { %v7655_v14 = vpop.eup %7654  ;;  %5724 = vst [vmem:[#allocation11 + $0x280] sm:$0xff] %v5628_v29  ;;  %v5629_v4 = vadd.f32 %v5533_v32, %v5341_v39  ;;  %vm3995_vm6 = vcmp.lt.f32.partialorder %v11436_v53, 0.0  ;;  %v5344_v16 = vmul.f32 %v7653_v59, %v4184_v55  ;;  %v5440_v17 = vsub.f32 1.0, %v7653_v59  ;;  %v7783_v55 = vld [vmem:[#allocation11 + $0x2b8] sm:$0xff]  ;;  %v7785_v29 = vld [vmem:[#allocation11 + $0x2d0] sm:$0xff] }
 0x523   : > { %v7657_v33 = vpop.eup %7656  ;;  %5727 = vst [vmem:[#allocation11 + $0x298] sm:$0xff] %v5631_v27  ;;  %v5538_v43 = vmul.f32 %v7781_v31, %v5442_v52  ;;  %v5347_v13 = vmul.f32 %v7655_v14, %v4187_v48  ;;  %v5443_v38 = vsub.f32 1.0, %v7655_v14  ;;  %7670 = vpow2.f32 %v6279_v57  ;;  %vm11466_vm3 = vmand %vm8970_vm1, %vm3995_vm6 }
 0x524   : > { %v7659_v23 = vpop.eup %7658  ;;  %5725 = vst [vmem:[#allocation11 + $0x288] sm:$0xff] %v5629_v4  ;;  %v5536_v0 = vmul.f32 %v7782_v24, %v5440_v17  ;;  %v3797_v63 = vmul.f32 %v11192_v36, %v11327_v26  ;;  %v5060_v54 = vadd.f32 1.0, %v7657_v33  ;;  %v6277_v5 = vmul.f32 -1.442695, %v4673_v58 }
 0x525   : > { %v7661_v11 = vpop.eup %7660  ;;  %v5634_v50 = vadd.f32 %v5538_v43, %v5346_v37  ;;  %v5539_v8 = vmul.f32 %v7783_v55, %v5443_v38  ;;  %v5063_v3 = vadd.f32 1.0, %v7659_v23  ;;  %v3799_v44 = vmul.f32 %v11192_v36, %v11394_v1  ;;  %v7786_v43 = vld [vmem:[#allocation11 + $0x2c0] sm:$0xff] }
 0x526   : > { %v7663_v48 = vpop.eup %7662  ;;  %v5632_v22 = vadd.f32 %v5536_v0, %v5344_v16  ;;  %v5345_v42 = vmul.f32 %v7661_v11, %v4185_v62  ;;  %v5441_v49 = vsub.f32 1.0, %v7661_v11  ;;  %7672 = vrcp.f32 %v5060_v54 }
 0x527   : > { %v7665_v26 = vpop.eup %7664  ;;  %5730 = vst [vmem:[#allocation11 + $0x2b0] sm:$0xff] %v5634_v50  ;;  %v3899_v28 = vadd.f32 %v11303_v25, %v3796_v30  ;;  %v5635_v18 = vadd.f32 %v5539_v8, %v5347_v13  ;;  %7674 = vrcp.f32 %v5063_v3  ;;  %v5061_v47 = vadd.f32 1.0, %v7663_v48 }
 0x528   : > { %v7667_v46 = vpop.eup %7666  ;;  %5728 = vst [vmem:[#allocation11 + $0x2a0] sm:$0xff] %v5632_v22  ;;  %v5537_v12 = vmul.f32 %v7784_v9, %v5441_v49  ;;  %v11471_v62 = vadd.f32 %v11303_v25, %v3797_v63  ;;  %v5066_v21 = vadd.f32 1.0, %v7665_v26  ;;  %7676 = vpow2.f32 %v6277_v5  ;;  %v7787_v63 = vld [vmem:[#allocation11 + $0x2d8] sm:$0xff] }
 0x529   : > { %vm3993_vm7 = vcmp.lt.f32.partialorder %v11414_v2, 0.0  ;;  %5731 = vst [vmem:[#allocation11 + $0x2b8] sm:$0xff] %v5635_v18  ;;  %7678 = vrcp.f32 %v5061_v47  ;;  %v3902_v41 = vadd.f32 %v11303_v25, %v3799_v44  ;;  %v5064_v56 = vadd.f32 1.0, %v7667_v46  ;;  %v7788_v44 = vld [vmem:[#allocation11 + $0x2c8] sm:$0xff] }
 0x52a   : > { %vm3994_vm10 = vcmp.lt.f32.partialorder %v11443_v7, 0.0  ;;  %v5633_v10 = vadd.f32 %v5537_v12, %v5345_v42  ;;  %7680 = vrcp.f32 %v5066_v21  ;;  %v4190_v39 = vsel %vm11466_vm3, 0.0, %v11436_v53  ;;  %vm11481_vm14 = vmand %vm8970_vm1, %vm3993_vm7  ;;  %v7789_v42 = vld [vmem:[#allocation11 + $0x2f0] sm:$0xff]  ;;  %v7791_v21 = vld [vmem:[#allocation11 + $0x2f8] sm:$0xff] }
 0x52b   : > { %v7669_v60 = vpop.eup %7668  ;;  %vm3996_vm13 = vcmp.lt.f32.partialorder %v3899_v28, 0.0  ;;  %7682 = vrcp.f32 %v5064_v56  ;;  %vm3997_vm2 = vcmp.lt.f32.partialorder %v11471_v62, 0.0  ;;  %v3800_v30 = vmul.f32 %v11192_v36, %v11418_v6  ;;  %vm11490_vm9 = vmand %vm8970_vm1, %vm3994_vm10 }
 0x52c   : > { %5729 = vst [vmem:[#allocation11 + $0x2a8] sm:$0xff] %v5633_v10  ;;  %v5350_v35 = vmul.f32 %v7669_v60, %v4190_v39  ;;  %v5446_v61 = vsub.f32 1.0, %v7669_v60  ;;  %vm3999_vm12 = vcmp.lt.f32.partialorder %v3902_v41, 0.0  ;;  %vm11496_vm5 = vmand %vm8970_vm1, %vm3996_vm13  ;;  %v3798_v57 = vmul.f32 %v11192_v36, %v11376_v51 }
 0x52d   : > { %v7671_v45 = vpop.eup %7670  ;;  %vm11502_vm8 = vmand %vm8970_vm1, %vm3997_vm2  ;;  %v4188_v58 = vsel %vm11481_vm14, 0.0, %v11414_v2  ;;  %v3903_v37 = vadd.f32 %v11303_v25, %v3800_v30  ;;  %v4191_v14 = vsel %vm11496_vm5, 0.0, %v3899_v28  ;;  %v4189_v2 = vsel %vm11490_vm9, 0.0, %v11443_v7  ;;  %v7790_v28 = vld [vmem:[#allocation11 + $0x2e0] sm:$0xff] }
 0x52e   : > { %v5542_v20 = vmul.f32 %v7785_v29, %v5446_v61  ;;  %v5067_v32 = vadd.f32 1.0, %v7671_v45  ;;  %vm11513_vm0 = vmand %vm8970_vm1, %vm3999_vm12  ;;  %v4192_v16 = vsel %vm11502_vm8, 0.0, %v11471_v62  ;;  %v3901_v38 = vadd.f32 %v11303_v25, %v3798_v57 }
 0x52f   : > { %v4194_v23 = vsel %vm11513_vm0, 0.0, %v3902_v41  ;;  %vm4000_vm4 = vcmp.lt.f32.partialorder %v3903_v37, 0.0 }
 0x530   : > { %v7673_v19 = vpop.eup %7672  ;;  %v5638_v59 = vadd.f32 %v5542_v20, %v5350_v35  ;;  %7684 = vrcp.f32 %v5067_v32  ;;  %vm4099_vm11 = vmand %vm8970_vm1, %vm4000_vm4  ;;  %vm3998_vm15 = vcmp.lt.f32.partialorder %v3901_v38, 0.0  ;;  %v7792_v35 = vld [vmem:[#allocation11 + $0x2e8] sm:$0xff] }
 0x531   : > { %v7675_v52 = vpop.eup %7674  ;;  %v5348_v36 = vmul.f32 %v7673_v19, %v4188_v58  ;;  %v5444_v51 = vsub.f32 1.0, %v7673_v19  ;;  %v4195_v9 = vsel %vm4099_vm11, 0.0, %v3903_v37  ;;  %vm4097_vm6 = vmand %vm8970_vm1, %vm3998_vm15 }
 0x532   : > { %v7677_v4 = vpop.eup %7676  ;;  %5734 = vst [vmem:[#allocation11 + $0x2d0] sm:$0xff] %v5638_v59  ;;  %v5351_v17 = vmul.f32 %v7675_v52, %v4191_v14  ;;  %v5447_v33 = vsub.f32 1.0, %v7675_v52  ;;  %v4193_v10 = vsel %vm4097_vm6, 0.0, %v3901_v38 }
 0x533   : > { %v7679_v31 = vpop.eup %7678  ;;  %v5540_v13 = vmul.f32 %v7786_v43, %v5444_v51  ;;  %v5065_v24 = vadd.f32 1.0, %v7677_v4 }
 0x534   : > { %v7681_v0 = vpop.eup %7680  ;;  %v5543_v54 = vmul.f32 %v7787_v63, %v5447_v33  ;;  %v5349_v7 = vmul.f32 %v7679_v31, %v4189_v2  ;;  %v5445_v5 = vsub.f32 1.0, %v7679_v31 }
 0x535   : > { %v7683_v11 = vpop.eup %7682  ;;  %v5636_v50 = vadd.f32 %v5540_v13, %v5348_v36  ;;  %v5354_v55 = vmul.f32 %v7681_v0, %v4194_v23  ;;  %v5450_v8 = vsub.f32 1.0, %v7681_v0  ;;  %7686 = vrcp.f32 %v5065_v24 }
 0x536   : > { %v5639_v3 = vadd.f32 %v5543_v54, %v5351_v17  ;;  %v5541_v48 = vmul.f32 %v7788_v44, %v5445_v5  ;;  %v5352_v22 = vmul.f32 %v7683_v11, %v4192_v16  ;;  %v5448_v25 = vsub.f32 1.0, %v7683_v11 }
 0x537   : > { %5732 = vst [vmem:[#allocation11 + $0x2c0] sm:$0xff] %v5636_v50  ;;  %v5546_v49 = vmul.f32 %v7789_v42, %v5450_v8 }
 0x538   : > { %5735 = vst [vmem:[#allocation11 + $0x2d8] sm:$0xff] %v5639_v3  ;;  %v5637_v26 = vadd.f32 %v5541_v48, %v5349_v7  ;;  %v5544_v18 = vmul.f32 %v7790_v28, %v5448_v25 }
 0x539   : > { %v5642_v47 = vadd.f32 %v5546_v49, %v5354_v55 }
 0x53a   : > { %v7685_v46 = vpop.eup %7684  ;;  %5733 = vst [vmem:[#allocation11 + $0x2c8] sm:$0xff] %v5637_v26  ;;  %v5640_v1 = vadd.f32 %v5544_v18, %v5352_v22 }
 0x53b   : > { %5738 = vst [vmem:[#allocation11 + $0x2f0] sm:$0xff] %v5642_v47  ;;  %v5355_v12 = vmul.f32 %v7685_v46, %v4195_v9  ;;  %v5451_v62 = vsub.f32 1.0, %v7685_v46 }
 0x53c   : > { %5736 = vst [vmem:[#allocation11 + $0x2e0] sm:$0xff] %v5640_v1 }
 0x53d   : > { %v5547_v41 = vmul.f32 %v7791_v21, %v5451_v62 }
 0x53f   : > { %v7687_v56 = vpop.eup %7686  ;;  %v5643_v60 = vadd.f32 %v5547_v41, %v5355_v12 }
 0x540   : > { %v5353_v39 = vmul.f32 %v7687_v56, %v4193_v10  ;;  %v5449_v40 = vsub.f32 1.0, %v7687_v56 }
 0x541   : > { %5739 = vst [vmem:[#allocation11 + $0x2f8] sm:$0xff] %v5643_v60 }
 0x542   : > { %v5545_v61 = vmul.f32 %v7792_v35, %v5449_v40 }
 0x544   : > { %v5641_v30 = vadd.f32 %v5545_v61, %v5353_v39 }
 0x546   : > { %5737 = vst [vmem:[#allocation11 + $0x2e8] sm:$0xff] %v5641_v30 }
 0x547   : > { %7982 = shalt.err (!%p7979_p9)
}
 0x548   : > { %s7983_s20 = scalar_lea.hbm %s11575_s6, 12288 }
 0x549   : > { %p7984_p2 = scmp.ne.s32.totalorder %s11575_s6, %s7983_s20  ;;  %p7989_p11 = scmp.lt.u32.totalorder %s7983_s20, %s11575_s6 }
 0x54b   : > { %p7985_p8 = pnand %p7984_p2, %p6818_p6 }
 0x54d   : > { %p7986_p1 = pneg %p7985_p8 }
 0x54f   : > { %p7991_p10 = pnand %p7989_p11, %p7986_p1 }
 0x551   : > { %7994 = shalt.err (!%p7991_p10)
}
 0x552   : > { %s8057_s2 = smov 128   ;;  %s8058_s9 = smov 8  }
 0x553   : > { %6790 = dma.vmem_to_hbm [thread:$0]  (%p6818_p6), %s5747_s10, 12288, %s11575_s6, [#allocation4], %s8057_s2, %s8057_s2, %s8058_s9  }
 0x554   : > { %8024 = dma.done.wait (%p6818_p6), [#allocation4], 12288  }
 0x555   : > { %8026 = vsyncadd (%p6818_p6), [#allocation4], 4294955008 }
 0x556 PF: > { %p16_p5 = scmp.ge.s32.totalorder %s8139_s7, 4   ;;  %s12601_s21 = smov %s8033_s22 }
 0x557   : > { %s12602_s22 = smov %s8037_s23  ;;  %s12603_s23 = smov %s8171_s28 }
 0x558   : > { %s12604_s24 = smov %s8139_s7  ;;  %18 = sbr.rel (!%p16_p5) target bundleno = 7 (0x7), region = 125 }
 0x55f   :  { %5762 = vsyncpa [#allocation3], 1 }
 0x560   :  { %5764 = vsyncpa [#allocation3 + $0x1], 1 }
 0x561   :  { %5765 = vsyncpa [#allocation6], 1 }
 0x562   :  { %5766 = vsyncpa [#allocation4], 1 }
 0x563   :  { %5768 = vsyncpa [#allocation4 + $0x1], 1 }

</bundles_post_ra>
